<compile_context>
chip_gen: v7x
topology: tpu7x:2x2x1
jax: 0.10.0
libtpu: 0.0.40
codegen_flags: <defaults>
</compile_context>

<pallas_src>
import functools

import jax
import jax.numpy as jnp
from jax import lax
from jax.experimental import pallas as pl
from jax.experimental.pallas import tpu as pltpu

# ------------- small synthetic config (StarCoder-like head geometry) ---------
HIDDEN = 256                  # config.hidden_size
NUM_HEADS = 2                 # config.num_attention_heads
HEAD_DIM = HIDDEN // NUM_HEADS        # = 128 (same as real GPTBigCode)
MULTI_QUERY = True            # config.multi_query (StarCoder default)
NUM_KV_HEADS = 1 if MULTI_QUERY else NUM_HEADS
KV_DIM = HEAD_DIM * NUM_KV_HEADS
INNER = 4 * HIDDEN            # config.n_inner is None -> 4 * hidden
NUM_LAYERS = 2                # config.num_hidden_layers
VOCAB = 512                   # config.vocab_size
MAX_POS = 128                 # config.max_position_embeddings
EPS = 1e-5                    # config.layer_norm_epsilon
SEQ = 128                     # number of tokens (prefill)

# Fused c_attn layout [ q | k | v ]; HEAD_DIM == 128 means every boundary is
# already 128-lane aligned -> no padding columns needed.
QKV_WIDTH = HIDDEN + 2 * KV_DIM      # 512  (multiple of 256: one MXU pass)
K_OFF = HIDDEN                       # 256
V_OFF = HIDDEN + KV_DIM              # 384


# ------------------------------ kernel ---------------------------------------
def _layernorm(x, w, b, eps):
    mu = jnp.mean(x, axis=-1, keepdims=True)
    xc = x - mu
    var = jnp.mean(xc * xc, axis=-1, keepdims=True)
    return xc * lax.rsqrt(var + eps) * w + b


def _layers_kernel(ids_ref, pos_ref, wte_ref, wpe_ref, mask_ref,
                   ln1w_ref, ln1b_ref, wqkv_ref, bqkv_ref,
                   wo_ref, bo_ref, ln2w_ref, ln2b_ref,
                   wfc_ref, bfc_ref, wpr_ref, bpr_ref,
                   lnfw_ref, lnfb_ref, out_ref,
                   *, num_heads, head_dim, k_off, v_off, eps):
    layer = pl.program_id(0)
    num_layers = pl.num_programs(0)
    t = out_ref.shape[0]

    # ---- embedding, fused into layer 0 (gather-free one-hot matmuls) -------
    @pl.when(layer == 0)
    def _():
        vocab = wte_ref.shape[0]
        max_pos = wpe_ref.shape[0]
        tok_oh = (lax.broadcasted_iota(jnp.int32, (t, vocab), 1)
                  == ids_ref[...]).astype(jnp.float32)
        pos_oh = (lax.broadcasted_iota(jnp.int32, (t, max_pos), 1)
                  == pos_ref[...]).astype(jnp.float32)
        out_ref[...] = (
            jnp.dot(tok_oh, wte_ref[...], preferred_element_type=jnp.float32)
            + jnp.dot(pos_oh, wpe_ref[...], preferred_element_type=jnp.float32))

    # Resident hidden state, carried across the layer grid axis in VMEM.
    x = out_ref[...]                                          # [T, H] f32

    # --- ln_1 (f32 elementwise) ---
    xn = _layernorm(x, ln1w_ref[...], ln1b_ref[...], eps)

    # --- c_attn: fused QKV matmul (1/sqrt(D) pre-folded into q weights) ------
    qkv = jnp.dot(xn.astype(jnp.bfloat16), wqkv_ref[...],
                  preferred_element_type=jnp.float32) + bqkv_ref[...]
    qkv_bf = qkv.astype(jnp.bfloat16)          # single cast, then aligned slices
    k = qkv_bf[:, k_off:k_off + head_dim]      # [T, D]  shared KV head (MQA)
    v = qkv_bf[:, v_off:v_off + head_dim]      # [T, D]

    # --- batched multi-query causal attention --------------------------------
    # Stack heads along sublanes: [NH*T, D].  HEAD_DIM == 128 keeps every
    # slice / concat 128-lane aligned, so this is vreg placement, not masked
    # lane extracts.
    q_flat = jnp.concatenate(
        [qkv_bf[:, h * head_dim:(h + 1) * head_dim] for h in range(num_heads)],
        axis=0)

    # One score matmul for all heads; contract on the feature dim directly
    # (no k.T materialization).
    s = lax.dot_general(q_flat, k,
                        dimension_numbers=(((1,), (1,)), ((), ())),
                        preferred_element_type=jnp.float32)   # [NH*T, T]
    s = s + mask_ref[...]                      # resident causal bias, built once

    s = s - jnp.max(s, axis=-1, keepdims=True)
    p = jnp.exp(s)
    p = p * pl.reciprocal(jnp.sum(p, axis=-1, keepdims=True), approx=True)

    # One PV matmul for all heads, then aligned head un-stack back to [T, H].
    o_flat = jnp.dot(p.astype(jnp.bfloat16), v,
                     preferred_element_type=jnp.float32)      # [NH*T, D]
    attn = jnp.concatenate(
        [o_flat[h * t:(h + 1) * t, :] for h in range(num_heads)], axis=1)

    # --- attn c_proj + residual ---
    attn = jnp.dot(attn.astype(jnp.bfloat16), wo_ref[...],
                   preferred_element_type=jnp.float32) + bo_ref[...]
    x1 = x + attn

    # --- ln_2 + MLP: c_fc -> gelu_pytorch_tanh -> c_proj + residual ---
    xn2 = _layernorm(x1, ln2w_ref[...], ln2b_ref[...], eps)
    h = jnp.dot(xn2.astype(jnp.bfloat16), wfc_ref[...],
                preferred_element_type=jnp.float32) + bfc_ref[...]
    c0 = 0.7978845608028654  # sqrt(2/pi)
    hact = 0.5 * h * (1.0 + jnp.tanh(c0 * (h + 0.044715 * h * h * h)))
    mlp = jnp.dot(hact.astype(jnp.bfloat16), wpr_ref[...],
                  preferred_element_type=jnp.float32) + bpr_ref[...]
    h_new = x1 + mlp

    # Exactly one store per grid step (final LN fused on the last layer).
    @pl.when(layer != num_layers - 1)
    def _():
        out_ref[...] = h_new

    @pl.when(layer == num_layers - 1)
    def _():
        out_ref[...] = _layernorm(h_new, lnfw_ref[...], lnfb_ref[...], eps)


# ------------------------------ wrapper ---------------------------------------
def gpt_bigcode_forward(input_ids, position_ids, params):
    """Embedding + all transformer blocks + final LN in one pallas_call."""
    num_layers = params["ln1_w"].shape[0]
    t = int(input_ids.shape[0])
    h = HIDDEN

    ids = input_ids.astype(jnp.int32).reshape(t, 1)
    pos = position_ids.astype(jnp.int32).reshape(t, 1)

    # Causal additive bias for the head-stacked score matrix [NH*T, T]; built
    # once on the host and kept resident across the layer axis.
    q_tok = jnp.arange(NUM_HEADS * t, dtype=jnp.int32) % t
    k_tok = jnp.arange(t, dtype=jnp.int32)
    mask_bias = jnp.where(q_tok[:, None] >= k_tok[None, :],
                          0.0, -1e30).astype(jnp.float32)

    weights = [params["ln1_w"], params["ln1_b"],
               params["w_qkv"], params["b_qkv"],
               params["w_o"], params["b_o"],
               params["ln2_w"], params["ln2_b"],
               params["w_fc"], params["b_fc"],
               params["w_pr"], params["b_pr"]]

    def const_spec(arr):
        # Same block every grid step -> stays resident in VMEM (no re-DMA).
        return pl.BlockSpec(arr.shape, lambda l: (0,) * arr.ndim)

    def layer_spec(arr):
        # Squeeze the layer dim; stream one layer's slab per grid step so the
        # pipeline prefetches layer l+1's weights under layer l's compute.
        return pl.BlockSpec((None,) + arr.shape[1:], lambda l: (l, 0, 0))

    in_specs = ([const_spec(ids), const_spec(pos),
                 const_spec(params["wte"]), const_spec(params["wpe"]),
                 const_spec(mask_bias)]
                + [layer_spec(w) for w in weights]
                + [const_spec(params["ln_f_w"]), const_spec(params["ln_f_b"])])

    kern = functools.partial(
        _layers_kernel,
        num_heads=NUM_HEADS,
        head_dim=HEAD_DIM,
        k_off=K_OFF,
        v_off=V_OFF,
        eps=EPS,
    )

    return pl.pallas_call(
        kern,
        grid=(num_layers,),
        in_specs=in_specs,
        out_specs=pl.BlockSpec((t, h), lambda l: (0, 0)),
        out_shape=jax.ShapeDtypeStruct((t, h), jnp.float32),
        compiler_params=pltpu.CompilerParams(
            dimension_semantics=("arbitrary",),
            vmem_limit_bytes=32 * 1024 * 1024),
    )(ids, pos, params["wte"], params["wpe"], mask_bias, *weights,
      params["ln_f_w"], params["ln_f_b"])


# --------------------------- parameter init ----------------------------------
def init_params(key):
    keys = iter(jax.random.split(key, 4 + NUM_LAYERS * 12))

    def nrm(shape, scale=0.02):
        return (scale * jax.random.normal(next(keys), shape)).astype(jnp.float32)

    params = {
        "wte": nrm((VOCAB, HIDDEN)),
        "wpe": nrm((MAX_POS, HIDDEN)),
        "ln_f_w": jnp.ones((1, HIDDEN), jnp.float32) + nrm((1, HIDDEN), 0.01),
        "ln_f_b": nrm((1, HIDDEN), 0.01),
    }

    ln1_w, ln1_b, w_qkv, b_qkv, w_o, b_o = [], [], [], [], [], []
    ln2_w, ln2_b, w_fc, b_fc, w_pr, b_pr = [], [], [], [], [], []
    att_scale = HEAD_DIM ** -0.5
    for _ in range(NUM_LAYERS):
        ln1_w.append(jnp.ones((1, HIDDEN), jnp.float32) + nrm((1, HIDDEN), 0.01))
        ln1_b.append(nrm((1, HIDDEN), 0.01))

        # Fused c_attn [H, H + 2*KV_DIM]; fold the attention scale into the q
        # columns so the kernel never scales the score matrix.
        wraw = nrm((HIDDEN, QKV_WIDTH))
        braw = nrm((1, QKV_WIDTH))
        wraw = wraw.at[:, :HIDDEN].multiply(att_scale)
        braw = braw.at[:, :HIDDEN].multiply(att_scale)
        w_qkv.append(wraw.astype(jnp.bfloat16))
        b_qkv.append(braw)

        w_o.append(nrm((HIDDEN, HIDDEN)).astype(jnp.bfloat16))   # attn c_proj
        b_o.append(nrm((1, HIDDEN), 0.01))
        ln2_w.append(jnp.ones((1, HIDDEN), jnp.float32) + nrm((1, HIDDEN), 0.01))
        ln2_b.append(nrm((1, HIDDEN), 0.01))
        w_fc.append(nrm((HIDDEN, INNER)).astype(jnp.bfloat16))   # c_fc
        b_fc.append(nrm((1, INNER), 0.01))
        w_pr.append(nrm((INNER, HIDDEN)).astype(jnp.bfloat16))   # mlp c_proj
        b_pr.append(nrm((1, HIDDEN), 0.01))

    params.update(
        ln1_w=jnp.stack(ln1_w), ln1_b=jnp.stack(ln1_b),
        w_qkv=jnp.stack(w_qkv), b_qkv=jnp.stack(b_qkv),
        w_o=jnp.stack(w_o), b_o=jnp.stack(b_o),
        ln2_w=jnp.stack(ln2_w), ln2_b=jnp.stack(ln2_b),
        w_fc=jnp.stack(w_fc), b_fc=jnp.stack(b_fc),
        w_pr=jnp.stack(w_pr), b_pr=jnp.stack(b_pr),
    )
    return params


# --------------------------------- main ---------------------------------------
if __name__ == "__main__":
    key = jax.random.PRNGKey(0)
    k_params, k_ids = jax.random.split(key)
    params = init_params(k_params)

    input_ids = jax.random.randint(k_ids, (SEQ,), 0, VOCAB, dtype=jnp.int32)
    position_ids = jnp.arange(SEQ, dtype=jnp.int32)

    out = gpt_bigcode_forward(input_ids, position_ids, params)
    out = jax.block_until_ready(out)
    assert out.shape == (SEQ, HIDDEN) and out.dtype == jnp.float32
    assert bool(jnp.all(jnp.isfinite(out)))
    print("KERNEL_OK")
</pallas_src>

<mosaic_0001>
module attributes {stable_mosaic.version = 11 : i64} {
  func.func @_layers_kernel(%arg0: i32, %arg1: memref<128x1xi32, #tpu.memory_space<vmem>>, %arg2: memref<128x1xi32, #tpu.memory_space<vmem>>, %arg3: memref<512x256xf32, #tpu.memory_space<vmem>>, %arg4: memref<128x256xf32, #tpu.memory_space<vmem>>, %arg5: memref<256x128xf32, #tpu.memory_space<vmem>>, %arg6: memref<1x1x256xf32, #tpu.memory_space<vmem>>, %arg7: memref<1x1x256xf32, #tpu.memory_space<vmem>>, %arg8: memref<1x256x512xbf16, #tpu.memory_space<vmem>>, %arg9: memref<1x1x512xf32, #tpu.memory_space<vmem>>, %arg10: memref<1x256x256xbf16, #tpu.memory_space<vmem>>, %arg11: memref<1x1x256xf32, #tpu.memory_space<vmem>>, %arg12: memref<1x1x256xf32, #tpu.memory_space<vmem>>, %arg13: memref<1x1x256xf32, #tpu.memory_space<vmem>>, %arg14: memref<1x256x1024xbf16, #tpu.memory_space<vmem>>, %arg15: memref<1x1x1024xf32, #tpu.memory_space<vmem>>, %arg16: memref<1x1024x256xbf16, #tpu.memory_space<vmem>>, %arg17: memref<1x1x256xf32, #tpu.memory_space<vmem>>, %arg18: memref<1x256xf32, #tpu.memory_space<vmem>>, %arg19: memref<1x256xf32, #tpu.memory_space<vmem>>, %arg20: memref<128x256xf32, #tpu.memory_space<vmem>>) attributes {dimension_semantics = [#tpu.dimension_semantics<arbitrary>], iteration_bounds = array<i64: 2>, scalar_prefetch = 0 : i64, scratch_operands = 0 : i64, tpu.core_type = #tpu.core_type<tc>, window_params = [{pipeline_mode = #tpu.pipeline_mode<synchronous>, transform_indices = @transform_0, window_bounds = array<i64: 128, 1>}, {pipeline_mode = #tpu.pipeline_mode<synchronous>, transform_indices = @transform_1, window_bounds = array<i64: 128, 1>}, {pipeline_mode = #tpu.pipeline_mode<synchronous>, transform_indices = @transform_2, window_bounds = array<i64: 512, 256>}, {pipeline_mode = #tpu.pipeline_mode<synchronous>, transform_indices = @transform_3, window_bounds = array<i64: 128, 256>}, {pipeline_mode = #tpu.pipeline_mode<synchronous>, transform_indices = @transform_4, window_bounds = array<i64: 256, 128>}, {transform_indices = @transform_5, window_bounds = array<i64: 1, 1, 256>}, {transform_indices = @transform_6, window_bounds = array<i64: 1, 1, 256>}, {transform_indices = @transform_7, window_bounds = array<i64: 1, 256, 512>}, {transform_indices = @transform_8, window_bounds = array<i64: 1, 1, 512>}, {transform_indices = @transform_9, window_bounds = array<i64: 1, 256, 256>}, {transform_indices = @transform_10, window_bounds = array<i64: 1, 1, 256>}, {transform_indices = @transform_11, window_bounds = array<i64: 1, 1, 256>}, {transform_indices = @transform_12, window_bounds = array<i64: 1, 1, 256>}, {transform_indices = @transform_13, window_bounds = array<i64: 1, 256, 1024>}, {transform_indices = @transform_14, window_bounds = array<i64: 1, 1, 1024>}, {transform_indices = @transform_15, window_bounds = array<i64: 1, 1024, 256>}, {transform_indices = @transform_16, window_bounds = array<i64: 1, 1, 256>}, {pipeline_mode = #tpu.pipeline_mode<synchronous>, transform_indices = @transform_17, window_bounds = array<i64: 1, 256>}, {pipeline_mode = #tpu.pipeline_mode<synchronous>, transform_indices = @transform_18, window_bounds = array<i64: 1, 256>}, {pipeline_mode = #tpu.pipeline_mode<synchronous>, transform_indices = @transform_19, window_bounds = array<i64: 128, 256>}]} {
    %c0_i32 = arith.constant 0 : i32
    %0 = arith.cmpi eq, %arg0, %c0_i32 : i32
    %1 = arith.extui %0 : i1 to i32
    %c0_i32_0 = arith.constant 0 : i32
    %2 = arith.cmpi ne, %1, %c0_i32_0 : i32
    scf.if %2 {
      %129 = tpu.iota {dimensions = array<i32: 1>} : vector<128x512xi32>
      %c0_64 = arith.constant 0 : index
      %c0_65 = arith.constant 0 : index
      %130 = vector.load %arg1[%c0_64, %c0_65] : memref<128x1xi32, #tpu.memory_space<vmem>>, vector<128x1xi32>
      %131 = vector.broadcast %130 : vector<128x1xi32> to vector<128x512xi32>
      %132 = arith.cmpi eq, %129, %131 : vector<128x512xi32>
      %133 = arith.extui %132 : vector<128x512xi1> to vector<128x512xi32>
      %134 = arith.sitofp %133 : vector<128x512xi32> to vector<128x512xf32>
      %135 = tpu.iota {dimensions = array<i32: 1>} : vector<128x128xi32>
      %c0_66 = arith.constant 0 : index
      %c0_67 = arith.constant 0 : index
      %136 = vector.load %arg2[%c0_66, %c0_67] : memref<128x1xi32, #tpu.memory_space<vmem>>, vector<128x1xi32>
      %137 = vector.broadcast %136 : vector<128x1xi32> to vector<128x128xi32>
      %138 = arith.cmpi eq, %135, %137 : vector<128x128xi32>
      %139 = arith.extui %138 : vector<128x128xi1> to vector<128x128xi32>
      %140 = arith.sitofp %139 : vector<128x128xi32> to vector<128x128xf32>
      %c0_68 = arith.constant 0 : index
      %c0_69 = arith.constant 0 : index
      %141 = vector.load %arg3[%c0_68, %c0_69] : memref<512x256xf32, #tpu.memory_space<vmem>>, vector<512x256xf32>
      %cst_70 = arith.constant dense<0.000000e+00> : vector<128x256xf32>
      %142 = tpu.matmul %134, %141, %cst_70 {dimension_numbers = #tpu.dot_dimension_numbers<[1], [0], [0], [1], [0, 0, 1, 1], [], []>} : vector<128x512xf32>, vector<512x256xf32>, vector<128x256xf32> -> vector<128x256xf32>
      %c0_71 = arith.constant 0 : index
      %c0_72 = arith.constant 0 : index
      %143 = vector.load %arg4[%c0_71, %c0_72] : memref<128x256xf32, #tpu.memory_space<vmem>>, vector<128x256xf32>
      %cst_73 = arith.constant dense<0.000000e+00> : vector<128x256xf32>
      %144 = tpu.matmul %140, %143, %cst_73 {dimension_numbers = #tpu.dot_dimension_numbers<[1], [0], [0], [1], [0, 0, 1, 1], [], []>} : vector<128x128xf32>, vector<128x256xf32>, vector<128x256xf32> -> vector<128x256xf32>
      %145 = arith.addf %142, %144 : vector<128x256xf32>
      %c0_74 = arith.constant 0 : index
      %c0_75 = arith.constant 0 : index
      %146 = vector.load %arg20[%c0_74, %c0_75] : memref<128x256xf32, #tpu.memory_space<vmem>>, vector<128x256xf32>
      tpu.vector_store %arg20[%c0_74, %c0_75], %145 {strides = array<i32>} : memref<128x256xf32, #tpu.memory_space<vmem>>, vector<128x256xf32>,
    } else {
    }
    %c0 = arith.constant 0 : index
    %c0_1 = arith.constant 0 : index
    %3 = vector.load %arg20[%c0, %c0_1] : memref<128x256xf32, #tpu.memory_space<vmem>>, vector<128x256xf32>
    %c0_2 = arith.constant 0 : index
    %c0_3 = arith.constant 0 : index
    %c0_4 = arith.constant 0 : index
    %4 = vector.load %arg6[%c0_2, %c0_3, %c0_4] : memref<1x1x256xf32, #tpu.memory_space<vmem>>, vector<1x1x256xf32>
    %5 = vector.shape_cast %4 : vector<1x1x256xf32> to vector<1x256xf32>
    %c0_5 = arith.constant 0 : index
    %c0_6 = arith.constant 0 : index
    %c0_7 = arith.constant 0 : index
    %6 = vector.load %arg7[%c0_5, %c0_6, %c0_7] : memref<1x1x256xf32, #tpu.memory_space<vmem>>, vector<1x1x256xf32>
    %7 = vector.shape_cast %6 : vector<1x1x256xf32> to vector<1x256xf32>
    %cst = arith.constant dense<0.000000e+00> : vector<128xf32>
    %8 = vector.multi_reduction <add>, %3, %cst [1] : vector<128x256xf32> to vector<128xf32>
    %9 = vector.shape_cast %8 : vector<128xf32> to vector<128x1xf32>
    %cst_8 = arith.constant 2.560000e+02 : f32
    %10 = vector.broadcast %cst_8 : f32 to vector<128x1xf32>
    %11 = arith.divf %9, %10 : vector<128x1xf32>
    %12 = vector.broadcast %11 : vector<128x1xf32> to vector<128x256xf32>
    %13 = arith.subf %3, %12 : vector<128x256xf32>
    %14 = arith.mulf %13, %13 : vector<128x256xf32>
    %cst_9 = arith.constant dense<0.000000e+00> : vector<128xf32>
    %15 = vector.multi_reduction <add>, %14, %cst_9 [1] : vector<128x256xf32> to vector<128xf32>
    %16 = vector.shape_cast %15 : vector<128xf32> to vector<128x1xf32>
    %cst_10 = arith.constant 2.560000e+02 : f32
    %17 = vector.broadcast %cst_10 : f32 to vector<128x1xf32>
    %18 = arith.divf %16, %17 : vector<128x1xf32>
    %cst_11 = arith.constant 9.99999974E-6 : f32
    %19 = vector.broadcast %cst_11 : f32 to vector<128x1xf32>
    %20 = arith.addf %18, %19 : vector<128x1xf32>
    %21 = math.rsqrt %20 : vector<128x1xf32>
    %22 = vector.broadcast %21 : vector<128x1xf32> to vector<128x256xf32>
    %23 = arith.mulf %13, %22 : vector<128x256xf32>
    %24 = vector.broadcast %5 : vector<1x256xf32> to vector<128x256xf32>
    %25 = arith.mulf %23, %24 : vector<128x256xf32>
    %26 = vector.broadcast %7 : vector<1x256xf32> to vector<128x256xf32>
    %27 = arith.addf %25, %26 : vector<128x256xf32>
    %28 = arith.truncf %27 : vector<128x256xf32> to vector<128x256xbf16>
    %c0_12 = arith.constant 0 : index
    %c0_13 = arith.constant 0 : index
    %c0_14 = arith.constant 0 : index
    %29 = vector.load %arg8[%c0_12, %c0_13, %c0_14] : memref<1x256x512xbf16, #tpu.memory_space<vmem>>, vector<1x256x512xbf16>
    %30 = vector.shape_cast %29 : vector<1x256x512xbf16> to vector<256x512xbf16>
    %cst_15 = arith.constant dense<0.000000e+00> : vector<128x512xf32>
    %31 = tpu.matmul %28, %30, %cst_15 {dimension_numbers = #tpu.dot_dimension_numbers<[1], [0], [0], [1], [0, 0, 1, 1], [], []>} : vector<128x256xbf16>, vector<256x512xbf16>, vector<128x512xf32> -> vector<128x512xf32>
    %c0_16 = arith.constant 0 : index
    %c0_17 = arith.constant 0 : index
    %c0_18 = arith.constant 0 : index
    %32 = vector.load %arg9[%c0_16, %c0_17, %c0_18] : memref<1x1x512xf32, #tpu.memory_space<vmem>>, vector<1x1x512xf32>
    %33 = vector.shape_cast %32 : vector<1x1x512xf32> to vector<1x512xf32>
    %34 = vector.broadcast %33 : vector<1x512xf32> to vector<128x512xf32>
    %35 = arith.addf %31, %34 : vector<128x512xf32>
    %36 = arith.truncf %35 : vector<128x512xf32> to vector<128x512xbf16>
    %37 = vector.extract_strided_slice %36 {offsets = [0, 256], sizes = [128, 128], strides = [1, 1]} : vector<128x512xbf16> to vector<128x128xbf16>
    %38 = vector.extract_strided_slice %36 {offsets = [0, 384], sizes = [128, 128], strides = [1, 1]} : vector<128x512xbf16> to vector<128x128xbf16>
    %39 = vector.extract_strided_slice %36 {offsets = [0, 0], sizes = [128, 128], strides = [1, 1]} : vector<128x512xbf16> to vector<128x128xbf16>
    %40 = vector.extract_strided_slice %36 {offsets = [0, 128], sizes = [128, 128], strides = [1, 1]} : vector<128x512xbf16> to vector<128x128xbf16>
    %41 = tpu.concatenate %39, %40 in 0 : vector<128x128xbf16>, vector<128x128xbf16> -> vector<256x128xbf16>
    %cst_19 = arith.constant dense<0.000000e+00> : vector<256x128xf32>
    %42 = tpu.matmul %41, %37, %cst_19 {dimension_numbers = #tpu.dot_dimension_numbers<[1], [1], [0], [0], [0, 0, 1, 0], [], []>} : vector<256x128xbf16>, vector<128x128xbf16>, vector<256x128xf32> -> vector<256x128xf32>
    %c0_20 = arith.constant 0 : index
    %c0_21 = arith.constant 0 : index
    %43 = vector.load %arg5[%c0_20, %c0_21] : memref<256x128xf32, #tpu.memory_space<vmem>>, vector<256x128xf32>
    %44 = arith.addf %42, %43 : vector<256x128xf32>
    %cst_22 = arith.constant dense<0xFF800000> : vector<256xf32>
    %45 = vector.multi_reduction <maximumf>, %44, %cst_22 [1] : vector<256x128xf32> to vector<256xf32>
    %46 = vector.shape_cast %45 : vector<256xf32> to vector<256x1xf32>
    %47 = vector.broadcast %46 : vector<256x1xf32> to vector<256x128xf32>
    %48 = arith.subf %44, %47 : vector<256x128xf32>
    %49 = math.exp %48 : vector<256x128xf32>
    %cst_23 = arith.constant dense<0.000000e+00> : vector<256xf32>
    %50 = vector.multi_reduction <add>, %49, %cst_23 [1] : vector<256x128xf32> to vector<256xf32>
    %51 = vector.shape_cast %50 : vector<256xf32> to vector<256x1xf32>
    %52 = tpu.reciprocal %51 {approx = true} : vector<256x1xf32> -> vector<256x1xf32>
    %53 = vector.broadcast %52 : vector<256x1xf32> to vector<256x128xf32>
    %54 = arith.mulf %49, %53 : vector<256x128xf32>
    %55 = arith.truncf %54 : vector<256x128xf32> to vector<256x128xbf16>
    %cst_24 = arith.constant dense<0.000000e+00> : vector<256x128xf32>
    %56 = tpu.matmul %55, %38, %cst_24 {dimension_numbers = #tpu.dot_dimension_numbers<[1], [0], [0], [1], [0, 0, 1, 1], [], []>} : vector<256x128xbf16>, vector<128x128xbf16>, vector<256x128xf32> -> vector<256x128xf32>
    %57 = vector.extract_strided_slice %56 {offsets = [0, 0], sizes = [128, 128], strides = [1, 1]} : vector<256x128xf32> to vector<128x128xf32>
    %58 = vector.extract_strided_slice %56 {offsets = [128, 0], sizes = [128, 128], strides = [1, 1]} : vector<256x128xf32> to vector<128x128xf32>
    %59 = tpu.concatenate %57, %58 in 1 : vector<128x128xf32>, vector<128x128xf32> -> vector<128x256xf32>
    %60 = arith.truncf %59 : vector<128x256xf32> to vector<128x256xbf16>
    %c0_25 = arith.constant 0 : index
    %c0_26 = arith.constant 0 : index
    %c0_27 = arith.constant 0 : index
    %61 = vector.load %arg10[%c0_25, %c0_26, %c0_27] : memref<1x256x256xbf16, #tpu.memory_space<vmem>>, vector<1x256x256xbf16>
    %62 = vector.shape_cast %61 : vector<1x256x256xbf16> to vector<256x256xbf16>
    %cst_28 = arith.constant dense<0.000000e+00> : vector<128x256xf32>
    %63 = tpu.matmul %60, %62, %cst_28 {dimension_numbers = #tpu.dot_dimension_numbers<[1], [0], [0], [1], [0, 0, 1, 1], [], []>} : vector<128x256xbf16>, vector<256x256xbf16>, vector<128x256xf32> -> vector<128x256xf32>
    %c0_29 = arith.constant 0 : index
    %c0_30 = arith.constant 0 : index
    %c0_31 = arith.constant 0 : index
    %64 = vector.load %arg11[%c0_29, %c0_30, %c0_31] : memref<1x1x256xf32, #tpu.memory_space<vmem>>, vector<1x1x256xf32>
    %65 = vector.shape_cast %64 : vector<1x1x256xf32> to vector<1x256xf32>
    %66 = vector.broadcast %65 : vector<1x256xf32> to vector<128x256xf32>
    %67 = arith.addf %63, %66 : vector<128x256xf32>
    %68 = arith.addf %3, %67 : vector<128x256xf32>
    %c0_32 = arith.constant 0 : index
    %c0_33 = arith.constant 0 : index
    %c0_34 = arith.constant 0 : index
    %69 = vector.load %arg12[%c0_32, %c0_33, %c0_34] : memref<1x1x256xf32, #tpu.memory_space<vmem>>, vector<1x1x256xf32>
    %70 = vector.shape_cast %69 : vector<1x1x256xf32> to vector<1x256xf32>
    %c0_35 = arith.constant 0 : index
    %c0_36 = arith.constant 0 : index
    %c0_37 = arith.constant 0 : index
    %71 = vector.load %arg13[%c0_35, %c0_36, %c0_37] : memref<1x1x256xf32, #tpu.memory_space<vmem>>, vector<1x1x256xf32>
    %72 = vector.shape_cast %71 : vector<1x1x256xf32> to vector<1x256xf32>
    %cst_38 = arith.constant dense<0.000000e+00> : vector<128xf32>
    %73 = vector.multi_reduction <add>, %68, %cst_38 [1] : vector<128x256xf32> to vector<128xf32>
    %74 = vector.shape_cast %73 : vector<128xf32> to vector<128x1xf32>
    %cst_39 = arith.constant 2.560000e+02 : f32
    %75 = vector.broadcast %cst_39 : f32 to vector<128x1xf32>
    %76 = arith.divf %74, %75 : vector<128x1xf32>
    %77 = vector.broadcast %76 : vector<128x1xf32> to vector<128x256xf32>
    %78 = arith.subf %68, %77 : vector<128x256xf32>
    %79 = arith.mulf %78, %78 : vector<128x256xf32>
    %cst_40 = arith.constant dense<0.000000e+00> : vector<128xf32>
    %80 = vector.multi_reduction <add>, %79, %cst_40 [1] : vector<128x256xf32> to vector<128xf32>
    %81 = vector.shape_cast %80 : vector<128xf32> to vector<128x1xf32>
    %cst_41 = arith.constant 2.560000e+02 : f32
    %82 = vector.broadcast %cst_41 : f32 to vector<128x1xf32>
    %83 = arith.divf %81, %82 : vector<128x1xf32>
    %cst_42 = arith.constant 9.99999974E-6 : f32
    %84 = vector.broadcast %cst_42 : f32 to vector<128x1xf32>
    %85 = arith.addf %83, %84 : vector<128x1xf32>
    %86 = math.rsqrt %85 : vector<128x1xf32>
    %87 = vector.broadcast %86 : vector<128x1xf32> to vector<128x256xf32>
    %88 = arith.mulf %78, %87 : vector<128x256xf32>
    %89 = vector.broadcast %70 : vector<1x256xf32> to vector<128x256xf32>
    %90 = arith.mulf %88, %89 : vector<128x256xf32>
    %91 = vector.broadcast %72 : vector<1x256xf32> to vector<128x256xf32>
    %92 = arith.addf %90, %91 : vector<128x256xf32>
    %93 = arith.truncf %92 : vector<128x256xf32> to vector<128x256xbf16>
    %c0_43 = arith.constant 0 : index
    %c0_44 = arith.constant 0 : index
    %c0_45 = arith.constant 0 : index
    %94 = vector.load %arg14[%c0_43, %c0_44, %c0_45] : memref<1x256x1024xbf16, #tpu.memory_space<vmem>>, vector<1x256x1024xbf16>
    %95 = vector.shape_cast %94 : vector<1x256x1024xbf16> to vector<256x1024xbf16>
    %cst_46 = arith.constant dense<0.000000e+00> : vector<128x1024xf32>
    %96 = tpu.matmul %93, %95, %cst_46 {dimension_numbers = #tpu.dot_dimension_numbers<[1], [0], [0], [1], [0, 0, 1, 1], [], []>} : vector<128x256xbf16>, vector<256x1024xbf16>, vector<128x1024xf32> -> vector<128x1024xf32>
    %c0_47 = arith.constant 0 : index
    %c0_48 = arith.constant 0 : index
    %c0_49 = arith.constant 0 : index
    %97 = vector.load %arg15[%c0_47, %c0_48, %c0_49] : memref<1x1x1024xf32, #tpu.memory_space<vmem>>, vector<1x1x1024xf32>
    %98 = vector.shape_cast %97 : vector<1x1x1024xf32> to vector<1x1024xf32>
    %99 = vector.broadcast %98 : vector<1x1024xf32> to vector<128x1024xf32>
    %100 = arith.addf %96, %99 : vector<128x1024xf32>
    %cst_50 = arith.constant 5.000000e-01 : f32
    %101 = vector.broadcast %cst_50 : f32 to vector<128x1024xf32>
    %102 = arith.mulf %101, %100 : vector<128x1024xf32>
    %cst_51 = arith.constant 4.471500e-02 : f32
    %103 = vector.broadcast %cst_51 : f32 to vector<128x1024xf32>
    %104 = arith.mulf %103, %100 : vector<128x1024xf32>
    %105 = arith.mulf %104, %100 : vector<128x1024xf32>
    %106 = arith.mulf %105, %100 : vector<128x1024xf32>
    %107 = arith.addf %100, %106 : vector<128x1024xf32>
    %cst_52 = arith.constant 0.797884583 : f32
    %108 = vector.broadcast %cst_52 : f32 to vector<128x1024xf32>
    %109 = arith.mulf %108, %107 : vector<128x1024xf32>
    %110 = math.tanh %109 : vector<128x1024xf32>
    %cst_53 = arith.constant 1.000000e+00 : f32
    %111 = vector.broadcast %cst_53 : f32 to vector<128x1024xf32>
    %112 = arith.addf %111, %110 : vector<128x1024xf32>
    %113 = arith.mulf %102, %112 : vector<128x1024xf32>
    %114 = arith.truncf %113 : vector<128x1024xf32> to vector<128x1024xbf16>
    %c0_54 = arith.constant 0 : index
    %c0_55 = arith.constant 0 : index
    %c0_56 = arith.constant 0 : index
    %115 = vector.load %arg16[%c0_54, %c0_55, %c0_56] : memref<1x1024x256xbf16, #tpu.memory_space<vmem>>, vector<1x1024x256xbf16>
    %116 = vector.shape_cast %115 : vector<1x1024x256xbf16> to vector<1024x256xbf16>
    %cst_57 = arith.constant dense<0.000000e+00> : vector<128x256xf32>
    %117 = tpu.matmul %114, %116, %cst_57 {dimension_numbers = #tpu.dot_dimension_numbers<[1], [0], [0], [1], [0, 0, 1, 1], [], []>} : vector<128x1024xbf16>, vector<1024x256xbf16>, vector<128x256xf32> -> vector<128x256xf32>
    %c0_58 = arith.constant 0 : index
    %c0_59 = arith.constant 0 : index
    %c0_60 = arith.constant 0 : index
    %118 = vector.load %arg17[%c0_58, %c0_59, %c0_60] : memref<1x1x256xf32, #tpu.memory_space<vmem>>, vector<1x1x256xf32>
    %119 = vector.shape_cast %118 : vector<1x1x256xf32> to vector<1x256xf32>
    %120 = vector.broadcast %119 : vector<1x256xf32> to vector<128x256xf32>
    %121 = arith.addf %117, %120 : vector<128x256xf32>
    %122 = arith.addf %68, %121 : vector<128x256xf32>
    %c1_i32 = arith.constant 1 : i32
    %123 = arith.cmpi ne, %arg0, %c1_i32 : i32
    %124 = arith.extui %123 : i1 to i32
    %c0_i32_61 = arith.constant 0 : i32
    %125 = arith.cmpi ne, %124, %c0_i32_61 : i32
    scf.if %125 {
      %c0_64 = arith.constant 0 : index
      %c0_65 = arith.constant 0 : index
      %129 = vector.load %arg20[%c0_64, %c0_65] : memref<128x256xf32, #tpu.memory_space<vmem>>, vector<128x256xf32>
      tpu.vector_store %arg20[%c0_64, %c0_65], %122 {strides = array<i32>} : memref<128x256xf32, #tpu.memory_space<vmem>>, vector<128x256xf32>,
    } else {
    }
    %c1_i32_62 = arith.constant 1 : i32
    %126 = arith.cmpi eq, %arg0, %c1_i32_62 : i32
    %127 = arith.extui %126 : i1 to i32
    %c0_i32_63 = arith.constant 0 : i32
    %128 = arith.cmpi ne, %127, %c0_i32_63 : i32
    scf.if %128 {
      %c0_64 = arith.constant 0 : index
      %c0_65 = arith.constant 0 : index
      %129 = vector.load %arg18[%c0_64, %c0_65] : memref<1x256xf32, #tpu.memory_space<vmem>>, vector<1x256xf32>
      %c0_66 = arith.constant 0 : index
      %c0_67 = arith.constant 0 : index
      %130 = vector.load %arg19[%c0_66, %c0_67] : memref<1x256xf32, #tpu.memory_space<vmem>>, vector<1x256xf32>
      %cst_68 = arith.constant dense<0.000000e+00> : vector<128xf32>
      %131 = vector.multi_reduction <add>, %122, %cst_68 [1] : vector<128x256xf32> to vector<128xf32>
      %132 = vector.shape_cast %131 : vector<128xf32> to vector<128x1xf32>
      %cst_69 = arith.constant 2.560000e+02 : f32
      %133 = vector.broadcast %cst_69 : f32 to vector<128x1xf32>
      %134 = arith.divf %132, %133 : vector<128x1xf32>
      %135 = vector.broadcast %134 : vector<128x1xf32> to vector<128x256xf32>
      %136 = arith.subf %122, %135 : vector<128x256xf32>
      %137 = arith.mulf %136, %136 : vector<128x256xf32>
      %cst_70 = arith.constant dense<0.000000e+00> : vector<128xf32>
      %138 = vector.multi_reduction <add>, %137, %cst_70 [1] : vector<128x256xf32> to vector<128xf32>
      %139 = vector.shape_cast %138 : vector<128xf32> to vector<128x1xf32>
      %cst_71 = arith.constant 2.560000e+02 : f32
      %140 = vector.broadcast %cst_71 : f32 to vector<128x1xf32>
      %141 = arith.divf %139, %140 : vector<128x1xf32>
      %cst_72 = arith.constant 9.99999974E-6 : f32
      %142 = vector.broadcast %cst_72 : f32 to vector<128x1xf32>
      %143 = arith.addf %141, %142 : vector<128x1xf32>
      %144 = math.rsqrt %143 : vector<128x1xf32>
      %145 = vector.broadcast %144 : vector<128x1xf32> to vector<128x256xf32>
      %146 = arith.mulf %136, %145 : vector<128x256xf32>
      %147 = vector.broadcast %129 : vector<1x256xf32> to vector<128x256xf32>
      %148 = arith.mulf %146, %147 : vector<128x256xf32>
      %149 = vector.broadcast %130 : vector<1x256xf32> to vector<128x256xf32>
      %150 = arith.addf %148, %149 : vector<128x256xf32>
      %c0_73 = arith.constant 0 : index
      %c0_74 = arith.constant 0 : index
      %151 = vector.load %arg20[%c0_73, %c0_74] : memref<128x256xf32, #tpu.memory_space<vmem>>, vector<128x256xf32>
      tpu.vector_store %arg20[%c0_73, %c0_74], %150 {strides = array<i32>} : memref<128x256xf32, #tpu.memory_space<vmem>>, vector<128x256xf32>,
    } else {
    }
    return
  }
  func.func @transform_0(%arg0: i32) -> (i32, i32) {
    %c0_i32 = arith.constant 0 : i32
    %c0_i32_0 = arith.constant 0 : i32
    %c0_i32_1 = arith.constant 0 : i32
    return %c0_i32, %c0_i32_0 : i32, i32
  }
  func.func @transform_1(%arg0: i32) -> (i32, i32) {
    %c0_i32 = arith.constant 0 : i32
    %c0_i32_0 = arith.constant 0 : i32
    %c0_i32_1 = arith.constant 0 : i32
    return %c0_i32, %c0_i32_0 : i32, i32
  }
  func.func @transform_2(%arg0: i32) -> (i32, i32) {
    %c0_i32 = arith.constant 0 : i32
    %c0_i32_0 = arith.constant 0 : i32
    %c0_i32_1 = arith.constant 0 : i32
    return %c0_i32, %c0_i32_0 : i32, i32
  }
  func.func @transform_3(%arg0: i32) -> (i32, i32) {
    %c0_i32 = arith.constant 0 : i32
    %c0_i32_0 = arith.constant 0 : i32
    %c0_i32_1 = arith.constant 0 : i32
    return %c0_i32, %c0_i32_0 : i32, i32
  }
  func.func @transform_4(%arg0: i32) -> (i32, i32) {
    %c0_i32 = arith.constant 0 : i32
    %c0_i32_0 = arith.constant 0 : i32
    %c0_i32_1 = arith.constant 0 : i32
    return %c0_i32, %c0_i32_0 : i32, i32
  }
  func.func @transform_5(%arg0: i32) -> (i32, i32, i32) {
    %c0_i32 = arith.constant 0 : i32
    %c0_i32_0 = arith.constant 0 : i32
    %c0_i32_1 = arith.constant 0 : i32
    return %arg0, %c0_i32, %c0_i32_0 : i32, i32, i32
  }
  func.func @transform_6(%arg0: i32) -> (i32, i32, i32) {
    %c0_i32 = arith.constant 0 : i32
    %c0_i32_0 = arith.constant 0 : i32
    %c0_i32_1 = arith.constant 0 : i32
    return %arg0, %c0_i32, %c0_i32_0 : i32, i32, i32
  }
  func.func @transform_7(%arg0: i32) -> (i32, i32, i32) {
    %c0_i32 = arith.constant 0 : i32
    %c0_i32_0 = arith.constant 0 : i32
    %c0_i32_1 = arith.constant 0 : i32
    return %arg0, %c0_i32, %c0_i32_0 : i32, i32, i32
  }
  func.func @transform_8(%arg0: i32) -> (i32, i32, i32) {
    %c0_i32 = arith.constant 0 : i32
    %c0_i32_0 = arith.constant 0 : i32
    %c0_i32_1 = arith.constant 0 : i32
    return %arg0, %c0_i32, %c0_i32_0 : i32, i32, i32
  }
  func.func @transform_9(%arg0: i32) -> (i32, i32, i32) {
    %c0_i32 = arith.constant 0 : i32
    %c0_i32_0 = arith.constant 0 : i32
    %c0_i32_1 = arith.constant 0 : i32
    return %arg0, %c0_i32, %c0_i32_0 : i32, i32, i32
  }
  func.func @transform_10(%arg0: i32) -> (i32, i32, i32) {
    %c0_i32 = arith.constant 0 : i32
    %c0_i32_0 = arith.constant 0 : i32
    %c0_i32_1 = arith.constant 0 : i32
    return %arg0, %c0_i32, %c0_i32_0 : i32, i32, i32
  }
  func.func @transform_11(%arg0: i32) -> (i32, i32, i32) {
    %c0_i32 = arith.constant 0 : i32
    %c0_i32_0 = arith.constant 0 : i32
    %c0_i32_1 = arith.constant 0 : i32
    return %arg0, %c0_i32, %c0_i32_0 : i32, i32, i32
  }
  func.func @transform_12(%arg0: i32) -> (i32, i32, i32) {
    %c0_i32 = arith.constant 0 : i32
    %c0_i32_0 = arith.constant 0 : i32
    %c0_i32_1 = arith.constant 0 : i32
    return %arg0, %c0_i32, %c0_i32_0 : i32, i32, i32
  }
  func.func @transform_13(%arg0: i32) -> (i32, i32, i32) {
    %c0_i32 = arith.constant 0 : i32
    %c0_i32_0 = arith.constant 0 : i32
    %c0_i32_1 = arith.constant 0 : i32
    return %arg0, %c0_i32, %c0_i32_0 : i32, i32, i32
  }
  func.func @transform_14(%arg0: i32) -> (i32, i32, i32) {
    %c0_i32 = arith.constant 0 : i32
    %c0_i32_0 = arith.constant 0 : i32
    %c0_i32_1 = arith.constant 0 : i32
    return %arg0, %c0_i32, %c0_i32_0 : i32, i32, i32
  }
  func.func @transform_15(%arg0: i32) -> (i32, i32, i32) {
    %c0_i32 = arith.constant 0 : i32
    %c0_i32_0 = arith.constant 0 : i32
    %c0_i32_1 = arith.constant 0 : i32
    return %arg0, %c0_i32, %c0_i32_0 : i32, i32, i32
  }
  func.func @transform_16(%arg0: i32) -> (i32, i32, i32) {
    %c0_i32 = arith.constant 0 : i32
    %c0_i32_0 = arith.constant 0 : i32
    %c0_i32_1 = arith.constant 0 : i32
    return %arg0, %c0_i32, %c0_i32_0 : i32, i32, i32
  }
  func.func @transform_17(%arg0: i32) -> (i32, i32) {
    %c0_i32 = arith.constant 0 : i32
    %c0_i32_0 = arith.constant 0 : i32
    %c0_i32_1 = arith.constant 0 : i32
    return %c0_i32, %c0_i32_0 : i32, i32
  }
  func.func @transform_18(%arg0: i32) -> (i32, i32) {
    %c0_i32 = arith.constant 0 : i32
    %c0_i32_0 = arith.constant 0 : i32
    %c0_i32_1 = arith.constant 0 : i32
    return %c0_i32, %c0_i32_0 : i32, i32
  }
  func.func @transform_19(%arg0: i32) -> (i32, i32) {
    %c0_i32 = arith.constant 0 : i32
    %c0_i32_0 = arith.constant 0 : i32
    %c0_i32_1 = arith.constant 0 : i32
    return %c0_i32, %c0_i32_0 : i32, i32
  }
}

</mosaic_0001>

<bundles_post_ra>
// kernel: tpu_custom_call.1
= control target key start
LH: loop header
LB: loop body
LE: loop exit
PB: predicated region body
PF: predicated region fallthrough
CT: control target
= control target key end

     0   :  { %s16753_s0 = inlined_call_operand.vmem [shape: s32[128,1], index: 0, kind: input, shape index: {}]   ;;  %s16754_s1 = inlined_call_operand.vmem [shape: s32[128,1], index: 1, kind: input, shape index: {}]   ;;  %s16755_s2 = inlined_call_operand.hbm [shape: f32[512,256], index: 2, kind: input, shape index: {}]   ;;  %s16756_s3 = inlined_call_operand.vmem [shape: f32[128,256], index: 3, kind: input, shape index: {}]   ;;  %s16757_s4 = inlined_call_operand.hbm [shape: f32[256,128], index: 4, kind: input, shape index: {}]   ;;  %s16758_s5 = inlined_call_operand.hbm [shape: f32[2,1,256], index: 5, kind: input, shape index: {}]   ;;  %s16759_s6 = inlined_call_operand.hbm [shape: f32[2,1,256], index: 6, kind: input, shape index: {}]   ;;  %s16760_s7 = inlined_call_operand.hbm [shape: bf16[2,256,512], index: 7, kind: input, shape index: {}]   ;;  %s16761_s8 = inlined_call_operand.vmem [shape: f32[2,1,512], index: 8, kind: input, shape index: {}]   ;;  %s16762_s9 = inlined_call_operand.hbm [shape: bf16[2,256,256], index: 9, kind: input, shape index: {}]   ;;  %s16763_s10 = inlined_call_operand.vmem [shape: f32[2,1,256], index: 10, kind: input, shape index: {}]   ;;  %s16764_s11 = inlined_call_operand.vmem [shape: f32[2,1,256], index: 11, kind: input, shape index: {}]   ;;  %s16765_s12 = inlined_call_operand.vmem [shape: f32[2,1,256], index: 12, kind: input, shape index: {}]   ;;  %s16766_s13 = inlined_call_operand.hbm [shape: bf16[2,256,1024], index: 13, kind: input, shape index: {}]   ;;  %s16767_s14 = inlined_call_operand.vmem [shape: f32[2,1,1024], index: 14, kind: input, shape index: {}]   ;;  %s16768_s15 = inlined_call_operand.hbm [shape: bf16[2,1024,256], index: 15, kind: input, shape index: {}]   ;;  %s16769_s16 = inlined_call_operand.vmem [shape: f32[2,1,256], index: 16, kind: input, shape index: {}]   ;;  %s16770_s17 = inlined_call_operand.vmem [shape: f32[1,256], index: 17, kind: input, shape index: {}]   ;;  %s16771_s18 = inlined_call_operand.vmem [shape: f32[1,256], index: 18, kind: input, shape index: {}]   ;;  %s16772_s19 = inlined_call_operand.hbm [shape: f32[128,256], index: 19, kind: output, shape index: {}]  }
   0x1   :  { %17008 = sst [smem:[#allocation184_spill]] %s16753_s0 }
   0x2   :  { %17009 = sst [smem:[#allocation185_spill]] %s16754_s1 }
   0x3   :  { %17010 = sst [smem:[#allocation186_spill]] %s16755_s2 }
   0x4   :  { %17011 = sst [smem:[#allocation187_spill]] %s16756_s3 }
   0x5   :  { %17012 = sst [smem:[#allocation188_spill]] %s16757_s4 }
   0x6   :  { %17013 = sst [smem:[#allocation189_spill]] %s16758_s5 }
   0x7   :  { %17014 = sst [smem:[#allocation190_spill]] %s16759_s6 }
   0x8   :  { %17015 = sst [smem:[#allocation191_spill]] %s16760_s7 }
   0x9   :  { %17016 = sst [smem:[#allocation192_spill]] %s16761_s8 }
   0xa   :  { %17017 = sst [smem:[#allocation193_spill]] %s16762_s9 }
   0xb   :  { %17018 = sst [smem:[#allocation194_spill]] %s16763_s10 }
   0xc   :  { %17019 = sst [smem:[#allocation195_spill]] %s16764_s11 }
   0xd   :  { %17020 = sst [smem:[#allocation196_spill]] %s16765_s12 }
   0xe   :  { %17021 = sst [smem:[#allocation197_spill]] %s16766_s13 }
   0xf   :  { %17022 = sst [smem:[#allocation198_spill]] %s16767_s14 }
  0x10   :  { %17023 = sst [smem:[#allocation199_spill]] %s16768_s15 }
  0x11   :  { %17024 = sst [smem:[#allocation200_spill]] %s16769_s16 }
  0x12   :  { %17025 = sst [smem:[#allocation201_spill]] %s16770_s17 }
  0x13   :  { %17026 = sst [smem:[#allocation202_spill]] %s16771_s18 }
  0x14   :  { %17027 = sst [smem:[#allocation203_spill]] %s16772_s19 }
  0x15   :  { %24 = vsyncpa [#allocation3], 0 }
  0x16   :  { %25 = vsyncpa [#allocation6], 0 }
  0x17   :  { %26 = vsyncpa [#allocation4], 0  ;;  %s11358_s0 = smov 0   ;;  %s11360_s30 = smov 0  }
  0x18   :  { %s11362_s20 = smov 0   ;;  %s11364_s21 = smov 0  }
  0x19 LB: > { %17028 = sst [smem:[#allocation18_spill]] %s11232_s20  ;;  %s11377_s1 = sadd.s32 4294967295, %s11236_s21   ;;  %s11236_s21 = sphi %s11364_s21, %s17605_s21   ;;  %s11232_s20 = sphi %s11362_s20, %s17607_s20   ;;  %s11228_s30 = sphi %s11360_s30, %s17609_s30   ;;  %s11224_s0 = sphi %s11358_s0, %s17608_s0  }
  0x1a   : > { %p157_p0 = scmp.ne.s32.totalorder %s11228_s30, %s11224_s0  ;;  %p16780_p1 = scmp.eq.s32.totalorder %s11377_s1, 0 }
  0x1b   : > { %p8821_p2 = scmp.ge.s32.totalorder %s11236_s21, 1  ;;  %p517_p3 = scmp.lt.s32.totalorder %s11236_s21, 3 }
  0x1c   : > { %p11386_p5 = por %p16780_p1, %p157_p0  ;;  %s11238_s23 = smov [#allocation2]  }
  0x1d   : > { %p11390_p6 = pnand %p8821_p2, %p517_p3  ;;  %s535_s24 = sshll.u32 %s11238_s23, 4  ;;  %s536_s24 = int_to_ptr.vmem [resolvable:$true] %s535_s24 }
  0x1e   : > { %s17029_s22 = scalar_select %p11386_p5, 1, 0 }
  0x1f   : > { %s17030_s2 = scalar_select %p11390_p6, 1, 0 }
  0x20   : > { %p9967_p7 = pneg %p11390_p6  ;;  %s11403_s3 = sadd.s32 1, %s11236_s21  }
  0x21   : > { %17032 = sst [smem:[#allocation19_spill]] %s11403_s3  ;;  %s144_s26 = sadd.s32 1, %s11232_s20 }
  0x22   : > { %p11398_p8 = pnand %p9967_p7, %p16780_p1  ;;  %s141_s27 = ssub.s32 %s11236_s21, %s11403_s3 }
  0x23   : > { %s17033_s0 = sld [smem:[#allocation186_spill]] }
  0x24   : > { %s17031_s25 = scalar_select %p11398_p8, 1, 0 }
  0x25   : > { %p16787_p10 = pneg %p11398_p8 }
  0x29   : > { %s17034_s19 = smov %s17033_s0  ;;  %s10928_s18 = scalar_lea.hbm %s17033_s0, 16384 }
  0x2a   : > { %p10929_p9 = scmp.ne.s32.totalorder %s17034_s19, %s10928_s18  ;;  %p10935_p13 = scmp.lt.u32.totalorder %s10928_s18, %s17034_s19 }
  0x2c   : > { %p10931_p11 = pnand %p16787_p10, %p10929_p9 }
  0x2e   : > { %p10932_p12 = pneg %p10931_p11 }
  0x30   : > { %p10937_p0 = pnand %p10935_p13, %p10932_p12 }
  0x32   : > { %10940 = shalt.err (!%p10937_p0)
}
  0x33   : > { %s10941_s3 = scalar_lea.vmem %s536_s24, 16384  ;;  %p10949_p4 = scmp.lt.s32.totalorder %s536_s24, %s536_s24 }
  0x34   : > { %p10942_p2 = scmp.ne.s32.totalorder %s536_s24, %s10941_s3  ;;  %p10950_p1 = scmp.lt.s32.totalorder %s10941_s3, %s10941_s3 }
  0x36   : > { %p10944_p3 = pnand %p10942_p2, %p16787_p10  ;;  %p10951_p5 = por %p10950_p1, %p10949_p4 }
  0x38   : > { %p10945_p7 = pneg %p10944_p3 }
  0x3a   : > { %p10952_p6 = pnand %p10951_p5, %p10945_p7 }
  0x3c   : > { %10955 = shalt.err (!%p10952_p6)
}
  0x3d   : > { %s16783_s17 = smov 256   ;;  %s16784_s14 = smov 16  }
  0x3e   : > { %9970 = dma.hbm_to_vmem [thread:$0]  (!%p11398_p8), %s17034_s19, 16384, %s536_s24, [#allocation3], %s16783_s17, %s16783_s17, %s16784_s14  }
  0x3f   : > { %p142_p1 = scmp.eq.s32.totalorder %s141_s27, 0  ;;  %p151_p4 = scmp.ne.s32.totalorder %s11232_s20, %s11228_s30 }
  0x40   : > { %p152_p5 = scmp.eq.s32.totalorder %s11236_s21, 0  ;;  %p9995_p6 = scmp.lt.s32.totalorder %s11236_s21, 2 }
  0x41   : > { %s11438_s3 = scalar_select %p142_p1, %s11232_s20, %s144_s26  }
  0x42   : > { %p153_p9 = por %p152_p5, %p151_p4  ;;  %s571_s28 = sand.u32 1, %s11236_s21  }
  0x43   : > { %17035 = sst [smem:[#allocation20_spill]] %s11438_s3  ;;  %s11442_s29 = sand.u32 1, %s11232_s20  }
  0x44   : > { %s16785_s0 = sshll.u32 %s11442_s29, 1  ;;  %s9377_s23 = sshll.u32 %s11236_s21, 5 }
  0x45   : > { %s17036_s5 = sld [smem:[#allocation189_spill]]  ;;  %s575_s24 = scalar_lea.vmem [#allocation7], %s16785_s0 }
  0x46   : > { %s583_s26 = sshll.u32 %s575_s24, 4  ;;  %p11453_p11 = pnand %p9995_p6, %p153_p9  ;;  %s11457_s26 = int_to_ptr.vmem [resolvable:$true] %s583_s26 }
  0x47   : > { %s17038_s6 = sld [smem:[#allocation190_spill]]  ;;  %s11464_s12 = scalar_lea.sflag [#allocation3], %s571_s28 }
  0x48   : > { %s17037_s27 = scalar_select %p11453_p11, 1, 0 }
  0x49   : > { %p11470_p13 = pneg %p11453_p11 }
  0x4b   : > { %s11449_s10 = scalar_lea.hbm %s17036_s5, %s9377_s23  ;;  %s10961_s19 = scalar_lea.hbm %s17036_s5, 64 }
  0x4c   : > { %s10956_s17 = scalar_lea.hbm %s11449_s10, 32  ;;  %p10962_p3 = scmp.lt.u32.totalorder %s11449_s10, %s17036_s5 }
  0x4d   : > { %s11462_s11 = scalar_lea.hbm %s17038_s6, %s9377_s23  ;;  %p10957_p12 = scmp.ne.s32.totalorder %s11449_s10, %s10956_s17 }
  0x4e   : > { %s17039_s14 = scalar_select %p11470_p13, 1, 0 }
  0x4f   : > { %p10959_p0 = pnand %p11470_p13, %p10957_p12  ;;  %p10963_p7 = scmp.lt.u32.totalorder %s10961_s19, %s10956_s17 }
  0x50   : > { %p10965_p4 = scmp.lt.u32.totalorder %s10956_s17, %s11449_s10 }
  0x51   : > { %p10960_p2 = pneg %p10959_p0  ;;  %p10964_p1 = por %p10963_p7, %p10962_p3 }
  0x53   : > { %p10966_p5 = por %p10965_p4, %p10964_p1 }
  0x55   : > { %p10967_p6 = pnand %p10966_p5, %p10960_p2 }
  0x57   : > { %10970 = shalt.err (!%p10967_p6)
}
  0x58   : > { %s10971_s28 = scalar_lea.vmem %s11457_s26, 32  ;;  %s11241_s0 = smov [#allocation7]  }
  0x59   : > { %p10972_p9 = scmp.ne.s32.totalorder %s11457_s26, %s10971_s28  ;;  %s10976_s18 = sshll.u32 %s11241_s0, 4  ;;  %s10977_s18 = int_to_ptr.vmem [resolvable:$false] %s10976_s18 }
  0x5a   : > { %s10978_s24 = scalar_lea.vmem %s10977_s18, 64  ;;  %p10979_p10 = scmp.lt.s32.totalorder %s11457_s26, %s10977_s18 }
  0x5b   : > { %p10974_p12 = pnand %p10972_p9, %p11470_p13  ;;  %p10980_p8 = scmp.lt.s32.totalorder %s10978_s24, %s10971_s28 }
  0x5d   : > { %p10975_p0 = pneg %p10974_p12  ;;  %p10981_p3 = por %p10980_p8, %p10979_p10 }
  0x5f   : > { %p10982_p7 = pnand %p10981_p3, %p10975_p0 }
  0x61   : > { %10985 = shalt.err (!%p10982_p7)
}
  0x62   : > { %9977 = dma.hbm_to_vmem [thread:$0]  (!%p11453_p11), %s11449_s10, 32, %s11457_s26, %s11464_s12  }
  0x63   : > { %s17040_s19 = sshll.u32 %s11442_s29, 1  ;;  %s8831_s23 = sshll.u32 %s11442_s29, 9 }
  0x64   : > { %s594_s17 = scalar_lea.vmem [#allocation8], %s17040_s19  ;;  %s10986_s28 = scalar_lea.hbm %s11462_s11, 32 }
  0x65   : > { %s602_s16 = sshll.u32 %s594_s17, 4  ;;  %p10987_p8 = scmp.ne.s32.totalorder %s11462_s11, %s10986_s28  ;;  %s603_s16 = int_to_ptr.vmem [resolvable:$true] %s602_s16 }
  0x66   : > { %s10991_s24 = scalar_lea.hbm %s17038_s6, 64  ;;  %p10992_p1 = scmp.lt.u32.totalorder %s11462_s11, %s17038_s6 }
  0x67   : > { %p10989_p10 = pnand %p10987_p8, %p11470_p13  ;;  %p10993_p4 = scmp.lt.u32.totalorder %s10991_s24, %s10986_s28 }
  0x68   : > { %p10995_p6 = scmp.lt.u32.totalorder %s10986_s28, %s11462_s11 }
  0x69   : > { %p10990_p2 = pneg %p10989_p10  ;;  %p10994_p5 = por %p10993_p4, %p10992_p1 }
  0x6b   : > { %p10996_p9 = por %p10995_p6, %p10994_p5 }
  0x6d   : > { %p10997_p12 = pnand %p10996_p9, %p10990_p2 }
  0x6f   : > { %11000 = shalt.err (!%p10997_p12)
}
  0x70   : > { %s11001_s10 = scalar_lea.vmem %s603_s16, 32  ;;  %s11242_s26 = smov [#allocation8]  }
  0x71   : > { %p11002_p0 = scmp.ne.s32.totalorder %s603_s16, %s11001_s10  ;;  %s11006_s19 = sshll.u32 %s11242_s26, 4  ;;  %s11007_s19 = int_to_ptr.vmem [resolvable:$false] %s11006_s19 }
  0x72   : > { %s11008_s17 = scalar_lea.vmem %s11007_s19, 64  ;;  %p11009_p8 = scmp.lt.s32.totalorder %s603_s16, %s11007_s19 }
  0x73   : > { %p11004_p3 = pnand %p11002_p0, %p11470_p13  ;;  %p11010_p10 = scmp.lt.s32.totalorder %s11008_s17, %s11001_s10 }
  0x75   : > { %p11005_p7 = pneg %p11004_p3  ;;  %p11011_p11 = por %p11010_p10, %p11009_p8 }
  0x77   : > { %p11012_p1 = pnand %p11011_p11, %p11005_p7 }
  0x79   : > { %11015 = shalt.err (!%p11012_p1)
}
  0x7a   : > { %p17041_p4 = scmp.ne.s32.totalorder %s17037_s27, 0  ;;  %s9379_s5 = sshll.u32 %s11236_s21, 13 }
  0x7b   : > { %s613_s3 = scalar_lea.vmem [#allocation9], %s8831_s23  ;;  %s17042_s7 = sld [smem:[#allocation191_spill]] }
  0x7c   : > { %9980 = dma.hbm_to_vmem [thread:$0]  (!%p17041_p4), %s11462_s11, 32, %s603_s16, %s11464_s12  }
  0x7d   : > { %s620_s28 = sshll.u32 %s613_s3, 4  ;;  %s11523_s28 = int_to_ptr.vmem [resolvable:$true] %s620_s28 }
  0x81   : > { %s11521_s24 = scalar_lea.hbm %s17042_s7, %s9379_s5  ;;  %s11021_s23 = scalar_lea.hbm %s17042_s7, 16384 }
  0x82   : > { %s11016_s10 = scalar_lea.hbm %s11521_s24, 8192  ;;  %p11022_p6 = scmp.lt.u32.totalorder %s11521_s24, %s17042_s7 }
  0x83   : > { %p11017_p11 = scmp.ne.s32.totalorder %s11521_s24, %s11016_s10  ;;  %p11023_p9 = scmp.lt.u32.totalorder %s11021_s23, %s11016_s10 }
  0x84   : > { %p11025_p0 = scmp.lt.u32.totalorder %s11016_s10, %s11521_s24 }
  0x85   : > { %p11019_p2 = pnand %p11017_p11, %p11470_p13  ;;  %p11024_p12 = por %p11023_p9, %p11022_p6 }
  0x87   : > { %p11020_p5 = pneg %p11019_p2  ;;  %p11026_p3 = por %p11025_p0, %p11024_p12 }
  0x89   : > { %p11027_p7 = pnand %p11026_p3, %p11020_p5 }
  0x8b   : > { %11030 = shalt.err (!%p11027_p7)
}
  0x8c   : > { %s11031_s17 = scalar_lea.vmem %s11523_s28, 8192  ;;  %s11243_s5 = smov [#allocation9]  }
  0x8d   : > { %p11032_p8 = scmp.ne.s32.totalorder %s11523_s28, %s11031_s17  ;;  %s11036_s3 = sshll.u32 %s11243_s5, 4  ;;  %s11037_s3 = int_to_ptr.vmem [resolvable:$false] %s11036_s3 }
  0x8e   : > { %s11038_s0 = scalar_lea.vmem %s11037_s3, 16384  ;;  %p11039_p11 = scmp.lt.s32.totalorder %s11523_s28, %s11037_s3 }
  0x8f   : > { %p11034_p10 = pnand %p11032_p8, %p11470_p13  ;;  %p11040_p2 = scmp.lt.s32.totalorder %s11038_s0, %s11031_s17 }
  0x91   : > { %p11035_p1 = pneg %p11034_p10  ;;  %p11041_p6 = por %p11040_p2, %p11039_p11 }
  0x93   : > { %p11042_p9 = pnand %p11041_p6, %p11035_p1 }
  0x95   : > { %11045 = shalt.err (!%p11042_p9)
}
  0x96   : > { %s17043_s18 = smov 16   ;;  %s17044_s10 = smov 256  }
  0x97   : > { %9983 = dma.hbm_to_vmem [thread:$0]  (!%p17041_p4), %s11521_s24, 8192, %s11523_s28, %s11464_s12, %s17044_s10, %s17044_s10, %s17043_s18  }
  0x98   : > { %s8834_s11 = sshll.u32 %s11442_s29, 8  ;;  %s9380_s16 = sshll.u32 %s11236_s21, 12 }
  0x99   : > { %s17045_s9 = sld [smem:[#allocation193_spill]]  ;;  %s641_s17 = scalar_lea.vmem [#allocation10], %s8834_s11 }
  0x9a   : > { %s648_s5 = sshll.u32 %s641_s17, 4  ;;  %s8837_s3 = sshll.u32 %s11442_s29, 10  ;;  %s11558_s5 = int_to_ptr.vmem [resolvable:$true] %s648_s5 }
  0x9f   : > { %s11555_s19 = scalar_lea.hbm %s17045_s9, %s9380_s16  ;;  %s11051_s18 = scalar_lea.hbm %s17045_s9, 8192 }
  0xa0   : > { %s11046_s0 = scalar_lea.hbm %s11555_s19, 4096  ;;  %p11052_p3 = scmp.lt.u32.totalorder %s11555_s19, %s17045_s9 }
  0xa1   : > { %p11047_p5 = scmp.ne.s32.totalorder %s11555_s19, %s11046_s0  ;;  %p11053_p7 = scmp.lt.u32.totalorder %s11051_s18, %s11046_s0 }
  0xa2   : > { %p11055_p10 = scmp.lt.u32.totalorder %s11046_s0, %s11555_s19 }
  0xa3   : > { %p11049_p12 = pnand %p11047_p5, %p11470_p13  ;;  %p11054_p8 = por %p11053_p7, %p11052_p3 }
  0xa5   : > { %p11050_p0 = pneg %p11049_p12  ;;  %p11056_p1 = por %p11055_p10, %p11054_p8 }
  0xa7   : > { %p11057_p11 = pnand %p11056_p1, %p11050_p0 }
  0xa9   : > { %11060 = shalt.err (!%p11057_p11)
}
  0xaa   : > { %s11061_s11 = scalar_lea.vmem %s11558_s5, 4096  ;;  %s11244_s23 = smov [#allocation10]  }
  0xab   : > { %p11062_p2 = scmp.ne.s32.totalorder %s11558_s5, %s11061_s11  ;;  %s11066_s26 = sshll.u32 %s11244_s23, 4  ;;  %s11067_s26 = int_to_ptr.vmem [resolvable:$false] %s11066_s26 }
  0xac   : > { %s11068_s17 = scalar_lea.vmem %s11067_s26, 8192  ;;  %p11069_p5 = scmp.lt.s32.totalorder %s11558_s5, %s11067_s26 }
  0xad   : > { %p11064_p6 = pnand %p11062_p2, %p11470_p13  ;;  %p11070_p12 = scmp.lt.s32.totalorder %s11068_s17, %s11061_s11 }
  0xaf   : > { %p11065_p9 = pneg %p11064_p6  ;;  %p11071_p3 = por %p11070_p12, %p11069_p5 }
  0xb1   : > { %p11072_p7 = pnand %p11071_p3, %p11065_p9 }
  0xb3   : > { %11075 = shalt.err (!%p11072_p7)
}
  0xb4   : > { %s16792_s0 = smov 128   ;;  %s16794_s28 = smov 8  }
  0xb5   : > { %9986 = dma.hbm_to_vmem [thread:$0]  (!%p17041_p4), %s11555_s19, 4096, %s11558_s5, %s11464_s12, %s16792_s0, %s16792_s0, %s16794_s28  }
  0xb6   : > { %s9381_s24 = sshll.u32 %s11236_s21, 14  ;;  %s683_s18 = scalar_lea.vmem [#allocation11], %s8837_s3 }
  0xb7   : > { %s690_s10 = sshll.u32 %s683_s18, 4  ;;  %s17046_s13 = sld [smem:[#allocation197_spill]]  ;;  %s11595_s10 = int_to_ptr.vmem [resolvable:$true] %s690_s10 }
  0xbd   : > { %s11593_s23 = scalar_lea.hbm %s17046_s13, %s9381_s24  ;;  %s11081_s17 = scalar_lea.hbm %s17046_s13, 32768 }
  0xbe   : > { %s11076_s26 = scalar_lea.hbm %s11593_s23, 16384  ;;  %p11082_p1 = scmp.lt.u32.totalorder %s11593_s23, %s17046_s13 }
  0xbf   : > { %p11077_p0 = scmp.ne.s32.totalorder %s11593_s23, %s11076_s26  ;;  %p11083_p11 = scmp.lt.u32.totalorder %s11081_s17, %s11076_s26 }
  0xc0   : > { %p11085_p6 = scmp.lt.u32.totalorder %s11076_s26, %s11593_s23 }
  0xc1   : > { %p11079_p8 = pnand %p11077_p0, %p11470_p13  ;;  %p11084_p2 = por %p11083_p11, %p11082_p1 }
  0xc3   : > { %p11080_p10 = pneg %p11079_p8  ;;  %p11086_p9 = por %p11085_p6, %p11084_p2 }
  0xc5   : > { %p11087_p5 = pnand %p11086_p9, %p11080_p10 }
  0xc7   : > { %11090 = shalt.err (!%p11087_p5)
}
  0xc8   : > { %s11091_s16 = scalar_lea.vmem %s11595_s10, 16384  ;;  %s11247_s11 = smov [#allocation11]  }
  0xc9   : > { %p11092_p12 = scmp.ne.s32.totalorder %s11595_s10, %s11091_s16  ;;  %s11096_s19 = sshll.u32 %s11247_s11, 4  ;;  %s11097_s19 = int_to_ptr.vmem [resolvable:$false] %s11096_s19 }
  0xca   : > { %s11098_s0 = scalar_lea.vmem %s11097_s19, 32768  ;;  %p11099_p0 = scmp.lt.s32.totalorder %s11595_s10, %s11097_s19 }
  0xcb   : > { %p11094_p3 = pnand %p11092_p12, %p11470_p13  ;;  %p11100_p8 = scmp.lt.s32.totalorder %s11098_s0, %s11091_s16 }
  0xcd   : > { %p11095_p7 = pneg %p11094_p3  ;;  %p11101_p1 = por %p11100_p8, %p11099_p0 }
  0xcf   : > { %p11102_p11 = pnand %p11101_p1, %p11095_p7 }
  0xd1   : > { %11105 = shalt.err (!%p11102_p11)
}
  0xd2   : > { %s11248_s26 = smov 512   ;;  %s11249_s5 = smov 32  }
  0xd3   : > { %9989 = dma.hbm_to_vmem [thread:$0]  (!%p17041_p4), %s11593_s23, 16384, %s11595_s10, %s11464_s12, %s11248_s26, %s11248_s26, %s11249_s5  }
  0xd4   : > { %s11250_s17 = smov [#allocation5]   ;;  %s17047_s15 = sld [smem:[#allocation199_spill]] }
  0xd5   : > { %s551_s18 = sshll.u32 %s11250_s17, 4  ;;  %s711_s0 = scalar_lea.vmem [#allocation12], %s8837_s3  ;;  %s552_s18 = int_to_ptr.vmem [resolvable:$true] %s551_s18 }
  0xd6   : > { %s718_s28 = sshll.u32 %s711_s0, 4  ;;  %s17048_s4 = sld [smem:[#allocation188_spill]]  ;;  %s11651_s28 = int_to_ptr.vmem [resolvable:$true] %s718_s28 }
  0xd7   : > { %p17049_p2 = scmp.ne.s32.totalorder %s17031_s25, 0 }
  0xd9   : > { %p17050_p6 = pneg %p17049_p2 }
  0xda   : > { %s11624_s16 = scalar_lea.hbm %s17047_s15, %s9381_s24 }
  0xdc   : > { %s11106_s9 = scalar_lea.hbm %s17048_s4, 4096 }
  0xdd   : > { %p11107_p10 = scmp.ne.s32.totalorder %s17048_s4, %s11106_s9  ;;  %p11113_p12 = scmp.lt.u32.totalorder %s11106_s9, %s17048_s4 }
  0xdf   : > { %p11109_p9 = pnand %p11107_p10, %p17050_p6 }
  0xe1   : > { %p11110_p5 = pneg %p11109_p9 }
  0xe3   : > { %p11115_p3 = pnand %p11113_p12, %p11110_p5 }
  0xe5   : > { %11118 = shalt.err (!%p11115_p3)
}
  0xe6   : > { %s11119_s29 = scalar_lea.vmem %s552_s18, 4096  ;;  %p17051_p0 = pmov %p17050_p6 }
  0xe7   : > { %p11120_p7 = scmp.ne.s32.totalorder %s552_s18, %s11119_s29  ;;  %p11127_p11 = scmp.lt.s32.totalorder %s552_s18, %s552_s18 }
  0xe8   : > { %p11128_p4 = scmp.lt.s32.totalorder %s11119_s29, %s11119_s29 }
  0xe9   : > { %p11122_p8 = pnand %p11120_p7, %p17051_p0 }
  0xea   : > { %p11129_p13 = por %p11128_p4, %p11127_p11 }
  0xeb   : > { %p11123_p1 = pneg %p11122_p8 }
  0xed   : > { %p11130_p6 = pnand %p11129_p13, %p11123_p1 }
  0xef   : > { %11133 = shalt.err (!%p11130_p6)
}
  0xf0   : > { %s17052_s6 = smov 8   ;;  %s17053_s7 = smov 128  }
  0xf1   : > { %9973 = dma.hbm_to_vmem [thread:$0]  (!%p17049_p2), %s17048_s4, 4096, %s552_s18, [#allocation6], %s17053_s7, %s17053_s7, %s17052_s6  }
  0xf2   : > { %s11134_s20 = scalar_lea.hbm %s11624_s16, 16384  ;;  %p17054_p13 = scmp.ne.s32.totalorder %s17039_s14, 0 }
  0xf3   : > { %p11135_p4 = scmp.ne.s32.totalorder %s11624_s16, %s11134_s20  ;;  %s11139_s24 = scalar_lea.hbm %s17047_s15, 32768 }
  0xf4   : > { %p11140_p5 = scmp.lt.u32.totalorder %s11624_s16, %s17047_s15  ;;  %p11141_p12 = scmp.lt.u32.totalorder %s11139_s24, %s11134_s20 }
  0xf5   : > { %p11137_p10 = pnand %p11135_p4, %p17054_p13  ;;  %p11143_p7 = scmp.lt.u32.totalorder %s11134_s20, %s11624_s16 }
  0xf6   : > { %p11142_p3 = por %p11141_p12, %p11140_p5 }
  0xf7   : > { %p11138_p9 = pneg %p11137_p10 }
  0xf8   : > { %p11144_p0 = por %p11143_p7, %p11142_p3 }
  0xfa   : > { %p11145_p2 = pnand %p11144_p0, %p11138_p9 }
  0xfc   : > { %11148 = shalt.err (!%p11145_p2)
}
  0xfd   : > { %s11149_s5 = scalar_lea.vmem %s11651_s28, 16384  ;;  %s11251_s17 = smov [#allocation12]  }
  0xfe   : > { %p11150_p8 = scmp.ne.s32.totalorder %s11651_s28, %s11149_s5  ;;  %s11154_s18 = sshll.u32 %s11251_s17, 4  ;;  %s11155_s18 = int_to_ptr.vmem [resolvable:$false] %s11154_s18 }
  0xff   : > { %s11156_s11 = scalar_lea.vmem %s11155_s18, 32768  ;;  %p11157_p6 = scmp.lt.s32.totalorder %s11651_s28, %s11155_s18 }
 0x100   : > { %p11152_p1 = pnand %p11150_p8, %p17054_p13  ;;  %p11158_p4 = scmp.lt.s32.totalorder %s11156_s11, %s11149_s5 }
 0x102   : > { %p11153_p11 = pneg %p11152_p1  ;;  %p11159_p10 = por %p11158_p4, %p11157_p6 }
 0x104   : > { %p11160_p5 = pnand %p11159_p10, %p11153_p11 }
 0x106   : > { %11163 = shalt.err (!%p11160_p5)
}
 0x107   : > { %p17055_p9 = scmp.ne.s32.totalorder %s17037_s27, 0  ;;  %p17056_p13 = scmp.ne.s32.totalorder %s17030_s2, 0 }
 0x109   : > { %9992 = dma.hbm_to_vmem [thread:$0]  (!%p17055_p9), %s11624_s16, 16384, %s11651_s28, %s11464_s12, %s17053_s7, %s17053_s7, %s17052_s6  }
 0x10a   : > { %737 = sbr.rel (%p17056_p13) target bundleno = 3954 (0xf72), region = 96 }
 0x111   : > { %p17057_p12 = scmp.eq.s32.totalorder %s11377_s1, 0 }
 0x113   : > { %11207 = dma.done.wait (%p17057_p12), [#allocation3], 16384   ;;  %p17058_p3 = pmov %p17057_p12 }
 0x115   : > { %11209 = vsyncadd (%p17058_p3), [#allocation3], 4294950912  ;;  %p17059_p7 = pmov %p17058_p3 }
 0x116   : > { %p17060_p0 = pmov %p17058_p3 }
 0x117   : > { %11211 = dma.done.wait (%p17059_p7), [#allocation6], 4096  }
 0x118   : > { %11213 = vsyncadd (%p17060_p0), [#allocation6], 4294963200  ;;  %s747_s14 = sand.u32 1, %s11377_s1   ;;  %s749_s27 = sand.u32 1, %s11228_s30  }
 0x119   : > { %s8846_s12 = sshll.u32 %s749_s27, 1  ;;  %s748_s2 = scalar_lea.sflag [#allocation3], %s747_s14 }
 0x11a   : > { %s11690_s28 = scalar_lea.vmem [#allocation7], %s8846_s12  ;;  %p17061_p2 = scmp.ne.s32.totalorder %s17029_s22, 0 }
 0x11c   : > { %11215 = dma.done.wait (%p17061_p2), %s748_s2, 45120  }
 0x11d   : > { %11217 = vsyncadd (%p17061_p2), %s748_s2, 4294922176  ;;  %s8848_s19 = sshll.u32 %s749_s27, 9  ;;  %s8849_s16 = sshll.u32 %s749_s27, 8 }
 0x11e   : > { %s8850_s0 = sshll.u32 %s749_s27, 10  ;;  %p895_p8 = scmp.lt.s32.totalorder %s11377_s1, 1 }
 0x11f   : > { %s17062_s8 = sld [smem:[#allocation192_spill]]  ;;  %s17063_s20 = sld [smem:[#allocation194_spill]] }
 0x120   : > { %s896_s21 = scalar_select %p895_p8, %s11377_s1, 1 }
 0x121   : > { %s17064_s23 = sld [smem:[#allocation195_spill]]  ;;  %s17065_s18 = sld [smem:[#allocation196_spill]] }
 0x122   : > { %s8852_s10 = sshll.u32 %s896_s21, 2  ;;  %s11698_s29 = sshll.u32 %s896_s21, 1 }
 0x123   : > { %s8856_s14 = sshll.u32 %s896_s21, 3  ;;  %s17066_s6 = sld [smem:[#allocation200_spill]] }
 0x124   : > { %s11726_s22 = scalar_lea.vmem [#allocation8], %s8846_s12  ;;  %s11728_s13 = scalar_lea.vmem [#allocation9], %s8848_s19 }
 0x125   : > { %s11703_s9 = scalar_lea.vmem %s17062_s8, %s8852_s10  ;;  %s902_s25 = scalar_lea.vmem %s17063_s20, %s11698_s29 }
 0x126   : > { %s17067_s8 = sld [smem:[#allocation198_spill]]  ;;  %s11730_s20 = scalar_lea.vmem [#allocation10], %s8849_s16 }
 0x127   : > { %s906_s26 = scalar_lea.vmem %s17064_s23, %s11698_s29  ;;  %s910_s11 = scalar_lea.vmem %s17065_s18, %s11698_s29 }
 0x128   : > { %s11732_s3 = scalar_lea.vmem [#allocation11], %s8850_s0  ;;  %s11734_s24 = scalar_lea.vmem [#allocation12], %s8850_s0 }
 0x129   : > { %s918_s7 = scalar_lea.vmem %s17066_s6, %s11698_s29  ;;  %p17068_p1 = scmp.ne.s32.totalorder %s11377_s1, 0 }
 0x12a   : > { %s17069_s5 = sld [smem:[#allocation185_spill]] (!%p17068_p1)  ;;  %v11252_v2 = vmov (!%p17068_p1), 0   ;;  %v11253_v5 = vmov (!%p17068_p1), 0.0   ;;  %v1298_v10 = vld [vmem:[#allocation2 + $0x8] sm:$0xff] (!%p17068_p1)  ;;  %v1300_v11 = vld [vmem:[#allocation2 + $0x18] sm:$0xff] (!%p17068_p1)  ;;  %v1297_v12 = vld [vmem:[#allocation2] sm:$0xff] (!%p17068_p1) }
 0x12b   : > { %923 = sbr.rel (%p17068_p1) target bundleno = 758 (0x2f6), region = 132  ;;  %10047 = vset.pattern.permute.xlu1 (!%p17068_p1), %v11252_v2  ;;  %10046 = vset.pattern.permute.xlu0 (!%p17068_p1), %v11252_v2  ;;  %v1299_v13 = vld [vmem:[#allocation2 + $0x10] sm:$0xff] (!%p17068_p1)  ;;  %v9559_v14 = vpack.c.bf16 (!%p17068_p1), %v1300_v11, %v1298_v10  ;;  %v1302_v16 = vld [vmem:[#allocation2 + $0x28] sm:$0xff] (!%p17068_p1)  ;;  %v1304_v17 = vld [vmem:[#allocation2 + $0x38] sm:$0xff] (!%p17068_p1)  ;;  %s17070_s19 = sld [smem:[#allocation184_spill]] (!%p17068_p1) }
 0x12c   : > { %s11724_s15 = scalar_lea.vmem %s17067_s8, %s8856_s14  ;;  %1521 = vmatprep.mubr.f32.mxu0 (!%p17068_p1), %v11253_v5  ;;  %v9561_v15 = vpack.c.bf16 (!%p17068_p1), %v1299_v13, %v1297_v12  ;;  %v9563_v18 = vpack.c.bf16 (!%p17068_p1), %v1304_v17, %v1302_v16  ;;  %v1301_v19 = vld [vmem:[#allocation2 + $0x20] sm:$0xff] (!%p17068_p1)  ;;  %v1303_v20 = vld [vmem:[#allocation2 + $0x30] sm:$0xff] (!%p17068_p1)  ;;  %v1306_v21 = vld [vmem:[#allocation2 + $0x48] sm:$0xff] (!%p17068_p1)  ;;  %s17071_s17 = sld [smem:[#allocation187_spill]] (!%p17068_p1) }
 0x12d   : > { %v1308_v22 = vld [vmem:[#allocation2 + $0x58] sm:$0xff] (!%p17068_p1)  ;;  %9560 = vmatprep.subr.bf16.mxu1 (!%p17068_p1), %v9559_v14  ;;  %v9565_v25 = vpack.c.bf16 (!%p17068_p1), %v1303_v20, %v1301_v19  ;;  %v1305_v32 = vld [vmem:[#allocation2 + $0x40] sm:$0xff] (!%p17068_p1)  ;;  %v1307_v33 = vld [vmem:[#allocation2 + $0x50] sm:$0xff] (!%p17068_p1) }
 0x12e   : > { %9562 = vmatpush1.bf16.msra.mxu1 (!%p17068_p1), %v9561_v15  ;;  %v9567_v31 = vpack.c.bf16 (!%p17068_p1), %v1308_v22, %v1306_v21  ;;  %v1310_v36 = vld [vmem:[#allocation2 + $0x68] sm:$0xff] (!%p17068_p1)  ;;  %v1312_v37 = vld [vmem:[#allocation2 + $0x78] sm:$0xff] (!%p17068_p1)  ;;  %v9569_v43 = vpack.c.bf16 (!%p17068_p1), %v1307_v33, %v1305_v32  ;;  %v1309_v44 = vld [vmem:[#allocation2 + $0x60] sm:$0xff] (!%p17068_p1) }
 0x12f   : > { %9564 = vmatprep.subr.bf16.mxu1 (!%p17068_p1), %v9563_v18  ;;  %v1311_v45 = vld [vmem:[#allocation2 + $0x70] sm:$0xff] (!%p17068_p1)  ;;  %v9571_v48 = vpack.c.bf16 (!%p17068_p1), %v1312_v37, %v1310_v36  ;;  %v1314_v49 = vld [vmem:[#allocation2 + $0x88] sm:$0xff] (!%p17068_p1)  ;;  %v1316_v52 = vld [vmem:[#allocation2 + $0x98] sm:$0xff] (!%p17068_p1) }
 0x130   : > { %v1187_v0 = vld [vmem:[%s17069_s5 + $0x10] sm:$0xff] (!%p17068_p1)  ;;  %v1185_v1 = vld [vmem:[%s17069_s5] sm:$0xff] (!%p17068_p1)  ;;  %v1188_v3 = vld [vmem:[%s17069_s5 + $0x18] sm:$0xff] (!%p17068_p1)  ;;  %v9573_v58 = vpack.c.bf16 (!%p17068_p1), %v1311_v45, %v1309_v44  ;;  %v9575_v63 = vpack.c.bf16 (!%p17068_p1), %v1316_v52, %v1314_v49 }
 0x131   : > { %1208 = vperm.xlu1 (!%p17068_p1), %10047, %v1187_v0   ;;  %1202 = vperm.xlu0 (!%p17068_p1), %10046, %v1185_v1   ;;  %v1186_v4 = vld [vmem:[%s17069_s5 + $0x8] sm:$0xff] (!%p17068_p1)  ;;  %v1189_v7 = vld [vmem:[%s17069_s5 + $0x20] sm:$0xff] (!%p17068_p1)  ;;  %v1192_v8 = vld [vmem:[%s17069_s5 + $0x38] sm:$0xff] (!%p17068_p1) }
 0x132   : > { %v1190_v6 = vld [vmem:[%s17069_s5 + $0x28] sm:$0xff]  ;;  %v1191_v9 = vld [vmem:[%s17069_s5 + $0x30] sm:$0xff]  ;;  %v1193_v23 = vld [vmem:[%s17069_s5 + $0x40] sm:$0xff]  ;;  %9566 = vmatpush1.bf16.msra.mxu1 %v9565_v25 }
 0x133   : > { %v929_v24 = vld [vmem:[%s17070_s19] sm:$0xff]  ;;  %v1426_v26 = vld [vmem:[%s17071_s17 + $0x8] sm:$0xff]  ;;  %v1428_v27 = vld [vmem:[%s17071_s17 + $0x18] sm:$0xff]  ;;  %9568 = vmatprep.subr.bf16.mxu1 %v9567_v31 }
 0x134   : > { %v1425_v28 = vld [vmem:[%s17071_s17] sm:$0xff]  ;;  %v1194_v29 = vld [vmem:[%s17069_s5 + $0x48] sm:$0xff]  ;;  %v9527_v34 = vpack.c.bf16 %v1428_v27, %v1426_v26  ;;  %v1427_v35 = vld [vmem:[%s17071_s17 + $0x10] sm:$0xff] }
 0x135   : > { %1211 = vperm.xlu1 %10047, %v1188_v3   ;;  %1205 = vperm.xlu0 %10046, %v1186_v4   ;;  %v930_v30 = vld [vmem:[%s17070_s19 + $0x8] sm:$0xff]  ;;  %v9529_v38 = vpack.c.bf16 %v1427_v35, %v1425_v28  ;;  %v1432_v40 = vld [vmem:[%s17071_s17 + $0x38] sm:$0xff]  ;;  %v1429_v41 = vld [vmem:[%s17071_s17 + $0x20] sm:$0xff] }
 0x136   : > { %v1430_v39 = vld [vmem:[%s17071_s17 + $0x28] sm:$0xff]  ;;  %9528 = vmatprep.subr.bf16.mxu0 %v9527_v34  ;;  %v1431_v42 = vld [vmem:[%s17071_s17 + $0x30] sm:$0xff]  ;;  %v1436_v51 = vld [vmem:[%s17071_s17 + $0x58] sm:$0xff]  ;;  %9570 = vmatpush1.bf16.msra.mxu1 %v9569_v43 }
 0x137   : > { %9530 = vmatpush1.bf16.msra.mxu0 %v9529_v38  ;;  %v9531_v46 = vpack.c.bf16 %v1432_v40, %v1430_v39  ;;  %v9533_v47 = vpack.c.bf16 %v1431_v42, %v1429_v41  ;;  %v1434_v50 = vld [vmem:[%s17071_s17 + $0x48] sm:$0xff]  ;;  %v1433_v54 = vld [vmem:[%s17071_s17 + $0x40] sm:$0xff]  ;;  %v1435_v55 = vld [vmem:[%s17071_s17 + $0x50] sm:$0xff]  ;;  %9572 = vmatprep.subr.bf16.mxu1 %v9571_v48 }
 0x138   : > { %v9535_v53 = vpack.c.bf16 %v1436_v51, %v1434_v50  ;;  %v1195_v56 = vld [vmem:[%s17069_s5 + $0x50] sm:$0xff]  ;;  %v1313_v59 = vld [vmem:[#allocation2 + $0x80] sm:$0xff]  ;;  %v9537_v60 = vpack.c.bf16 %v1435_v55, %v1433_v54  ;;  %v1440_v62 = vld [vmem:[%s17071_s17 + $0x78] sm:$0xff] }
 0x139   : > { %1217 = vperm.xlu1 %10047, %v1190_v6   ;;  %1214 = vperm.xlu0 %10046, %v1189_v7   ;;  %v931_v57 = vld [vmem:[%s17070_s19 + $0x10] sm:$0xff]  ;;  %v1438_v61 = vld [vmem:[%s17071_s17 + $0x68] sm:$0xff]  ;;  %v1315_v0 = vld [vmem:[#allocation2 + $0x90] sm:$0xff] }
 0x13a   : > { %9532 = vmatprep.subr.bf16.mxu0 %v9531_v46  ;;  %v9539_v1 = vpack.c.bf16 %v1440_v62, %v1438_v61  ;;  %v1437_v2 = vld [vmem:[%s17071_s17 + $0x60] sm:$0xff]  ;;  %v1439_v3 = vld [vmem:[%s17071_s17 + $0x70] sm:$0xff]  ;;  %v1442_v7 = vld [vmem:[%s17071_s17 + $0x88] sm:$0xff]  ;;  %9574 = vmatpush1.bf16.msra.mxu1 %v9573_v58  ;;  %v9577_v11 = vpack.c.bf16 %v1315_v0, %v1313_v59 }
 0x13b   : > { %9534 = vmatpush1.bf16.msra.mxu0 %v9533_v47  ;;  %v1318_v4 = vld [vmem:[#allocation2 + $0xa8] sm:$0xff]  ;;  %v1320_v6 = vld [vmem:[#allocation2 + $0xb8] sm:$0xff]  ;;  %v1444_v10 = vld [vmem:[%s17071_s17 + $0x98] sm:$0xff]  ;;  %v9541_v14 = vpack.c.bf16 %v1439_v3, %v1437_v2  ;;  %9576 = vmatprep.subr.bf16.mxu1 %v9575_v63 }
 0x13c   : > { %9536 = vmatprep.subr.bf16.mxu0 %v9535_v53  ;;  %v1317_v12 = vld [vmem:[#allocation2 + $0xa0] sm:$0xff]  ;;  %v1319_v13 = vld [vmem:[#allocation2 + $0xb0] sm:$0xff]  ;;  %v9579_v15 = vpack.c.bf16 %v1320_v6, %v1318_v4  ;;  %v1322_v16 = vld [vmem:[#allocation2 + $0xc8] sm:$0xff]  ;;  %v9543_v17 = vpack.c.bf16 %v1444_v10, %v1442_v7 }
 0x13d   : > { %1223 = vperm.xlu1 %10047, %v1192_v8   ;;  %1220 = vperm.xlu0 %10046, %v1191_v9   ;;  %v1196_v8 = vld [vmem:[%s17069_s5 + $0x58] sm:$0xff]  ;;  %v1441_v18 = vld [vmem:[%s17071_s17 + $0x80] sm:$0xff]  ;;  %v1443_v19 = vld [vmem:[%s17071_s17 + $0x90] sm:$0xff]  ;;  %v9581_v25 = vpack.c.bf16 %v1319_v13, %v1317_v12 }
 0x13e   : > { %v932_v9 = vld [vmem:[%s17070_s19 + $0x18] sm:$0xff]  ;;  %v1324_v20 = vld [vmem:[#allocation2 + $0xd8] sm:$0xff]  ;;  %v1446_v21 = vld [vmem:[%s17071_s17 + $0xa8] sm:$0xff]  ;;  %9578 = vmatpush1.bf16.msra.mxu1 %v9577_v11  ;;  %v9545_v28 = vpack.c.bf16 %v1443_v19, %v1441_v18 }
 0x13f   : > { %9538 = vmatpush1.bf16.msra.mxu0 %v9537_v60  ;;  %v1448_v22 = vld [vmem:[%s17071_s17 + $0xb8] sm:$0xff]  ;;  %v1321_v26 = vld [vmem:[#allocation2 + $0xc0] sm:$0xff]  ;;  %9580 = vmatprep.subr.bf16.mxu1 %v9579_v15  ;;  %v1445_v32 = vld [vmem:[%s17071_s17 + $0xa0] sm:$0xff] }
 0x140   : > { %9540 = vmatprep.subr.bf16.mxu0 %v9539_v1  ;;  %v1323_v27 = vld [vmem:[#allocation2 + $0xd0] sm:$0xff]  ;;  %v9547_v31 = vpack.c.bf16 %v1448_v22, %v1446_v21  ;;  %v1447_v33 = vld [vmem:[%s17071_s17 + $0xb0] sm:$0xff]  ;;  %v1328_v34 = vld [vmem:[#allocation2 + $0xf8] sm:$0xff] }
 0x141   : > { %1226 = vperm.xlu1 %10047, %v1193_v23   ;;  %946 = vperm.xlu0 %10046, %v929_v24   ;;  %v1197_v23 = vld [vmem:[%s17069_s5 + $0x60] sm:$0xff]  ;;  %v1450_v35 = vld [vmem:[%s17071_s17 + $0xc8] sm:$0xff]  ;;  %v1452_v36 = vld [vmem:[%s17071_s17 + $0xd8] sm:$0xff]  ;;  %v9585_v39 = vpack.c.bf16 %v1323_v27, %v1321_v26  ;;  %v9549_v42 = vpack.c.bf16 %v1447_v33, %v1445_v32 }
 0x142   : > { %v933_v24 = vld [vmem:[%s17070_s19 + $0x20] sm:$0xff]  ;;  %v1198_v37 = vld [vmem:[%s17069_s5 + $0x68] sm:$0xff]  ;;  %9582 = vmatpush1.bf16.msra.mxu1 %v9581_v25  ;;  %v1327_v41 = vld [vmem:[#allocation2 + $0xf0] sm:$0xff]  ;;  %v9551_v45 = vpack.c.bf16 %v1452_v36, %v1450_v35 }
 0x143   : > { %9542 = vmatpush1.bf16.msra.mxu0 %v9541_v14  ;;  %v934_v38 = vld [vmem:[%s17070_s19 + $0x28] sm:$0xff]  ;;  %v1330_v44 = vld [vmem:[#allocation2 + $0x108] sm:$0xff]  ;;  %v1449_v46 = vld [vmem:[%s17071_s17 + $0xc0] sm:$0xff] }
 0x144   : > { %9544 = vmatprep.subr.bf16.mxu0 %v9543_v17  ;;  %v1325_v40 = vld [vmem:[#allocation2 + $0xe0] sm:$0xff]  ;;  %v1451_v47 = vld [vmem:[%s17071_s17 + $0xd0] sm:$0xff]  ;;  %v1332_v48 = vld [vmem:[#allocation2 + $0x118] sm:$0xff] }
 0x145   : > { %1229 = vperm.xlu1 %10047, %v1194_v29   ;;  %949 = vperm.xlu0 %10046, %v930_v30   ;;  %v9583_v29 = vpack.c.bf16 %v1324_v20, %v1322_v16  ;;  %v1326_v30 = vld [vmem:[#allocation2 + $0xe8] sm:$0xff]  ;;  %v1454_v49 = vld [vmem:[%s17071_s17 + $0xe8] sm:$0xff]  ;;  %v1456_v50 = vld [vmem:[%s17071_s17 + $0xf8] sm:$0xff]  ;;  %v9589_v53 = vpack.c.bf16 %v1327_v41, %v1325_v40 }
 0x146   : > { %v9587_v43 = vpack.c.bf16 %v1328_v34, %v1326_v30  ;;  %v1199_v51 = vld [vmem:[%s17069_s5 + $0x70] sm:$0xff]  ;;  %v1329_v54 = vld [vmem:[#allocation2 + $0x100] sm:$0xff]  ;;  %v1331_v55 = vld [vmem:[#allocation2 + $0x110] sm:$0xff]  ;;  %v9555_v59 = vpack.c.bf16 %v1456_v50, %v1454_v49 }
 0x147   : > { %9546 = vmatpush1.bf16.msra.mxu0 %v9545_v28  ;;  %9584 = vmatprep.subr.bf16.mxu1 %v9583_v29  ;;  %v935_v52 = vld [vmem:[%s17070_s19 + $0x30] sm:$0xff]  ;;  %v1453_v60 = vld [vmem:[%s17071_s17 + $0xe0] sm:$0xff]  ;;  %v1200_v1 = vld [vmem:[%s17069_s5 + $0x78] sm:$0xff]  ;;  %v9593_v3 = vpack.c.bf16 %v1331_v55, %v1329_v54  ;;  %v924_v55 = vlaneseq }
 0x148   : > { %9548 = vmatprep.subr.bf16.mxu0 %v9547_v31  ;;  %9586 = vmatpush1.bf16.msra.mxu1 %v9585_v39  ;;  %v1334_v58 = vld [vmem:[#allocation2 + $0x128] sm:$0xff]  ;;  %v1336_v62 = vld [vmem:[#allocation2 + $0x138] sm:$0xff]  ;;  %v936_v2 = vld [vmem:[%s17070_s19 + $0x38] sm:$0xff] }
 0x149   : > { %1232 = vperm.xlu1 %10047, %v1195_v56   ;;  %952 = vperm.xlu0 %10046, %v931_v57   ;;  %v9553_v56 = vpack.c.bf16 %v1451_v47, %v1449_v46  ;;  %v9591_v57 = vpack.c.bf16 %v1332_v48, %v1330_v44  ;;  %v1455_v61 = vld [vmem:[%s17071_s17 + $0xf0] sm:$0xff]  ;;  %v1364_v0 = vld [vmem:[#allocation2 + $0x218] sm:$0xff]  ;;  %v9595_v6 = vpack.c.bf16 %v1336_v62, %v1334_v58  ;;  %v1333_v7 = vld [vmem:[#allocation2 + $0x120] sm:$0xff]  ;;  %v11935_v58 = vand.u32 127, %v924_v55 }
 0x14a   : > { %9588 = vmatprep.subr.bf16.mxu1 %v9587_v43  ;;  %v1362_v63 = vld [vmem:[#allocation2 + $0x208] sm:$0xff]  ;;  %v9557_v4 = vpack.c.bf16 %v1455_v61, %v1453_v60  ;;  %v1340_v11 = vld [vmem:[#allocation2 + $0x158] sm:$0xff]  ;;  %v938_v12 = vld [vmem:[%s17070_s19 + $0x48] sm:$0xff] }
 0x14b   : > { %9550 = vmatpush1.bf16.msra.mxu0 %v9549_v42  ;;  %v1338_v10 = vld [vmem:[#allocation2 + $0x148] sm:$0xff]  ;;  %v937_v13 = vld [vmem:[%s17070_s19 + $0x40] sm:$0xff]  ;;  %v1337_v16 = vld [vmem:[#allocation2 + $0x140] sm:$0xff] }
 0x14c   : > { %9552 = vmatprep.subr.bf16.mxu0 %v9551_v45  ;;  %9590 = vmatpush1.bf16.msra.mxu1 %v9589_v53  ;;  %v9599_v15 = vpack.c.bf16 %v1340_v11, %v1338_v10  ;;  %v1339_v17 = vld [vmem:[#allocation2 + $0x150] sm:$0xff]  ;;  %v1342_v18 = vld [vmem:[#allocation2 + $0x168] sm:$0xff]  ;;  %v1344_v19 = vld [vmem:[#allocation2 + $0x178] sm:$0xff] }
 0x14d   : > { %1235 = vperm.xlu1 %10047, %v1196_v8   ;;  %955 = vperm.xlu0 %10046, %v932_v9   ;;  %v1335_v8 = vld [vmem:[#allocation2 + $0x130] sm:$0xff]  ;;  %v11907_v9 = vpack.c.bf16 %v1364_v0, %v1362_v63  ;;  %v939_v21 = vld [vmem:[%s17070_s19 + $0x50] sm:$0xff]  ;;  %v9601_v22 = vpack.c.bf16 %v1339_v17, %v1337_v16  ;;  %v1348_v27 = vld [vmem:[#allocation2 + $0x198] sm:$0xff] }
 0x14e   : > { %9592 = vmatprep.subr.bf16.mxu1 %v9591_v57  ;;  %v9597_v14 = vpack.c.bf16 %v1335_v8, %v1333_v7  ;;  %v940_v20 = vld [vmem:[%s17070_s19 + $0x58] sm:$0xff]  ;;  %v1346_v26 = vld [vmem:[#allocation2 + $0x188] sm:$0xff]  ;;  %v942_v28 = vld [vmem:[%s17070_s19 + $0x68] sm:$0xff] }
 0x14f   : > { %9554 = vmatpush1.bf16.msra.mxu0 %v9553_v56  ;;  %v1343_v25 = vld [vmem:[#allocation2 + $0x170] sm:$0xff]  ;;  %v941_v29 = vld [vmem:[%s17070_s19 + $0x60] sm:$0xff]  ;;  %v9607_v31 = vpack.c.bf16 %v1348_v27, %v1346_v26  ;;  %v1345_v32 = vld [vmem:[#allocation2 + $0x180] sm:$0xff] }
 0x150   : > { %9556 = vmatprep.subr.bf16.mxu0 %v9555_v59  ;;  %9594 = vmatpush1.bf16.msra.mxu1 %v9593_v3  ;;  %v1347_v33 = vld [vmem:[#allocation2 + $0x190] sm:$0xff]  ;;  %v1350_v34 = vld [vmem:[#allocation2 + $0x1a8] sm:$0xff]  ;;  %v1352_v35 = vld [vmem:[#allocation2 + $0x1b8] sm:$0xff] }
 0x151   : > { %1238 = vperm.xlu1 %10047, %v1197_v23   ;;  %958 = vperm.xlu0 %10046, %v933_v24   ;;  %v9603_v23 = vpack.c.bf16 %v1344_v19, %v1342_v18  ;;  %v1341_v24 = vld [vmem:[#allocation2 + $0x160] sm:$0xff]  ;;  %v944_v36 = vld [vmem:[%s17070_s19 + $0x78] sm:$0xff]  ;;  %v9611_v39 = vpack.c.bf16 %v1352_v35, %v1350_v34  ;;  %v1354_v42 = vld [vmem:[#allocation2 + $0x1c8] sm:$0xff] }
 0x152   : > { %9596 = vmatprep.subr.bf16.mxu1 %v9595_v6  ;;  %v9605_v30 = vpack.c.bf16 %v1343_v25, %v1341_v24  ;;  %v1349_v40 = vld [vmem:[#allocation2 + $0x1a0] sm:$0xff]  ;;  %v1351_v41 = vld [vmem:[#allocation2 + $0x1b0] sm:$0xff]  ;;  %v1356_v43 = vld [vmem:[#allocation2 + $0x1d8] sm:$0xff]  ;;  %v11254_v6 = vmov 1.0  }
 0x153   : > { %9558 = vmatpush1.bf16.msra.mxu0 %v9557_v4  ;;  %v9613_v44 = vpack.c.bf16 %v1351_v41, %v1349_v40  ;;  %v9615_v45 = vpack.c.bf16 %v1356_v43, %v1354_v42  ;;  %v1353_v46 = vld [vmem:[#allocation2 + $0x1c0] sm:$0xff]  ;;  %v1355_v47 = vld [vmem:[#allocation2 + $0x1d0] sm:$0xff]  ;;  %v1358_v48 = vld [vmem:[#allocation2 + $0x1e8] sm:$0xff] }
 0x154   : > { %9624 = vmatprep.subr.bf16.mxu0 %v11907_v9  ;;  %9598 = vmatpush1.bf16.msra.mxu1 %v9597_v14  ;;  %v1360_v49 = vld [vmem:[#allocation2 + $0x1f8] sm:$0xff]  ;;  %v9617_v50 = vpack.c.bf16 %v1355_v47, %v1353_v46  ;;  %v1359_v53 = vld [vmem:[#allocation2 + $0x1f0] sm:$0xff]  ;;  %v1361_v56 = vld [vmem:[#allocation2 + $0x200] sm:$0xff] }
 0x155   : > { %1241 = vperm.xlu1 %10047, %v1198_v37   ;;  %961 = vperm.xlu0 %10046, %v934_v38   ;;  %v943_v37 = vld [vmem:[%s17070_s19 + $0x70] sm:$0xff]  ;;  %v9609_v38 = vpack.c.bf16 %v1347_v33, %v1345_v32  ;;  %v1363_v57 = vld [vmem:[#allocation2 + $0x210] sm:$0xff]  ;;  %v1368_v60 = vld [vmem:[#allocation2 + $0x238] sm:$0xff] }
 0x156   : > { %9600 = vmatprep.subr.bf16.mxu1 %v9599_v15  ;;  %v1366_v59 = vld [vmem:[#allocation2 + $0x228] sm:$0xff]  ;;  %v11937_v61 = vpack.c.bf16 %v1363_v57, %v1361_v56  ;;  %v1372_v4 = vld [vmem:[#allocation2 + $0x258] sm:$0xff]  ;;  %v1369_v11 = vld [vmem:[#allocation2 + $0x240] sm:$0xff] }
 0x157   : > { %v11939_v0 = vpack.c.bf16 %v1368_v60, %v1366_v59  ;;  %v1370_v3 = vld [vmem:[#allocation2 + $0x248] sm:$0xff]  ;;  %v1376_v14 = vld [vmem:[#allocation2 + $0x278] sm:$0xff]  ;;  %v1373_v19 = vld [vmem:[#allocation2 + $0x260] sm:$0xff] }
 0x158   : > { %9602 = vmatpush1.bf16.msra.mxu1 %v9601_v22  ;;  %v11948_v10 = vpack.c.bf16 %v1372_v4, %v1370_v3  ;;  %v1380_v22 = vld [vmem:[#allocation2 + $0x298] sm:$0xff]  ;;  %v1377_v27 = vld [vmem:[#allocation2 + $0x280] sm:$0xff]  ;;  %v1390_v46 = vld [vmem:[#allocation2 + $0x2e8] sm:$0xff] }
 0x159   : > { %1244 = vperm.xlu1 %10047, %v1199_v51   ;;  %964 = vperm.xlu0 %10046, %v935_v52   ;;  %v9619_v51 = vpack.c.bf16 %v1360_v49, %v1358_v48  ;;  %v1357_v52 = vld [vmem:[#allocation2 + $0x1e0] sm:$0xff]  ;;  %v1392_v47 = vld [vmem:[#allocation2 + $0x2f8] sm:$0xff] }
 0x15a   : > { %9604 = vmatprep.subr.bf16.mxu1 %v9603_v23  ;;  %v9621_v54 = vpack.c.bf16 %v1359_v53, %v1357_v52  ;;  %v1381_v35 = vld [vmem:[#allocation2 + $0x2a0] sm:$0xff]  ;;  %v1391_v53 = vld [vmem:[#allocation2 + $0x2f0] sm:$0xff]  ;;  %v1396_v55 = vld [vmem:[#allocation2 + $0x318] sm:$0xff] }
 0x15b   : > { %v1389_v52 = vld [vmem:[#allocation2 + $0x2e0] sm:$0xff] }
 0x15c   : > { %9606 = vmatpush1.bf16.msra.mxu1 %v9605_v30  ;;  %v1382_v30 = vld [vmem:[#allocation2 + $0x2a8] sm:$0xff]  ;;  %v12040_v56 = vpack.c.bf16 %v1391_v53, %v1389_v52  ;;  %v1424_v53 = vld [vmem:[#allocation2 + $0x3f8] sm:$0xff] }
 0x15d   : > { %1247 = vperm.xlu1 %10047, %v1200_v1   ;;  %967 = vperm.xlu0 %10046, %v936_v2   ;;  %v1365_v1 = vld [vmem:[#allocation2 + $0x220] sm:$0xff]  ;;  %v1367_v2 = vld [vmem:[#allocation2 + $0x230] sm:$0xff]  ;;  %v1422_v52 = vld [vmem:[#allocation2 + $0x3e8] sm:$0xff] }
 0x15e   : > { %9608 = vmatprep.subr.bf16.mxu1 %v9607_v31  ;;  %v11945_v7 = vpack.c.bf16 %v1367_v2, %v1365_v1  ;;  %v1384_v31 = vld [vmem:[#allocation2 + $0x2b8] sm:$0xff] }
 0x160   : > { %9610 = vmatpush1.bf16.msra.mxu1 %v9609_v38  ;;  %v1386_v38 = vld [vmem:[#allocation2 + $0x2c8] sm:$0xff] }
 0x161   : > { %973 = vperm.xlu1 %10047, %v938_v12   ;;  %970 = vperm.xlu0 %10046, %v937_v13   ;;  %v1371_v12 = vld [vmem:[#allocation2 + $0x250] sm:$0xff]  ;;  %v1374_v13 = vld [vmem:[#allocation2 + $0x268] sm:$0xff] }
 0x162   : > { %9612 = vmatprep.subr.bf16.mxu1 %v9611_v39  ;;  %v11955_v15 = vpack.c.bf16 %v1371_v12, %v1369_v11  ;;  %v11958_v18 = vpack.c.bf16 %v1376_v14, %v1374_v13  ;;  %v1388_v39 = vld [vmem:[#allocation2 + $0x2d8] sm:$0xff] }
 0x163   : > { %v12005_v43 = vpack.c.bf16 %v1388_v39, %v1386_v38 }
 0x164   : > { %9614 = vmatpush1.bf16.msra.mxu1 %v9613_v44  ;;  %v1385_v44 = vld [vmem:[#allocation2 + $0x2c0] sm:$0xff] }
 0x165   : > { %979 = vperm.xlu1 %10047, %v940_v20   ;;  %976 = vperm.xlu0 %10046, %v939_v21   ;;  %v1375_v20 = vld [vmem:[#allocation2 + $0x270] sm:$0xff]  ;;  %v1378_v21 = vld [vmem:[#allocation2 + $0x288] sm:$0xff] }
 0x166   : > { %9616 = vmatprep.subr.bf16.mxu1 %v9615_v45  ;;  %v11963_v23 = vpack.c.bf16 %v1375_v20, %v1373_v19  ;;  %v11970_v26 = vpack.c.bf16 %v1380_v22, %v1378_v21  ;;  %v1387_v45 = vld [vmem:[#allocation2 + $0x2d0] sm:$0xff] }
 0x167   : > { %v12018_v48 = vpack.c.bf16 %v1387_v45, %v1385_v44  ;;  %v1418_v44 = vld [vmem:[#allocation2 + $0x3c8] sm:$0xff]  ;;  %v1420_v45 = vld [vmem:[#allocation2 + $0x3d8] sm:$0xff] }
 0x168   : > { %9618 = vmatpush1.bf16.msra.mxu1 %v9617_v50 }
 0x169   : > { %985 = vperm.xlu1 %10047, %v942_v28   ;;  %982 = vperm.xlu0 %10046, %v941_v29   ;;  %v1379_v28 = vld [vmem:[#allocation2 + $0x290] sm:$0xff]  ;;  %v11974_v29 = vadd.s32 128, %v11935_v58 }
 0x16a   : > { %9620 = vmatprep.subr.bf16.mxu1 %v9619_v51  ;;  %v11979_v32 = vpack.c.bf16 %v1379_v28, %v1377_v27  ;;  %v12026_v51 = vpack.c.bf16 %v1392_v47, %v1390_v46 }
 0x16c   : > { %9622 = vmatpush1.bf16.msra.mxu1 %v9621_v54  ;;  %v1394_v54 = vld [vmem:[#allocation2 + $0x308] sm:$0xff] }
 0x16d   : > { %991 = vperm.xlu1 %10047, %v944_v36   ;;  %988 = vperm.xlu0 %10046, %v943_v37   ;;  %v1383_v36 = vld [vmem:[#allocation2 + $0x2b0] sm:$0xff]  ;;  %v11991_v37 = vpack.c.bf16 %v1384_v31, %v1382_v30  ;;  %v12048_v60 = vpack.c.bf16 %v1396_v55, %v1394_v54 }
 0x16e   : > { %9687 = vmatprep.subr.bf16.mxu1 %v11907_v9  ;;  %v11997_v40 = vpack.c.bf16 %v1383_v36, %v1381_v35  ;;  %v1414_v35 = vld [vmem:[#allocation2 + $0x3a8] sm:$0xff]  ;;  %v1416_v36 = vld [vmem:[#allocation2 + $0x3b8] sm:$0xff] }
 0x1b0   : > { %v1209_v62 = vpop.permute.xlu1 %1208  ;;  %v1203_v63 = vpop.permute.xlu0 %1202 }
 0x1b1   : > { %vm1249_vm0 = vcmp.eq.s32.totalorder %v11935_v58, %v1203_v63  ;;  %vm1251_vm2 = vcmp.eq.s32.totalorder %v11935_v58, %v1209_v62  ;;  %v1395_v62 = vld [vmem:[#allocation2 + $0x310] sm:$0xff]  ;;  %v1398_v63 = vld [vmem:[#allocation2 + $0x328] sm:$0xff] }
 0x1b2   : > { %8939 = vmatmul.mubr.msk.f32.vlgmr.msra.gmra.mrb[0].mxu0 %vm1249_vm0, %v11254_v6 }
 0x1b3   : > { %9626 = vmatpush1.bf16.msra.mxu0 %v11937_v61  ;;  %1527 = vmatprep.mubr.f32.mxu0 %v11253_v5 }
 0x1b4   : > { %v1212_v8 = vpop.permute.xlu1 %1211  ;;  %v1206_v9 = vpop.permute.xlu0 %1205  ;;  %9628 = vmatprep.subr.bf16.mxu0 %v11939_v0 }
 0x1b5   : > { %vm1250_vm1 = vcmp.eq.s32.totalorder %v11935_v58, %v1206_v9  ;;  %vm1252_vm3 = vcmp.eq.s32.totalorder %v11935_v58, %v1212_v8  ;;  %v1399_v8 = vld [vmem:[#allocation2 + $0x330] sm:$0xff]  ;;  %v1402_v9 = vld [vmem:[#allocation2 + $0x348] sm:$0xff] }
 0x1b6   : > { %8940 = vmatmul.mubr.msk.f32.gmra.mrb[2].mxu0 %vm1250_vm1, %v11254_v6 }
 0x1b7   : > { %9630 = vmatpush1.bf16.msra.mxu0 %v11945_v7  ;;  %1533 = vmatprep.mubr.f32.mxu0 %v11253_v5 }
 0x1b8   : > { %v1218_v16 = vpop.permute.xlu1 %1217  ;;  %v1215_v17 = vpop.permute.xlu0 %1214  ;;  %9632 = vmatprep.subr.bf16.mxu0 %v11948_v10 }
 0x1b9   : > { %vm1253_vm4 = vcmp.eq.s32.totalorder %v11935_v58, %v1215_v17  ;;  %vm1254_vm7 = vcmp.eq.s32.totalorder %v11935_v58, %v1218_v16  ;;  %v1403_v16 = vld [vmem:[#allocation2 + $0x350] sm:$0xff]  ;;  %v1406_v17 = vld [vmem:[#allocation2 + $0x368] sm:$0xff] }
 0x1ba   : > { %8941 = vmatmul.mubr.msk.f32.gmra.mrb[4].mxu0 %vm1251_vm2, %v11254_v6 }
 0x1bb   : > { %9634 = vmatpush1.bf16.msra.mxu0 %v11955_v15  ;;  %1539 = vmatprep.mubr.f32.mxu0 %v11253_v5 }
 0x1bc   : > { %v11965_v24 = vpop.permute.xlu1 %1223  ;;  %v11967_v25 = vpop.permute.xlu0 %1220  ;;  %9636 = vmatprep.subr.bf16.mxu0 %v11958_v18 }
 0x1bd   : > { %vm1255_vm10 = vcmp.eq.s32.totalorder %v11935_v58, %v11967_v25  ;;  %vm1256_vm13 = vcmp.eq.s32.totalorder %v11935_v58, %v11965_v24  ;;  %v1407_v24 = vld [vmem:[#allocation2 + $0x370] sm:$0xff]  ;;  %v1410_v25 = vld [vmem:[#allocation2 + $0x388] sm:$0xff] }
 0x1be   : > { %8942 = vmatmul.mubr.msk.f32.gmra.mrb[6].mxu0 %vm1252_vm3, %v11254_v6 }
 0x1bf   : > { %9638 = vmatpush1.bf16.msra.mxu0 %v11963_v23  ;;  %1545 = vmatprep.mubr.f32.mxu0 %v11253_v5 }
 0x1c0   : > { %v11981_v33 = vpop.permute.xlu1 %1226  ;;  %v11983_v34 = vpop.permute.xlu0 %946  ;;  %9640 = vmatprep.subr.bf16.mxu0 %v11970_v26 }
 0x1c1   : > { %vm994_vm5 = vcmp.eq.s32.totalorder %v11974_v29, %v11983_v34  ;;  %vm993_vm6 = vcmp.eq.s32.totalorder %v11935_v58, %v11983_v34  ;;  %vm1257_vm0 = vcmp.eq.s32.totalorder %v11935_v58, %v11981_v33  ;;  %v1411_v33 = vld [vmem:[#allocation2 + $0x390] sm:$0xff] }
 0x1c2   : > { %8943 = vmatmul.mubr.msk.f32.gmra.mrb[8].mxu0 %vm1253_vm4, %v11254_v6  ;;  %8955 = vmatprep.mubr.msk.f32.mxu1 %vm994_vm5, %v11254_v6 }
 0x1c3   : > { %9642 = vmatpush1.bf16.msra.mxu0 %v11979_v32  ;;  %8956 = vmatmul.mubr.msk.f32.vlgmr.msra.gmra.mrb[0].mxu1 %vm993_vm6, %v11254_v6 }
 0x1c4   : > { %v11999_v41 = vpop.permute.xlu1 %1229  ;;  %v12001_v42 = vpop.permute.xlu0 %949  ;;  %9703 = vmatpush1.bf16.msra.mxu1 %v11937_v61  ;;  %1551 = vmatprep.mubr.f32.mxu0 %v11253_v5  ;;  %v1393_v61 = vld [vmem:[#allocation2 + $0x300] sm:$0xff] }
 0x1c5   : > { %9644 = vmatprep.subr.bf16.mxu0 %v11991_v37  ;;  %vm998_vm8 = vcmp.eq.s32.totalorder %v11974_v29, %v12001_v42  ;;  %vm997_vm9 = vcmp.eq.s32.totalorder %v11935_v58, %v12001_v42  ;;  %9688 = vmatprep.subr.bf16.mxu1 %v11939_v0  ;;  %v1400_v0 = vld [vmem:[#allocation2 + $0x338] sm:$0xff]  ;;  %v12062_v1 = vpack.c.bf16 %v1395_v62, %v1393_v61  ;;  %v12213_v62 = vadd.s32 384, %v11935_v58 }
 0x1c6   : > { %8944 = vmatmul.mubr.msk.f32.gmra.mrb[10].mxu0 %vm1254_vm7, %v11254_v6  ;;  %8957 = vmatprep.mubr.msk.f32.mxu1 %vm998_vm8, %v11254_v6  ;;  %v12070_v4 = vpack.c.bf16 %v1400_v0, %v1398_v63  ;;  %vm1258_vm3 = vcmp.eq.s32.totalorder %v11935_v58, %v11999_v41  ;;  %v1413_v41 = vld [vmem:[#allocation2 + $0x3a0] sm:$0xff]  ;;  %v12220_v0 = vadd.s32 256, %v11935_v58 }
 0x1c7   : > { %9646 = vmatpush1.bf16.msra.mxu0 %v11997_v40  ;;  %8958 = vmatmul.mubr.msk.f32.gmra.mrb[2].mxu1 %vm997_vm9, %v11254_v6 }
 0x1c8   : > { %v12020_v49 = vpop.permute.xlu1 %1232  ;;  %v12022_v50 = vpop.permute.xlu0 %952  ;;  %9704 = vmatpush1.bf16.msra.mxu1 %v11945_v7  ;;  %1557 = vmatprep.mubr.f32.mxu0 %v11253_v5  ;;  %v1397_v7 = vld [vmem:[#allocation2 + $0x320] sm:$0xff] }
 0x1c9   : > { %9648 = vmatprep.subr.bf16.mxu0 %v12005_v43  ;;  %vm1002_vm11 = vcmp.eq.s32.totalorder %v11974_v29, %v12022_v50  ;;  %vm1001_vm12 = vcmp.eq.s32.totalorder %v11935_v58, %v12022_v50  ;;  %9689 = vmatprep.subr.bf16.mxu1 %v11948_v10  ;;  %v1404_v10 = vld [vmem:[#allocation2 + $0x358] sm:$0xff]  ;;  %v12084_v11 = vpack.c.bf16 %v1399_v8, %v1397_v7 }
 0x1ca   : > { %8945 = vmatmul.mubr.msk.f32.gmra.mrb[12].mxu0 %vm1255_vm10, %v11254_v6  ;;  %8959 = vmatprep.mubr.msk.f32.mxu1 %vm1002_vm11, %v11254_v6  ;;  %v12092_v14 = vpack.c.bf16 %v1404_v10, %v1402_v9  ;;  %vm1259_vm6 = vcmp.eq.s32.totalorder %v11935_v58, %v12020_v49  ;;  %v1419_v49 = vld [vmem:[#allocation2 + $0x3d0] sm:$0xff] }
 0x1cb   : > { %9650 = vmatpush1.bf16.msra.mxu0 %v12018_v48  ;;  %8960 = vmatmul.mubr.msk.f32.gmra.mrb[4].mxu1 %vm1001_vm12, %v11254_v6 }
 0x1cc   : > { %v12042_v57 = vpop.permute.xlu1 %1235  ;;  %v12044_v59 = vpop.permute.xlu0 %955  ;;  %9705 = vmatpush1.bf16.msra.mxu1 %v11955_v15  ;;  %1563 = vmatprep.mubr.f32.mxu0 %v11253_v5  ;;  %v1401_v15 = vld [vmem:[#allocation2 + $0x340] sm:$0xff] }
 0x1cd   : > { %9652 = vmatprep.subr.bf16.mxu0 %v12026_v51  ;;  %vm1006_vm14 = vcmp.eq.s32.totalorder %v11974_v29, %v12044_v59  ;;  %vm1005_vm15 = vcmp.eq.s32.totalorder %v11935_v58, %v12044_v59  ;;  %9690 = vmatprep.subr.bf16.mxu1 %v11958_v18  ;;  %v1408_v18 = vld [vmem:[#allocation2 + $0x378] sm:$0xff]  ;;  %v12106_v19 = vpack.c.bf16 %v1403_v16, %v1401_v15 }
 0x1ce   : > { %8946 = vmatmul.mubr.msk.f32.gmra.mrb[14].mxu0 %vm1256_vm13, %v11254_v6  ;;  %8961 = vmatprep.mubr.msk.f32.mxu1 %vm1006_vm14, %v11254_v6  ;;  %v12114_v22 = vpack.c.bf16 %v1408_v18, %v1406_v17  ;;  %vm1260_vm9 = vcmp.eq.s32.totalorder %v11935_v58, %v12042_v57  ;;  %v1423_v57 = vld [vmem:[#allocation2 + $0x3f0] sm:$0xff] }
 0x1cf   : > { %9654 = vmatpush1.bf16.msra.mxu0 %v12040_v56  ;;  %8962 = vmatmul.mubr.msk.f32.gmra.mrb[6].mxu1 %vm1005_vm15, %v11254_v6 }
 0x1d0   : > { %v12064_v2 = vpop.permute.xlu1 %1238  ;;  %v12066_v3 = vpop.permute.xlu0 %958  ;;  %9706 = vmatpush1.bf16.msra.mxu1 %v11963_v23  ;;  %1569 = vmatprep.mubr.f32.mxu0 %v11253_v5  ;;  %v1405_v23 = vld [vmem:[#allocation2 + $0x360] sm:$0xff] }
 0x1d1   : > { %9656 = vmatprep.subr.bf16.mxu0 %v12048_v60  ;;  %vm1010_vm1 = vcmp.eq.s32.totalorder %v11974_v29, %v12066_v3  ;;  %vm1009_vm2 = vcmp.eq.s32.totalorder %v11935_v58, %v12066_v3  ;;  %9691 = vmatprep.subr.bf16.mxu1 %v11970_v26  ;;  %v1412_v26 = vld [vmem:[#allocation2 + $0x398] sm:$0xff]  ;;  %v12128_v27 = vpack.c.bf16 %v1407_v24, %v1405_v23 }
 0x1d2   : > { %8947 = vmatmul.mubr.msk.f32.gmra.mrb[16].mxu0 %vm1257_vm0, %v11254_v6  ;;  %8963 = vmatprep.mubr.msk.f32.mxu1 %vm1010_vm1, %v11254_v6  ;;  %v12136_v31 = vpack.c.bf16 %v1412_v26, %v1410_v25  ;;  %vm1261_vm12 = vcmp.eq.s32.totalorder %v11935_v58, %v12064_v2 }
 0x1d3   : > { %9658 = vmatpush1.bf16.msra.mxu0 %v12062_v1  ;;  %8964 = vmatmul.mubr.msk.f32.gmra.mrb[8].mxu1 %vm1009_vm2, %v11254_v6 }
 0x1d4   : > { %v12086_v12 = vpop.permute.xlu1 %1241  ;;  %v12088_v13 = vpop.permute.xlu0 %961  ;;  %9707 = vmatpush1.bf16.msra.mxu1 %v11979_v32  ;;  %1575 = vmatprep.mubr.f32.mxu0 %v11253_v5  ;;  %v1409_v32 = vld [vmem:[#allocation2 + $0x380] sm:$0xff] }
 0x1d5   : > { %9660 = vmatprep.subr.bf16.mxu0 %v12070_v4  ;;  %vm1014_vm4 = vcmp.eq.s32.totalorder %v11974_v29, %v12088_v13  ;;  %vm1013_vm5 = vcmp.eq.s32.totalorder %v11935_v58, %v12088_v13  ;;  %9692 = vmatprep.subr.bf16.mxu1 %v11991_v37  ;;  %v12150_v37 = vpack.c.bf16 %v1411_v33, %v1409_v32 }
 0x1d6   : > { %8948 = vmatmul.mubr.msk.f32.gmra.mrb[18].mxu0 %vm1258_vm3, %v11254_v6  ;;  %8965 = vmatprep.mubr.msk.f32.mxu1 %vm1014_vm4, %v11254_v6  ;;  %vm1262_vm0 = vcmp.eq.s32.totalorder %v11935_v58, %v12086_v12 }
 0x1d7   : > { %9662 = vmatpush1.bf16.msra.mxu0 %v12084_v11  ;;  %8966 = vmatmul.mubr.msk.f32.gmra.mrb[10].mxu1 %vm1013_vm5, %v11254_v6 }
 0x1d8   : > { %v12108_v20 = vpop.permute.xlu1 %1244  ;;  %v12110_v21 = vpop.permute.xlu0 %964  ;;  %9708 = vmatpush1.bf16.msra.mxu1 %v11997_v40  ;;  %1581 = vmatprep.mubr.f32.mxu0 %v11253_v5  ;;  %v12158_v40 = vpack.c.bf16 %v1416_v36, %v1414_v35 }
 0x1d9   : > { %9664 = vmatprep.subr.bf16.mxu0 %v12092_v14  ;;  %vm1018_vm7 = vcmp.eq.s32.totalorder %v11974_v29, %v12110_v21  ;;  %vm1017_vm8 = vcmp.eq.s32.totalorder %v11935_v58, %v12110_v21  ;;  %9693 = vmatprep.subr.bf16.mxu1 %v12005_v43  ;;  %v1415_v43 = vld [vmem:[#allocation2 + $0x3b0] sm:$0xff]  ;;  %vm1263_vm3 = vcmp.eq.s32.totalorder %v11935_v58, %v12108_v20 }
 0x1da   : > { %8949 = vmatmul.mubr.msk.f32.gmra.mrb[20].mxu0 %vm1259_vm6, %v11254_v6  ;;  %8967 = vmatprep.mubr.msk.f32.mxu1 %vm1018_vm7, %v11254_v6  ;;  %v12174_v46 = vpack.c.bf16 %v1415_v43, %v1413_v41 }
 0x1db   : > { %9666 = vmatpush1.bf16.msra.mxu0 %v12106_v19  ;;  %8968 = vmatmul.mubr.msk.f32.gmra.mrb[12].mxu1 %vm1017_vm8, %v11254_v6  ;;  %vm996_vm8 = vcmp.eq.s32.totalorder %v12213_v62, %v11983_v34 }
 0x1dc   : > { %v12130_v28 = vpop.permute.xlu1 %1247  ;;  %v12132_v30 = vpop.permute.xlu0 %967  ;;  %9709 = vmatpush1.bf16.msra.mxu1 %v12018_v48  ;;  %1587 = vmatprep.mubr.f32.mxu0 %v11253_v5  ;;  %v1417_v48 = vld [vmem:[#allocation2 + $0x3c0] sm:$0xff] }
 0x1dd   : > { %9668 = vmatprep.subr.bf16.mxu0 %v12114_v22  ;;  %vm1022_vm10 = vcmp.eq.s32.totalorder %v11974_v29, %v12132_v30  ;;  %vm1021_vm11 = vcmp.eq.s32.totalorder %v11935_v58, %v12132_v30  ;;  %9694 = vmatprep.subr.bf16.mxu1 %v12026_v51  ;;  %v12184_v51 = vpack.c.bf16 %v1420_v45, %v1418_v44 }
 0x1de   : > { %8950 = vmatmul.mubr.msk.f32.gmra.mrb[22].mxu0 %vm1260_vm9, %v11254_v6  ;;  %8969 = vmatprep.mubr.msk.f32.mxu1 %vm1022_vm10, %v11254_v6  ;;  %v12194_v54 = vpack.c.bf16 %v1419_v49, %v1417_v48  ;;  %vm1264_vm6 = vcmp.eq.s32.totalorder %v11935_v58, %v12130_v28  ;;  %vm995_vm10 = vcmp.eq.s32.totalorder %v12220_v0, %v11983_v34 }
 0x1df   : > { %9670 = vmatpush1.bf16.msra.mxu0 %v12128_v27  ;;  %8970 = vmatmul.mubr.msk.f32.gmra.mrb[14].mxu1 %vm1021_vm11, %v11254_v6 }
 0x1e0   : > { %v12152_v38 = vpop.permute.xlu1 %973  ;;  %v12154_v39 = vpop.permute.xlu0 %970  ;;  %9710 = vmatpush1.bf16.msra.mxu1 %v12040_v56  ;;  %1593 = vmatprep.mubr.f32.mxu0 %v11253_v5  ;;  %v1421_v56 = vld [vmem:[#allocation2 + $0x3e0] sm:$0xff] }
 0x1e1   : > { %9672 = vmatprep.subr.bf16.mxu0 %v12136_v31  ;;  %vm1026_vm13 = vcmp.eq.s32.totalorder %v11974_v29, %v12154_v39  ;;  %vm1025_vm14 = vcmp.eq.s32.totalorder %v11935_v58, %v12154_v39  ;;  %9695 = vmatprep.subr.bf16.mxu1 %v12048_v60  ;;  %vm1030_vm15 = vcmp.eq.s32.totalorder %v11974_v29, %v12152_v38 }
 0x1e2   : > { %8951 = vmatmul.mubr.msk.f32.gmra.mrb[24].mxu0 %vm1261_vm12, %v11254_v6  ;;  %8971 = vmatprep.mubr.msk.f32.mxu1 %vm1026_vm13, %v11254_v6  ;;  %vm1029_vm1 = vcmp.eq.s32.totalorder %v11935_v58, %v12152_v38  ;;  %v9683_v60 = vpack.c.bf16 %v1424_v53, %v1422_v52  ;;  %v9685_v61 = vpack.c.bf16 %v1423_v57, %v1421_v56 }
 0x1e3   : > { %9674 = vmatpush1.bf16.msra.mxu0 %v12150_v37  ;;  %8972 = vmatmul.mubr.msk.f32.gmra.mrb[16].mxu1 %vm1025_vm14, %v11254_v6  ;;  %vm1000_vm12 = vcmp.eq.s32.totalorder %v12213_v62, %v12001_v42  ;;  %vm999_vm14 = vcmp.eq.s32.totalorder %v12220_v0, %v12001_v42 }
 0x1e4   : > { %v12176_v47 = vpop.permute.xlu0 %976  ;;  %8973 = vmatprep.mubr.msk.f32.mxu1 %vm1030_vm15, %v11254_v6  ;;  %9711 = vmatpush1.bf16.msra.mxu1 %v12062_v1  ;;  %v12196_v55 = vpop.permute.xlu1 %979 }
 0x1e5   : > { %1599 = vmatprep.mubr.f32.mxu0 %v11253_v5  ;;  %9676 = vmatprep.subr.bf16.mxu0 %v12158_v40  ;;  %vm1034_vm2 = vcmp.eq.s32.totalorder %v11974_v29, %v12176_v47  ;;  %vm1033_vm4 = vcmp.eq.s32.totalorder %v11935_v58, %v12176_v47  ;;  %vm1038_vm5 = vcmp.eq.s32.totalorder %v11974_v29, %v12196_v55 }
 0x1e6   : > { %8952 = vmatmul.mubr.msk.f32.gmra.mrb[26].mxu0 %vm1262_vm0, %v11254_v6  ;;  %9696 = vmatprep.subr.bf16.mxu1 %v12070_v4  ;;  %vm1037_vm7 = vcmp.eq.s32.totalorder %v11935_v58, %v12196_v55  ;;  %vm1004_vm0 = vcmp.eq.s32.totalorder %v12213_v62, %v12022_v50 }
 0x1e7   : > { %9678 = vmatpush1.bf16.msra.mxu0 %v12174_v46  ;;  %8974 = vmatmul.mubr.msk.f32.gmra.mrb[18].mxu1 %vm1029_vm1, %v11254_v6 }
 0x1e8   : > { %8975 = vmatprep.mubr.msk.f32.mxu1 %vm1034_vm2, %v11254_v6  ;;  %9712 = vmatpush1.bf16.msra.mxu1 %v12084_v11  ;;  %v12215_v63 = vpop.permute.xlu0 %982  ;;  %v986_v1 = vpop.permute.xlu1 %985  ;;  %vm1003_vm2 = vcmp.eq.s32.totalorder %v12220_v0, %v12022_v50 }
 0x1e9   : > { %1605 = vmatprep.mubr.f32.mxu0 %v11253_v5  ;;  %9680 = vmatprep.subr.bf16.mxu0 %v12184_v51  ;;  %vm1042_vm9 = vcmp.eq.s32.totalorder %v11974_v29, %v12215_v63  ;;  %vm1041_vm11 = vcmp.eq.s32.totalorder %v11935_v58, %v12215_v63  ;;  %vm1046_vm13 = vcmp.eq.s32.totalorder %v11974_v29, %v986_v1 }
 0x1ea   : > { %8953 = vmatmul.mubr.msk.f32.gmra.mrb[28].mxu0 %vm1263_vm3, %v11254_v6  ;;  %9697 = vmatprep.subr.bf16.mxu1 %v12092_v14  ;;  %vm1045_vm15 = vcmp.eq.s32.totalorder %v11935_v58, %v986_v1 }
 0x1eb   : > { %9682 = vmatpush1.bf16.msra.mxu0 %v12194_v54  ;;  %8976 = vmatmul.mubr.msk.f32.gmra.mrb[20].mxu1 %vm1033_vm4, %v11254_v6  ;;  %vm1008_vm4 = vcmp.eq.s32.totalorder %v12213_v62, %v12044_v59 }
 0x1ec   : > { %8977 = vmatprep.mubr.msk.f32.mxu1 %vm1038_vm5, %v11254_v6  ;;  %9713 = vmatpush1.bf16.msra.mxu1 %v12106_v19  ;;  %v992_v34 = vpop.permute.xlu1 %991 }
 0x1ed   : > { %1611 = vmatprep.mubr.f32.mxu0 %v11253_v5  ;;  %9684 = vmatprep.subr.bf16.mxu0 %v9683_v60  ;;  %v989_v5 = vpop.permute.xlu0 %988  ;;  %vm1054_vm5 = vcmp.eq.s32.totalorder %v11974_v29, %v992_v34 }
 0x1ee   : > { %8954 = vmatmul.mubr.msk.f32.gmra.mrb[30].mxu0 %vm1264_vm6, %v11254_v6  ;;  %9698 = vmatprep.subr.bf16.mxu1 %v12114_v22  ;;  %vm1050_vm1 = vcmp.eq.s32.totalorder %v11974_v29, %v989_v5  ;;  %vm1049_vm3 = vcmp.eq.s32.totalorder %v11935_v58, %v989_v5  ;;  %vm1007_vm6 = vcmp.eq.s32.totalorder %v12220_v0, %v12044_v59 }
 0x1ef   : > { %9686 = vmatpush1.bf16.msra.mxu0 %v9685_v61  ;;  %8978 = vmatmul.mubr.msk.f32.gmra.mrb[22].mxu1 %vm1037_vm7, %v11254_v6  ;;  %vm1053_vm7 = vcmp.eq.s32.totalorder %v11935_v58, %v992_v34 }
 0x1f0   : > { %8987 = vmatprep.mubr.msk.f32.mxu0 %vm996_vm8, %v11254_v6  ;;  %8979 = vmatprep.mubr.msk.f32.mxu1 %vm1042_vm9, %v11254_v6  ;;  %vm1012_vm8 = vcmp.eq.s32.totalorder %v12213_v62, %v12066_v3  ;;  %vm1044_vm9 = vcmp.eq.s32.totalorder %v12213_v62, %v12215_v63 }
 0x1f1   : > { %9714 = vmatpush1.bf16.msra.mxu1 %v12128_v27 }
 0x1f2   : > { %8988 = vmatmul.mubr.msk.f32.vlgmr.msra.gmra.mrb[32].mxu0 %vm995_vm10, %v11254_v6  ;;  %9699 = vmatprep.subr.bf16.mxu1 %v12136_v31  ;;  %vm1011_vm10 = vcmp.eq.s32.totalorder %v12220_v0, %v12066_v3 }
 0x1f3   : > { %8980 = vmatmul.mubr.msk.f32.gmra.mrb[24].mxu1 %vm1041_vm11, %v11254_v6  ;;  %8989 = vmatprep.mubr.msk.f32.mxu0 %vm1000_vm12, %v11254_v6  ;;  %vm1016_vm11 = vcmp.eq.s32.totalorder %v12213_v62, %v12088_v13  ;;  %vm1043_vm12 = vcmp.eq.s32.totalorder %v12220_v0, %v12215_v63 }
 0x1f4   : > { %8981 = vmatprep.mubr.msk.f32.mxu1 %vm1046_vm13, %v11254_v6  ;;  %vm1048_vm13 = vcmp.eq.s32.totalorder %v12213_v62, %v986_v1 }
 0x1f5   : > { %9715 = vmatpush1.bf16.msra.mxu1 %v12150_v37 }
 0x1f6   : > { %8990 = vmatmul.mubr.msk.f32.gmra.mrb[34].mxu0 %vm999_vm14, %v11254_v6  ;;  %9700 = vmatprep.subr.bf16.mxu1 %v12158_v40  ;;  %vm1015_vm14 = vcmp.eq.s32.totalorder %v12220_v0, %v12088_v13 }
 0x1f7   : > { %8982 = vmatmul.mubr.msk.f32.gmra.mrb[26].mxu1 %vm1045_vm15, %v11254_v6  ;;  %8991 = vmatprep.mubr.msk.f32.mxu0 %vm1004_vm0, %v11254_v6  ;;  %vm1020_vm15 = vcmp.eq.s32.totalorder %v12213_v62, %v12110_v21  ;;  %vm1047_vm0 = vcmp.eq.s32.totalorder %v12220_v0, %v986_v1 }
 0x1f8   : > { %8983 = vmatprep.mubr.msk.f32.mxu1 %vm1050_vm1, %v11254_v6  ;;  %vm1052_vm1 = vcmp.eq.s32.totalorder %v12213_v62, %v989_v5 }
 0x1f9   : > { %9716 = vmatpush1.bf16.msra.mxu1 %v12174_v46 }
 0x1fa   : > { %8992 = vmatmul.mubr.msk.f32.gmra.mrb[36].mxu0 %vm1003_vm2, %v11254_v6  ;;  %9701 = vmatprep.subr.bf16.mxu1 %v12184_v51  ;;  %vm1019_vm2 = vcmp.eq.s32.totalorder %v12220_v0, %v12110_v21 }
 0x1fb   : > { %8984 = vmatmul.mubr.msk.f32.gmra.mrb[28].mxu1 %vm1049_vm3, %v11254_v6  ;;  %8993 = vmatprep.mubr.msk.f32.mxu0 %vm1008_vm4, %v11254_v6  ;;  %vm1024_vm3 = vcmp.eq.s32.totalorder %v12213_v62, %v12132_v30  ;;  %vm1051_vm4 = vcmp.eq.s32.totalorder %v12220_v0, %v989_v5 }
 0x1fc   : > { %8985 = vmatprep.mubr.msk.f32.mxu1 %vm1054_vm5, %v11254_v6  ;;  %vm1056_vm5 = vcmp.eq.s32.totalorder %v12213_v62, %v992_v34 }
 0x1fd   : > { %9717 = vmatpush1.bf16.msra.mxu1 %v12194_v54 }
 0x1fe   : > { %8994 = vmatmul.mubr.msk.f32.gmra.mrb[38].mxu0 %vm1007_vm6, %v11254_v6  ;;  %9702 = vmatprep.subr.bf16.mxu1 %v9683_v60  ;;  %vm1023_vm6 = vcmp.eq.s32.totalorder %v12220_v0, %v12132_v30 }
 0x1ff   : > { %8986 = vmatmul.mubr.msk.f32.gmra.mrb[30].mxu1 %vm1053_vm7, %v11254_v6  ;;  %8995 = vmatprep.mubr.msk.f32.mxu0 %vm1012_vm8, %v11254_v6  ;;  %vm1028_vm7 = vcmp.eq.s32.totalorder %v12213_v62, %v12154_v39  ;;  %vm1055_vm8 = vcmp.eq.s32.totalorder %v12220_v0, %v992_v34 }
 0x200   : > { %9011 = vmatprep.mubr.msk.f32.mxu1 %vm1044_vm9, %v11254_v6  ;;  %vm1027_vm9 = vcmp.eq.s32.totalorder %v12220_v0, %v12154_v39 }
 0x201   : > { %9718 = vmatpush1.bf16.msra.mxu1 %v9685_v61 }
 0x202   : > { %8996 = vmatmul.mubr.msk.f32.gmra.mrb[40].mxu0 %vm1011_vm10, %v11254_v6  ;;  %vm1032_vm10 = vcmp.eq.s32.totalorder %v12213_v62, %v12152_v38 }
 0x203   : > { %8997 = vmatprep.mubr.msk.f32.mxu0 %vm1016_vm11, %v11254_v6  ;;  %vm1031_vm11 = vcmp.eq.s32.totalorder %v12220_v0, %v12152_v38 }
 0x204   : > { %9012 = vmatmul.mubr.msk.f32.vlgmr.msra.gmra.mrb[24].mxu1 %vm1043_vm12, %v11254_v6  ;;  %vm1036_vm12 = vcmp.eq.s32.totalorder %v12213_v62, %v12176_v47 }
 0x205   : > { %9013 = vmatprep.mubr.msk.f32.mxu1 %vm1048_vm13, %v11254_v6  ;;  %vm1035_vm13 = vcmp.eq.s32.totalorder %v12220_v0, %v12176_v47 }
 0x206   : > { %8998 = vmatmul.mubr.msk.f32.gmra.mrb[42].mxu0 %vm1015_vm14, %v11254_v6  ;;  %vm1040_vm14 = vcmp.eq.s32.totalorder %v12213_v62, %v12196_v55 }
 0x207   : > { %8999 = vmatprep.mubr.msk.f32.mxu0 %vm1020_vm15, %v11254_v6  ;;  %vm1039_vm15 = vcmp.eq.s32.totalorder %v12220_v0, %v12196_v55 }
 0x208   : > { %9014 = vmatmul.mubr.msk.f32.gmra.mrb[26].mxu1 %vm1047_vm0, %v11254_v6 }
 0x209   : > { %9015 = vmatprep.mubr.msk.f32.mxu1 %vm1052_vm1, %v11254_v6 }
 0x20a   : > { %9000 = vmatmul.mubr.msk.f32.gmra.mrb[44].mxu0 %vm1019_vm2, %v11254_v6 }
 0x20b   : > { %9001 = vmatprep.mubr.msk.f32.mxu0 %vm1024_vm3, %v11254_v6 }
 0x20c   : > { %9016 = vmatmul.mubr.msk.f32.gmra.mrb[28].mxu1 %vm1051_vm4, %v11254_v6 }
 0x20d   : > { %9017 = vmatprep.mubr.msk.f32.mxu1 %vm1056_vm5, %v11254_v6 }
 0x20e   : > { %9002 = vmatmul.mubr.msk.f32.gmra.mrb[46].mxu0 %vm1023_vm6, %v11254_v6 }
 0x20f   : > { %9003 = vmatprep.mubr.msk.f32.mxu0 %vm1028_vm7, %v11254_v6 }
 0x210   : > { %9018 = vmatmul.mubr.msk.f32.gmra.mrb[30].mxu1 %vm1055_vm8, %v11254_v6 }
 0x212   : > { %9004 = vmatmul.mubr.msk.f32.gmra.mrb[48].mxu0 %vm1027_vm9, %v11254_v6 }
 0x213   : > { %9005 = vmatprep.mubr.msk.f32.mxu0 %vm1032_vm10, %v11254_v6 }
 0x216   : > { %9006 = vmatmul.mubr.msk.f32.gmra.mrb[50].mxu0 %vm1031_vm11, %v11254_v6 }
 0x217   : > { %9007 = vmatprep.mubr.msk.f32.mxu0 %vm1036_vm12, %v11254_v6 }
 0x21a   : > { %9008 = vmatmul.mubr.msk.f32.gmra.mrb[52].mxu0 %vm1035_vm13, %v11254_v6 }
 0x21b   : > { %9009 = vmatprep.mubr.msk.f32.mxu0 %vm1040_vm14, %v11254_v6 }
 0x21e   : > { %9010 = vmatmul.mubr.msk.f32.gmra.mrb[54].mxu0 %vm1039_vm15, %v11254_v6 }
 0x285   : > { %v1523_v58 = vpop.f32.mrb[0].mxu0 }
 0x286   : > { %v1525_v29 = vpop.f32.mrb[1].mxu0 }
 0x289   : > { %v1529_v42 = vpop.f32.mrb[2].mxu0 }
 0x28a   : > { %v1531_v50 = vpop.f32.mrb[3].mxu0 }
 0x28d   : > { %v1535_v59 = vpop.f32.mrb[4].mxu0 }
 0x28e   : > { %v1537_v2 = vpop.f32.mrb[5].mxu0 }
 0x291   : > { %v1541_v3 = vpop.f32.mrb[6].mxu0 }
 0x292   : > { %v1543_v4 = vpop.f32.mrb[7].mxu0 }
 0x295   : > { %v1547_v7 = vpop.f32.mrb[8].mxu0 }
 0x296   : > { %v1549_v8 = vpop.f32.mrb[9].mxu0  ;;  %v1684_v9 = vpop.f32.mrb[0].mxu1 }
 0x297   : > { %v12345_v10 = vadd.f32 %v1684_v9, %v1523_v58  ;;  %v1686_v11 = vpop.f32.mrb[1].mxu1 }
 0x298   : > { %v12347_v12 = vadd.f32 %v1686_v11, %v1525_v29 }
 0x299   : > { %v1553_v13 = vpop.f32.mrb[10].mxu0 }
 0x29a   : > { %v1555_v14 = vpop.f32.mrb[11].mxu0  ;;  %v1690_v15 = vpop.f32.mrb[2].mxu1 }
 0x29b   : > { %v12349_v6 = vadd.f32 %v1690_v15, %v1529_v42  ;;  %v1692_v16 = vpop.f32.mrb[3].mxu1 }
 0x29c   : > { %v12351_v17 = vadd.f32 %v1692_v16, %v1531_v50 }
 0x29d   : > { %v1559_v18 = vpop.f32.mrb[12].mxu0 }
 0x29e   : > { %v1561_v19 = vpop.f32.mrb[13].mxu0  ;;  %v1696_v20 = vpop.f32.mrb[4].mxu1 }
 0x29f   : > { %v12353_v21 = vadd.f32 %v1696_v20, %v1535_v59  ;;  %v1698_v22 = vpop.f32.mrb[5].mxu1 }
 0x2a0   : > { %v12355_v23 = vadd.f32 %v1698_v22, %v1537_v2 }
 0x2a1   : > { %v1565_v24 = vpop.f32.mrb[14].mxu0 }
 0x2a2   : > { %v1567_v25 = vpop.f32.mrb[15].mxu0  ;;  %v1702_v26 = vpop.f32.mrb[6].mxu1 }
 0x2a3   : > { %v12357_v27 = vadd.f32 %v1702_v26, %v1541_v3  ;;  %v1704_v28 = vpop.f32.mrb[7].mxu1 }
 0x2a4   : > { %v12359_v30 = vadd.f32 %v1704_v28, %v1543_v4 }
 0x2a5   : > { %v1571_v31 = vpop.f32.mrb[16].mxu0 }
 0x2a6   : > { %v1573_v32 = vpop.f32.mrb[17].mxu0  ;;  %v1708_v33 = vpop.f32.mrb[8].mxu1 }
 0x2a7   : > { %v12361_v35 = vadd.f32 %v1708_v33, %v1547_v7  ;;  %v1710_v36 = vpop.f32.mrb[9].mxu1 }
 0x2a8   : > { %v12363_v37 = vadd.f32 %v1710_v36, %v1549_v8 }
 0x2a9   : > { %v1577_v38 = vpop.f32.mrb[18].mxu0 }
 0x2aa   : > { %v1579_v39 = vpop.f32.mrb[19].mxu0  ;;  %v1714_v40 = vpop.f32.mrb[10].mxu1 }
 0x2ab   : > { %v12365_v41 = vadd.f32 %v1714_v40, %v1553_v13  ;;  %v1716_v43 = vpop.f32.mrb[11].mxu1 }
 0x2ac   : > { %v12367_v44 = vadd.f32 %v1716_v43, %v1555_v14 }
 0x2ad   : > { %v1583_v45 = vpop.f32.mrb[20].mxu0 }
 0x2ae   : > { %v1585_v46 = vpop.f32.mrb[21].mxu0  ;;  %v1720_v47 = vpop.f32.mrb[12].mxu1 }
 0x2af   : > { %v12369_v48 = vadd.f32 %v1720_v47, %v1559_v18  ;;  %v1722_v49 = vpop.f32.mrb[13].mxu1 }
 0x2b0   : > { %v12371_v51 = vadd.f32 %v1722_v49, %v1561_v19 }
 0x2b1   : > { %v1589_v52 = vpop.f32.mrb[22].mxu0 }
 0x2b2   : > { %v1591_v53 = vpop.f32.mrb[23].mxu0  ;;  %v1726_v54 = vpop.f32.mrb[14].mxu1 }
 0x2b3   : > { %v12373_v55 = vadd.f32 %v1726_v54, %v1565_v24  ;;  %v1728_v56 = vpop.f32.mrb[15].mxu1 }
 0x2b4   : > { %v12375_v57 = vadd.f32 %v1728_v56, %v1567_v25 }
 0x2b5   : > { %v1595_v60 = vpop.f32.mrb[24].mxu0 }
 0x2b6   : > { %v1597_v61 = vpop.f32.mrb[25].mxu0  ;;  %v1732_v62 = vpop.f32.mrb[16].mxu1 }
 0x2b7   : > { %v12377_v63 = vadd.f32 %v1732_v62, %v1571_v31  ;;  %v1734_v0 = vpop.f32.mrb[17].mxu1 }
 0x2b8   : > { %v12379_v1 = vadd.f32 %v1734_v0, %v1573_v32 }
 0x2b9   : > { %v1601_v5 = vpop.f32.mrb[26].mxu0 }
 0x2ba   : > { %v1603_v34 = vpop.f32.mrb[27].mxu0  ;;  %v1738_v58 = vpop.f32.mrb[18].mxu1 }
 0x2bb   : > { %v12381_v29 = vadd.f32 %v1738_v58, %v1577_v38  ;;  %v1740_v42 = vpop.f32.mrb[19].mxu1 }
 0x2bc   : > { %v12383_v50 = vadd.f32 %v1740_v42, %v1579_v39 }
 0x2bd   : > { %v12385_v59 = vpop.f32.mrb[28].mxu0 }
 0x2be   : > { %v12387_v2 = vpop.f32.mrb[29].mxu0  ;;  %v1744_v3 = vpop.f32.mrb[20].mxu1 }
 0x2bf   : > { %v12389_v4 = vadd.f32 %v1744_v3, %v1583_v45  ;;  %v1746_v7 = vpop.f32.mrb[21].mxu1 }
 0x2c0   : > { %v12391_v8 = vadd.f32 %v1746_v7, %v1585_v46 }
 0x2c1   : > { %v12393_v9 = vpop.f32.mrb[30].mxu0 }
 0x2c2   : > { %v12395_v11 = vpop.f32.mrb[31].mxu0  ;;  %v1750_v13 = vpop.f32.mrb[22].mxu1 }
 0x2c3   : > { %v12397_v14 = vadd.f32 %v1750_v13, %v1589_v52  ;;  %v1752_v15 = vpop.f32.mrb[23].mxu1 }
 0x2c4   : > { %v12399_v16 = vadd.f32 %v1752_v15, %v1591_v53 }
 0x2c5   : > { %v1845_v18 = vpop.f32.mrb[32].mxu0 }
 0x2c6   : > { %v1846_v19 = vadd.f32 %v1845_v18, %v12345_v10  ;;  %v1847_v20 = vpop.f32.mrb[33].mxu0 }
 0x2c7   : > { %v1848_v22 = vadd.f32 %v1847_v20, %v12347_v12 }
 0x2c8   : > { %1940 = vst [vmem:[#allocation13] sm:$0xff] %v1846_v19 }
 0x2c9   : > { %1941 = vst [vmem:[#allocation13 + $0x8] sm:$0xff] %v1848_v22  ;;  %v1851_v24 = vpop.f32.mrb[34].mxu0 }
 0x2ca   : > { %v1852_v25 = vadd.f32 %v1851_v24, %v12349_v6  ;;  %v1853_v26 = vpop.f32.mrb[35].mxu0 }
 0x2cb   : > { %v1854_v28 = vadd.f32 %v1853_v26, %v12351_v17 }
 0x2cc   : > { %1942 = vst [vmem:[#allocation13 + $0x10] sm:$0xff] %v1852_v25 }
 0x2cd   : > { %1943 = vst [vmem:[#allocation13 + $0x18] sm:$0xff] %v1854_v28  ;;  %v1857_v31 = vpop.f32.mrb[36].mxu0 }
 0x2ce   : > { %v1858_v32 = vadd.f32 %v1857_v31, %v12353_v21  ;;  %v1859_v33 = vpop.f32.mrb[37].mxu0 }
 0x2cf   : > { %v1860_v36 = vadd.f32 %v1859_v33, %v12355_v23 }
 0x2d0   : > { %1944 = vst [vmem:[#allocation13 + $0x20] sm:$0xff] %v1858_v32 }
 0x2d1   : > { %1945 = vst [vmem:[#allocation13 + $0x28] sm:$0xff] %v1860_v36  ;;  %v1863_v10 = vpop.f32.mrb[38].mxu0 }
 0x2d2   : > { %v1864_v12 = vadd.f32 %v1863_v10, %v12357_v27  ;;  %v1865_v38 = vpop.f32.mrb[39].mxu0 }
 0x2d3   : > { %v1866_v39 = vadd.f32 %v1865_v38, %v12359_v30 }
 0x2d4   : > { %1946 = vst [vmem:[#allocation13 + $0x30] sm:$0xff] %v1864_v12 }
 0x2d5   : > { %1947 = vst [vmem:[#allocation13 + $0x38] sm:$0xff] %v1866_v39  ;;  %v1869_v6 = vpop.f32.mrb[40].mxu0 }
 0x2d6   : > { %v1870_v17 = vadd.f32 %v1869_v6, %v12361_v35  ;;  %v1871_v40 = vpop.f32.mrb[41].mxu0 }
 0x2d7   : > { %v1872_v43 = vadd.f32 %v1871_v40, %v12363_v37  ;;  %v1917_v21 = vpop.f32.mrb[24].mxu1 }
 0x2d8   : > { %1948 = vst [vmem:[#allocation13 + $0x40] sm:$0xff] %v1870_v17  ;;  %v9767_v45 = vadd.f32 %v1917_v21, %v1595_v60  ;;  %v1919_v23 = vpop.f32.mrb[25].mxu1 }
 0x2d9   : > { %1949 = vst [vmem:[#allocation13 + $0x48] sm:$0xff] %v1872_v43  ;;  %v9768_v46 = vadd.f32 %v1919_v23, %v1597_v61  ;;  %v1875_v47 = vpop.f32.mrb[42].mxu0 }
 0x2da   : > { %1964 = vst [vmem:[#allocation13 + $0xc0] sm:$0xff] %v9767_v45  ;;  %v1876_v27 = vadd.f32 %v1875_v47, %v12365_v41  ;;  %v1877_v49 = vpop.f32.mrb[43].mxu0 }
 0x2db   : > { %1965 = vst [vmem:[#allocation13 + $0xc8] sm:$0xff] %v9768_v46  ;;  %v1878_v30 = vadd.f32 %v1877_v49, %v12367_v44  ;;  %v1923_v52 = vpop.f32.mrb[26].mxu1 }
 0x2dc   : > { %1950 = vst [vmem:[#allocation13 + $0x50] sm:$0xff] %v1876_v27  ;;  %v9769_v35 = vadd.f32 %v1923_v52, %v1601_v5  ;;  %v1925_v53 = vpop.f32.mrb[27].mxu1 }
 0x2dd   : > { %1951 = vst [vmem:[#allocation13 + $0x58] sm:$0xff] %v1878_v30  ;;  %v9770_v37 = vadd.f32 %v1925_v53, %v1603_v34  ;;  %v1881_v54 = vpop.f32.mrb[44].mxu0 }
 0x2de   : > { %1966 = vst [vmem:[#allocation13 + $0xd0] sm:$0xff] %v9769_v35  ;;  %v1882_v56 = vadd.f32 %v1881_v54, %v12369_v48  ;;  %v1883_v60 = vpop.f32.mrb[45].mxu0 }
 0x2df   : > { %1967 = vst [vmem:[#allocation13 + $0xd8] sm:$0xff] %v9770_v37  ;;  %v1884_v61 = vadd.f32 %v1883_v60, %v12371_v51  ;;  %v1929_v62 = vpop.f32.mrb[28].mxu1 }
 0x2e0   : > { %1952 = vst [vmem:[#allocation13 + $0x60] sm:$0xff] %v1882_v56  ;;  %v9771_v41 = vadd.f32 %v1929_v62, %v12385_v59  ;;  %v1931_v0 = vpop.f32.mrb[29].mxu1 }
 0x2e1   : > { %1953 = vst [vmem:[#allocation13 + $0x68] sm:$0xff] %v1884_v61  ;;  %v9772_v44 = vadd.f32 %v1931_v0, %v12387_v2  ;;  %v1887_v5 = vpop.f32.mrb[46].mxu0 }
 0x2e2   : > { %1968 = vst [vmem:[#allocation13 + $0xe0] sm:$0xff] %v9771_v41  ;;  %v1888_v34 = vadd.f32 %v1887_v5, %v12373_v55  ;;  %v1889_v58 = vpop.f32.mrb[47].mxu0 }
 0x2e3   : > { %1969 = vst [vmem:[#allocation13 + $0xe8] sm:$0xff] %v9772_v44  ;;  %v1890_v48 = vadd.f32 %v1889_v58, %v12375_v57  ;;  %v1935_v42 = vpop.f32.mrb[30].mxu1 }
 0x2e4   : > { %1954 = vst [vmem:[#allocation13 + $0x70] sm:$0xff] %v1888_v34  ;;  %v9773_v51 = vadd.f32 %v1935_v42, %v12393_v9  ;;  %v1937_v3 = vpop.f32.mrb[31].mxu1 }
 0x2e5   : > { %1955 = vst [vmem:[#allocation13 + $0x78] sm:$0xff] %v1890_v48  ;;  %v9774_v59 = vadd.f32 %v1937_v3, %v12395_v11  ;;  %v1893_v7 = vpop.f32.mrb[48].mxu0 }
 0x2e6   : > { %1970 = vst [vmem:[#allocation13 + $0xf0] sm:$0xff] %v9773_v51  ;;  %v1894_v2 = vadd.f32 %v1893_v7, %v12377_v63  ;;  %v1895_v13 = vpop.f32.mrb[49].mxu0 }
 0x2e7   : > { %1971 = vst [vmem:[#allocation13 + $0xf8] sm:$0xff] %v9774_v59  ;;  %v1896_v55 = vadd.f32 %v1895_v13, %v12379_v1 }
 0x2e8   : > { %1956 = vst [vmem:[#allocation13 + $0x80] sm:$0xff] %v1894_v2 }
 0x2e9   : > { %1957 = vst [vmem:[#allocation13 + $0x88] sm:$0xff] %v1896_v55  ;;  %v1899_v15 = vpop.f32.mrb[50].mxu0 }
 0x2ea   : > { %v1900_v57 = vadd.f32 %v1899_v15, %v12381_v29  ;;  %v1901_v18 = vpop.f32.mrb[51].mxu0 }
 0x2eb   : > { %v1902_v9 = vadd.f32 %v1901_v18, %v12383_v50 }
 0x2ec   : > { %1958 = vst [vmem:[#allocation13 + $0x90] sm:$0xff] %v1900_v57 }
 0x2ed   : > { %1959 = vst [vmem:[#allocation13 + $0x98] sm:$0xff] %v1902_v9  ;;  %v1905_v19 = vpop.f32.mrb[52].mxu0 }
 0x2ee   : > { %v1906_v11 = vadd.f32 %v1905_v19, %v12389_v4  ;;  %v1907_v20 = vpop.f32.mrb[53].mxu0 }
 0x2ef   : > { %v1908_v63 = vadd.f32 %v1907_v20, %v12391_v8 }
 0x2f0   : > { %1960 = vst [vmem:[#allocation13 + $0xa0] sm:$0xff] %v1906_v11 }
 0x2f1   : > { %1961 = vst [vmem:[#allocation13 + $0xa8] sm:$0xff] %v1908_v63  ;;  %v1911_v22 = vpop.f32.mrb[54].mxu0 }
 0x2f2   : > { %v1912_v1 = vadd.f32 %v1911_v22, %v12397_v14  ;;  %v1913_v24 = vpop.f32.mrb[55].mxu0 }
 0x2f3   : > { %v1914_v25 = vadd.f32 %v1913_v24, %v12399_v16 }
 0x2f4   : > { %1962 = vst [vmem:[#allocation13 + $0xb0] sm:$0xff] %v1912_v1 }
 0x2f5   : > { %1963 = vst [vmem:[#allocation13 + $0xb8] sm:$0xff] %v1914_v25 }
 0x2f6 PF: > { %v12429_v29 = vld [vmem:[#allocation13] sm:$0xff]  ;;  %v12431_v50 = vld [vmem:[#allocation13 + $0x8] sm:$0xff]  ;;  %v12439_v28 = vld [vmem:[#allocation13 + $0x10] sm:$0xff]  ;;  %p9371_p11 = scmp.eq.s32.totalorder %s11377_s1, 1 }
 0x2f7   : > { %v12433_v26 = vld [vmem:[#allocation13 + $0x20] sm:$0xff]  ;;  %v2006_v4 = vadd.f32 %v12431_v50, %v12429_v29  ;;  %v12437_v8 = vld [vmem:[#allocation13 + $0x28] sm:$0xff]  ;;  %v12441_v14 = vld [vmem:[#allocation13 + $0x18] sm:$0xff] }
 0x2f8   : > { %v2012_v16 = vadd.f32 %v12437_v8, %v12433_v26  ;;  %v12445_v31 = vld [vmem:[#allocation13 + $0x30] sm:$0xff]  ;;  %v12447_v32 = vld [vmem:[#allocation13 + $0x38] sm:$0xff]  ;;  %v2009_v33 = vadd.f32 %v12441_v14, %v12439_v28  ;;  %v12453_v10 = vld [vmem:[#allocation13 + $0x40] sm:$0xff] }
 0x2f9   : > { %2007 = vadd.xlane.f32.xlu0 %v2006_v4  ;;  %v2015_v36 = vadd.f32 %v12447_v32, %v12445_v31  ;;  %v12455_v12 = vld [vmem:[#allocation13 + $0x48] sm:$0xff]  ;;  %v12457_v38 = vld [vmem:[#allocation13 + $0x50] sm:$0xff]  ;;  %v12459_v39 = vld [vmem:[#allocation13 + $0x58] sm:$0xff] }
 0x2fa   : > { %2013 = vadd.xlane.f32.xlu1 %v2012_v16  ;;  %v2018_v6 = vadd.f32 %v12455_v12, %v12453_v10  ;;  %v2021_v17 = vadd.f32 %v12459_v39, %v12457_v38  ;;  %v12465_v40 = vld [vmem:[#allocation13 + $0x60] sm:$0xff]  ;;  %v12467_v43 = vld [vmem:[#allocation13 + $0x68] sm:$0xff]  ;;  %v12469_v21 = vld [vmem:[#allocation13 + $0x70] sm:$0xff] }
 0x2fb   : > { %v12471_v45 = vld [vmem:[#allocation13 + $0x78] sm:$0xff]  ;;  %v12473_v23 = vld [vmem:[#allocation13 + $0x80] sm:$0xff]  ;;  %v12475_v46 = vld [vmem:[#allocation13 + $0x88] sm:$0xff]  ;;  %v2024_v47 = vadd.f32 %v12467_v43, %v12465_v40 }
 0x2fc   : > { %v12479_v27 = vld [vmem:[#allocation13 + $0x90] sm:$0xff]  ;;  %v12481_v49 = vld [vmem:[#allocation13 + $0x98] sm:$0xff]  ;;  %v2027_v30 = vadd.f32 %v12471_v45, %v12469_v21  ;;  %v12485_v52 = vld [vmem:[#allocation13 + $0xa0] sm:$0xff]  ;;  %v2030_v53 = vadd.f32 %v12475_v46, %v12473_v23 }
 0x2fd   : > { %2010 = vadd.xlane.f32.xlu0 %v2009_v33  ;;  %v12487_v35 = vld [vmem:[#allocation13 + $0xa8] sm:$0xff]  ;;  %v12491_v37 = vld [vmem:[#allocation13 + $0xb0] sm:$0xff]  ;;  %v12493_v54 = vld [vmem:[#allocation13 + $0xb8] sm:$0xff]  ;;  %v2033_v56 = vadd.f32 %v12481_v49, %v12479_v27 }
 0x2fe   : > { %2016 = vadd.xlane.f32.xlu1 %v2015_v36  ;;  %v12497_v60 = vld [vmem:[#allocation13 + $0xc0] sm:$0xff]  ;;  %v12499_v61 = vld [vmem:[#allocation13 + $0xc8] sm:$0xff]  ;;  %v2036_v62 = vadd.f32 %v12487_v35, %v12485_v52  ;;  %v12503_v41 = vld [vmem:[#allocation13 + $0xd0] sm:$0xff]  ;;  %v2039_v44 = vadd.f32 %v12493_v54, %v12491_v37 }
 0x2ff   : > { %v12505_v0 = vld [vmem:[#allocation13 + $0xd8] sm:$0xff]  ;;  %v12509_v5 = vld [vmem:[#allocation13 + $0xe0] sm:$0xff]  ;;  %v12511_v34 = vld [vmem:[#allocation13 + $0xe8] sm:$0xff]  ;;  %v2042_v58 = vadd.f32 %v12499_v61, %v12497_v60 }
 0x300   : > { %v12515_v48 = vld [vmem:[#allocation13 + $0xf0] sm:$0xff]  ;;  %v12517_v42 = vld [vmem:[#allocation13 + $0xf8] sm:$0xff]  ;;  %v2045_v51 = vadd.f32 %v12505_v0, %v12503_v41  ;;  %v2048_v3 = vadd.f32 %v12511_v34, %v12509_v5 }
 0x301   : > { %2019 = vadd.xlane.f32.xlu0 %v2018_v6  ;;  %v2051_v59 = vadd.f32 %v12517_v42, %v12515_v48  ;;  %v10048_v7 = vld [vmem:[%s11728_s13 + $0x4] ss:$16 sps:$4 sm:$0xff]   ;;  %v10050_v2 = vld [vmem:[%s11728_s13] ss:$16 sps:$4 sm:$0xff]  }
 0x302   : > { %2022 = vadd.xlane.f32.xlu1 %v2021_v17  ;;  %v10051_v13 = vld [vmem:[%s11728_s13 + $0x24] ss:$16 sps:$4 sm:$0xff]   ;;  %2771 = vmatprep.subr.bf16.mxu0 %v10048_v7  ;;  %v10053_v55 = vld [vmem:[%s11728_s13 + $0x20] ss:$16 sps:$4 sm:$0xff]  }
 0x303   : > { %2772 = vmatpush1.bf16.msra.mxu0 %v10050_v2  ;;  %v10054_v15 = vld [vmem:[%s11728_s13 + $0x44] ss:$16 sps:$4 sm:$0xff]   ;;  %v10056_v57 = vld [vmem:[%s11728_s13 + $0x40] ss:$16 sps:$4 sm:$0xff]  }
 0x304   : > { %2773 = vmatprep.subr.bf16.mxu0 %v10051_v13  ;;  %v10057_v18 = vld [vmem:[%s11728_s13 + $0x64] ss:$16 sps:$4 sm:$0xff]   ;;  %v10059_v9 = vld [vmem:[%s11728_s13 + $0x60] ss:$16 sps:$4 sm:$0xff]  }
 0x305   : > { %2025 = vadd.xlane.f32.xlu0 %v2024_v47  ;;  %v10060_v19 = vld [vmem:[%s11728_s13 + $0x84] ss:$16 sps:$4 sm:$0xff]   ;;  %v10062_v11 = vld [vmem:[%s11728_s13 + $0x80] ss:$16 sps:$4 sm:$0xff]  }
 0x306   : > { %2028 = vadd.xlane.f32.xlu1 %v2027_v30  ;;  %v10063_v20 = vld [vmem:[%s11728_s13 + $0xa4] ss:$16 sps:$4 sm:$0xff]   ;;  %v10065_v63 = vld [vmem:[%s11728_s13 + $0xa0] ss:$16 sps:$4 sm:$0xff]  }
 0x307   : > { %2774 = vmatpush1.bf16.msra.mxu0 %v10053_v55  ;;  %v10066_v22 = vld [vmem:[%s11728_s13 + $0xc4] ss:$16 sps:$4 sm:$0xff]   ;;  %v10068_v1 = vld [vmem:[%s11728_s13 + $0xc0] ss:$16 sps:$4 sm:$0xff]  }
 0x308   : > { %2775 = vmatprep.subr.bf16.mxu0 %v10054_v15  ;;  %v10069_v24 = vld [vmem:[%s11728_s13 + $0xe4] ss:$16 sps:$4 sm:$0xff]   ;;  %v10071_v25 = vld [vmem:[%s11728_s13 + $0xe0] ss:$16 sps:$4 sm:$0xff]  }
 0x309   : > { %2031 = vadd.xlane.f32.xlu0 %v2030_v53  ;;  %v10072_v4 = vld [vmem:[%s11728_s13 + $0x104] ss:$16 sps:$4 sm:$0xff]   ;;  %v10074_v16 = vld [vmem:[%s11728_s13 + $0x100] ss:$16 sps:$4 sm:$0xff]  }
 0x30a   : > { %2034 = vadd.xlane.f32.xlu1 %v2033_v56 }
 0x30b   : > { %2776 = vmatpush1.bf16.msra.mxu0 %v10056_v57 }
 0x30c   : > { %2777 = vmatprep.subr.bf16.mxu0 %v10057_v18 }
 0x30d   : > { %2037 = vadd.xlane.f32.xlu0 %v2036_v62 }
 0x30e   : > { %2040 = vadd.xlane.f32.xlu1 %v2039_v44 }
 0x30f   : > { %2778 = vmatpush1.bf16.msra.mxu0 %v10059_v9 }
 0x310   : > { %2779 = vmatprep.subr.bf16.mxu0 %v10060_v19 }
 0x311   : > { %2043 = vadd.xlane.f32.xlu0 %v2042_v58 }
 0x312   : > { %2046 = vadd.xlane.f32.xlu1 %v2045_v51 }
 0x313   : > { %2780 = vmatpush1.bf16.msra.mxu0 %v10062_v11 }
 0x314   : > { %2781 = vmatprep.subr.bf16.mxu0 %v10063_v20 }
 0x315   : > { %2049 = vadd.xlane.f32.xlu0 %v2048_v3 }
 0x316   : > { %2052 = vadd.xlane.f32.xlu1 %v2051_v59 }
 0x317   : > { %2782 = vmatpush1.bf16.msra.mxu0 %v10065_v63 }
 0x318   : > { %2783 = vmatprep.subr.bf16.mxu0 %v10066_v22 }
 0x31b   : > { %2784 = vmatpush1.bf16.msra.mxu0 %v10068_v1 }
 0x31c   : > { %2785 = vmatprep.subr.bf16.mxu0 %v10069_v24 }
 0x31f   : > { %2786 = vmatpush1.bf16.msra.mxu0 %v10071_v25 }
 0x320   : > { %2787 = vmatprep.subr.bf16.mxu0 %v10072_v4 }
 0x323   : > { %2788 = vmatpush1.bf16.msra.mxu0 %v10074_v16 }
 0x386   : > { %v2008_v33 = vpop.xlane.xlu0 %2007 }
 0x387   : > { %v2055_v36 = vmul.f32 0.00390625, %v2008_v33  ;;  %v2014_v6 = vpop.xlane.xlu1 %2013 }
 0x388   : > { %v2057_v17 = vmul.f32 0.00390625, %v2014_v6 }
 0x389   : > { %v12544_v47 = vsub.f32 %v12429_v29, %v2055_v36  ;;  %v12547_v30 = vsub.f32 %v12431_v50, %v2055_v36 }
 0x38a   : > { %v12550_v53 = vsub.f32 %v12433_v26, %v2057_v17  ;;  %v12553_v56 = vsub.f32 %v12437_v8, %v2057_v17  ;;  %v2011_v62 = vpop.xlane.xlu0 %2010 }
 0x38b   : > { %v2056_v44 = vmul.f32 0.00390625, %v2011_v62  ;;  %v2017_v58 = vpop.xlane.xlu1 %2016  ;;  %v2103_v51 = vmul.f32 %v12544_v47, %v12544_v47  ;;  %v2104_v3 = vmul.f32 %v12547_v30, %v12547_v30 }
 0x38c   : > { %v2058_v29 = vmul.f32 0.00390625, %v2017_v58  ;;  %v2107_v50 = vmul.f32 %v12550_v53, %v12550_v53  ;;  %v2108_v26 = vmul.f32 %v12553_v56, %v12553_v56 }
 0x38d   : > { %v12564_v59 = vsub.f32 %v12439_v28, %v2056_v44  ;;  %v12567_v8 = vsub.f32 %v12441_v14, %v2056_v44  ;;  %v2135_v7 = vadd.f32 %v2104_v3, %v2103_v51 }
 0x38e   : > { %v12570_v2 = vsub.f32 %v12445_v31, %v2058_v29  ;;  %v12573_v13 = vsub.f32 %v12447_v32, %v2058_v29  ;;  %v2020_v55 = vpop.xlane.xlu0 %2019  ;;  %v2141_v18 = vadd.f32 %v2108_v26, %v2107_v50 }
 0x38f   : > { %v2059_v15 = vmul.f32 0.00390625, %v2020_v55  ;;  %2136 = vadd.xlane.f32.xlu0 %v2135_v7  ;;  %v2023_v57 = vpop.xlane.xlu1 %2022  ;;  %v2105_v9 = vmul.f32 %v12564_v59, %v12564_v59  ;;  %v2106_v28 = vmul.f32 %v12567_v8, %v12567_v8 }
 0x390   : > { %v2060_v14 = vmul.f32 0.00390625, %v2023_v57  ;;  %v2109_v19 = vmul.f32 %v12570_v2, %v12570_v2  ;;  %v2110_v31 = vmul.f32 %v12573_v13, %v12573_v13 }
 0x391   : > { %v12584_v32 = vsub.f32 %v12453_v10, %v2059_v15  ;;  %v12587_v11 = vsub.f32 %v12455_v12, %v2059_v15  ;;  %v2138_v20 = vadd.f32 %v2106_v28, %v2105_v9 }
 0x392   : > { %v12590_v63 = vsub.f32 %v12457_v38, %v2060_v14  ;;  %v12593_v22 = vsub.f32 %v12459_v39, %v2060_v14  ;;  %v2026_v1 = vpop.xlane.xlu0 %2025  ;;  %v2144_v4 = vadd.f32 %v2110_v31, %v2109_v19  ;;  %v10075_v14 = vld [vmem:[%s11728_s13 + $0x124] ss:$16 sps:$4 sm:$0xff]   ;;  %v10077_v31 = vld [vmem:[%s11728_s13 + $0x120] ss:$16 sps:$4 sm:$0xff]  }
 0x393   : > { %v2061_v24 = vmul.f32 0.00390625, %v2026_v1  ;;  %2142 = vadd.xlane.f32.xlu0 %v2141_v18  ;;  %2139 = vadd.xlane.f32.xlu1 %v2138_v20  ;;  %v2029_v25 = vpop.xlane.xlu1 %2028  ;;  %v2111_v10 = vmul.f32 %v12584_v32, %v12584_v32  ;;  %v2112_v12 = vmul.f32 %v12587_v11, %v12587_v11 }
 0x394   : > { %v2062_v16 = vmul.f32 0.00390625, %v2029_v25  ;;  %v2113_v38 = vmul.f32 %v12590_v63, %v12590_v63  ;;  %v2114_v39 = vmul.f32 %v12593_v22, %v12593_v22  ;;  %2789 = vmatprep.subr.bf16.mxu0 %v10075_v14 }
 0x395   : > { %v12604_v33 = vsub.f32 %v12465_v40, %v2061_v24  ;;  %v12607_v36 = vsub.f32 %v12467_v43, %v2061_v24  ;;  %v2147_v6 = vadd.f32 %v2112_v12, %v2111_v10  ;;  %2790 = vmatpush1.bf16.msra.mxu0 %v10077_v31 }
 0x396   : > { %v12610_v17 = vsub.f32 %v12469_v21, %v2062_v16  ;;  %v12613_v62 = vsub.f32 %v12471_v45, %v2062_v16  ;;  %v2032_v44 = vpop.xlane.xlu0 %2031  ;;  %v2150_v3 = vadd.f32 %v2114_v39, %v2113_v38 }
 0x397   : > { %v2063_v58 = vmul.f32 0.00390625, %v2032_v44  ;;  %2145 = vadd.xlane.f32.xlu1 %v2144_v4  ;;  %2148 = vadd.xlane.f32.xlu0 %v2147_v6  ;;  %v2035_v51 = vpop.xlane.xlu1 %2034  ;;  %v2115_v40 = vmul.f32 %v12604_v33, %v12604_v33  ;;  %v2116_v43 = vmul.f32 %v12607_v36, %v12607_v36  ;;  %v10078_v6 = vld [vmem:[%s11728_s13 + $0x144] ss:$16 sps:$4 sm:$0xff]  }
 0x398   : > { %v2064_v29 = vmul.f32 0.00390625, %v2035_v51  ;;  %v2117_v21 = vmul.f32 %v12610_v17, %v12610_v17  ;;  %v2118_v45 = vmul.f32 %v12613_v62, %v12613_v62  ;;  %2791 = vmatprep.subr.bf16.mxu0 %v10078_v6 }
 0x399   : > { %v12624_v50 = vsub.f32 %v12473_v23, %v2063_v58  ;;  %v12627_v26 = vsub.f32 %v12475_v46, %v2063_v58  ;;  %v2153_v7 = vadd.f32 %v2116_v43, %v2115_v40 }
 0x39a   : > { %v12630_v55 = vsub.f32 %v12479_v27, %v2064_v29  ;;  %v12633_v15 = vsub.f32 %v12481_v49, %v2064_v29  ;;  %v2038_v57 = vpop.xlane.xlu0 %2037  ;;  %v2156_v28 = vadd.f32 %v2118_v45, %v2117_v21 }
 0x39b   : > { %v2065_v18 = vmul.f32 0.00390625, %v2038_v57  ;;  %2151 = vadd.xlane.f32.xlu1 %v2150_v3  ;;  %2154 = vadd.xlane.f32.xlu0 %v2153_v7  ;;  %v2041_v9 = vpop.xlane.xlu1 %2040  ;;  %v2119_v23 = vmul.f32 %v12624_v50, %v12624_v50  ;;  %v2120_v46 = vmul.f32 %v12627_v26, %v12627_v26  ;;  %v10080_v3 = vld [vmem:[%s11728_s13 + $0x140] ss:$16 sps:$4 sm:$0xff]  }
 0x39c   : > { %v2066_v19 = vmul.f32 0.00390625, %v2041_v9  ;;  %v2121_v27 = vmul.f32 %v12630_v55, %v12630_v55  ;;  %v2122_v49 = vmul.f32 %v12633_v15, %v12633_v15  ;;  %2792 = vmatpush1.bf16.msra.mxu0 %v10080_v3  ;;  %v2264_v3 = vlaneseq }
 0x39d   : > { %v12646_v20 = vsub.f32 %v12485_v52, %v2065_v18  ;;  %v12649_v1 = vsub.f32 %v12487_v35, %v2065_v18  ;;  %v2159_v24 = vadd.f32 %v2120_v46, %v2119_v23  ;;  %v10081_v18 = vld [vmem:[%s11728_s13 + $0x164] ss:$16 sps:$4 sm:$0xff]   ;;  %v10083_v46 = vld [vmem:[%s11728_s13 + $0x160] ss:$16 sps:$4 sm:$0xff]  }
 0x39e   : > { %v12652_v25 = vsub.f32 %v12491_v37, %v2066_v19  ;;  %v12655_v4 = vsub.f32 %v12493_v54, %v2066_v19  ;;  %v2044_v10 = vpop.xlane.xlu0 %2043  ;;  %v2162_v16 = vadd.f32 %v2122_v49, %v2121_v27  ;;  %2793 = vmatprep.subr.bf16.mxu0 %v10081_v18 }
 0x39f   : > { %v2067_v12 = vmul.f32 0.00390625, %v2044_v10  ;;  %2157 = vadd.xlane.f32.xlu1 %v2156_v28  ;;  %2160 = vadd.xlane.f32.xlu0 %v2159_v24  ;;  %v2047_v52 = vpop.xlane.xlu1 %2046  ;;  %v2123_v35 = vmul.f32 %v12646_v20, %v12646_v20  ;;  %v2124_v38 = vmul.f32 %v12649_v1, %v12649_v1  ;;  %v10086_v24 = vld [vmem:[%s11728_s13 + $0x180] ss:$16 sps:$4 sm:$0xff]  }
 0x3a0   : > { %v2068_v39 = vmul.f32 0.00390625, %v2047_v52  ;;  %v2125_v37 = vmul.f32 %v12652_v25, %v12652_v25  ;;  %v2126_v54 = vmul.f32 %v12655_v4, %v12655_v4  ;;  %2794 = vmatpush1.bf16.msra.mxu0 %v10083_v46  ;;  %v10089_v52 = vld [vmem:[%s11728_s13 + $0x1a0] ss:$16 sps:$4 sm:$0xff]  }
 0x3a1   : > { %v12667_v44 = vsub.f32 %v12497_v60, %v2067_v12  ;;  %v12670_v58 = vsub.f32 %v12499_v61, %v2067_v12  ;;  %v2165_v51 = vadd.f32 %v2124_v38, %v2123_v35  ;;  %v10087_v12 = vld [vmem:[%s11728_s13 + $0x1a4] ss:$16 sps:$4 sm:$0xff]   ;;  %v10092_v35 = vld [vmem:[%s11728_s13 + $0x1c0] ss:$16 sps:$4 sm:$0xff]  }
 0x3a2   : > { %v12674_v40 = vsub.f32 %v12503_v41, %v2068_v39  ;;  %v12677_v43 = vsub.f32 %v12505_v0, %v2068_v39  ;;  %v2050_v29 = vpop.xlane.xlu0 %2049  ;;  %v2168_v45 = vadd.f32 %v2126_v54, %v2125_v37  ;;  %v10093_v38 = vld [vmem:[%s11728_s13 + $0x1e4] ss:$16 sps:$4 sm:$0xff]   ;;  %v10095_v39 = vld [vmem:[%s11728_s13 + $0x1e0] ss:$16 sps:$4 sm:$0xff]   ;;  %v10098_v37 = vld [vmem:[%s11728_s13 + $0xc] ss:$16 sps:$4 sm:$0xff]  }
 0x3a3   : > { %v2069_v21 = vmul.f32 0.00390625, %v2050_v29  ;;  %2163 = vadd.xlane.f32.xlu1 %v2162_v16  ;;  %2166 = vadd.xlane.f32.xlu0 %v2165_v51  ;;  %v2053_v60 = vpop.xlane.xlu1 %2052  ;;  %v2127_v61 = vmul.f32 %v12667_v44, %v12667_v44  ;;  %v2128_v7 = vmul.f32 %v12670_v58, %v12670_v58  ;;  %v10090_v16 = vld [vmem:[%s11728_s13 + $0x1c4] ss:$16 sps:$4 sm:$0xff]  }
 0x3a4   : > { %v2070_v57 = vmul.f32 0.00390625, %v2053_v60  ;;  %v2129_v41 = vmul.f32 %v12674_v40, %v12674_v40  ;;  %v2130_v0 = vmul.f32 %v12677_v43, %v12677_v43 }
 0x3a5   : > { %v12689_v9 = vsub.f32 %v12509_v5, %v2069_v21  ;;  %v12692_v28 = vsub.f32 %v12511_v34, %v2069_v21  ;;  %v2171_v23 = vadd.f32 %v2128_v7, %v2127_v61 }
 0x3a6   : > { %v12696_v14 = vsub.f32 %v12515_v48, %v2070_v57  ;;  %v12699_v19 = vsub.f32 %v12517_v42, %v2070_v57  ;;  %v2174_v27 = vadd.f32 %v2130_v0, %v2129_v41  ;;  %v10084_v42 = vld [vmem:[%s11728_s13 + $0x184] ss:$16 sps:$4 sm:$0xff]   ;;  %v12718_v57 = vshrl.u32 %v2264_v3, 7 }
 0x3a7   : > { %2169 = vadd.xlane.f32.xlu1 %v2168_v45  ;;  %2172 = vadd.xlane.f32.xlu0 %v2171_v23  ;;  %v2131_v5 = vmul.f32 %v12689_v9, %v12689_v9  ;;  %v2132_v34 = vmul.f32 %v12692_v28, %v12692_v28 }
 0x3a8   : > { %v2133_v49 = vmul.f32 %v12696_v14, %v12696_v14  ;;  %v2134_v48 = vmul.f32 %v12699_v19, %v12699_v19  ;;  %2795 = vmatprep.subr.bf16.mxu0 %v10084_v42  ;;  %v2004_v42 = vld [vmem:[%s11690_s28] sm:$0x3] }
 0x3a9   : > { %v2177_v31 = vadd.f32 %v2132_v34, %v2131_v5  ;;  %2796 = vmatpush1.bf16.msra.mxu0 %v10086_v24  ;;  %v12721_v5 = vsub.s32 0, %v12718_v57  ;;  %v12724_v34 = vsub.s32 1, %v12718_v57 }
 0x3aa   : > { %v2180_v10 = vadd.f32 %v2134_v48, %v2133_v49  ;;  %2797 = vmatprep.subr.bf16.mxu0 %v10087_v12 }
 0x3ab   : > { %2175 = vadd.xlane.f32.xlu1 %v2174_v27  ;;  %2178 = vadd.xlane.f32.xlu0 %v2177_v31  ;;  %17072 = vst [vmem:[#allocation21_spill] sm:$0xff] %v12721_v5  ;;  %17073 = vst [vmem:[#allocation22_spill] sm:$0xff] %v12724_v34 }
 0x3ad   : > { %2798 = vmatpush1.bf16.msra.mxu0 %v10089_v52  ;;  %v2005_v52 = vld [vmem:[%s11726_s22] sm:$0x3] }
 0x3ae   : > { %2799 = vmatprep.subr.bf16.mxu0 %v10090_v16  ;;  %v12729_v16 = vrot.slane %v2004_v42, %v12721_v5  ;;  %v12737_v3 = vrot.slane %v2005_v52, %v12721_v5 }
 0x3af   : > { %2181 = vadd.xlane.f32.xlu1 %v2180_v10 }
 0x3b1   : > { %2800 = vmatpush1.bf16.msra.mxu0 %v10092_v35  ;;  %v12732_v35 = vrot.slane %v2004_v42, %v12724_v34 }
 0x3b2   : > { %2801 = vmatprep.subr.bf16.mxu0 %v10093_v38 }
 0x3b5   : > { %2802 = vmatpush1.bf16.msra.mxu0 %v10095_v39 }
 0x3b6   : > { %2884 = vmatprep.subr.bf16.mxu0 %v10098_v37 }
 0x41c   : > { %v2137_v54 = vpop.xlane.xlu0 %2136 }
 0x41d   : > { %v2183_v6 = vmul.f32 0.00390625, %v2137_v54 }
 0x41f   : > { %v2199_v51 = vadd.f32 1e-05, %v2183_v6 }
 0x420   : > { %v2140_v29 = vpop.xlane.xlu1 %2139  ;;  %v2143_v21 = vpop.xlane.xlu0 %2142 }
 0x421   : > { %10384 = vrsqrt.f32 %v2199_v51  ;;  %v2184_v60 = vmul.f32 0.00390625, %v2140_v29  ;;  %v2185_v45 = vmul.f32 0.00390625, %v2143_v21 }
 0x423   : > { %v2200_v61 = vadd.f32 1e-05, %v2184_v60  ;;  %v2201_v7 = vadd.f32 1e-05, %v2185_v45  ;;  %v12741_v45 = vrot.slane %v2005_v52, %v12724_v34 }
 0x424   : > { %v2146_v41 = vpop.xlane.xlu1 %2145  ;;  %v2149_v0 = vpop.xlane.xlu0 %2148 }
 0x425   : > { %10386 = vrsqrt.f32 %v2200_v61  ;;  %v2186_v18 = vmul.f32 0.00390625, %v2146_v41  ;;  %v2187_v23 = vmul.f32 0.00390625, %v2149_v0 }
 0x426   : > { %10388 = vrsqrt.f32 %v2201_v7 }
 0x427   : > { %v2202_v46 = vadd.f32 1e-05, %v2186_v18  ;;  %v2203_v27 = vadd.f32 1e-05, %v2187_v23 }
 0x428   : > { %v2152_v49 = vpop.xlane.xlu1 %2151  ;;  %v2155_v48 = vpop.xlane.xlu0 %2154 }
 0x429   : > { %10390 = vrsqrt.f32 %v2202_v46  ;;  %v2188_v31 = vmul.f32 0.00390625, %v2152_v49  ;;  %v2189_v24 = vmul.f32 0.00390625, %v2155_v48 }
 0x42a   : > { %10392 = vrsqrt.f32 %v2203_v27 }
 0x42b   : > { %v10385_v10 = vpop.eup %10384  ;;  %v2204_v12 = vadd.f32 1e-05, %v2188_v31  ;;  %v2205_v38 = vadd.f32 1e-05, %v2189_v24 }
 0x42c   : > { %v2158_v39 = vpop.xlane.xlu1 %2157  ;;  %v2232_v37 = vmul.f32 %v10385_v10, %v12547_v30  ;;  %v2231_v54 = vmul.f32 %v10385_v10, %v12544_v47  ;;  %v2161_v51 = vpop.xlane.xlu0 %2160 }
 0x42d   : > { %10394 = vrsqrt.f32 %v2204_v12  ;;  %v2190_v6 = vmul.f32 0.00390625, %v2158_v39  ;;  %v2191_v0 = vmul.f32 0.00390625, %v2161_v51  ;;  %v10096_v51 = vld [vmem:[%s11728_s13 + $0x8] ss:$16 sps:$4 sm:$0xff]  }
 0x42e   : > { %v2275_v60 = vmul.f32 %v12732_v35, %v2232_v37  ;;  %v2274_v61 = vmul.f32 %v12729_v16, %v2231_v54  ;;  %10396 = vrsqrt.f32 %v2205_v38 }
 0x42f   : > { %v10387_v29 = vpop.eup %10386  ;;  %v2206_v21 = vadd.f32 1e-05, %v2190_v6  ;;  %v2207_v38 = vadd.f32 1e-05, %v2191_v0 }
 0x430   : > { %v10389_v7 = vpop.eup %10388  ;;  %v2164_v30 = vpop.xlane.xlu1 %2163  ;;  %v2234_v47 = vmul.f32 %v10387_v29, %v12567_v8  ;;  %v2233_v41 = vmul.f32 %v10387_v29, %v12564_v59  ;;  %v2318_v42 = vadd.f32 %v12741_v45, %v2275_v60  ;;  %v2317_v31 = vadd.f32 %v12737_v3, %v2274_v61  ;;  %v10101_v61 = vld [vmem:[%s11728_s13 + $0x2c] ss:$16 sps:$4 sm:$0xff]  }
 0x431   : > { %10398 = vrsqrt.f32 %v2206_v21  ;;  %v2192_v18 = vmul.f32 0.00390625, %v2164_v30  ;;  %v2236_v23 = vmul.f32 %v10389_v7, %v12553_v56  ;;  %v2235_v39 = vmul.f32 %v10389_v7, %v12550_v53  ;;  %v2167_v37 = vpop.xlane.xlu0 %2166 }
 0x432   : > { %v2277_v46 = vmul.f32 %v12732_v35, %v2234_v47  ;;  %v2276_v27 = vmul.f32 %v12729_v16, %v2233_v41  ;;  %v2193_v47 = vmul.f32 0.00390625, %v2167_v37 }
 0x433   : > { %v10391_v49 = vpop.eup %10390  ;;  %v2208_v48 = vadd.f32 1e-05, %v2192_v18  ;;  %v2279_v8 = vmul.f32 %v12732_v35, %v2236_v23  ;;  %v2278_v41 = vmul.f32 %v12729_v16, %v2235_v39  ;;  %v10099_v23 = vld [vmem:[%s11728_s13 + $0x28] ss:$16 sps:$4 sm:$0xff]  }
 0x434   : > { %v2170_v24 = vpop.xlane.xlu1 %2169  ;;  %v2320_v59 = vadd.f32 %v12741_v45, %v2277_v46  ;;  %v2319_v10 = vadd.f32 %v12737_v3, %v2276_v27  ;;  %v2238_v56 = vmul.f32 %v10391_v49, %v12573_v13  ;;  %v2237_v12 = vmul.f32 %v10391_v49, %v12570_v2  ;;  %v10393_v52 = vpop.eup %10392 }
 0x435   : > { %10400 = vrsqrt.f32 %v2208_v48  ;;  %v2194_v60 = vmul.f32 0.00390625, %v2170_v24  ;;  %v2322_v2 = vadd.f32 %v12741_v45, %v2279_v8  ;;  %v2240_v7 = vmul.f32 %v10393_v52, %v12587_v11 }
 0x436   : > { %v12757_v54 = vpack.c.bf16 %v2320_v59, %v2318_v42  ;;  %v12759_v6 = vpack.c.bf16 %v2319_v10, %v2317_v31  ;;  %v2281_v29 = vmul.f32 %v12732_v35, %v2238_v56  ;;  %v2280_v13 = vmul.f32 %v12729_v16, %v2237_v12  ;;  %v2173_v56 = vpop.xlane.xlu0 %2172  ;;  %v10102_v12 = vld [vmem:[%s11728_s13 + $0x48] ss:$16 sps:$4 sm:$0xff]  }
 0x437   : > { %v10395_v21 = vpop.eup %10394  ;;  %10402 = vrsqrt.f32 %v2207_v38  ;;  %v2283_v46 = vmul.f32 %v12732_v35, %v2240_v7  ;;  %v2210_v49 = vadd.f32 1e-05, %v2194_v60  ;;  %v2209_v8 = vadd.f32 1e-05, %v2193_v47 }
 0x438   : > { %2803 = vmatprep.mubr.bf16.mxu0 %v12757_v54  ;;  %v2324_v53 = vadd.f32 %v12741_v45, %v2281_v29  ;;  %v2242_v30 = vmul.f32 %v10395_v21, %v12593_v22  ;;  %v10397_v0 = vpop.eup %10396  ;;  %v2323_v11 = vadd.f32 %v12737_v3, %v2280_v13  ;;  %v10104_v22 = vld [vmem:[%s11728_s13 + $0x4c] ss:$16 sps:$4 sm:$0xff]   ;;  %v2241_v42 = vmul.f32 %v10395_v21, %v12590_v63  ;;  %v2176_v31 = vpop.xlane.xlu1 %2175 }
 0x439   : > { %2804 = vmatmul.mubr.bf16.vlgmr.msra.gmra.mrb[0].mxu0 %v12759_v6  ;;  %v2321_v24 = vadd.f32 %v12737_v3, %v2278_v41  ;;  %v2239_v10 = vmul.f32 %v10393_v52, %v12584_v32  ;;  %v2326_v38 = vadd.f32 %v12741_v45, %v2283_v46  ;;  %v2244_v39 = vmul.f32 %v10397_v0, %v12607_v36  ;;  %v10107_v29 = vld [vmem:[%s11728_s13 + $0x6c] ss:$16 sps:$4 sm:$0xff]  }
 0x43a   : > { %2885 = vmatpush1.bf16.msra.mxu0 %v10096_v51  ;;  %v12772_v18 = vpack.c.bf16 %v2324_v53, %v2322_v2  ;;  %v2285_v48 = vmul.f32 %v12732_v35, %v2242_v30  ;;  %10404 = vrsqrt.f32 %v2210_v49  ;;  %v2196_v37 = vmul.f32 0.00390625, %v2176_v31  ;;  %v10110_v30 = vld [vmem:[%s11728_s13 + $0x8c] ss:$16 sps:$4 sm:$0xff]  }
 0x43b   : > { %v10399_v27 = vpop.eup %10398  ;;  %2886 = vmatprep.subr.bf16.mxu0 %v10101_v61  ;;  %v12788_v51 = vpack.c.bf16 %v2323_v11, %v2321_v24  ;;  %v2284_v21 = vmul.f32 %v12729_v16, %v2241_v42  ;;  %10406 = vrsqrt.f32 %v2209_v8  ;;  %v2195_v61 = vmul.f32 0.00390625, %v2173_v56  ;;  %v10108_v42 = vld [vmem:[%s11728_s13 + $0x88] ss:$16 sps:$4 sm:$0xff]   ;;  %v10113_v24 = vld [vmem:[%s11728_s13 + $0xac] ss:$16 sps:$4 sm:$0xff]  }
 0x43c   : > { %2813 = vmatprep.mubr.bf16.mxu0 %v12772_v18  ;;  %v2328_v59 = vadd.f32 %v12741_v45, %v2285_v48  ;;  %v2246_v63 = vmul.f32 %v10399_v27, %v12613_v62  ;;  %v2282_v36 = vmul.f32 %v12729_v16, %v2239_v10  ;;  %v10105_v62 = vld [vmem:[%s11728_s13 + $0x68] ss:$16 sps:$4 sm:$0xff]   ;;  %v2287_v13 = vmul.f32 %v12732_v35, %v2244_v39  ;;  %v2182_v41 = vpop.xlane.xlu1 %2181  ;;  %v2179_v48 = vpop.xlane.xlu0 %2178 }
 0x43d   : > { %v2212_v53 = vadd.f32 1e-05, %v2196_v37  ;;  %v2327_v7 = vadd.f32 %v12737_v3, %v2284_v21  ;;  %v2245_v47 = vmul.f32 %v10399_v27, %v12610_v17  ;;  %v2211_v49 = vadd.f32 1e-05, %v2195_v61  ;;  %v10111_v56 = vld [vmem:[%s11728_s13 + $0xa8] ss:$16 sps:$4 sm:$0xff]  }
 0x43e   : > { %2887 = vmatpush1.bf16.msra.mxu0 %v10099_v23  ;;  %v12792_v32 = vpack.c.bf16 %v2328_v59, %v2326_v38  ;;  %v2289_v52 = vmul.f32 %v12732_v35, %v2246_v63  ;;  %v2325_v11 = vadd.f32 %v12737_v3, %v2282_v36  ;;  %v2330_v31 = vadd.f32 %v12741_v45, %v2287_v13  ;;  %v10116_v37 = vld [vmem:[%s11728_s13 + $0xcc] ss:$16 sps:$4 sm:$0xff]   ;;  %v10114_v13 = vld [vmem:[%s11728_s13 + $0xc8] ss:$16 sps:$4 sm:$0xff]  }
 0x43f   : > { %2888 = vmatprep.subr.bf16.mxu0 %v10104_v22  ;;  %v10401_v60 = vpop.eup %10400  ;;  %v2243_v22 = vmul.f32 %v10397_v0, %v12604_v33  ;;  %10408 = vrsqrt.f32 %v2212_v53  ;;  %v2198_v17 = vmul.f32 0.00390625, %v2182_v41  ;;  %v2197_v10 = vmul.f32 0.00390625, %v2179_v48 }
 0x440   : > { %v2332_v23 = vadd.f32 %v12741_v45, %v2289_v52  ;;  %v2250_v46 = vmul.f32 %v10401_v60, %v12633_v15  ;;  %v12810_v27 = vpack.c.bf16 %v2327_v7, %v2325_v11  ;;  %v2288_v15 = vmul.f32 %v12729_v16, %v2245_v47 }
 0x441   : > { %2814 = vmatmul.mubr.bf16.gmra.mrb[4].mxu0 %v12788_v51  ;;  %v10403_v2 = vpop.eup %10402  ;;  %10410 = vrsqrt.f32 %v2211_v49  ;;  %v2214_v39 = vadd.f32 1e-05, %v2198_v17  ;;  %v2213_v61 = vadd.f32 1e-05, %v2197_v10  ;;  %v10122_v49 = vld [vmem:[%s11728_s13 + $0x10c] ss:$16 sps:$4 sm:$0xff]  }
 0x442   : > { %2823 = vmatprep.mubr.bf16.mxu0 %v12792_v32  ;;  %2889 = vmatpush1.bf16.msra.mxu0 %v10102_v12  ;;  %v2248_v8 = vmul.f32 %v10403_v2, %v12627_v26  ;;  %v12814_v59 = vpack.c.bf16 %v2332_v23, %v2330_v31  ;;  %v2293_v33 = vmul.f32 %v12732_v35, %v2250_v46 }
 0x443   : > { %2890 = vmatprep.subr.bf16.mxu0 %v10107_v29  ;;  %v2286_v26 = vmul.f32 %v12729_v16, %v2243_v22  ;;  %v2331_v63 = vadd.f32 %v12737_v3, %v2288_v15  ;;  %v2249_v29 = vmul.f32 %v10401_v60, %v12630_v55  ;;  %10412 = vrsqrt.f32 %v2214_v39  ;;  %v10119_v55 = vld [vmem:[%s11728_s13 + $0xec] ss:$16 sps:$4 sm:$0xff]  }
 0x444   : > { %v10405_v0 = vpop.eup %10404  ;;  %v2291_v12 = vmul.f32 %v12732_v35, %v2248_v8  ;;  %v2336_v21 = vadd.f32 %v12741_v45, %v2293_v33  ;;  %10414 = vrsqrt.f32 %v2213_v61  ;;  %v10120_v8 = vld [vmem:[%s11728_s13 + $0x108] ss:$16 sps:$4 sm:$0xff]  }
 0x445   : > { %v10407_v38 = vpop.eup %10406  ;;  %v2254_v52 = vmul.f32 %v10405_v0, %v12655_v4  ;;  %v2329_v36 = vadd.f32 %v12737_v3, %v2286_v26  ;;  %v2292_v4 = vmul.f32 %v12729_v16, %v2249_v29  ;;  %v2253_v11 = vmul.f32 %v10405_v0, %v12652_v25  ;;  %v10125_v25 = vld [vmem:[%s11728_s13 + $0x12c] ss:$16 sps:$4 sm:$0xff]  }
 0x446   : > { %2891 = vmatpush1.bf16.msra.mxu0 %v10105_v62  ;;  %v2247_v62 = vmul.f32 %v10403_v2, %v12624_v50  ;;  %v2334_v53 = vadd.f32 %v12741_v45, %v2291_v12  ;;  %v2252_v7 = vmul.f32 %v10407_v38, %v12649_v1  ;;  %v10117_v1 = vld [vmem:[%s11728_s13 + $0xe8] ss:$16 sps:$4 sm:$0xff]   ;;  %v2251_v31 = vmul.f32 %v10407_v38, %v12646_v20  ;;  %v10128_v38 = vld [vmem:[%s11728_s13 + $0x14c] ss:$16 sps:$4 sm:$0xff]  }
 0x447   : > { %2892 = vmatprep.subr.bf16.mxu0 %v10110_v30  ;;  %v12832_v30 = vpack.c.bf16 %v2331_v63, %v2329_v36  ;;  %v2297_v47 = vmul.f32 %v12732_v35, %v2254_v52  ;;  %v2335_v46 = vadd.f32 %v12737_v3, %v2292_v4  ;;  %v2296_v33 = vmul.f32 %v12729_v16, %v2253_v11  ;;  %v10126_v52 = vld [vmem:[%s11728_s13 + $0x148] ss:$16 sps:$4 sm:$0xff]   ;;  %v10134_v4 = vld [vmem:[%s11728_s13 + $0x18c] ss:$16 sps:$4 sm:$0xff]  }
 0x448   : > { %v12836_v60 = vpack.c.bf16 %v2336_v21, %v2334_v53  ;;  %v2290_v2 = vmul.f32 %v12729_v16, %v2247_v62  ;;  %v2295_v41 = vmul.f32 %v12732_v35, %v2252_v7  ;;  %v2294_v20 = vmul.f32 %v12729_v16, %v2251_v31 }
 0x449   : > { %2824 = vmatmul.mubr.bf16.gmra.mrb[8].mxu0 %v12810_v27  ;;  %v10409_v50 = vpop.eup %10408  ;;  %v2340_v22 = vadd.f32 %v12741_v45, %v2297_v47  ;;  %v2339_v12 = vadd.f32 %v12737_v3, %v2296_v33 }
 0x44a   : > { %2833 = vmatprep.mubr.bf16.mxu0 %v12814_v59  ;;  %2893 = vmatpush1.bf16.msra.mxu0 %v10108_v42  ;;  %v2258_v48 = vmul.f32 %v10409_v50, %v12677_v43  ;;  %v2333_v42 = vadd.f32 %v12737_v3, %v2290_v2  ;;  %v2338_v17 = vadd.f32 %v12741_v45, %v2295_v41  ;;  %v10132_v41 = vld [vmem:[%s11728_s13 + $0x188] ss:$16 sps:$4 sm:$0xff]  }
 0x44b   : > { %2894 = vmatprep.subr.bf16.mxu0 %v10113_v24  ;;  %v10411_v23 = vpop.eup %10410  ;;  %v2257_v39 = vmul.f32 %v10409_v50, %v12674_v40  ;;  %v2337_v29 = vadd.f32 %v12737_v3, %v2294_v20 }
 0x44c   : > { %v2256_v24 = vmul.f32 %v10411_v23, %v12670_v58  ;;  %v12854_v15 = vpack.c.bf16 %v2335_v46, %v2333_v42  ;;  %v12858_v0 = vpack.c.bf16 %v2340_v22, %v2338_v17  ;;  %v2301_v43 = vmul.f32 %v12732_v35, %v2258_v48  ;;  %v10123_v58 = vld [vmem:[%s11728_s13 + $0x128] ss:$16 sps:$4 sm:$0xff]   ;;  %v10137_v46 = vld [vmem:[%s11728_s13 + $0x1ac] ss:$16 sps:$4 sm:$0xff]  }
 0x44d   : > { %v10413_v10 = vpop.eup %10412  ;;  %v2255_v21 = vmul.f32 %v10411_v23, %v12667_v44  ;;  %v2359_v62 = vpack.c.bf16 %v2339_v12, %v2337_v29  ;;  %v2300_v40 = vmul.f32 %v12729_v16, %v2257_v39  ;;  %v10129_v44 = vld [vmem:[%s11728_s13 + $0x168] ss:$16 sps:$4 sm:$0xff]   ;;  %v10140_v48 = vld [vmem:[%s11728_s13 + $0x1cc] ss:$16 sps:$4 sm:$0xff]  }
 0x44e   : > { %2895 = vmatpush1.bf16.msra.mxu0 %v10111_v56  ;;  %v2299_v26 = vmul.f32 %v12732_v35, %v2256_v24  ;;  %v10415_v56 = vpop.eup %10414  ;;  %v2344_v63 = vadd.f32 %v12741_v45, %v2301_v43  ;;  %v2261_v47 = vmul.f32 %v10413_v10, %v12696_v14  ;;  %v10138_v42 = vld [vmem:[%s11728_s13 + $0x1c8] ss:$16 sps:$4 sm:$0xff]  }
 0x44f   : > { %2896 = vmatprep.subr.bf16.mxu0 %v10116_v37  ;;  %v2262_v37 = vmul.f32 %v10413_v10, %v12699_v19  ;;  %v2260_v36 = vmul.f32 %v10415_v56, %v12692_v28  ;;  %v2298_v7 = vmul.f32 %v12729_v16, %v2255_v21  ;;  %v2343_v28 = vadd.f32 %v12737_v3, %v2300_v40 }
 0x450   : > { %v2342_v61 = vadd.f32 %v12741_v45, %v2299_v26 }
 0x451   : > { %2834 = vmatmul.mubr.bf16.gmra.mrb[12].mxu0 %v12832_v30  ;;  %v2305_v19 = vmul.f32 %v12732_v35, %v2262_v37  ;;  %v2341_v2 = vadd.f32 %v12737_v3, %v2298_v7 }
 0x452   : > { %2843 = vmatprep.mubr.bf16.mxu0 %v12836_v60  ;;  %2897 = vmatpush1.bf16.msra.mxu0 %v10114_v13  ;;  %v10131_v13 = vld [vmem:[%s11728_s13 + $0x16c] ss:$16 sps:$4 sm:$0xff]   ;;  %v2362_v53 = vpack.c.bf16 %v2344_v63, %v2342_v61 }
 0x453   : > { %2898 = vmatprep.subr.bf16.mxu0 %v10119_v55  ;;  %v2303_v55 = vmul.f32 %v12732_v35, %v2260_v36  ;;  %v2348_v50 = vadd.f32 %v12741_v45, %v2305_v19  ;;  %v2361_v35 = vpack.c.bf16 %v2343_v28, %v2341_v2 }
 0x455   : > { %v2346_v23 = vadd.f32 %v12741_v45, %v2303_v55 }
 0x456   : > { %2899 = vmatpush1.bf16.msra.mxu0 %v10117_v1  ;;  %v2259_v1 = vmul.f32 %v10415_v56, %v12689_v9  ;;  %v10135_v9 = vld [vmem:[%s11728_s13 + $0x1a8] ss:$16 sps:$4 sm:$0xff]  }
 0x457   : > { %2900 = vmatprep.subr.bf16.mxu0 %v10122_v49  ;;  %v2304_v49 = vmul.f32 %v12729_v16, %v2261_v47  ;;  %v2364_v14 = vpack.c.bf16 %v2348_v50, %v2346_v23 }
 0x458   : > { %v2302_v11 = vmul.f32 %v12729_v16, %v2259_v1  ;;  %v10141_v16 = vld [vmem:[%s11728_s13 + $0x1e8] ss:$16 sps:$4 sm:$0xff]  }
 0x459   : > { %2844 = vmatmul.mubr.bf16.gmra.mrb[16].mxu0 %v12854_v15  ;;  %v2347_v22 = vadd.f32 %v12737_v3, %v2304_v49 }
 0x45a   : > { %2853 = vmatprep.mubr.bf16.mxu0 %v12858_v0  ;;  %2901 = vmatpush1.bf16.msra.mxu0 %v10120_v8  ;;  %v2345_v45 = vadd.f32 %v12737_v3, %v2302_v11  ;;  %v10143_v8 = vld [vmem:[%s11728_s13 + $0x1ec] ss:$16 sps:$4 sm:$0xff]   ;;  %v12912_v3 = vld [vmem:[%s11703_s9] sm:$0xf] }
 0x45b   : > { %2902 = vmatprep.subr.bf16.mxu0 %v10125_v25 }
 0x45c   : > { %v2363_v31 = vpack.c.bf16 %v2347_v22, %v2345_v45 }
 0x45e   : > { %2903 = vmatpush1.bf16.msra.mxu0 %v10123_v58 }
 0x45f   : > { %2904 = vmatprep.subr.bf16.mxu0 %v10128_v38 }
 0x461   : > { %2854 = vmatmul.mubr.bf16.gmra.mrb[20].mxu0 %v2359_v62 }
 0x462   : > { %2863 = vmatprep.mubr.bf16.mxu0 %v2362_v53  ;;  %2905 = vmatpush1.bf16.msra.mxu0 %v10126_v52 }
 0x463   : > { %2906 = vmatprep.subr.bf16.mxu0 %v10131_v13 }
 0x466   : > { %2907 = vmatpush1.bf16.msra.mxu0 %v10129_v44 }
 0x467   : > { %2908 = vmatprep.subr.bf16.mxu0 %v10134_v4 }
 0x469   : > { %2864 = vmatmul.mubr.bf16.gmra.mrb[24].mxu0 %v2361_v35 }
 0x46a   : > { %2873 = vmatprep.mubr.bf16.mxu0 %v2364_v14  ;;  %2909 = vmatpush1.bf16.msra.mxu0 %v10132_v41 }
 0x46b   : > { %2910 = vmatprep.subr.bf16.mxu0 %v10137_v46 }
 0x46e   : > { %2911 = vmatpush1.bf16.msra.mxu0 %v10135_v9 }
 0x46f   : > { %2912 = vmatprep.subr.bf16.mxu0 %v10140_v48 }
 0x471   : > { %2874 = vmatmul.mubr.bf16.gmra.mrb[28].mxu0 %v2363_v31 }
 0x472   : > { %2913 = vmatpush1.bf16.msra.mxu0 %v10138_v42  ;;  %2916 = vmatprep.mubr.bf16.mxu0 %v12757_v54  ;;  %v12916_v54 = vrot.slane %v12912_v3, %v12721_v5 }
 0x473   : > { %2914 = vmatprep.subr.bf16.mxu0 %v10143_v8 }
 0x476   : > { %2915 = vmatpush1.bf16.msra.mxu0 %v10141_v16 }
 0x479   : > { %2917 = vmatmul.mubr.bf16.vlgmr.msra.gmra.mrb[32].mxu0 %v12759_v6 }
 0x47a   : > { %2926 = vmatprep.mubr.bf16.mxu0 %v12772_v18  ;;  %v12920_v18 = vrot.slane %v12912_v3, %v12724_v34 }
 0x481   : > { %2927 = vmatmul.mubr.bf16.gmra.mrb[36].mxu0 %v12788_v51 }
 0x482   : > { %2936 = vmatprep.mubr.bf16.mxu0 %v12792_v32 }
 0x489   : > { %2937 = vmatmul.mubr.bf16.gmra.mrb[40].mxu0 %v12810_v27 }
 0x48a   : > { %2946 = vmatprep.mubr.bf16.mxu0 %v12814_v59 }
 0x491   : > { %2947 = vmatmul.mubr.bf16.gmra.mrb[44].mxu0 %v12832_v30 }
 0x492   : > { %2956 = vmatprep.mubr.bf16.mxu0 %v12836_v60 }
 0x499   : > { %2957 = vmatmul.mubr.bf16.gmra.mrb[48].mxu0 %v12854_v15 }
 0x49a   : > { %2966 = vmatprep.mubr.bf16.mxu0 %v12858_v0 }
 0x4a1   : > { %2967 = vmatmul.mubr.bf16.gmra.mrb[52].mxu0 %v2359_v62 }
 0x4a2   : > { %2976 = vmatprep.mubr.bf16.mxu0 %v2362_v53 }
 0x4a9   : > { %2977 = vmatmul.mubr.bf16.gmra.mrb[56].mxu0 %v2361_v35 }
 0x4aa   : > { %2986 = vmatprep.mubr.bf16.mxu0 %v2364_v14 }
 0x4b1   : > { %2987 = vmatmul.mubr.bf16.gmra.mrb[60].mxu0 %v2363_v31 }
 0x50c   : > { %v2805_v6 = vpop.f32.mrb[0].mxu0 }
 0x50d   : > { %v2807_v51 = vpop.f32.mrb[1].mxu0  ;;  %v2806_v27 = vadd.f32 %v2805_v6, %v12916_v54 }
 0x50e   : > { %v2809_v32 = vpop.f32.mrb[2].mxu0  ;;  %v12925_v60 = vadd.f32 %v2807_v51, %v12920_v18 }
 0x50f   : > { %v2810_v59 = vadd.f32 %v2809_v32, %v12916_v54  ;;  %v2811_v30 = vpop.f32.mrb[3].mxu0 }
 0x510   : > { %v12928_v17 = vadd.f32 %v2811_v30, %v12920_v18 }
 0x511   : > { %v2997_v24 = vpack.c.bf16 %v2810_v59, %v2806_v27 }
 0x512   : > { %v2998_v15 = vpack.c.bf16 %v12928_v17, %v12925_v60 }
 0x513   : > { %9447 = vmatprep.mubr.bf16.mxu0 %v2997_v24 }
 0x514   : > { %v2815_v25 = vpop.f32.mrb[4].mxu0 }
 0x515   : > { %v12933_v33 = vadd.f32 %v2815_v25, %v12916_v54  ;;  %v2817_v0 = vpop.f32.mrb[5].mxu0 }
 0x516   : > { %v2819_v43 = vpop.f32.mrb[6].mxu0  ;;  %v12939_v58 = vadd.f32 %v2817_v0, %v12920_v18 }
 0x517   : > { %v12936_v10 = vadd.f32 %v2819_v43, %v12916_v54  ;;  %v2821_v20 = vpop.f32.mrb[7].mxu0 }
 0x518   : > { %v12942_v26 = vadd.f32 %v2821_v20, %v12920_v18 }
 0x519   : > { %v3001_v56 = vpack.c.bf16 %v12936_v10, %v12933_v33 }
 0x51a   : > { %v3002_v12 = vpack.c.bf16 %v12942_v26, %v12939_v58  ;;  %v3030_v58 = vld [vmem:[#allocation5 + $0x8] sm:$0xff] }
 0x51c   : > { %v2825_v38 = vpop.f32.mrb[8].mxu0 }
 0x51d   : > { %v12949_v39 = vadd.f32 %v2825_v38, %v12916_v54  ;;  %v2827_v63 = vpop.f32.mrb[9].mxu0 }
 0x51e   : > { %v2829_v37 = vpop.f32.mrb[10].mxu0  ;;  %v12955_v52 = vadd.f32 %v2827_v63, %v12920_v18 }
 0x51f   : > { %v12952_v29 = vadd.f32 %v2829_v37, %v12916_v54  ;;  %v2831_v21 = vpop.f32.mrb[11].mxu0 }
 0x520   : > { %v12958_v61 = vadd.f32 %v2831_v21, %v12920_v18 }
 0x521   : > { %v3005_v36 = vpack.c.bf16 %v12952_v29, %v12949_v39 }
 0x522   : > { %v3006_v62 = vpack.c.bf16 %v12958_v61, %v12955_v52  ;;  %v3032_v52 = vld [vmem:[#allocation5 + $0x18] sm:$0xff] }
 0x524   : > { %v2835_v13 = vpop.f32.mrb[12].mxu0 }
 0x525   : > { %v12965_v40 = vadd.f32 %v2835_v13, %v12916_v54  ;;  %v2837_v53 = vpop.f32.mrb[13].mxu0 }
 0x526   : > { %v2839_v19 = vpop.f32.mrb[14].mxu0  ;;  %v12971_v55 = vadd.f32 %v2837_v53, %v12920_v18 }
 0x527   : > { %v12968_v7 = vadd.f32 %v2839_v19, %v12916_v54  ;;  %v2841_v44 = vpop.f32.mrb[15].mxu0 }
 0x528   : > { %v12974_v28 = vadd.f32 %v2841_v44, %v12920_v18  ;;  %v16800_v44 = vsub.s32 2, %v12718_v57 }
 0x529   : > { %v3009_v4 = vpack.c.bf16 %v12968_v7, %v12965_v40 }
 0x52a   : > { %v3010_v47 = vpack.c.bf16 %v12974_v28, %v12971_v55  ;;  %v3034_v55 = vld [vmem:[#allocation5 + $0x28] sm:$0xff] }
 0x52c   : > { %v2845_v50 = vpop.f32.mrb[16].mxu0 }
 0x52d   : > { %v12981_v2 = vadd.f32 %v2845_v50, %v12916_v54  ;;  %v2847_v1 = vpop.f32.mrb[17].mxu0 }
 0x52e   : > { %v2849_v41 = vpop.f32.mrb[18].mxu0  ;;  %v12987_v46 = vadd.f32 %v2847_v1, %v12920_v18 }
 0x52f   : > { %v12984_v23 = vadd.f32 %v2849_v41, %v12916_v54  ;;  %v2851_v35 = vpop.f32.mrb[19].mxu0  ;;  %v16801_v41 = vsub.s32 3, %v12718_v57 }
 0x530   : > { %v12990_v49 = vadd.f32 %v2851_v35, %v12920_v18 }
 0x531   : > { %v3013_v14 = vpack.c.bf16 %v12984_v23, %v12981_v2 }
 0x532   : > { %v3014_v11 = vpack.c.bf16 %v12990_v49, %v12987_v46  ;;  %v3036_v46 = vld [vmem:[#allocation5 + $0x38] sm:$0xff] }
 0x534   : > { %v2855_v9 = vpop.f32.mrb[20].mxu0 }
 0x535   : > { %v12997_v22 = vadd.f32 %v2855_v9, %v12916_v54  ;;  %v2857_v48 = vpop.f32.mrb[21].mxu0 }
 0x536   : > { %v2859_v45 = vpop.f32.mrb[22].mxu0  ;;  %v13003_v8 = vadd.f32 %v2857_v48, %v12920_v18 }
 0x537   : > { %v13000_v42 = vadd.f32 %v2859_v45, %v12916_v54  ;;  %v2861_v31 = vpop.f32.mrb[23].mxu0  ;;  %v13054_v45 = vrot.slane %v12912_v3, %v16801_v41 }
 0x538   : > { %v13006_v16 = vadd.f32 %v2861_v31, %v12920_v18 }
 0x539   : > { %v3017_v6 = vpack.c.bf16 %v13000_v42, %v12997_v22 }
 0x53a   : > { %v3018_v51 = vpack.c.bf16 %v13006_v16, %v13003_v8  ;;  %v3038_v8 = vld [vmem:[#allocation5 + $0x48] sm:$0xff] }
 0x53c   : > { %v2865_v32 = vpop.f32.mrb[24].mxu0 }
 0x53d   : > { %v13013_v27 = vadd.f32 %v2865_v32, %v12916_v54  ;;  %v2867_v59 = vpop.f32.mrb[25].mxu0 }
 0x53e   : > { %v2869_v30 = vpop.f32.mrb[26].mxu0  ;;  %v13019_v0 = vadd.f32 %v2867_v59, %v12920_v18 }
 0x53f   : > { %v13016_v24 = vadd.f32 %v2869_v30, %v12916_v54  ;;  %v2871_v25 = vpop.f32.mrb[27].mxu0 }
 0x540   : > { %v13022_v43 = vadd.f32 %v2871_v25, %v12920_v18 }
 0x541   : > { %v3021_v20 = vpack.c.bf16 %v13016_v24, %v13013_v27 }
 0x542   : > { %v17074_v60 = vpack.c.bf16 %v13022_v43, %v13019_v0  ;;  %v3040_v0 = vld [vmem:[#allocation5 + $0x58] sm:$0xff] }
 0x544   : > { %v2875_v63 = vpop.f32.mrb[28].mxu0 }
 0x545   : > { %v13029_v37 = vadd.f32 %v2875_v63, %v12916_v54  ;;  %v2877_v21 = vpop.f32.mrb[29].mxu0 }
 0x546   : > { %v2879_v13 = vpop.f32.mrb[30].mxu0  ;;  %v13036_v50 = vadd.f32 %v2877_v21, %v12920_v18 }
 0x547   : > { %v13032_v53 = vadd.f32 %v2879_v13, %v12916_v54  ;;  %v2881_v19 = vpop.f32.mrb[31].mxu0  ;;  %v13049_v54 = vrot.slane %v12912_v3, %v16800_v44 }
 0x548   : > { %v13039_v1 = vadd.f32 %v2881_v19, %v12920_v18 }
 0x549   : > { %v3025_v35 = vpack.c.bf16 %v13032_v53, %v13029_v37 }
 0x54a   : > { %v17075_v17 = vpack.c.bf16 %v13039_v1, %v13036_v50  ;;  %v3042_v1 = vld [vmem:[#allocation5 + $0x68] sm:$0xff] }
 0x54c   : > { %v2918_v48 = vpop.f32.mrb[32].mxu0 }
 0x54d   : > { %v2920_v18 = vpop.f32.mrb[33].mxu0  ;;  %v2919_v32 = vadd.f32 %v2918_v48, %v13049_v54 }
 0x54e   : > { %v2922_v31 = vpop.f32.mrb[34].mxu0  ;;  %v2921_v25 = vadd.f32 %v2920_v18, %v13054_v45 }
 0x54f   : > { %v2923_v59 = vadd.f32 %v2922_v31, %v13049_v54  ;;  %v2924_v30 = vpop.f32.mrb[35].mxu0 }
 0x550   : > { %v2925_v63 = vadd.f32 %v2924_v30, %v13054_v45 }
 0x551   : > { %v2999_v21 = vpack.c.bf16 %v2923_v59, %v2919_v32 }
 0x552   : > { %v3000_v13 = vpack.c.bf16 %v2925_v63, %v2921_v25 }
 0x553   : > { %9431 = vmatprep.subr.bf16.mxu0 %v2999_v21 }
 0x554   : > { %v2928_v19 = vpop.f32.mrb[36].mxu0  ;;  %9432 = vmatpush3.bf16.xpose.msra.mxu0 %v2999_v21  ;;  %9479 = vmatprep.subr.bf16.mxu1 %v3000_v13 }
 0x555   : > { %v2930_v44 = vpop.f32.mrb[37].mxu0  ;;  %9480 = vmatpush3.bf16.msra.mxu1 %v3000_v13  ;;  %v2929_v41 = vadd.f32 %v2928_v19, %v13049_v54 }
 0x556   : > { %v2932_v3 = vpop.f32.mrb[38].mxu0  ;;  %v2931_v31 = vadd.f32 %v2930_v44, %v13054_v45 }
 0x557   : > { %v2933_v48 = vadd.f32 %v2932_v3, %v13049_v54  ;;  %v2934_v9 = vpop.f32.mrb[39].mxu0 }
 0x558   : > { %v2935_v18 = vadd.f32 %v2934_v9, %v13054_v45 }
 0x559   : > { %v3003_v38 = vpack.c.bf16 %v2933_v48, %v2929_v41 }
 0x55a   : > { %v3004_v30 = vpack.c.bf16 %v2935_v18, %v2931_v31 }
 0x55b   : > { %9433 = vmatprep.subr.bf16.mxu0 %v3003_v38 }
 0x55c   : > { %v2938_v32 = vpop.f32.mrb[40].mxu0  ;;  %9434 = vmatpush3.bf16.xpose.msra.mxu0 %v3003_v38  ;;  %9481 = vmatprep.subr.bf16.mxu1 %v3004_v30 }
 0x55d   : > { %v2940_v59 = vpop.f32.mrb[41].mxu0  ;;  %9482 = vmatpush3.bf16.msra.mxu1 %v3004_v30  ;;  %v2939_v63 = vadd.f32 %v2938_v32, %v13049_v54 }
 0x55e   : > { %v2942_v25 = vpop.f32.mrb[42].mxu0  ;;  %v2941_v19 = vadd.f32 %v2940_v59, %v13054_v45 }
 0x55f   : > { %v2943_v21 = vadd.f32 %v2942_v25, %v13049_v54  ;;  %v2944_v13 = vpop.f32.mrb[43].mxu0 }
 0x560   : > { %v2945_v44 = vadd.f32 %v2944_v13, %v13054_v45 }
 0x561   : > { %v3007_v3 = vpack.c.bf16 %v2943_v21, %v2939_v63 }
 0x562   : > { %v3008_v9 = vpack.c.bf16 %v2945_v44, %v2941_v19 }
 0x563   : > { %9435 = vmatprep.subr.bf16.mxu0 %v3007_v3 }
 0x564   : > { %v2948_v41 = vpop.f32.mrb[44].mxu0  ;;  %9436 = vmatpush3.bf16.xpose.msra.mxu0 %v3007_v3  ;;  %9483 = vmatprep.subr.bf16.mxu1 %v3008_v9 }
 0x565   : > { %v2950_v38 = vpop.f32.mrb[45].mxu0  ;;  %9484 = vmatpush3.bf16.msra.mxu1 %v3008_v9  ;;  %v2949_v31 = vadd.f32 %v2948_v41, %v13049_v54 }
 0x566   : > { %v2952_v48 = vpop.f32.mrb[46].mxu0  ;;  %v2951_v32 = vadd.f32 %v2950_v38, %v13054_v45 }
 0x567   : > { %v2953_v18 = vadd.f32 %v2952_v48, %v13049_v54  ;;  %v2954_v30 = vpop.f32.mrb[47].mxu0 }
 0x568   : > { %v2955_v59 = vadd.f32 %v2954_v30, %v13054_v45 }
 0x569   : > { %v3011_v25 = vpack.c.bf16 %v2953_v18, %v2949_v31 }
 0x56a   : > { %v3012_v13 = vpack.c.bf16 %v2955_v59, %v2951_v32 }
 0x56b   : > { %9437 = vmatprep.subr.bf16.mxu0 %v3011_v25 }
 0x56c   : > { %v2958_v63 = vpop.f32.mrb[48].mxu0  ;;  %9438 = vmatpush3.bf16.xpose.msra.mxu0 %v3011_v25  ;;  %9485 = vmatprep.subr.bf16.mxu1 %v3012_v13 }
 0x56d   : > { %v2960_v21 = vpop.f32.mrb[49].mxu0  ;;  %9486 = vmatpush3.bf16.msra.mxu1 %v3012_v13  ;;  %v2959_v44 = vadd.f32 %v2958_v63, %v13049_v54 }
 0x56e   : > { %v2962_v19 = vpop.f32.mrb[50].mxu0  ;;  %v2961_v41 = vadd.f32 %v2960_v21, %v13054_v45 }
 0x56f   : > { %v2963_v3 = vadd.f32 %v2962_v19, %v13049_v54  ;;  %v2964_v9 = vpop.f32.mrb[51].mxu0 }
 0x570   : > { %v2965_v38 = vadd.f32 %v2964_v9, %v13054_v45 }
 0x571   : > { %v3015_v48 = vpack.c.bf16 %v2963_v3, %v2959_v44 }
 0x572   : > { %v3016_v30 = vpack.c.bf16 %v2965_v38, %v2961_v41 }
 0x573   : > { %9439 = vmatprep.subr.bf16.mxu0 %v3015_v48 }
 0x574   : > { %v2968_v31 = vpop.f32.mrb[52].mxu0  ;;  %9440 = vmatpush3.bf16.xpose.msra.mxu0 %v3015_v48  ;;  %9487 = vmatprep.subr.bf16.mxu1 %v3016_v30 }
 0x575   : > { %v2970_v18 = vpop.f32.mrb[53].mxu0  ;;  %9488 = vmatpush3.bf16.msra.mxu1 %v3016_v30  ;;  %v2969_v59 = vadd.f32 %v2968_v31, %v13049_v54 }
 0x576   : > { %v2972_v32 = vpop.f32.mrb[54].mxu0  ;;  %v2971_v63 = vadd.f32 %v2970_v18, %v13054_v45 }
 0x577   : > { %v2973_v25 = vadd.f32 %v2972_v32, %v13049_v54  ;;  %v2974_v13 = vpop.f32.mrb[55].mxu0 }
 0x578   : > { %v2975_v21 = vadd.f32 %v2974_v13, %v13054_v45 }
 0x579   : > { %v3019_v19 = vpack.c.bf16 %v2973_v25, %v2969_v59 }
 0x57a   : > { %v3020_v9 = vpack.c.bf16 %v2975_v21, %v2971_v63 }
 0x57b   : > { %9441 = vmatprep.subr.bf16.mxu0 %v3019_v19 }
 0x57c   : > { %v2978_v44 = vpop.f32.mrb[56].mxu0  ;;  %9442 = vmatpush3.bf16.xpose.msra.mxu0 %v3019_v19  ;;  %9489 = vmatprep.subr.bf16.mxu1 %v3020_v9 }
 0x57d   : > { %v2980_v3 = vpop.f32.mrb[57].mxu0  ;;  %9490 = vmatpush3.bf16.msra.mxu1 %v3020_v9  ;;  %v2979_v38 = vadd.f32 %v2978_v44, %v13049_v54 }
 0x57e   : > { %v2982_v41 = vpop.f32.mrb[58].mxu0  ;;  %v2981_v31 = vadd.f32 %v2980_v3, %v13054_v45 }
 0x57f   : > { %v2983_v48 = vadd.f32 %v2982_v41, %v13049_v54  ;;  %v2984_v30 = vpop.f32.mrb[59].mxu0 }
 0x580   : > { %v2985_v18 = vadd.f32 %v2984_v30, %v13054_v45 }
 0x581   : > { %v3023_v32 = vpack.c.bf16 %v2983_v48, %v2979_v38 }
 0x582   : > { %v3024_v13 = vpack.c.bf16 %v2985_v18, %v2981_v31  ;;  %v3044_v31 = vld [vmem:[#allocation5 + $0x78] sm:$0xff] }
 0x583   : > { %9443 = vmatprep.subr.bf16.mxu0 %v3023_v32 }
 0x584   : > { %v2988_v59 = vpop.f32.mrb[60].mxu0  ;;  %9444 = vmatpush3.bf16.xpose.msra.mxu0 %v3023_v32  ;;  %9491 = vmatprep.subr.bf16.mxu1 %v3024_v13  ;;  %v3045_v32 = vld [vmem:[#allocation5 + $0x80] sm:$0xff] }
 0x585   : > { %v2990_v25 = vpop.f32.mrb[61].mxu0  ;;  %9492 = vmatpush3.bf16.msra.mxu1 %v3024_v13  ;;  %v2989_v21 = vadd.f32 %v2988_v59, %v13049_v54 }
 0x586   : > { %v2992_v63 = vpop.f32.mrb[62].mxu0  ;;  %v2991_v44 = vadd.f32 %v2990_v25, %v13054_v45 }
 0x587   : > { %v2993_v19 = vadd.f32 %v2992_v63, %v13049_v54  ;;  %v2994_v9 = vpop.f32.mrb[63].mxu0  ;;  %v3046_v63 = vld [vmem:[#allocation5 + $0x88] sm:$0xff] }
 0x588   : > { %v2995_v3 = vadd.f32 %v2994_v9, %v13054_v45  ;;  %v3043_v45 = vld [vmem:[#allocation5 + $0x70] sm:$0xff] }
 0x589   : > { %v3027_v41 = vpack.c.bf16 %v2993_v19, %v2989_v21  ;;  %v3047_v9 = vld [vmem:[#allocation5 + $0x90] sm:$0xff] }
 0x58a   : > { %v3028_v30 = vpack.c.bf16 %v2995_v3, %v2991_v44 }
 0x58b   : > { %9445 = vmatprep.subr.bf16.mxu0 %v3027_v41 }
 0x58c   : > { %9446 = vmatpush3.bf16.xpose.msra.mxu0 %v3027_v41  ;;  %9493 = vmatprep.subr.bf16.mxu1 %v3028_v30  ;;  %v3048_v41 = vld [vmem:[#allocation5 + $0x98] sm:$0xff] }
 0x58d   : > { %9494 = vmatpush3.bf16.msra.mxu1 %v3028_v30 }
 0x593   : > { %9448 = vmatmul.mubr.bf16.vlgmr.msra.gmra.mrb[64].mxu0 %v3001_v56 }
 0x594   : > { %9451 = vmatprep.mubr.bf16.mxu0 %v3005_v36  ;;  %v3033_v36 = vld [vmem:[#allocation5 + $0x20] sm:$0xff] }
 0x59b   : > { %9452 = vmatmul.mubr.bf16.gmra.mrb[68].mxu0 %v3009_v4 }
 0x59c   : > { %9455 = vmatprep.mubr.bf16.mxu0 %v3013_v14  ;;  %v3037_v14 = vld [vmem:[#allocation5 + $0x40] sm:$0xff] }
 0x5a3   : > { %9456 = vmatmul.mubr.bf16.gmra.mrb[72].mxu0 %v3017_v6 }
 0x5a4   : > { %9459 = vmatprep.mubr.bf16.mxu0 %v3021_v20  ;;  %v3041_v20 = vld [vmem:[#allocation5 + $0x60] sm:$0xff] }
 0x5ab   : > { %9460 = vmatmul.mubr.bf16.gmra.mrb[76].mxu0 %v3025_v35 }
 0x5ac   : > { %9463 = vmatprep.mubr.bf16.mxu0 %v2998_v15  ;;  %v3029_v15 = vld [vmem:[#allocation5] sm:$0xff] }
 0x5b3   : > { %9464 = vmatmul.mubr.bf16.gmra.mrb[80].mxu0 %v3002_v12  ;;  %v3031_v12 = vld [vmem:[#allocation5 + $0x10] sm:$0xff] }
 0x5b4   : > { %9467 = vmatprep.mubr.bf16.mxu0 %v3006_v62 }
 0x5bb   : > { %9468 = vmatmul.mubr.bf16.gmra.mrb[84].mxu0 %v3010_v47  ;;  %v3035_v47 = vld [vmem:[#allocation5 + $0x30] sm:$0xff] }
 0x5bc   : > { %9471 = vmatprep.mubr.bf16.mxu0 %v3014_v11 }
 0x5c3   : > { %9472 = vmatmul.mubr.bf16.gmra.mrb[88].mxu0 %v3018_v51  ;;  %v3039_v51 = vld [vmem:[#allocation5 + $0x50] sm:$0xff] }
 0x5c4   : > { %9475 = vmatprep.mubr.bf16.mxu0 %v17074_v60  ;;  %v3049_v60 = vld [vmem:[#allocation5 + $0xa0] sm:$0xff] }
 0x5cb   : > { %9476 = vmatmul.mubr.bf16.gmra.mrb[92].mxu0 %v17075_v17 }
 0x666   : > { %v9449_v33 = vpop.f32.mrb[64].mxu0 }
 0x667   : > { %v3095_v10 = vpop.f32.mrb[65].mxu0  ;;  %v13138_v61 = vadd.f32 %v9449_v33, %v3031_v12  ;;  %v3051_v12 = vld [vmem:[#allocation5 + $0xb0] sm:$0xff] }
 0x668   : > { %v13133_v26 = vadd.f32 %v3095_v10, %v3029_v15  ;;  %v9450_v56 = vpop.f32.mrb[66].mxu0  ;;  %v3050_v10 = vld [vmem:[#allocation5 + $0xa8] sm:$0xff] }
 0x669   : > { %v3098_v39 = vpop.f32.mrb[67].mxu0  ;;  %v13141_v62 = vadd.f32 %v9450_v56, %v3032_v52 }
 0x66a   : > { %v13135_v29 = vadd.f32 %v3098_v39, %v3030_v58  ;;  %3222 = vmax.xlane.f32.xlu0 %v13133_v26 }
 0x66c   : > { %3224 = vmax.xlane.f32.xlu1 %v13135_v29 }
 0x66e   : > { %v9453_v40 = vpop.f32.mrb[68].mxu0  ;;  %3226 = vmax.xlane.f32.xlu0 %v13138_v61 }
 0x66f   : > { %v3111_v7 = vpop.f32.mrb[69].mxu0  ;;  %v13150_v49 = vadd.f32 %v9453_v40, %v3035_v47 }
 0x670   : > { %v13144_v28 = vadd.f32 %v3111_v7, %v3033_v36  ;;  %v9454_v4 = vpop.f32.mrb[70].mxu0  ;;  %3228 = vmax.xlane.f32.xlu1 %v13141_v62  ;;  %v3052_v36 = vld [vmem:[#allocation5 + $0xb8] sm:$0xff]  ;;  %v3053_v7 = vld [vmem:[#allocation5 + $0xc0] sm:$0xff] }
 0x671   : > { %v3114_v2 = vpop.f32.mrb[71].mxu0  ;;  %v13153_v11 = vadd.f32 %v9454_v4, %v3036_v46 }
 0x672   : > { %v13147_v23 = vadd.f32 %v3114_v2, %v3034_v55  ;;  %3230 = vmax.xlane.f32.xlu0 %v13144_v28  ;;  %v3054_v2 = vld [vmem:[#allocation5 + $0xc8] sm:$0xff] }
 0x674   : > { %3232 = vmax.xlane.f32.xlu1 %v13147_v23 }
 0x676   : > { %v9457_v22 = vpop.f32.mrb[72].mxu0  ;;  %3234 = vmax.xlane.f32.xlu0 %v13150_v49 }
 0x677   : > { %v3127_v42 = vpop.f32.mrb[73].mxu0  ;;  %v13162_v43 = vadd.f32 %v9457_v22, %v3039_v51  ;;  %v3055_v22 = vld [vmem:[#allocation5 + $0xd0] sm:$0xff] }
 0x678   : > { %v13156_v16 = vadd.f32 %v3127_v42, %v3037_v14  ;;  %v9458_v6 = vpop.f32.mrb[74].mxu0  ;;  %3236 = vmax.xlane.f32.xlu1 %v13153_v11 }
 0x679   : > { %v3130_v27 = vpop.f32.mrb[75].mxu0  ;;  %v13165_v37 = vadd.f32 %v9458_v6, %v3040_v0  ;;  %v3056_v6 = vld [vmem:[#allocation5 + $0xd8] sm:$0xff] }
 0x67a   : > { %v13159_v24 = vadd.f32 %v3130_v27, %v3038_v8  ;;  %3238 = vmax.xlane.f32.xlu0 %v13156_v16  ;;  %v3059_v27 = vld [vmem:[#allocation5 + $0xf0] sm:$0xff] }
 0x67c   : > { %3240 = vmax.xlane.f32.xlu1 %v13159_v24 }
 0x67e   : > { %3242 = vmax.xlane.f32.xlu0 %v13162_v43  ;;  %v9461_v53 = vpop.f32.mrb[76].mxu0 }
 0x67f   : > { %v3143_v50 = vpop.f32.mrb[77].mxu0  ;;  %v13174_v18 = vadd.f32 %v9461_v53, %v3043_v45  ;;  %v3060_v53 = vld [vmem:[#allocation5 + $0xf8] sm:$0xff]  ;;  %v3057_v45 = vld [vmem:[#allocation5 + $0xe0] sm:$0xff] }
 0x680   : > { %v13168_v35 = vadd.f32 %v3143_v50, %v3041_v20  ;;  %3244 = vmax.xlane.f32.xlu1 %v13165_v37  ;;  %v9462_v54 = vpop.f32.mrb[78].mxu0 }
 0x681   : > { %v3146_v38 = vpop.f32.mrb[79].mxu0  ;;  %v13177_v13 = vadd.f32 %v9462_v54, %v3044_v31 }
 0x682   : > { %v13171_v48 = vadd.f32 %v3146_v38, %v3042_v1  ;;  %3246 = vmax.xlane.f32.xlu0 %v13168_v35 }
 0x684   : > { %3248 = vmax.xlane.f32.xlu1 %v13171_v48 }
 0x686   : > { %v9465_v59 = vpop.f32.mrb[80].mxu0  ;;  %3250 = vmax.xlane.f32.xlu0 %v13174_v18 }
 0x687   : > { %v3159_v25 = vpop.f32.mrb[81].mxu0  ;;  %v13186_v30 = vadd.f32 %v9465_v59, %v3047_v9 }
 0x688   : > { %v13180_v21 = vadd.f32 %v3159_v25, %v3045_v32  ;;  %v9466_v19 = vpop.f32.mrb[82].mxu0  ;;  %3252 = vmax.xlane.f32.xlu1 %v13177_v13  ;;  %v3058_v32 = vld [vmem:[#allocation5 + $0xe8] sm:$0xff] }
 0x689   : > { %v3162_v44 = vpop.f32.mrb[83].mxu0  ;;  %v13189_v17 = vadd.f32 %v9466_v19, %v3048_v41 }
 0x68a   : > { %v13183_v3 = vadd.f32 %v3162_v44, %v3046_v63  ;;  %3254 = vmax.xlane.f32.xlu0 %v13180_v21 }
 0x68c   : > { %3256 = vmax.xlane.f32.xlu1 %v13183_v3 }
 0x68e   : > { %v9469_v15 = vpop.f32.mrb[84].mxu0  ;;  %3258 = vmax.xlane.f32.xlu0 %v13186_v30 }
 0x68f   : > { %v3175_v33 = vpop.f32.mrb[85].mxu0  ;;  %v13198_v40 = vadd.f32 %v9469_v15, %v3051_v12 }
 0x690   : > { %v13192_v58 = vadd.f32 %v3175_v33, %v3049_v60  ;;  %v9470_v56 = vpop.f32.mrb[86].mxu0  ;;  %3260 = vmax.xlane.f32.xlu1 %v13189_v17 }
 0x691   : > { %v3178_v39 = vpop.f32.mrb[87].mxu0  ;;  %v13201_v55 = vadd.f32 %v9470_v56, %v3052_v36 }
 0x692   : > { %v13195_v52 = vadd.f32 %v3178_v39, %v3050_v10  ;;  %3262 = vmax.xlane.f32.xlu0 %v13192_v58 }
 0x694   : > { %3264 = vmax.xlane.f32.xlu1 %v13195_v52 }
 0x696   : > { %v9473_v4 = vpop.f32.mrb[88].mxu0  ;;  %3266 = vmax.xlane.f32.xlu0 %v13198_v40 }
 0x697   : > { %v3191_v47 = vpop.f32.mrb[89].mxu0  ;;  %v13210_v51 = vadd.f32 %v9473_v4, %v3055_v22 }
 0x698   : > { %v13204_v46 = vadd.f32 %v3191_v47, %v3053_v7  ;;  %v9474_v14 = vpop.f32.mrb[90].mxu0  ;;  %3268 = vmax.xlane.f32.xlu1 %v13201_v55 }
 0x699   : > { %v3194_v42 = vpop.f32.mrb[91].mxu0  ;;  %v13213_v0 = vadd.f32 %v9474_v14, %v3056_v6 }
 0x69a   : > { %v13207_v8 = vadd.f32 %v3194_v42, %v3054_v2  ;;  %3270 = vmax.xlane.f32.xlu0 %v13204_v46 }
 0x69c   : > { %3272 = vmax.xlane.f32.xlu1 %v13207_v8 }
 0x69e   : > { %v9477_v20 = vpop.f32.mrb[92].mxu0  ;;  %3274 = vmax.xlane.f32.xlu0 %v13210_v51 }
 0x69f   : > { %v13216_v50 = vadd.f32 %v9477_v20, %v3059_v27  ;;  %v3207_v1 = vpop.f32.mrb[93].mxu0 }
 0x6a0   : > { %v9478_v54 = vpop.f32.mrb[94].mxu0  ;;  %3276 = vmax.xlane.f32.xlu1 %v13213_v0  ;;  %v13222_v59 = vadd.f32 %v3207_v1, %v3057_v45 }
 0x6a1   : > { %v13219_v38 = vadd.f32 %v9478_v54, %v3060_v53  ;;  %v3210_v31 = vpop.f32.mrb[95].mxu0 }
 0x6a2   : > { %3282 = vmax.xlane.f32.xlu0 %v13216_v50  ;;  %v13225_v25 = vadd.f32 %v3210_v31, %v3058_v32 }
 0x6a4   : > { %3284 = vmax.xlane.f32.xlu1 %v13219_v38 }
 0x6a6   : > { %3278 = vmax.xlane.f32.xlu0 %v13222_v59 }
 0x6a8   : > { %3280 = vmax.xlane.f32.xlu1 %v13225_v25 }
 0x6f7   : > { %v3223_v63 = vpop.xlane.xlu0 %3222 }
 0x6f8   : > { %v3286_v19 = vsub.f32 %v13133_v26, %v3223_v63 }
 0x6f9   : > { %v3225_v9 = vpop.xlane.xlu1 %3224 }
 0x6fa   : > { %v3318_v44 = vmul.f32 1.442695, %v3286_v19  ;;  %v3287_v41 = vsub.f32 %v13135_v29, %v3225_v9 }
 0x6fb   : > { %v3227_v60 = vpop.xlane.xlu0 %3226 }
 0x6fc   : > { %10416 = vpow2.f32 %v3318_v44  ;;  %v3320_v15 = vmul.f32 1.442695, %v3287_v41  ;;  %v3288_v33 = vsub.f32 %v13138_v61, %v3227_v60 }
 0x6fd   : > { %v3229_v10 = vpop.xlane.xlu1 %3228 }
 0x6fe   : > { %10418 = vpow2.f32 %v3320_v15  ;;  %v3322_v56 = vmul.f32 1.442695, %v3288_v33  ;;  %v3289_v12 = vsub.f32 %v13141_v62, %v3229_v10 }
 0x6ff   : > { %v3231_v39 = vpop.xlane.xlu0 %3230 }
 0x700   : > { %10420 = vpow2.f32 %v3322_v56  ;;  %v3324_v36 = vmul.f32 1.442695, %v3289_v12  ;;  %v3290_v7 = vsub.f32 %v13144_v28, %v3231_v39 }
 0x701   : > { %v3233_v26 = vpop.xlane.xlu1 %3232 }
 0x702   : > { %10422 = vpow2.f32 %v3324_v36  ;;  %v3326_v4 = vmul.f32 1.442695, %v3290_v7  ;;  %v3291_v29 = vsub.f32 %v13147_v23, %v3233_v26 }
 0x703   : > { %v3235_v47 = vpop.xlane.xlu0 %3234 }
 0x704   : > { %10424 = vpow2.f32 %v3326_v4  ;;  %v3328_v2 = vmul.f32 1.442695, %v3291_v29  ;;  %v3292_v61 = vsub.f32 %v13150_v49, %v3235_v47 }
 0x705   : > { %v3237_v14 = vpop.xlane.xlu1 %3236 }
 0x706   : > { %v13236_v22 = vpop.eup %10416  ;;  %10426 = vpow2.f32 %v3328_v2  ;;  %v3330_v62 = vmul.f32 1.442695, %v3292_v61  ;;  %v3293_v42 = vsub.f32 %v13153_v11, %v3237_v14 }
 0x707   : > { %v3239_v6 = vpop.xlane.xlu0 %3238  ;;  %3382 = vadd.xlane.f32.xlu0 %v13236_v22 }
 0x708   : > { %v13240_v28 = vpop.eup %10418  ;;  %10428 = vpow2.f32 %v3330_v62  ;;  %v3332_v27 = vmul.f32 1.442695, %v3293_v42  ;;  %v3294_v23 = vsub.f32 %v13156_v16, %v3239_v6 }
 0x709   : > { %v3241_v20 = vpop.xlane.xlu1 %3240  ;;  %3384 = vadd.xlane.f32.xlu1 %v13240_v28 }
 0x70a   : > { %v13244_v49 = vpop.eup %10420  ;;  %10430 = vpow2.f32 %v3332_v27  ;;  %v3334_v53 = vmul.f32 1.442695, %v3294_v23  ;;  %v3295_v1 = vsub.f32 %v13159_v24, %v3241_v20 }
 0x70b   : > { %v3243_v54 = vpop.xlane.xlu0 %3242  ;;  %3386 = vadd.xlane.f32.xlu0 %v13244_v49 }
 0x70c   : > { %v13248_v11 = vpop.eup %10422  ;;  %10432 = vpow2.f32 %v3334_v53  ;;  %v3336_v45 = vmul.f32 1.442695, %v3295_v1  ;;  %v3296_v31 = vsub.f32 %v13162_v43, %v3243_v54 }
 0x70d   : > { %v3245_v32 = vpop.xlane.xlu1 %3244  ;;  %3388 = vadd.xlane.f32.xlu1 %v13248_v11 }
 0x70e   : > { %v13252_v16 = vpop.eup %10424  ;;  %10434 = vpow2.f32 %v3336_v45  ;;  %v3338_v63 = vmul.f32 1.442695, %v3296_v31  ;;  %v3297_v19 = vsub.f32 %v13165_v37, %v3245_v32 }
 0x70f   : > { %3390 = vadd.xlane.f32.xlu0 %v13252_v16  ;;  %v3247_v24 = vpop.xlane.xlu0 %3246 }
 0x710   : > { %v13256_v9 = vpop.eup %10426  ;;  %10436 = vpow2.f32 %v3338_v63  ;;  %v3340_v44 = vmul.f32 1.442695, %v3297_v19  ;;  %v3298_v41 = vsub.f32 %v13168_v35, %v3247_v24 }
 0x711   : > { %3392 = vadd.xlane.f32.xlu1 %v13256_v9  ;;  %v3249_v43 = vpop.xlane.xlu1 %3248 }
 0x712   : > { %v13260_v60 = vpop.eup %10428  ;;  %10438 = vpow2.f32 %v3340_v44  ;;  %v3342_v15 = vmul.f32 1.442695, %v3298_v41  ;;  %v3299_v33 = vsub.f32 %v13171_v48, %v3249_v43 }
 0x713   : > { %3394 = vadd.xlane.f32.xlu0 %v13260_v60  ;;  %v3251_v37 = vpop.xlane.xlu0 %3250 }
 0x714   : > { %v13264_v10 = vpop.eup %10430  ;;  %10440 = vpow2.f32 %v3342_v15  ;;  %v3344_v56 = vmul.f32 1.442695, %v3299_v33  ;;  %v3300_v12 = vsub.f32 %v13174_v18, %v3251_v37 }
 0x715   : > { %3396 = vadd.xlane.f32.xlu1 %v13264_v10  ;;  %v3253_v35 = vpop.xlane.xlu1 %3252 }
 0x716   : > { %v13268_v39 = vpop.eup %10432  ;;  %10442 = vpow2.f32 %v3344_v56  ;;  %v3346_v36 = vmul.f32 1.442695, %v3300_v12  ;;  %v3301_v7 = vsub.f32 %v13177_v13, %v3253_v35 }
 0x717   : > { %3398 = vadd.xlane.f32.xlu0 %v13268_v39  ;;  %v3255_v48 = vpop.xlane.xlu0 %3254 }
 0x718   : > { %v13272_v26 = vpop.eup %10434  ;;  %10444 = vpow2.f32 %v3346_v36  ;;  %v3348_v4 = vmul.f32 1.442695, %v3301_v7  ;;  %v3302_v29 = vsub.f32 %v13180_v21, %v3255_v48 }
 0x719   : > { %3400 = vadd.xlane.f32.xlu1 %v13272_v26  ;;  %v3257_v18 = vpop.xlane.xlu1 %3256 }
 0x71a   : > { %v13276_v47 = vpop.eup %10436  ;;  %10446 = vpow2.f32 %v3348_v4  ;;  %v3350_v2 = vmul.f32 1.442695, %v3302_v29  ;;  %v3303_v61 = vsub.f32 %v13183_v3, %v3257_v18 }
 0x71b   : > { %3402 = vadd.xlane.f32.xlu0 %v13276_v47  ;;  %v3259_v13 = vpop.xlane.xlu0 %3258 }
 0x71c   : > { %v13280_v14 = vpop.eup %10438  ;;  %10448 = vpow2.f32 %v3350_v2  ;;  %v3352_v62 = vmul.f32 1.442695, %v3303_v61  ;;  %v3304_v42 = vsub.f32 %v13186_v30, %v3259_v13 }
 0x71d   : > { %3404 = vadd.xlane.f32.xlu1 %v13280_v14  ;;  %v3261_v21 = vpop.xlane.xlu1 %3260 }
 0x71e   : > { %v13284_v6 = vpop.eup %10440  ;;  %10450 = vpow2.f32 %v3352_v62  ;;  %v3354_v27 = vmul.f32 1.442695, %v3304_v42  ;;  %v3305_v23 = vsub.f32 %v13189_v17, %v3261_v21 }
 0x71f   : > { %3406 = vadd.xlane.f32.xlu0 %v13284_v6  ;;  %v3263_v3 = vpop.xlane.xlu0 %3262 }
 0x720   : > { %v13288_v20 = vpop.eup %10442  ;;  %10452 = vpow2.f32 %v3354_v27  ;;  %v3356_v53 = vmul.f32 1.442695, %v3305_v23  ;;  %v3306_v1 = vsub.f32 %v13192_v58, %v3263_v3 }
 0x721   : > { %3408 = vadd.xlane.f32.xlu1 %v13288_v20  ;;  %v3265_v30 = vpop.xlane.xlu1 %3264 }
 0x722   : > { %v13292_v54 = vpop.eup %10444  ;;  %10454 = vpow2.f32 %v3356_v53  ;;  %v3358_v45 = vmul.f32 1.442695, %v3306_v1  ;;  %v3307_v31 = vsub.f32 %v13195_v52, %v3265_v30 }
 0x723   : > { %3410 = vadd.xlane.f32.xlu0 %v13292_v54  ;;  %v3267_v17 = vpop.xlane.xlu0 %3266 }
 0x724   : > { %v13296_v32 = vpop.eup %10446  ;;  %10456 = vpow2.f32 %v3358_v45  ;;  %v3360_v63 = vmul.f32 1.442695, %v3307_v31  ;;  %v3308_v19 = vsub.f32 %v13198_v40, %v3267_v17 }
 0x725   : > { %3412 = vadd.xlane.f32.xlu1 %v13296_v32  ;;  %v3269_v58 = vpop.xlane.xlu1 %3268 }
 0x726   : > { %v13300_v24 = vpop.eup %10448  ;;  %10458 = vpow2.f32 %v3360_v63  ;;  %v3362_v44 = vmul.f32 1.442695, %v3308_v19  ;;  %v3309_v41 = vsub.f32 %v13201_v55, %v3269_v58  ;;  %v10144_v19 = vld [vmem:[%s11730_s20] ss:$8 sps:$4 sm:$0xff]   ;;  %v10146_v58 = vld [vmem:[%s11730_s20 + $0x4] ss:$8 sps:$4 sm:$0xff]  }
 0x727   : > { %3414 = vadd.xlane.f32.xlu0 %v13300_v24  ;;  %v3271_v52 = vpop.xlane.xlu0 %3270  ;;  %3907 = vmatprep.subr.bf16.mxu0 %v10146_v58 }
 0x728   : > { %v13304_v43 = vpop.eup %10450  ;;  %10460 = vpow2.f32 %v3362_v44  ;;  %v3364_v15 = vmul.f32 1.442695, %v3309_v41  ;;  %v3310_v33 = vsub.f32 %v13204_v46, %v3271_v52  ;;  %v10149_v44 = vld [vmem:[%s11730_s20 + $0x14] ss:$8 sps:$4 sm:$0xff]   ;;  %3908 = vmatpush1.bf16.msra.mxu0 %v10144_v19  ;;  %v10147_v41 = vld [vmem:[%s11730_s20 + $0x10] ss:$8 sps:$4 sm:$0xff]  }
 0x729   : > { %3416 = vadd.xlane.f32.xlu1 %v13304_v43  ;;  %v3273_v40 = vpop.xlane.xlu1 %3272  ;;  %3909 = vmatprep.subr.bf16.mxu0 %v10149_v44  ;;  %v10152_v52 = vld [vmem:[%s11730_s20 + $0x24] ss:$8 sps:$4 sm:$0xff]  }
 0x72a   : > { %v13308_v37 = vpop.eup %10452  ;;  %10462 = vpow2.f32 %v3364_v15  ;;  %v3366_v56 = vmul.f32 1.442695, %v3310_v33  ;;  %v3311_v12 = vsub.f32 %v13207_v8, %v3273_v40  ;;  %v10150_v15 = vld [vmem:[%s11730_s20 + $0x20] ss:$8 sps:$4 sm:$0xff]   ;;  %v10155_v33 = vld [vmem:[%s11730_s20 + $0x34] ss:$8 sps:$4 sm:$0xff]  }
 0x72b   : > { %3418 = vadd.xlane.f32.xlu0 %v13308_v37  ;;  %v3275_v55 = vpop.xlane.xlu0 %3274  ;;  %v10153_v40 = vld [vmem:[%s11730_s20 + $0x30] ss:$8 sps:$4 sm:$0xff]  }
 0x72c   : > { %v13312_v35 = vpop.eup %10454  ;;  %10464 = vpow2.f32 %v3366_v56  ;;  %v3368_v36 = vmul.f32 1.442695, %v3311_v12  ;;  %v3312_v7 = vsub.f32 %v13210_v51, %v3275_v55  ;;  %3910 = vmatpush1.bf16.msra.mxu0 %v10147_v41  ;;  %v10158_v56 = vld [vmem:[%s11730_s20 + $0x44] ss:$8 sps:$4 sm:$0xff]   ;;  %v10156_v12 = vld [vmem:[%s11730_s20 + $0x40] ss:$8 sps:$4 sm:$0xff]  }
 0x72d   : > { %3420 = vadd.xlane.f32.xlu1 %v13312_v35  ;;  %v3277_v46 = vpop.xlane.xlu1 %3276  ;;  %3911 = vmatprep.subr.bf16.mxu0 %v10152_v52  ;;  %v10161_v55 = vld [vmem:[%s11730_s20 + $0x54] ss:$8 sps:$4 sm:$0xff]  }
 0x72e   : > { %v13316_v48 = vpop.eup %10456  ;;  %10466 = vpow2.f32 %v3368_v36  ;;  %v3370_v4 = vmul.f32 1.442695, %v3312_v7  ;;  %v3313_v29 = vsub.f32 %v13213_v0, %v3277_v46  ;;  %v10159_v36 = vld [vmem:[%s11730_s20 + $0x50] ss:$8 sps:$4 sm:$0xff]   ;;  %v10164_v7 = vld [vmem:[%s11730_s20 + $0x64] ss:$8 sps:$4 sm:$0xff]  }
 0x72f   : > { %3422 = vadd.xlane.f32.xlu0 %v13316_v48  ;;  %v3283_v8 = vpop.xlane.xlu0 %3282  ;;  %v10162_v46 = vld [vmem:[%s11730_s20 + $0x60] ss:$8 sps:$4 sm:$0xff]  }
 0x730   : > { %v13320_v18 = vpop.eup %10458  ;;  %10468 = vpow2.f32 %v3370_v4  ;;  %v3372_v2 = vmul.f32 1.442695, %v3313_v29  ;;  %v3316_v0 = vsub.f32 %v13216_v50, %v3283_v8  ;;  %3912 = vmatpush1.bf16.msra.mxu0 %v10150_v15 }
 0x731   : > { %3424 = vadd.xlane.f32.xlu1 %v13320_v18  ;;  %v3285_v61 = vpop.xlane.xlu1 %3284  ;;  %3913 = vmatprep.subr.bf16.mxu0 %v10155_v33 }
 0x732   : > { %v13323_v51 = vpop.eup %10460  ;;  %10470 = vpow2.f32 %v3372_v2  ;;  %v3317_v23 = vsub.f32 %v13219_v38, %v3285_v61  ;;  %v3378_v30 = vmul.f32 1.442695, %v3316_v0 }
 0x733   : > { %3426 = vadd.xlane.f32.xlu0 %v13323_v51  ;;  %v3279_v13 = vpop.xlane.xlu0 %3278 }
 0x734   : > { %v13326_v62 = vpop.eup %10462  ;;  %v3314_v42 = vsub.f32 %v13222_v59, %v3279_v13  ;;  %v3380_v59 = vmul.f32 1.442695, %v3317_v23  ;;  %3914 = vmatpush1.bf16.msra.mxu0 %v10153_v40 }
 0x735   : > { %3428 = vadd.xlane.f32.xlu1 %v13326_v62  ;;  %v3281_v21 = vpop.xlane.xlu1 %3280  ;;  %3915 = vmatprep.subr.bf16.mxu0 %v10158_v56 }
 0x736   : > { %v13331_v27 = vpop.eup %10464  ;;  %v3374_v3 = vmul.f32 1.442695, %v3314_v42  ;;  %v3315_v53 = vsub.f32 %v13225_v25, %v3281_v21 }
 0x737   : > { %3430 = vadd.xlane.f32.xlu0 %v13331_v27 }
 0x738   : > { %v13336_v1 = vpop.eup %10466  ;;  %10472 = vpow2.f32 %v3374_v3  ;;  %v3376_v45 = vmul.f32 1.442695, %v3315_v53  ;;  %3916 = vmatpush1.bf16.msra.mxu0 %v10156_v12 }
 0x739   : > { %3432 = vadd.xlane.f32.xlu1 %v13336_v1  ;;  %3917 = vmatprep.subr.bf16.mxu0 %v10161_v55 }
 0x73a   : > { %v13339_v50 = vpop.eup %10468  ;;  %10474 = vpow2.f32 %v3376_v45 }
 0x73b   : > { %3434 = vadd.xlane.f32.xlu0 %v13339_v50  ;;  %10476 = vpow2.f32 %v3378_v30 }
 0x73c   : > { %v13342_v38 = vpop.eup %10470  ;;  %10478 = vpow2.f32 %v3380_v59  ;;  %3918 = vmatpush1.bf16.msra.mxu0 %v10159_v36 }
 0x73d   : > { %3436 = vadd.xlane.f32.xlu1 %v13342_v38  ;;  %3919 = vmatprep.subr.bf16.mxu0 %v10164_v7 }
 0x740   : > { %3920 = vmatpush1.bf16.msra.mxu0 %v10162_v46 }
 0x742   : > { %v13345_v25 = vpop.eup %10472 }
 0x743   : > { %3438 = vadd.xlane.f32.xlu0 %v13345_v25 }
 0x744   : > { %v13348_v31 = vpop.eup %10474 }
 0x745   : > { %3440 = vadd.xlane.f32.xlu1 %v13348_v31  ;;  %v13351_v17 = vpop.eup %10476 }
 0x746   : > { %v13354_v63 = vpop.eup %10478 }
 0x747   : > { %3442 = vadd.xlane.f32.xlu0 %v13351_v17 }
 0x749   : > { %3444 = vadd.xlane.f32.xlu1 %v13354_v63 }
 0x794   : > { %v3383_v4 = vpop.xlane.xlu0 %3382 }
 0x795   : > { %10480 = vrcp.f32 %v3383_v4 }
 0x796   : > { %v3385_v29 = vpop.xlane.xlu1 %3384 }
 0x797   : > { %10482 = vrcp.f32 %v3385_v29 }
 0x798   : > { %v3387_v8 = vpop.xlane.xlu0 %3386 }
 0x799   : > { %10484 = vrcp.f32 %v3387_v8 }
 0x79a   : > { %v3389_v2 = vpop.xlane.xlu1 %3388 }
 0x79b   : > { %10486 = vrcp.f32 %v3389_v2 }
 0x79c   : > { %v3391_v61 = vpop.xlane.xlu0 %3390 }
 0x79d   : > { %10488 = vrcp.f32 %v3391_v61 }
 0x79e   : > { %v3393_v13 = vpop.xlane.xlu1 %3392 }
 0x79f   : > { %v10481_v0 = vpop.eup %10480  ;;  %10490 = vrcp.f32 %v3393_v13 }
 0x7a0   : > { %v3395_v42 = vpop.xlane.xlu0 %3394  ;;  %v3478_v3 = vmul.f32 %v10481_v0, %v13236_v22 }
 0x7a1   : > { %v10483_v21 = vpop.eup %10482  ;;  %10492 = vrcp.f32 %v3395_v42 }
 0x7a2   : > { %v3397_v23 = vpop.xlane.xlu1 %3396  ;;  %v3479_v53 = vmul.f32 %v10483_v21, %v13240_v28 }
 0x7a3   : > { %v10485_v30 = vpop.eup %10484  ;;  %10494 = vrcp.f32 %v3397_v23 }
 0x7a4   : > { %v3399_v45 = vpop.xlane.xlu0 %3398  ;;  %v3510_v59 = vpack.c.bf16 %v3479_v53, %v3478_v3  ;;  %v3480_v44 = vmul.f32 %v10485_v30, %v13244_v49 }
 0x7a5   : > { %v10487_v19 = vpop.eup %10486  ;;  %10496 = vrcp.f32 %v3399_v45 }
 0x7a6   : > { %v3401_v58 = vpop.xlane.xlu1 %3400  ;;  %9495 = vmatprep.mubr.bf16.mxu1 %v3510_v59  ;;  %v3481_v41 = vmul.f32 %v10487_v19, %v13248_v11 }
 0x7a7   : > { %v10489_v52 = vpop.eup %10488  ;;  %10498 = vrcp.f32 %v3401_v58 }
 0x7a8   : > { %v3403_v15 = vpop.xlane.xlu0 %3402  ;;  %v3511_v33 = vpack.c.bf16 %v3481_v41, %v3480_v44  ;;  %v3482_v28 = vmul.f32 %v10489_v52, %v13252_v16 }
 0x7a9   : > { %v10491_v40 = vpop.eup %10490  ;;  %10500 = vrcp.f32 %v3403_v15 }
 0x7aa   : > { %v3405_v22 = vpop.xlane.xlu1 %3404  ;;  %9496 = vmatmul.mubr.bf16.vlgmr.msra.gmra.mrb[0].mxu1 %v3511_v33  ;;  %v3483_v56 = vmul.f32 %v10491_v40, %v13256_v9 }
 0x7ab   : > { %v10493_v12 = vpop.eup %10492  ;;  %10502 = vrcp.f32 %v3405_v22 }
 0x7ac   : > { %v3407_v55 = vpop.xlane.xlu0 %3406  ;;  %v3512_v36 = vpack.c.bf16 %v3483_v56, %v3482_v28  ;;  %v3484_v11 = vmul.f32 %v10493_v12, %v13260_v60 }
 0x7ad   : > { %v10495_v7 = vpop.eup %10494  ;;  %10504 = vrcp.f32 %v3407_v55 }
 0x7ae   : > { %v3409_v49 = vpop.xlane.xlu1 %3408  ;;  %9499 = vmatprep.mubr.bf16.mxu1 %v3512_v36  ;;  %v3485_v46 = vmul.f32 %v10495_v7, %v13264_v10 }
 0x7af   : > { %v10497_v4 = vpop.eup %10496  ;;  %10506 = vrcp.f32 %v3409_v49 }
 0x7b0   : > { %v3411_v29 = vpop.xlane.xlu0 %3410  ;;  %v3513_v8 = vpack.c.bf16 %v3485_v46, %v3484_v11  ;;  %v3486_v9 = vmul.f32 %v10497_v4, %v13268_v39 }
 0x7b1   : > { %v10499_v2 = vpop.eup %10498  ;;  %10508 = vrcp.f32 %v3411_v29 }
 0x7b2   : > { %v3413_v16 = vpop.xlane.xlu1 %3412  ;;  %9500 = vmatmul.mubr.bf16.gmra.mrb[4].mxu1 %v3513_v8  ;;  %v3487_v61 = vmul.f32 %v10499_v2, %v13272_v26 }
 0x7b3   : > { %v10501_v13 = vpop.eup %10500  ;;  %10510 = vrcp.f32 %v3413_v16 }
 0x7b4   : > { %v3415_v0 = vpop.xlane.xlu0 %3414  ;;  %v3514_v42 = vpack.c.bf16 %v3487_v61, %v3486_v9  ;;  %v3488_v10 = vmul.f32 %v10501_v13, %v13276_v47 }
 0x7b5   : > { %v10503_v21 = vpop.eup %10502  ;;  %10512 = vrcp.f32 %v3415_v0 }
 0x7b6   : > { %v3417_v60 = vpop.xlane.xlu1 %3416  ;;  %9503 = vmatprep.mubr.bf16.mxu1 %v3514_v42  ;;  %v3489_v23 = vmul.f32 %v10503_v21, %v13280_v14 }
 0x7b7   : > { %v10505_v3 = vpop.eup %10504  ;;  %10514 = vrcp.f32 %v3417_v60 }
 0x7b8   : > { %v3419_v53 = vpop.xlane.xlu0 %3418  ;;  %v3515_v30 = vpack.c.bf16 %v3489_v23, %v3488_v10  ;;  %v3490_v26 = vmul.f32 %v10505_v3, %v13284_v6 }
 0x7b9   : > { %v10507_v45 = vpop.eup %10506  ;;  %10516 = vrcp.f32 %v3419_v53 }
 0x7ba   : > { %v3421_v39 = vpop.xlane.xlu1 %3420  ;;  %9504 = vmatmul.mubr.bf16.gmra.mrb[8].mxu1 %v3515_v30  ;;  %v3491_v59 = vmul.f32 %v10507_v45, %v13288_v20 }
 0x7bb   : > { %v10509_v19 = vpop.eup %10508  ;;  %10518 = vrcp.f32 %v3421_v39 }
 0x7bc   : > { %v3423_v58 = vpop.xlane.xlu0 %3422  ;;  %v3516_v44 = vpack.c.bf16 %v3491_v59, %v3490_v26  ;;  %v3492_v14 = vmul.f32 %v10509_v19, %v13292_v54 }
 0x7bd   : > { %v10511_v41 = vpop.eup %10510  ;;  %10520 = vrcp.f32 %v3423_v58  ;;  %v10165_v58 = vld [vmem:[%s11730_s20 + $0x70] ss:$8 sps:$4 sm:$0xff]  }
 0x7be   : > { %v3425_v47 = vpop.xlane.xlu1 %3424  ;;  %9507 = vmatprep.mubr.bf16.mxu1 %v3516_v44  ;;  %v3493_v52 = vmul.f32 %v10511_v41, %v13296_v32  ;;  %v10167_v44 = vld [vmem:[%s11730_s20 + $0x74] ss:$8 sps:$4 sm:$0xff]   ;;  %v10171_v41 = vld [vmem:[%s11730_s20 + $0x90] ss:$8 sps:$4 sm:$0xff]  }
 0x7bf   : > { %v10513_v15 = vpop.eup %10512  ;;  %10522 = vrcp.f32 %v3425_v47  ;;  %3921 = vmatprep.subr.bf16.mxu0 %v10167_v44  ;;  %v10174_v47 = vld [vmem:[%s11730_s20 + $0xa0] ss:$8 sps:$4 sm:$0xff]  }
 0x7c0   : > { %v3427_v33 = vpop.xlane.xlu0 %3426  ;;  %v3517_v40 = vpack.c.bf16 %v3493_v52, %v3492_v14  ;;  %v3494_v20 = vmul.f32 %v10513_v15, %v13300_v24  ;;  %3922 = vmatpush1.bf16.msra.mxu0 %v10165_v58  ;;  %v10177_v14 = vld [vmem:[%s11730_s20 + $0xb0] ss:$8 sps:$4 sm:$0xff]   ;;  %v10179_v52 = vld [vmem:[%s11730_s20 + $0xb4] ss:$8 sps:$4 sm:$0xff]   ;;  %v10182_v15 = vld [vmem:[%s11730_s20 + $0xc4] ss:$8 sps:$4 sm:$0xff]  }
 0x7c1   : > { %v10515_v22 = vpop.eup %10514  ;;  %10524 = vrcp.f32 %v3427_v33  ;;  %v10180_v33 = vld [vmem:[%s11730_s20 + $0xc0] ss:$8 sps:$4 sm:$0xff]  }
 0x7c2   : > { %v3429_v6 = vpop.xlane.xlu1 %3428  ;;  %9508 = vmatmul.mubr.bf16.gmra.mrb[12].mxu1 %v3517_v40  ;;  %v3495_v28 = vmul.f32 %v10515_v22, %v13304_v43  ;;  %v10183_v40 = vld [vmem:[%s11730_s20 + $0xd0] ss:$8 sps:$4 sm:$0xff]   ;;  %v10185_v22 = vld [vmem:[%s11730_s20 + $0xd4] ss:$8 sps:$4 sm:$0xff]  }
 0x7c3   : > { %v10517_v56 = vpop.eup %10516  ;;  %10526 = vrcp.f32 %v3429_v6  ;;  %v10188_v6 = vld [vmem:[%s11730_s20 + $0xe4] ss:$8 sps:$4 sm:$0xff]  }
 0x7c4   : > { %v3431_v12 = vpop.xlane.xlu0 %3430  ;;  %v3518_v55 = vpack.c.bf16 %v3495_v28, %v3494_v20  ;;  %v3496_v32 = vmul.f32 %v10517_v56, %v13308_v37  ;;  %v10186_v20 = vld [vmem:[%s11730_s20 + $0xe0] ss:$8 sps:$4 sm:$0xff]   ;;  %v10189_v28 = vld [vmem:[%s11730_s20 + $0xf0] ss:$8 sps:$4 sm:$0xff]   ;;  %v10191_v56 = vld [vmem:[%s11730_s20 + $0xf4] ss:$8 sps:$4 sm:$0xff]  }
 0x7c5   : > { %v10519_v36 = vpop.eup %10518  ;;  %10528 = vrcp.f32 %v3431_v12 }
 0x7c6   : > { %v3433_v54 = vpop.xlane.xlu1 %3432  ;;  %9511 = vmatprep.mubr.bf16.mxu1 %v3518_v55  ;;  %v3497_v7 = vmul.f32 %v10519_v36, %v13312_v35 }
 0x7c7   : > { %v10521_v49 = vpop.eup %10520  ;;  %10530 = vrcp.f32 %v3433_v54 }
 0x7c8   : > { %v3435_v11 = vpop.xlane.xlu0 %3434  ;;  %v3519_v46 = vpack.c.bf16 %v3497_v7, %v3496_v32  ;;  %v3498_v43 = vmul.f32 %v10521_v49, %v13316_v48 }
 0x7c9   : > { %v10523_v4 = vpop.eup %10522  ;;  %10532 = vrcp.f32 %v3435_v11 }
 0x7ca   : > { %v3437_v24 = vpop.xlane.xlu1 %3436  ;;  %9512 = vmatmul.mubr.bf16.gmra.mrb[16].mxu1 %v3519_v46  ;;  %v3499_v29 = vmul.f32 %v10523_v4, %v13320_v18 }
 0x7cb   : > { %v10525_v8 = vpop.eup %10524  ;;  %10534 = vrcp.f32 %v3437_v24 }
 0x7cc   : > { %v3520_v2 = vpack.c.bf16 %v3499_v29, %v3498_v43  ;;  %v3500_v37 = vmul.f32 %v10525_v8, %v13323_v51 }
 0x7cd   : > { %v10527_v16 = vpop.eup %10526 }
 0x7ce   : > { %9515 = vmatprep.mubr.bf16.mxu1 %v3520_v2  ;;  %v3501_v35 = vmul.f32 %v10527_v16, %v13326_v62 }
 0x7cf   : > { %v10529_v9 = vpop.eup %10528 }
 0x7d0   : > { %v3439_v61 = vpop.xlane.xlu0 %3438  ;;  %v3521_v13 = vpack.c.bf16 %v3501_v35, %v3500_v37  ;;  %v3502_v48 = vmul.f32 %v10529_v9, %v13331_v27 }
 0x7d1   : > { %v10531_v0 = vpop.eup %10530  ;;  %10536 = vrcp.f32 %v3439_v61 }
 0x7d2   : > { %v3441_v42 = vpop.xlane.xlu1 %3440  ;;  %9516 = vmatmul.mubr.bf16.gmra.mrb[20].mxu1 %v3521_v13  ;;  %v3503_v18 = vmul.f32 %v10531_v0, %v13336_v1 }
 0x7d3   : > { %v10533_v21 = vpop.eup %10532  ;;  %10538 = vrcp.f32 %v3441_v42 }
 0x7d4   : > { %v3443_v60 = vpop.xlane.xlu0 %3442  ;;  %v3522_v10 = vpack.c.bf16 %v3503_v18, %v3502_v48  ;;  %v3504_v62 = vmul.f32 %v10533_v21, %v13339_v50 }
 0x7d5   : > { %v10535_v23 = vpop.eup %10534  ;;  %10540 = vrcp.f32 %v3443_v60 }
 0x7d6   : > { %v3445_v51 = vpop.xlane.xlu1 %3444  ;;  %9519 = vmatprep.mubr.bf16.mxu1 %v3522_v10  ;;  %v3505_v3 = vmul.f32 %v10535_v23, %v13342_v38 }
 0x7d7   : > { %10542 = vrcp.f32 %v3445_v51 }
 0x7d8   : > { %v3523_v53 = vpack.c.bf16 %v3505_v3, %v3504_v62 }
 0x7da   : > { %9520 = vmatmul.mubr.bf16.gmra.mrb[24].mxu1 %v3523_v53 }
 0x7db   : > { %v10537_v27 = vpop.eup %10536 }
 0x7dc   : > { %v3506_v30 = vmul.f32 %v10537_v27, %v13345_v25  ;;  %v10170_v25 = vld [vmem:[%s11730_s20 + $0x84] ss:$8 sps:$4 sm:$0xff]  }
 0x7dd   : > { %v10539_v1 = vpop.eup %10538  ;;  %3923 = vmatprep.subr.bf16.mxu0 %v10170_v25 }
 0x7de   : > { %v3507_v45 = vmul.f32 %v10539_v1, %v13348_v31  ;;  %v10168_v31 = vld [vmem:[%s11730_s20 + $0x80] ss:$8 sps:$4 sm:$0xff]  }
 0x7df   : > { %v10541_v39 = vpop.eup %10540  ;;  %3924 = vmatpush1.bf16.msra.mxu0 %v10168_v31 }
 0x7e0   : > { %v3524_v26 = vpack.c.bf16 %v3507_v45, %v3506_v30  ;;  %v3508_v38 = vmul.f32 %v10541_v39, %v13351_v17  ;;  %v10173_v17 = vld [vmem:[%s11730_s20 + $0x94] ss:$8 sps:$4 sm:$0xff]  }
 0x7e1   : > { %v10543_v50 = vpop.eup %10542  ;;  %3925 = vmatprep.subr.bf16.mxu0 %v10173_v17  ;;  %v3735_v17 = vld [vmem:[%s902_s25] sm:$0x3] }
 0x7e2   : > { %9523 = vmatprep.mubr.bf16.mxu1 %v3524_v26  ;;  %v3509_v59 = vmul.f32 %v10543_v50, %v13354_v63  ;;  %v10176_v63 = vld [vmem:[%s11730_s20 + $0xa4] ss:$8 sps:$4 sm:$0xff]  }
 0x7e3   : > { %3926 = vmatpush1.bf16.msra.mxu0 %v10171_v41 }
 0x7e4   : > { %v3525_v19 = vpack.c.bf16 %v3509_v59, %v3508_v38  ;;  %3927 = vmatprep.subr.bf16.mxu0 %v10176_v63  ;;  %v13427_v63 = vrot.slane %v3735_v17, %v12721_v5 }
 0x7e6   : > { %9524 = vmatmul.mubr.bf16.gmra.mrb[28].mxu1 %v3525_v19 }
 0x7e7   : > { %3928 = vmatpush1.bf16.msra.mxu0 %v10174_v47  ;;  %v13430_v47 = vrot.slane %v3735_v17, %v12724_v34 }
 0x7e8   : > { %3929 = vmatprep.subr.bf16.mxu0 %v10179_v52 }
 0x7eb   : > { %3930 = vmatpush1.bf16.msra.mxu0 %v10177_v14 }
 0x7ec   : > { %3931 = vmatprep.subr.bf16.mxu0 %v10182_v15 }
 0x7ef   : > { %3932 = vmatpush1.bf16.msra.mxu0 %v10180_v33 }
 0x7f0   : > { %3933 = vmatprep.subr.bf16.mxu0 %v10185_v22  ;;  %v10832_v22 = vld [vmem:[#allocation13] sm:$0xff] }
 0x7f3   : > { %3934 = vmatpush1.bf16.msra.mxu0 %v10183_v40 }
 0x7f4   : > { %3935 = vmatprep.subr.bf16.mxu0 %v10188_v6 }
 0x7f7   : > { %3936 = vmatpush1.bf16.msra.mxu0 %v10186_v20 }
 0x7f8   : > { %3937 = vmatprep.subr.bf16.mxu0 %v10191_v56  ;;  %v10833_v56 = vld [vmem:[#allocation13 + $0x8] sm:$0xff] }
 0x7fb   : > { %3938 = vmatpush1.bf16.msra.mxu0 %v10189_v28 }
 0x87d   : > { %v9497_v12 = vpop.f32.mrb[0].mxu1 }
 0x87e   : > { %v3560_v55 = vpop.f32.mrb[1].mxu1 }
 0x87f   : > { %v9498_v36 = vpop.f32.mrb[2].mxu1 }
 0x880   : > { %v3689_v54 = vpack.c.bf16 %v9498_v36, %v9497_v12  ;;  %v3563_v32 = vpop.f32.mrb[3].mxu1  ;;  %v10834_v36 = vld [vmem:[#allocation13 + $0x10] sm:$0xff] }
 0x881   : > { %v3687_v7 = vpack.c.bf16 %v3563_v32, %v3560_v55  ;;  %v10835_v32 = vld [vmem:[#allocation13 + $0x18] sm:$0xff] }
 0x885   : > { %v9501_v49 = vpop.f32.mrb[4].mxu1 }
 0x886   : > { %v3576_v11 = vpop.f32.mrb[5].mxu1 }
 0x887   : > { %v9502_v46 = vpop.f32.mrb[6].mxu1 }
 0x888   : > { %v3693_v4 = vpack.c.bf16 %v9502_v46, %v9501_v49  ;;  %v3579_v24 = vpop.f32.mrb[7].mxu1 }
 0x889   : > { %v3691_v43 = vpack.c.bf16 %v3579_v24, %v3576_v11 }
 0x88d   : > { %v9505_v29 = vpop.f32.mrb[8].mxu1 }
 0x88e   : > { %v3592_v8 = vpop.f32.mrb[9].mxu1 }
 0x88f   : > { %v9506_v2 = vpop.f32.mrb[10].mxu1 }
 0x890   : > { %v3697_v16 = vpack.c.bf16 %v9506_v2, %v9505_v29  ;;  %v3595_v37 = vpop.f32.mrb[11].mxu1 }
 0x891   : > { %v3695_v35 = vpack.c.bf16 %v3595_v37, %v3592_v8  ;;  %v10836_v8 = vld [vmem:[#allocation13 + $0x20] sm:$0xff] }
 0x895   : > { %v9509_v9 = vpop.f32.mrb[12].mxu1 }
 0x896   : > { %v3608_v61 = vpop.f32.mrb[13].mxu1 }
 0x897   : > { %v9510_v13 = vpop.f32.mrb[14].mxu1 }
 0x898   : > { %v3701_v0 = vpack.c.bf16 %v9510_v13, %v9509_v9  ;;  %v3611_v42 = vpop.f32.mrb[15].mxu1  ;;  %v10838_v13 = vld [vmem:[#allocation13 + $0x30] sm:$0xff] }
 0x899   : > { %v3699_v48 = vpack.c.bf16 %v3611_v42, %v3608_v61  ;;  %v10839_v42 = vld [vmem:[#allocation13 + $0x38] sm:$0xff] }
 0x89d   : > { %v9513_v18 = vpop.f32.mrb[16].mxu1 }
 0x89e   : > { %v3624_v21 = vpop.f32.mrb[17].mxu1 }
 0x89f   : > { %v9514_v60 = vpop.f32.mrb[18].mxu1 }
 0x8a0   : > { %v3690_v10 = vpack.c.bf16 %v9514_v60, %v9513_v18  ;;  %v3627_v23 = vpop.f32.mrb[19].mxu1 }
 0x8a1   : > { %v3688_v51 = vpack.c.bf16 %v3627_v23, %v3624_v21 }
 0x8a3   : > { %3939 = vmatprep.mubr.bf16.mxu0 %v3688_v51 }
 0x8a4   : > { %3940 = vmatmul.mubr.bf16.vlgmr.msra.gmra.mrb[96].mxu0 %v3687_v7 }
 0x8a5   : > { %v9517_v62 = vpop.f32.mrb[20].mxu1  ;;  %3949 = vmatprep.mubr.bf16.mxu0 %v3690_v10 }
 0x8a6   : > { %v3640_v3 = vpop.f32.mrb[21].mxu1 }
 0x8a7   : > { %v9518_v53 = vpop.f32.mrb[22].mxu1 }
 0x8a8   : > { %v3694_v27 = vpack.c.bf16 %v9518_v53, %v9517_v62  ;;  %v3643_v1 = vpop.f32.mrb[23].mxu1 }
 0x8a9   : > { %v3692_v30 = vpack.c.bf16 %v3643_v1, %v3640_v3  ;;  %v10840_v3 = vld [vmem:[#allocation13 + $0x40] sm:$0xff] }
 0x8ac   : > { %3950 = vmatmul.mubr.bf16.gmra.mrb[100].mxu0 %v3689_v54 }
 0x8ad   : > { %v9521_v45 = vpop.f32.mrb[24].mxu1  ;;  %3959 = vmatprep.mubr.bf16.mxu0 %v3692_v30  ;;  %v10841_v30 = vld [vmem:[#allocation13 + $0x48] sm:$0xff] }
 0x8ae   : > { %v3656_v39 = vpop.f32.mrb[25].mxu1 }
 0x8af   : > { %v9522_v26 = vpop.f32.mrb[26].mxu1 }
 0x8b0   : > { %v3698_v50 = vpack.c.bf16 %v9522_v26, %v9521_v45  ;;  %v3659_v38 = vpop.f32.mrb[27].mxu1  ;;  %v10842_v26 = vld [vmem:[#allocation13 + $0x50] sm:$0xff] }
 0x8b1   : > { %v3696_v59 = vpack.c.bf16 %v3659_v38, %v3656_v39  ;;  %v10843_v38 = vld [vmem:[#allocation13 + $0x58] sm:$0xff] }
 0x8b4   : > { %3960 = vmatmul.mubr.bf16.gmra.mrb[104].mxu0 %v3691_v43 }
 0x8b5   : > { %3969 = vmatprep.mubr.bf16.mxu0 %v3694_v27 }
 0x8b9   : > { %v9525_v19 = vpop.f32.mrb[28].mxu1 }
 0x8ba   : > { %v3672_v58 = vpop.f32.mrb[29].mxu1 }
 0x8bb   : > { %v9526_v44 = vpop.f32.mrb[30].mxu1 }
 0x8bc   : > { %v3702_v25 = vpack.c.bf16 %v9526_v44, %v9525_v19  ;;  %v3675_v31 = vpop.f32.mrb[31].mxu1  ;;  %3970 = vmatmul.mubr.bf16.gmra.mrb[108].mxu0 %v3693_v4 }
 0x8bd   : > { %v3700_v41 = vpack.c.bf16 %v3675_v31, %v3672_v58  ;;  %3979 = vmatprep.mubr.bf16.mxu0 %v3696_v59 }
 0x8c4   : > { %3980 = vmatmul.mubr.bf16.gmra.mrb[112].mxu0 %v3695_v35  ;;  %v10837_v35 = vld [vmem:[#allocation13 + $0x28] sm:$0xff] }
 0x8c5   : > { %3989 = vmatprep.mubr.bf16.mxu0 %v3698_v50 }
 0x8cc   : > { %3990 = vmatmul.mubr.bf16.gmra.mrb[116].mxu0 %v3697_v16 }
 0x8cd   : > { %3999 = vmatprep.mubr.bf16.mxu0 %v3700_v41 }
 0x8d4   : > { %4000 = vmatmul.mubr.bf16.gmra.mrb[120].mxu0 %v3699_v48 }
 0x8d5   : > { %4009 = vmatprep.mubr.bf16.mxu0 %v3702_v25 }
 0x8dc   : > { %4010 = vmatmul.mubr.bf16.gmra.mrb[124].mxu0 %v3701_v0 }
 0x977   : > { %v3941_v14 = vpop.f32.mrb[96].mxu0 }
 0x978   : > { %v3942_v52 = vadd.f32 %v3941_v14, %v13427_v63  ;;  %v3943_v15 = vpop.f32.mrb[97].mxu0  ;;  %v10844_v14 = vld [vmem:[#allocation13 + $0x60] sm:$0xff] }
 0x979   : > { %v3944_v33 = vadd.f32 %v3943_v15, %v13430_v47  ;;  %v3945_v40 = vpop.f32.mrb[98].mxu0 }
 0x97a   : > { %v13434_v6 = vadd.f32 %v10832_v22, %v3942_v52  ;;  %v3946_v20 = vadd.f32 %v3945_v40, %v13427_v63  ;;  %v3947_v28 = vpop.f32.mrb[99].mxu0  ;;  %v10845_v40 = vld [vmem:[#allocation13 + $0x68] sm:$0xff] }
 0x97b   : > { %v13437_v12 = vadd.f32 %v10833_v56, %v3944_v33  ;;  %v3948_v55 = vadd.f32 %v3947_v28, %v13430_v47  ;;  %v10846_v28 = vld [vmem:[#allocation13 + $0x70] sm:$0xff] }
 0x97c   : > { %17077 = vst [vmem:[#allocation23_spill] sm:$0xff] %v13434_v6  ;;  %v13440_v54 = vadd.f32 %v10834_v36, %v3946_v20 }
 0x97d   : > { %17078 = vst [vmem:[#allocation24_spill] sm:$0xff] %v13437_v12  ;;  %v13442_v7 = vadd.f32 %v10835_v32, %v3948_v55  ;;  %v4054_v49 = vadd.f32 %v13437_v12, %v13434_v6  ;;  %v10847_v55 = vld [vmem:[#allocation13 + $0x78] sm:$0xff] }
 0x97e   : > { %17079 = vst [vmem:[#allocation25_spill] sm:$0xff] %v13440_v54 }
 0x97f   : > { %17080 = vst [vmem:[#allocation26_spill] sm:$0xff] %v13442_v7  ;;  %v3951_v11 = vpop.f32.mrb[100].mxu0  ;;  %4055 = vadd.xlane.f32.xlu0 %v4054_v49  ;;  %v4057_v46 = vadd.f32 %v13442_v7, %v13440_v54 }
 0x980   : > { %v3952_v4 = vadd.f32 %v3951_v11, %v13427_v63  ;;  %v3953_v24 = vpop.f32.mrb[101].mxu0 }
 0x981   : > { %v3954_v43 = vadd.f32 %v3953_v24, %v13430_v47  ;;  %v3955_v29 = vpop.f32.mrb[102].mxu0  ;;  %4058 = vadd.xlane.f32.xlu1 %v4057_v46 }
 0x982   : > { %v13450_v2 = vadd.f32 %v10836_v8, %v3952_v4  ;;  %v3956_v16 = vadd.f32 %v3955_v29, %v13427_v63  ;;  %v3957_v37 = vpop.f32.mrb[103].mxu0  ;;  %v10848_v29 = vld [vmem:[#allocation13 + $0x80] sm:$0xff] }
 0x983   : > { %v13453_v9 = vadd.f32 %v10837_v35, %v3954_v43  ;;  %v3958_v61 = vadd.f32 %v3957_v37, %v13430_v47  ;;  %v10849_v35 = vld [vmem:[#allocation13 + $0x88] sm:$0xff] }
 0x984   : > { %17081 = vst [vmem:[#allocation27_spill] sm:$0xff] %v13450_v2  ;;  %v13456_v0 = vadd.f32 %v10838_v13, %v3956_v16 }
 0x985   : > { %17082 = vst [vmem:[#allocation28_spill] sm:$0xff] %v13453_v9  ;;  %v13458_v48 = vadd.f32 %v10839_v42, %v3958_v61  ;;  %v4060_v18 = vadd.f32 %v13453_v9, %v13450_v2  ;;  %v10850_v42 = vld [vmem:[#allocation13 + $0x90] sm:$0xff] }
 0x986   : > { %17083 = vst [vmem:[#allocation29_spill] sm:$0xff] %v13456_v0 }
 0x987   : > { %17084 = vst [vmem:[#allocation30_spill] sm:$0xff] %v13458_v48  ;;  %4061 = vadd.xlane.f32.xlu0 %v4060_v18  ;;  %v3961_v21 = vpop.f32.mrb[104].mxu0  ;;  %v4063_v60 = vadd.f32 %v13458_v48, %v13456_v0 }
 0x988   : > { %v3962_v10 = vadd.f32 %v3961_v21, %v13427_v63  ;;  %v3963_v23 = vpop.f32.mrb[105].mxu0  ;;  %v10851_v21 = vld [vmem:[#allocation13 + $0x98] sm:$0xff] }
 0x989   : > { %v3964_v51 = vadd.f32 %v3963_v23, %v13430_v47  ;;  %4064 = vadd.xlane.f32.xlu1 %v4063_v60  ;;  %v3965_v62 = vpop.f32.mrb[106].mxu0 }
 0x98a   : > { %v13466_v53 = vadd.f32 %v10840_v3, %v3962_v10  ;;  %v3966_v27 = vadd.f32 %v3965_v62, %v13427_v63  ;;  %v3967_v1 = vpop.f32.mrb[107].mxu0 }
 0x98b   : > { %v13469_v45 = vadd.f32 %v10841_v30, %v3964_v51  ;;  %v3968_v39 = vadd.f32 %v3967_v1, %v13430_v47  ;;  %v10852_v30 = vld [vmem:[#allocation13 + $0xa0] sm:$0xff] }
 0x98c   : > { %17085 = vst [vmem:[#allocation31_spill] sm:$0xff] %v13466_v53  ;;  %v13472_v50 = vadd.f32 %v10842_v26, %v3966_v27 }
 0x98d   : > { %17086 = vst [vmem:[#allocation32_spill] sm:$0xff] %v13469_v45  ;;  %v13474_v59 = vadd.f32 %v10843_v38, %v3968_v39  ;;  %v4066_v19 = vadd.f32 %v13469_v45, %v13466_v53 }
 0x98e   : > { %17087 = vst [vmem:[#allocation33_spill] sm:$0xff] %v13472_v50 }
 0x98f   : > { %17088 = vst [vmem:[#allocation34_spill] sm:$0xff] %v13474_v59  ;;  %v3971_v58 = vpop.f32.mrb[108].mxu0  ;;  %4067 = vadd.xlane.f32.xlu0 %v4066_v19  ;;  %v4069_v44 = vadd.f32 %v13474_v59, %v13472_v50  ;;  %v10853_v19 = vld [vmem:[#allocation13 + $0xa8] sm:$0xff] }
 0x990   : > { %v3972_v25 = vadd.f32 %v3971_v58, %v13427_v63  ;;  %v3973_v31 = vpop.f32.mrb[109].mxu0 }
 0x991   : > { %v3974_v41 = vadd.f32 %v3973_v31, %v13430_v47  ;;  %v3975_v17 = vpop.f32.mrb[110].mxu0  ;;  %4070 = vadd.xlane.f32.xlu1 %v4069_v44 }
 0x992   : > { %v13482_v52 = vadd.f32 %v10844_v14, %v3972_v25  ;;  %v3976_v15 = vadd.f32 %v3975_v17, %v13427_v63  ;;  %v3977_v33 = vpop.f32.mrb[111].mxu0  ;;  %v10854_v25 = vld [vmem:[#allocation13 + $0xb0] sm:$0xff] }
 0x993   : > { %v13485_v22 = vadd.f32 %v10845_v40, %v3974_v41  ;;  %v3978_v20 = vadd.f32 %v3977_v33, %v13430_v47  ;;  %v10855_v41 = vld [vmem:[#allocation13 + $0xb8] sm:$0xff] }
 0x994   : > { %17089 = vst [vmem:[#allocation35_spill] sm:$0xff] %v13482_v52  ;;  %v13488_v56 = vadd.f32 %v10846_v28, %v3976_v15 }
 0x995   : > { %17090 = vst [vmem:[#allocation36_spill] sm:$0xff] %v13485_v22  ;;  %v13490_v36 = vadd.f32 %v10847_v55, %v3978_v20  ;;  %v4072_v32 = vadd.f32 %v13485_v22, %v13482_v52 }
 0x996   : > { %17091 = vst [vmem:[#allocation37_spill] sm:$0xff] %v13488_v56 }
 0x997   : > { %17092 = vst [vmem:[#allocation38_spill] sm:$0xff] %v13490_v36  ;;  %4073 = vadd.xlane.f32.xlu0 %v4072_v32  ;;  %v3981_v49 = vpop.f32.mrb[112].mxu0  ;;  %v4075_v11 = vadd.f32 %v13490_v36, %v13488_v56  ;;  %v10856_v32 = vld [vmem:[#allocation13 + $0xc0] sm:$0xff] }
 0x998   : > { %v3982_v46 = vadd.f32 %v3981_v49, %v13427_v63  ;;  %v3983_v4 = vpop.f32.mrb[113].mxu0 }
 0x999   : > { %v3984_v24 = vadd.f32 %v3983_v4, %v13430_v47  ;;  %4076 = vadd.xlane.f32.xlu1 %v4075_v11  ;;  %v3985_v43 = vpop.f32.mrb[114].mxu0  ;;  %v10857_v4 = vld [vmem:[#allocation13 + $0xc8] sm:$0xff] }
 0x99a   : > { %v13498_v8 = vadd.f32 %v10848_v29, %v3982_v46  ;;  %v3986_v16 = vadd.f32 %v3985_v43, %v13427_v63  ;;  %v3987_v37 = vpop.f32.mrb[115].mxu0  ;;  %v10858_v29 = vld [vmem:[#allocation13 + $0xd0] sm:$0xff] }
 0x99b   : > { %v13501_v61 = vadd.f32 %v10849_v35, %v3984_v24  ;;  %v3988_v13 = vadd.f32 %v3987_v37, %v13430_v47  ;;  %v10859_v37 = vld [vmem:[#allocation13 + $0xd8] sm:$0xff] }
 0x99c   : > { %17093 = vst [vmem:[#allocation39_spill] sm:$0xff] %v13498_v8  ;;  %v13504_v18 = vadd.f32 %v10850_v42, %v3986_v16 }
 0x99d   : > { %17094 = vst [vmem:[#allocation40_spill] sm:$0xff] %v13501_v61  ;;  %v13506_v60 = vadd.f32 %v10851_v21, %v3988_v13  ;;  %v4078_v10 = vadd.f32 %v13501_v61, %v13498_v8 }
 0x99e   : > { %17095 = vst [vmem:[#allocation41_spill] sm:$0xff] %v13504_v18 }
 0x99f   : > { %17096 = vst [vmem:[#allocation42_spill] sm:$0xff] %v13506_v60  ;;  %v3991_v23 = vpop.f32.mrb[116].mxu0  ;;  %4079 = vadd.xlane.f32.xlu0 %v4078_v10  ;;  %v4081_v51 = vadd.f32 %v13506_v60, %v13504_v18 }
 0x9a0   : > { %v3992_v62 = vadd.f32 %v3991_v23, %v13427_v63  ;;  %v3993_v3 = vpop.f32.mrb[117].mxu0 }
 0x9a1   : > { %v3994_v27 = vadd.f32 %v3993_v3, %v13430_v47  ;;  %v3995_v1 = vpop.f32.mrb[118].mxu0  ;;  %4082 = vadd.xlane.f32.xlu1 %v4081_v51  ;;  %v10860_v3 = vld [vmem:[#allocation13 + $0xe0] sm:$0xff] }
 0x9a2   : > { %v13514_v39 = vadd.f32 %v10852_v30, %v3992_v62  ;;  %v3996_v26 = vadd.f32 %v3995_v1, %v13427_v63  ;;  %v3997_v38 = vpop.f32.mrb[119].mxu0 }
 0x9a3   : > { %v13517_v58 = vadd.f32 %v10853_v19, %v3994_v27  ;;  %v3998_v44 = vadd.f32 %v3997_v38, %v13430_v47 }
 0x9a4   : > { %17097 = vst [vmem:[#allocation43_spill] sm:$0xff] %v13514_v39  ;;  %v13520_v31 = vadd.f32 %v10854_v25, %v3996_v26  ;;  %v10861_v26 = vld [vmem:[#allocation13 + $0xe8] sm:$0xff] }
 0x9a5   : > { %17098 = vst [vmem:[#allocation44_spill] sm:$0xff] %v13517_v58  ;;  %v13522_v17 = vadd.f32 %v10855_v41, %v3998_v44  ;;  %v4084_v14 = vadd.f32 %v13517_v58, %v13514_v39  ;;  %v10862_v44 = vld [vmem:[#allocation13 + $0xf0] sm:$0xff]  ;;  %v10863_v41 = vld [vmem:[#allocation13 + $0xf8] sm:$0xff] }
 0x9a6   : > { %17099 = vst [vmem:[#allocation45_spill] sm:$0xff] %v13520_v31 }
 0x9a7   : > { %17100 = vst [vmem:[#allocation46_spill] sm:$0xff] %v13522_v17  ;;  %4085 = vadd.xlane.f32.xlu0 %v4084_v14  ;;  %v4001_v15 = vpop.f32.mrb[120].mxu0  ;;  %v4087_v33 = vadd.f32 %v13522_v17, %v13520_v31 }
 0x9a8   : > { %v4002_v40 = vadd.f32 %v4001_v15, %v13427_v63  ;;  %v4003_v20 = vpop.f32.mrb[121].mxu0 }
 0x9a9   : > { %v4004_v28 = vadd.f32 %v4003_v20, %v13430_v47  ;;  %4088 = vadd.xlane.f32.xlu1 %v4087_v33  ;;  %v4005_v55 = vpop.f32.mrb[122].mxu0  ;;  %v4412_v33 = vld [vmem:[%s11732_s3] sm:$0xff] }
 0x9aa   : > { %v13530_v49 = vadd.f32 %v10856_v32, %v4002_v40  ;;  %v4006_v11 = vadd.f32 %v4005_v55, %v13427_v63  ;;  %v4007_v46 = vpop.f32.mrb[123].mxu0  ;;  %v4413_v40 = vld [vmem:[%s11732_s3 + $0x8] sm:$0xff]  ;;  %v4420_v32 = vld [vmem:[%s11732_s3 + $0x40] sm:$0xff] }
 0x9ab   : > { %v13533_v24 = vadd.f32 %v10857_v4, %v4004_v28  ;;  %v4008_v43 = vadd.f32 %v4007_v46, %v13430_v47  ;;  %v4417_v55 = vld [vmem:[%s11732_s3 + $0x28] sm:$0xff] }
 0x9ac   : > { %17101 = vst [vmem:[#allocation47_spill] sm:$0xff] %v13530_v49  ;;  %v13536_v16 = vadd.f32 %v10858_v29, %v4006_v11  ;;  %v4424_v11 = vld [vmem:[%s11732_s3 + $0x60] sm:$0xff]  ;;  %v9117_v46 = vcombine.low %v4413_v40, %v4417_v55  ;;  %v9118_v4 = vcombine.high %v4413_v40, %v4417_v55  ;;  %v4421_v29 = vld [vmem:[%s11732_s3 + $0x48] sm:$0xff] }
 0x9ad   : > { %17102 = vst [vmem:[#allocation48_spill] sm:$0xff] %v13533_v24  ;;  %v13538_v35 = vadd.f32 %v10859_v37, %v4008_v43  ;;  %v4090_v13 = vadd.f32 %v13533_v24, %v13530_v49  ;;  %v9124_v43 = vcombine.high %v4420_v32, %v4424_v11  ;;  %v4425_v37 = vld [vmem:[%s11732_s3 + $0x68] sm:$0xff]  ;;  %v4448_v40 = vld [vmem:[%s11732_s3 + $0x120] sm:$0xff] }
 0x9ae   : > { %17103 = vst [vmem:[#allocation49_spill] sm:$0xff] %v13536_v16  ;;  %5335 = vmatprep.subr.bf16.mxu0 %v9118_v4  ;;  %v4452_v4 = vld [vmem:[%s11732_s3 + $0x140] sm:$0xff] }
 0x9af   : > { %17104 = vst [vmem:[#allocation50_spill] sm:$0xff] %v13538_v35  ;;  %v4011_v42 = vpop.f32.mrb[124].mxu0  ;;  %4091 = vadd.xlane.f32.xlu0 %v4090_v13  ;;  %v4093_v21 = vadd.f32 %v13538_v35, %v13536_v16  ;;  %v4428_v13 = vld [vmem:[%s11732_s3 + $0x80] sm:$0xff]  ;;  %5336 = vmatpush1.bf16.msra.mxu0 %v9117_v46 }
 0x9b0   : > { %v4012_v10 = vadd.f32 %v4011_v42, %v13427_v63  ;;  %v4013_v23 = vpop.f32.mrb[125].mxu0  ;;  %v9126_v42 = vcombine.high %v4421_v29, %v4425_v37 }
 0x9b1   : > { %v4014_v51 = vadd.f32 %v4013_v23, %v13430_v47  ;;  %v4015_v62 = vpop.f32.mrb[126].mxu0  ;;  %4094 = vadd.xlane.f32.xlu1 %v4093_v21  ;;  %v4432_v21 = vld [vmem:[%s11732_s3 + $0xa0] sm:$0xff]  ;;  %v4433_v23 = vld [vmem:[%s11732_s3 + $0xa8] sm:$0xff] }
 0x9b2   : > { %v13546_v27 = vadd.f32 %v10860_v3, %v4012_v10  ;;  %v4016_v1 = vadd.f32 %v4015_v62, %v13427_v63  ;;  %v4017_v30 = vpop.f32.mrb[127].mxu0  ;;  %v4429_v10 = vld [vmem:[%s11732_s3 + $0x88] sm:$0xff]  ;;  %v9125_v62 = vcombine.low %v4421_v29, %v4425_v37  ;;  %v9132_v3 = vcombine.high %v4428_v13, %v4432_v21  ;;  %5337 = vmatprep.subr.bf16.mxu0 %v9126_v42 }
 0x9b3   : > { %v13549_v38 = vadd.f32 %v10861_v26, %v4014_v51  ;;  %v4018_v19 = vadd.f32 %v4017_v30, %v13430_v47  ;;  %v4416_v47 = vld [vmem:[%s11732_s3 + $0x20] sm:$0xff]  ;;  %v9123_v51 = vcombine.low %v4420_v32, %v4424_v11  ;;  %v4453_v29 = vld [vmem:[%s11732_s3 + $0x148] sm:$0xff] }
 0x9b4   : > { %17105 = vst [vmem:[#allocation51_spill] sm:$0xff] %v13546_v27  ;;  %v13552_v25 = vadd.f32 %v10862_v44, %v4016_v1  ;;  %v9115_v20 = vcombine.low %v4412_v33, %v4416_v47  ;;  %v9116_v28 = vcombine.high %v4412_v33, %v4416_v47  ;;  %v9134_v1 = vcombine.high %v4429_v10, %v4433_v23  ;;  %v4436_v30 = vld [vmem:[%s11732_s3 + $0xc0] sm:$0xff]  ;;  %v4441_v44 = vld [vmem:[%s11732_s3 + $0xe8] sm:$0xff] }
 0x9b5   : > { %17106 = vst [vmem:[#allocation52_spill] sm:$0xff] %v13549_v38  ;;  %v13554_v14 = vadd.f32 %v10863_v41, %v4018_v19  ;;  %v4096_v15 = vadd.f32 %v13549_v38, %v13546_v27  ;;  %v4440_v26 = vld [vmem:[%s11732_s3 + $0xe0] sm:$0xff]  ;;  %v4437_v19 = vld [vmem:[%s11732_s3 + $0xc8] sm:$0xff]  ;;  %v9131_v41 = vcombine.low %v4428_v13, %v4432_v21  ;;  %5338 = vmatpush1.bf16.msra.mxu0 %v9125_v62 }
 0x9b6   : > { %17107 = vst [vmem:[#allocation53_spill] sm:$0xff] %v13552_v25  ;;  %5222 = vmatprep.subr.bf16.mxu1 %v9116_v28  ;;  %5339 = vmatprep.subr.bf16.mxu0 %v9134_v1  ;;  %v9142_v33 = vcombine.high %v4437_v19, %v4441_v44  ;;  %v4444_v47 = vld [vmem:[%s11732_s3 + $0x100] sm:$0xff]  ;;  %v4449_v28 = vld [vmem:[%s11732_s3 + $0x128] sm:$0xff]  ;;  %v9139_v55 = vcombine.low %v4436_v30, %v4440_v26 }
 0x9b7   : > { %17108 = vst [vmem:[#allocation54_spill] sm:$0xff] %v13554_v14  ;;  %4097 = vadd.xlane.f32.xlu0 %v4096_v15  ;;  %v4099_v63 = vadd.f32 %v13554_v14, %v13552_v25  ;;  %5223 = vmatpush1.bf16.msra.mxu1 %v9115_v20  ;;  %v9133_v15 = vcombine.low %v4429_v10, %v4433_v23  ;;  %v4445_v20 = vld [vmem:[%s11732_s3 + $0x108] sm:$0xff]  ;;  %v4460_v23 = vld [vmem:[%s11732_s3 + $0x180] sm:$0xff] }
 0x9b8   : > { %5224 = vmatprep.subr.bf16.mxu1 %v9124_v43  ;;  %v9141_v32 = vcombine.low %v4437_v19, %v4441_v44  ;;  %v9148_v11 = vcombine.high %v4444_v47, %v4448_v40  ;;  %v9150_v46 = vcombine.high %v4445_v20, %v4449_v28  ;;  %v4456_v43 = vld [vmem:[%s11732_s3 + $0x160] sm:$0xff]  ;;  %v4457_v37 = vld [vmem:[%s11732_s3 + $0x168] sm:$0xff]  ;;  %v9147_v13 = vcombine.low %v4444_v47, %v4448_v40 }
 0x9b9   : > { %4100 = vadd.xlane.f32.xlu1 %v4099_v63  ;;  %v9140_v63 = vcombine.high %v4436_v30, %v4440_v26  ;;  %5340 = vmatpush1.bf16.msra.mxu0 %v9133_v15  ;;  %v9149_v42 = vcombine.low %v4445_v20, %v4449_v28  ;;  %v9156_v21 = vcombine.high %v4452_v4, %v4456_v43  ;;  %v4461_v62 = vld [vmem:[%s11732_s3 + $0x188] sm:$0xff]  ;;  %v4468_v44 = vld [vmem:[%s11732_s3 + $0x1c0] sm:$0xff] }
 0x9ba   : > { %5341 = vmatprep.subr.bf16.mxu0 %v9142_v33  ;;  %v9158_v10 = vcombine.high %v4453_v29, %v4457_v37  ;;  %v9155_v1 = vcombine.low %v4452_v4, %v4456_v43  ;;  %v9157_v30 = vcombine.low %v4453_v29, %v4457_v37  ;;  %v4469_v15 = vld [vmem:[%s11732_s3 + $0x1c8] sm:$0xff]  ;;  %v4476_v28 = vld [vmem:[%s11732_s3 + $0x200] sm:$0xff] }
 0x9bb   : > { %5225 = vmatpush1.bf16.msra.mxu1 %v9123_v51  ;;  %v4464_v51 = vld [vmem:[%s11732_s3 + $0x1a0] sm:$0xff] }
 0x9bc   : > { %5226 = vmatprep.subr.bf16.mxu1 %v9132_v3  ;;  %v4465_v3 = vld [vmem:[%s11732_s3 + $0x1a8] sm:$0xff]  ;;  %v9164_v26 = vcombine.high %v4460_v23, %v4464_v51  ;;  %v9163_v33 = vcombine.low %v4460_v23, %v4464_v51  ;;  %v4484_v37 = vld [vmem:[%s11732_s3 + $0x240] sm:$0xff] }
 0x9bd   : > { %5342 = vmatpush1.bf16.msra.mxu0 %v9141_v32  ;;  %v9166_v19 = vcombine.high %v4461_v62, %v4465_v3  ;;  %v9165_v47 = vcombine.low %v4461_v62, %v4465_v3  ;;  %v4477_v32 = vld [vmem:[%s11732_s3 + $0x208] sm:$0xff] }
 0x9be   : > { %5343 = vmatprep.subr.bf16.mxu0 %v9150_v46 }
 0x9bf   : > { %5227 = vmatpush1.bf16.msra.mxu1 %v9131_v41  ;;  %v4472_v41 = vld [vmem:[%s11732_s3 + $0x1e0] sm:$0xff] }
 0x9c0   : > { %5228 = vmatprep.subr.bf16.mxu1 %v9140_v63  ;;  %v4473_v63 = vld [vmem:[%s11732_s3 + $0x1e8] sm:$0xff]  ;;  %v9172_v40 = vcombine.high %v4468_v44, %v4472_v41  ;;  %v9171_v46 = vcombine.low %v4468_v44, %v4472_v41 }
 0x9c1   : > { %5344 = vmatpush1.bf16.msra.mxu0 %v9149_v42  ;;  %v9174_v20 = vcombine.high %v4469_v15, %v4473_v63  ;;  %v9173_v4 = vcombine.low %v4469_v15, %v4473_v63  ;;  %v4485_v42 = vld [vmem:[%s11732_s3 + $0x248] sm:$0xff] }
 0x9c2   : > { %5345 = vmatprep.subr.bf16.mxu0 %v9158_v10 }
 0x9c3   : > { %5229 = vmatpush1.bf16.msra.mxu1 %v9139_v55  ;;  %v4480_v55 = vld [vmem:[%s11732_s3 + $0x220] sm:$0xff] }
 0x9c4   : > { %5230 = vmatprep.subr.bf16.mxu1 %v9148_v11  ;;  %v4481_v11 = vld [vmem:[%s11732_s3 + $0x228] sm:$0xff]  ;;  %v9180_v43 = vcombine.high %v4476_v28, %v4480_v55  ;;  %v9179_v10 = vcombine.low %v4476_v28, %v4480_v55 }
 0x9c5   : > { %5346 = vmatpush1.bf16.msra.mxu0 %v9157_v30  ;;  %v9182_v29 = vcombine.high %v4477_v32, %v4481_v11  ;;  %v9181_v23 = vcombine.low %v4477_v32, %v4481_v11 }
 0x9c6   : > { %5347 = vmatprep.subr.bf16.mxu0 %v9166_v19 }
 0x9c7   : > { %5231 = vmatpush1.bf16.msra.mxu1 %v9147_v13  ;;  %v4488_v13 = vld [vmem:[%s11732_s3 + $0x260] sm:$0xff] }
 0x9c8   : > { %5232 = vmatprep.subr.bf16.mxu1 %v9156_v21  ;;  %v4489_v21 = vld [vmem:[%s11732_s3 + $0x268] sm:$0xff]  ;;  %v9188_v51 = vcombine.high %v4484_v37, %v4488_v13  ;;  %v9187_v3 = vcombine.low %v4484_v37, %v4488_v13 }
 0x9c9   : > { %5348 = vmatpush1.bf16.msra.mxu0 %v9165_v47  ;;  %v9190_v62 = vcombine.high %v4485_v42, %v4489_v21 }
 0x9ca   : > { %5349 = vmatprep.subr.bf16.mxu0 %v9174_v20 }
 0x9cb   : > { %5233 = vmatpush1.bf16.msra.mxu1 %v9155_v1  ;;  %v9189_v1 = vcombine.low %v4485_v42, %v4489_v21 }
 0x9cc   : > { %5234 = vmatprep.subr.bf16.mxu1 %v9164_v26 }
 0x9cd   : > { %5350 = vmatpush1.bf16.msra.mxu0 %v9173_v4 }
 0x9ce   : > { %5351 = vmatprep.subr.bf16.mxu0 %v9182_v29 }
 0x9cf   : > { %5235 = vmatpush1.bf16.msra.mxu1 %v9163_v33 }
 0x9d0   : > { %5236 = vmatprep.subr.bf16.mxu1 %v9172_v40 }
 0x9d1   : > { %5352 = vmatpush1.bf16.msra.mxu0 %v9181_v23 }
 0x9d2   : > { %5353 = vmatprep.subr.bf16.mxu0 %v9190_v62 }
 0x9d3   : > { %5237 = vmatpush1.bf16.msra.mxu1 %v9171_v46 }
 0x9d4   : > { %5238 = vmatprep.subr.bf16.mxu1 %v9180_v43 }
 0x9d5   : > { %5354 = vmatpush1.bf16.msra.mxu0 %v9189_v1 }
 0x9d7   : > { %5239 = vmatpush1.bf16.msra.mxu1 %v9179_v10 }
 0x9d8   : > { %5240 = vmatprep.subr.bf16.mxu1 %v9188_v51 }
 0x9db   : > { %5241 = vmatpush1.bf16.msra.mxu1 %v9187_v3 }
 0xa0c   : > { %v4056_v30 = vpop.xlane.xlu0 %4055 }
 0xa0d   : > { %v4102_v26 = vmul.f32 0.00390625, %v4056_v30 }
 0xa0e   : > { %v4059_v19 = vpop.xlane.xlu1 %4058 }
 0xa0f   : > { %v13601_v44 = vsub.f32 %v13434_v6, %v4102_v26  ;;  %v13604_v41 = vsub.f32 %v13437_v12, %v4102_v26  ;;  %v4103_v15 = vmul.f32 0.00390625, %v4059_v19 }
 0xa11   : > { %v4150_v63 = vmul.f32 %v13601_v44, %v13601_v44  ;;  %v4151_v33 = vmul.f32 %v13604_v41, %v13604_v41  ;;  %v13611_v47 = vsub.f32 %v13440_v54, %v4103_v15  ;;  %v13614_v40 = vsub.f32 %v13442_v7, %v4103_v15 }
 0xa13   : > { %v4152_v20 = vmul.f32 %v13611_v47, %v13611_v47  ;;  %v4153_v28 = vmul.f32 %v13614_v40, %v13614_v40  ;;  %v4182_v55 = vadd.f32 %v4151_v33, %v4150_v63 }
 0xa14   : > { %v4062_v32 = vpop.xlane.xlu0 %4061 }
 0xa15   : > { %v4104_v11 = vmul.f32 0.00390625, %v4062_v32  ;;  %4183 = vadd.xlane.f32.xlu0 %v4182_v55  ;;  %v4185_v46 = vadd.f32 %v4153_v28, %v4152_v20 }
 0xa16   : > { %v4065_v4 = vpop.xlane.xlu1 %4064 }
 0xa17   : > { %v13621_v43 = vsub.f32 %v13450_v2, %v4104_v11  ;;  %v13624_v29 = vsub.f32 %v13453_v9, %v4104_v11  ;;  %v4105_v37 = vmul.f32 0.00390625, %v4065_v4  ;;  %4186 = vadd.xlane.f32.xlu1 %v4185_v46  ;;  %v13849_v9 = vld [vmem:[%s11732_s3 + $0x90] sm:$0xff] }
 0xa19   : > { %v4154_v13 = vmul.f32 %v13621_v43, %v13621_v43  ;;  %v4155_v42 = vmul.f32 %v13624_v29, %v13624_v29  ;;  %v13631_v21 = vsub.f32 %v13456_v0, %v4105_v37  ;;  %v13634_v10 = vsub.f32 %v13458_v48, %v4105_v37  ;;  %v4505_v48 = vld [vmem:[%s11732_s3 + $0x2e8] sm:$0xff] }
 0xa1a   : > { %v4521_v0 = vld [vmem:[%s11732_s3 + $0x368] sm:$0xff] }
 0xa1b   : > { %v4156_v23 = vmul.f32 %v13631_v21, %v13631_v21  ;;  %v4157_v51 = vmul.f32 %v13634_v10, %v13634_v10  ;;  %v4188_v62 = vadd.f32 %v4155_v42, %v4154_v13 }
 0xa1c   : > { %v4068_v3 = vpop.xlane.xlu0 %4067 }
 0xa1d   : > { %v4106_v1 = vmul.f32 0.00390625, %v4068_v3  ;;  %4189 = vadd.xlane.f32.xlu0 %v4188_v62  ;;  %v4191_v30 = vadd.f32 %v4157_v51, %v4156_v23 }
 0xa1e   : > { %v4071_v26 = vpop.xlane.xlu1 %4070 }
 0xa1f   : > { %v13641_v19 = vsub.f32 %v13466_v53, %v4106_v1  ;;  %v13644_v15 = vsub.f32 %v13469_v45, %v4106_v1  ;;  %v4107_v63 = vmul.f32 0.00390625, %v4071_v26  ;;  %4192 = vadd.xlane.f32.xlu1 %v4191_v30 }
 0xa21   : > { %v4158_v33 = vmul.f32 %v13641_v19, %v13641_v19  ;;  %v4159_v20 = vmul.f32 %v13644_v15, %v13644_v15  ;;  %v13651_v28 = vsub.f32 %v13472_v50, %v4107_v63  ;;  %v13654_v55 = vsub.f32 %v13474_v59, %v4107_v63  ;;  %v4492_v63 = vld [vmem:[%s11732_s3 + $0x280] sm:$0xff]  ;;  %v4501_v50 = vld [vmem:[%s11732_s3 + $0x2c8] sm:$0xff] }
 0xa22   : > { %v4504_v59 = vld [vmem:[%s11732_s3 + $0x2e0] sm:$0xff] }
 0xa23   : > { %v4160_v32 = vmul.f32 %v13651_v28, %v13651_v28  ;;  %v4161_v11 = vmul.f32 %v13654_v55, %v13654_v55  ;;  %v4194_v46 = vadd.f32 %v4159_v20, %v4158_v33  ;;  %v4496_v33 = vld [vmem:[%s11732_s3 + $0x2a0] sm:$0xff]  ;;  %v4493_v20 = vld [vmem:[%s11732_s3 + $0x288] sm:$0xff] }
 0xa24   : > { %v4074_v4 = vpop.xlane.xlu0 %4073 }
 0xa25   : > { %v4108_v37 = vmul.f32 0.00390625, %v4074_v4  ;;  %4195 = vadd.xlane.f32.xlu0 %v4194_v46  ;;  %v4197_v13 = vadd.f32 %v4161_v11, %v4160_v32  ;;  %v9196_v32 = vcombine.high %v4492_v63, %v4496_v33  ;;  %v4497_v11 = vld [vmem:[%s11732_s3 + $0x2a8] sm:$0xff] }
 0xa26   : > { %v4077_v42 = vpop.xlane.xlu1 %4076 }
 0xa27   : > { %v13661_v23 = vsub.f32 %v13482_v52, %v4108_v37  ;;  %v13664_v51 = vsub.f32 %v13485_v22, %v4108_v37  ;;  %v4109_v62 = vmul.f32 0.00390625, %v4077_v42  ;;  %4198 = vadd.xlane.f32.xlu1 %v4197_v13  ;;  %v9195_v13 = vcombine.low %v4492_v63, %v4496_v33  ;;  %5242 = vmatprep.subr.bf16.mxu1 %v9196_v32  ;;  %v4500_v52 = vld [vmem:[%s11732_s3 + $0x2c0] sm:$0xff] }
 0xa28   : > { %v9204_v53 = vcombine.high %v4500_v52, %v4504_v59  ;;  %v9203_v33 = vcombine.low %v4500_v52, %v4504_v59  ;;  %v9206_v32 = vcombine.high %v4501_v50, %v4505_v48 }
 0xa29   : > { %v4162_v3 = vmul.f32 %v13661_v23, %v13661_v23  ;;  %v4163_v1 = vmul.f32 %v13664_v51, %v13664_v51  ;;  %v13671_v30 = vsub.f32 %v13488_v56, %v4109_v62  ;;  %v13674_v26 = vsub.f32 %v13490_v36, %v4109_v62  ;;  %5243 = vmatpush1.bf16.msra.mxu1 %v9195_v13 }
 0xa2a   : > { %v9197_v62 = vcombine.low %v4493_v20, %v4497_v11  ;;  %v9198_v36 = vcombine.high %v4493_v20, %v4497_v11  ;;  %5244 = vmatprep.subr.bf16.mxu1 %v9204_v53  ;;  %v9205_v20 = vcombine.low %v4501_v50, %v4505_v48  ;;  %v4513_v48 = vld [vmem:[%s11732_s3 + $0x328] sm:$0xff] }
 0xa2b   : > { %v4164_v46 = vmul.f32 %v13671_v30, %v13671_v30  ;;  %v4165_v4 = vmul.f32 %v13674_v26, %v13674_v26  ;;  %v4200_v37 = vadd.f32 %v4163_v1, %v4162_v3 }
 0xa2c   : > { %v4080_v42 = vpop.xlane.xlu0 %4079  ;;  %5355 = vmatprep.subr.bf16.mxu0 %v9198_v36 }
 0xa2d   : > { %v4110_v56 = vmul.f32 0.00390625, %v4080_v42  ;;  %4201 = vadd.xlane.f32.xlu0 %v4200_v37  ;;  %v4203_v22 = vadd.f32 %v4165_v4, %v4164_v46  ;;  %5356 = vmatpush1.bf16.msra.mxu0 %v9197_v62  ;;  %v4509_v4 = vld [vmem:[%s11732_s3 + $0x308] sm:$0xff] }
 0xa2e   : > { %v4083_v45 = vpop.xlane.xlu1 %4082  ;;  %5245 = vmatpush1.bf16.msra.mxu1 %v9203_v33  ;;  %5357 = vmatprep.subr.bf16.mxu0 %v9206_v32  ;;  %v9213_v42 = vcombine.low %v4509_v4, %v4513_v48  ;;  %v9214_v62 = vcombine.high %v4509_v4, %v4513_v48  ;;  %v4516_v32 = vld [vmem:[%s11732_s3 + $0x340] sm:$0xff] }
 0xa2f   : > { %v13689_v3 = vsub.f32 %v13498_v8, %v4110_v56  ;;  %v13692_v1 = vsub.f32 %v13501_v61, %v4110_v56  ;;  %v4111_v63 = vmul.f32 0.00390625, %v4083_v45  ;;  %4204 = vadd.xlane.f32.xlu1 %v4203_v22  ;;  %v4508_v45 = vld [vmem:[%s11732_s3 + $0x300] sm:$0xff] }
 0xa30   : > { %v4512_v22 = vld [vmem:[%s11732_s3 + $0x320] sm:$0xff] }
 0xa31   : > { %v4166_v36 = vmul.f32 %v13689_v3, %v13689_v3  ;;  %v4167_v11 = vmul.f32 %v13692_v1, %v13692_v1  ;;  %v13699_v46 = vsub.f32 %v13504_v18, %v4111_v63  ;;  %v13702_v56 = vsub.f32 %v13506_v60, %v4111_v63  ;;  %5358 = vmatpush1.bf16.msra.mxu0 %v9205_v20  ;;  %v4520_v60 = vld [vmem:[%s11732_s3 + $0x360] sm:$0xff]  ;;  %v4517_v18 = vld [vmem:[%s11732_s3 + $0x348] sm:$0xff] }
 0xa32   : > { %v9212_v53 = vcombine.high %v4508_v45, %v4512_v22  ;;  %v9211_v37 = vcombine.low %v4508_v45, %v4512_v22  ;;  %5359 = vmatprep.subr.bf16.mxu0 %v9214_v62  ;;  %v9220_v8 = vcombine.high %v4516_v32, %v4520_v60  ;;  %v9219_v45 = vcombine.low %v4516_v32, %v4520_v60 }
 0xa33   : > { %v4168_v50 = vmul.f32 %v13699_v46, %v13699_v46  ;;  %v4169_v59 = vmul.f32 %v13702_v56, %v13702_v56  ;;  %v4206_v52 = vadd.f32 %v4167_v11, %v4166_v36  ;;  %v9221_v22 = vcombine.low %v4517_v18, %v4521_v0 }
 0xa34   : > { %v4086_v13 = vpop.xlane.xlu0 %4085  ;;  %5246 = vmatprep.subr.bf16.mxu1 %v9212_v53  ;;  %v9222_v4 = vcombine.high %v4517_v18, %v4521_v0  ;;  %v4529_v0 = vld [vmem:[%s11732_s3 + $0x3a8] sm:$0xff] }
 0xa35   : > { %v4112_v63 = vmul.f32 0.00390625, %v4086_v13  ;;  %4207 = vadd.xlane.f32.xlu0 %v4206_v52  ;;  %v4209_v33 = vadd.f32 %v4169_v59, %v4168_v50  ;;  %5247 = vmatpush1.bf16.msra.mxu1 %v9211_v37  ;;  %v4528_v52 = vld [vmem:[%s11732_s3 + $0x3a0] sm:$0xff]  ;;  %v4525_v37 = vld [vmem:[%s11732_s3 + $0x388] sm:$0xff] }
 0xa36   : > { %v4089_v61 = vpop.xlane.xlu1 %4088  ;;  %5360 = vmatpush1.bf16.msra.mxu0 %v9213_v42  ;;  %5248 = vmatprep.subr.bf16.mxu1 %v9220_v8 }
 0xa37   : > { %v13717_v20 = vsub.f32 %v13514_v39, %v4112_v63  ;;  %v13720_v36 = vsub.f32 %v13517_v58, %v4112_v63  ;;  %v4113_v11 = vmul.f32 0.00390625, %v4089_v61  ;;  %4210 = vadd.xlane.f32.xlu1 %v4209_v33  ;;  %v4524_v61 = vld [vmem:[%s11732_s3 + $0x380] sm:$0xff]  ;;  %5361 = vmatprep.subr.bf16.mxu0 %v9222_v4  ;;  %v9229_v63 = vcombine.low %v4525_v37, %v4529_v0  ;;  %v4537_v39 = vld [vmem:[%s11732_s3 + $0x3e8] sm:$0xff] }
 0xa38   : > { %v9228_v8 = vcombine.high %v4524_v61, %v4528_v52  ;;  %v9227_v42 = vcombine.low %v4524_v61, %v4528_v52  ;;  %v9230_v33 = vcombine.high %v4525_v37, %v4529_v0  ;;  %v4536_v4 = vld [vmem:[%s11732_s3 + $0x3e0] sm:$0xff] }
 0xa39   : > { %v4170_v53 = vmul.f32 %v13717_v20, %v13717_v20  ;;  %v4171_v48 = vmul.f32 %v13720_v36, %v13720_v36  ;;  %v13727_v50 = vsub.f32 %v13520_v31, %v4113_v11  ;;  %v13730_v59 = vsub.f32 %v13522_v17, %v4113_v11  ;;  %5249 = vmatpush1.bf16.msra.mxu1 %v9219_v45  ;;  %v4532_v45 = vld [vmem:[%s11732_s3 + $0x3c0] sm:$0xff]  ;;  %v4533_v17 = vld [vmem:[%s11732_s3 + $0x3c8] sm:$0xff] }
 0xa3a   : > { %5362 = vmatpush1.bf16.msra.mxu0 %v9221_v22  ;;  %5250 = vmatprep.subr.bf16.mxu1 %v9228_v8  ;;  %v9236_v58 = vcombine.high %v4532_v45, %v4536_v4  ;;  %v9235_v61 = vcombine.low %v4532_v45, %v4536_v4  ;;  %v9237_v52 = vcombine.low %v4533_v17, %v4537_v39 }
 0xa3b   : > { %v4172_v18 = vmul.f32 %v13727_v50, %v13727_v50  ;;  %v4173_v60 = vmul.f32 %v13730_v59, %v13730_v59  ;;  %v4212_v13 = vadd.f32 %v4171_v48, %v4170_v53  ;;  %5363 = vmatprep.subr.bf16.mxu0 %v9230_v33  ;;  %v9238_v37 = vcombine.high %v4533_v17, %v4537_v39  ;;  %v13772_v17 = vld [vmem:[%s11732_s3 + $0x38] sm:$0xff] }
 0xa3c   : > { %v4092_v62 = vpop.xlane.xlu0 %4091 }
 0xa3d   : > { %v4114_v32 = vmul.f32 0.00390625, %v4092_v62  ;;  %4213 = vadd.xlane.f32.xlu0 %v4212_v13  ;;  %v4215_v11 = vadd.f32 %v4173_v60, %v4172_v18  ;;  %5251 = vmatpush1.bf16.msra.mxu1 %v9227_v42  ;;  %v13764_v13 = vld [vmem:[%s11732_s3 + $0x30] sm:$0xff] }
 0xa3e   : > { %v4095_v31 = vpop.xlane.xlu1 %4094  ;;  %5364 = vmatpush1.bf16.msra.mxu0 %v9229_v63  ;;  %5252 = vmatprep.subr.bf16.mxu1 %v9236_v58  ;;  %v13767_v58 = vld [vmem:[%s11732_s3 + $0x18] sm:$0xff] }
 0xa3f   : > { %v13745_v22 = vsub.f32 %v13530_v49, %v4114_v32  ;;  %v13748_v53 = vsub.f32 %v13533_v24, %v4114_v32  ;;  %v4115_v48 = vmul.f32 0.00390625, %v4095_v31  ;;  %4216 = vadd.xlane.f32.xlu1 %v4215_v11  ;;  %v13761_v31 = vld [vmem:[%s11732_s3 + $0x10] sm:$0xff]  ;;  %5365 = vmatprep.subr.bf16.mxu0 %v9238_v37  ;;  %v9122_v45 = vcombine.high %v13767_v58, %v13772_v17 }
 0xa40   : > { %v9120_v39 = vcombine.high %v13761_v31, %v13764_v13 }
 0xa41   : > { %v4174_v8 = vmul.f32 %v13745_v22, %v13745_v22  ;;  %v4175_v0 = vmul.f32 %v13748_v53, %v13748_v53  ;;  %v13755_v18 = vsub.f32 %v13536_v16, %v4115_v48  ;;  %v13758_v60 = vsub.f32 %v13538_v35, %v4115_v48  ;;  %5253 = vmatpush1.bf16.msra.mxu1 %v9235_v61  ;;  %v4422_v16 = vld [vmem:[%s11732_s3 + $0x50] sm:$0xff] }
 0xa42   : > { %5366 = vmatpush1.bf16.msra.mxu0 %v9237_v52  ;;  %5448 = vmatprep.subr.bf16.mxu1 %v9120_v39 }
 0xa43   : > { %v4176_v42 = vmul.f32 %v13755_v18, %v13755_v18  ;;  %v4177_v62 = vmul.f32 %v13758_v60, %v13758_v60  ;;  %v4218_v63 = vadd.f32 %v4175_v0, %v4174_v8  ;;  %5561 = vmatprep.subr.bf16.mxu0 %v9122_v45 }
 0xa44   : > { %v4098_v32 = vpop.xlane.xlu0 %4097 }
 0xa45   : > { %v4116_v4 = vmul.f32 0.00390625, %v4098_v32  ;;  %4219 = vadd.xlane.f32.xlu0 %v4218_v63  ;;  %v4221_v48 = vadd.f32 %v4177_v62, %v4176_v42 }
 0xa46   : > { %v4101_v61 = vpop.xlane.xlu1 %4100 }
 0xa47   : > { %v13785_v37 = vsub.f32 %v13546_v27, %v4116_v4  ;;  %v13788_v52 = vsub.f32 %v13549_v38, %v4116_v4  ;;  %v4117_v8 = vmul.f32 0.00390625, %v4101_v61  ;;  %4222 = vadd.xlane.f32.xlu1 %v4221_v48 }
 0xa49   : > { %v4178_v0 = vmul.f32 %v13785_v37, %v13785_v37  ;;  %v4179_v39 = vmul.f32 %v13788_v52, %v13788_v52  ;;  %v13795_v32 = vsub.f32 %v13552_v25, %v4117_v8  ;;  %v13798_v42 = vsub.f32 %v13554_v14, %v4117_v8 }
 0xa4b   : > { %v4180_v62 = vmul.f32 %v13795_v32, %v13795_v32  ;;  %v4181_v63 = vmul.f32 %v13798_v42, %v13798_v42  ;;  %v4224_v45 = vadd.f32 %v4179_v39, %v4178_v0  ;;  %v4052_v0 = vld [vmem:[%s906_s26] sm:$0x3] }
 0xa4d   : > { %4225 = vadd.xlane.f32.xlu0 %v4224_v45  ;;  %v4227_v4 = vadd.f32 %v4181_v63, %v4180_v62  ;;  %v13810_v45 = vrot.slane %v4052_v0, %v12721_v5 }
 0xa4f   : > { %4228 = vadd.xlane.f32.xlu1 %v4227_v4 }
 0xaa2   : > { %v4184_v48 = vpop.xlane.xlu0 %4183 }
 0xaa3   : > { %v4230_v61 = vmul.f32 0.00390625, %v4184_v48 }
 0xaa4   : > { %v4187_v11 = vpop.xlane.xlu1 %4186 }
 0xaa5   : > { %v4246_v33 = vadd.f32 1e-05, %v4230_v61  ;;  %v4231_v25 = vmul.f32 0.00390625, %v4187_v11 }
 0xaa7   : > { %10544 = vrsqrt.f32 %v4246_v33  ;;  %v4247_v8 = vadd.f32 1e-05, %v4231_v25  ;;  %v4053_v25 = vld [vmem:[%s910_s11] sm:$0x3] }
 0xaa8   : > { %v13823_v61 = vrot.slane %v4053_v25, %v12721_v5 }
 0xaa9   : > { %10546 = vrsqrt.f32 %v4247_v8  ;;  %v13826_v8 = vrot.slane %v4053_v25, %v12724_v34 }
 0xaaa   : > { %v4190_v14 = vpop.xlane.xlu0 %4189 }
 0xaab   : > { %v4232_v38 = vmul.f32 0.00390625, %v4190_v14  ;;  %v13818_v14 = vrot.slane %v4052_v0, %v12724_v34 }
 0xaac   : > { %v4193_v27 = vpop.xlane.xlu1 %4192 }
 0xaad   : > { %v4248_v39 = vadd.f32 1e-05, %v4232_v38  ;;  %v4233_v62 = vmul.f32 0.00390625, %v4193_v27 }
 0xaaf   : > { %10548 = vrsqrt.f32 %v4248_v39  ;;  %v4249_v63 = vadd.f32 1e-05, %v4233_v62 }
 0xab1   : > { %v10545_v33 = vpop.eup %10544  ;;  %10550 = vrsqrt.f32 %v4249_v63 }
 0xab2   : > { %v4278_v11 = vmul.f32 %v10545_v33, %v13601_v44  ;;  %v4279_v38 = vmul.f32 %v10545_v33, %v13604_v41  ;;  %v4196_v27 = vpop.xlane.xlu0 %4195 }
 0xab3   : > { %v10547_v4 = vpop.eup %10546  ;;  %v4234_v48 = vmul.f32 0.00390625, %v4196_v27 }
 0xab4   : > { %v4321_v39 = vmul.f32 %v13810_v45, %v4278_v11  ;;  %v4280_v0 = vmul.f32 %v10547_v4, %v13611_v47  ;;  %v4281_v44 = vmul.f32 %v10547_v4, %v13614_v40  ;;  %v4199_v41 = vpop.xlane.xlu1 %4198  ;;  %v4322_v62 = vmul.f32 %v13818_v14, %v4279_v38  ;;  %v4426_v4 = vld [vmem:[%s11732_s3 + $0x70] sm:$0xff]  ;;  %v4423_v38 = vld [vmem:[%s11732_s3 + $0x58] sm:$0xff] }
 0xab5   : > { %v4250_v63 = vadd.f32 1e-05, %v4234_v48  ;;  %v4235_v33 = vmul.f32 0.00390625, %v4199_v41  ;;  %v4427_v48 = vld [vmem:[%s11732_s3 + $0x78] sm:$0xff] }
 0xab6   : > { %v4323_v27 = vmul.f32 %v13810_v45, %v4280_v0  ;;  %v4324_v35 = vmul.f32 %v13818_v14, %v4281_v44  ;;  %v4365_v11 = vadd.f32 %v13826_v8, %v4322_v62  ;;  %v4364_v24 = vadd.f32 %v13823_v61, %v4321_v39 }
 0xab7   : > { %10552 = vrsqrt.f32 %v4250_v63  ;;  %v4251_v25 = vadd.f32 1e-05, %v4235_v33  ;;  %v9130_v49 = vcombine.high %v4423_v38, %v4427_v48 }
 0xab8   : > { %v4367_v47 = vadd.f32 %v13826_v8, %v4324_v35  ;;  %v4366_v40 = vadd.f32 %v13823_v61, %v4323_v27  ;;  %v9128_v27 = vcombine.high %v4422_v16, %v4426_v4 }
 0xab9   : > { %v10549_v41 = vpop.eup %10548  ;;  %10554 = vrsqrt.f32 %v4251_v25 }
 0xaba   : > { %v4282_v0 = vmul.f32 %v10549_v41, %v13621_v43  ;;  %v4283_v44 = vmul.f32 %v10549_v41, %v13624_v29  ;;  %v4202_v63 = vpop.xlane.xlu0 %4201  ;;  %v13844_v62 = vpack.c.bf16 %v4367_v47, %v4365_v11  ;;  %v13846_v35 = vpack.c.bf16 %v4366_v40, %v4364_v24  ;;  %v4434_v11 = vld [vmem:[%s11732_s3 + $0xb0] sm:$0xff]  ;;  %v4431_v24 = vld [vmem:[%s11732_s3 + $0x98] sm:$0xff] }
 0xabb   : > { %v10551_v39 = vpop.eup %10550  ;;  %v4236_v33 = vmul.f32 0.00390625, %v4202_v63  ;;  %v4435_v47 = vld [vmem:[%s11732_s3 + $0xb8] sm:$0xff]  ;;  %v17111_v63 = vcombine.low %v13761_v31, %v13764_v13  ;;  %v13872_v13 = vld [vmem:[%s11732_s3 + $0xd0] sm:$0xff] }
 0xabc   : > { %v4284_v25 = vmul.f32 %v10551_v39, %v13631_v21  ;;  %v4285_v43 = vmul.f32 %v10551_v39, %v13634_v10  ;;  %v4205_v2 = vpop.xlane.xlu1 %4204  ;;  %5254 = vmatprep.mubr.bf16.mxu1 %v13844_v62  ;;  %5367 = vmatprep.mubr.bf16.mxu0 %v13844_v62  ;;  %v4326_v29 = vmul.f32 %v13818_v14, %v4283_v44 }
 0xabd   : > { %v4252_v40 = vadd.f32 1e-05, %v4236_v33  ;;  %v4237_v41 = vmul.f32 0.00390625, %v4205_v2  ;;  %5255 = vmatmul.mubr.bf16.vlgmr.msra.gmra.mrb[32].mxu1 %v13846_v35  ;;  %5368 = vmatmul.mubr.bf16.vlgmr.msra.gmra.mrb[128].mxu0 %v13846_v35  ;;  %v9127_v21 = vcombine.low %v4422_v16, %v4426_v4  ;;  %v4325_v10 = vmul.f32 %v13810_v45, %v4282_v0 }
 0xabe   : > { %5449 = vmatpush1.bf16.msra.mxu1 %v17111_v63  ;;  %v17112_v44 = vcombine.low %v13767_v58, %v13772_v17  ;;  %v9129_v2 = vcombine.low %v4423_v38, %v4427_v48  ;;  %v4328_v39 = vmul.f32 %v13818_v14, %v4285_v43  ;;  %v4327_v33 = vmul.f32 %v13810_v45, %v4284_v25  ;;  %v4442_v38 = vld [vmem:[%s11732_s3 + $0xf0] sm:$0xff]  ;;  %v4439_v48 = vld [vmem:[%s11732_s3 + $0xd8] sm:$0xff] }
 0xabf   : > { %10556 = vrsqrt.f32 %v4252_v40  ;;  %v4253_v16 = vadd.f32 1e-05, %v4237_v41  ;;  %5450 = vmatprep.subr.bf16.mxu1 %v9128_v27  ;;  %v9136_v4 = vcombine.high %v13849_v9, %v4434_v11  ;;  %v9138_v31 = vcombine.high %v4431_v24, %v4435_v47  ;;  %v4443_v43 = vld [vmem:[%s11732_s3 + $0xf8] sm:$0xff] }
 0xac0   : > { %5562 = vmatpush1.bf16.msra.mxu0 %v17112_v44  ;;  %v4369_v0 = vadd.f32 %v13826_v8, %v4326_v29  ;;  %v4371_v58 = vadd.f32 %v13826_v8, %v4328_v39  ;;  %v4370_v17 = vadd.f32 %v13823_v61, %v4327_v33  ;;  %v4368_v25 = vadd.f32 %v13823_v61, %v4325_v10  ;;  %v4450_v10 = vld [vmem:[%s11732_s3 + $0x130] sm:$0xff] }
 0xac1   : > { %5563 = vmatprep.subr.bf16.mxu0 %v9130_v49  ;;  %v10553_v63 = vpop.eup %10552  ;;  %10558 = vrsqrt.f32 %v4253_v16  ;;  %v9135_v49 = vcombine.low %v13849_v9, %v4434_v11  ;;  %v9137_v27 = vcombine.low %v4431_v24, %v4435_v47  ;;  %v9144_v9 = vcombine.high %v13872_v13, %v4442_v38 }
 0xac2   : > { %v4286_v40 = vmul.f32 %v10553_v63, %v13641_v19  ;;  %v4287_v41 = vmul.f32 %v10553_v63, %v13644_v15  ;;  %5451 = vmatpush1.bf16.msra.mxu1 %v9127_v21  ;;  %v4208_v29 = vpop.xlane.xlu0 %4207  ;;  %v13884_v44 = vpack.c.bf16 %v4371_v58, %v4369_v0  ;;  %v13886_v16 = vpack.c.bf16 %v4370_v17, %v4368_v25  ;;  %v13890_v19 = vld [vmem:[%s11732_s3 + $0x110] sm:$0xff] }
 0xac3   : > { %v10555_v39 = vpop.eup %10554  ;;  %v4238_v33 = vmul.f32 0.00390625, %v4208_v29  ;;  %5452 = vmatprep.subr.bf16.mxu1 %v9136_v4  ;;  %v9146_v11 = vcombine.high %v4439_v48, %v4443_v43  ;;  %v4451_v4 = vld [vmem:[%s11732_s3 + $0x138] sm:$0xff]  ;;  %v9145_v58 = vcombine.low %v4439_v48, %v4443_v43  ;;  %v4458_v48 = vld [vmem:[%s11732_s3 + $0x170] sm:$0xff] }
 0xac4   : > { %5564 = vmatpush1.bf16.msra.mxu0 %v9129_v2  ;;  %v4288_v15 = vmul.f32 %v10555_v39, %v13651_v28  ;;  %v4289_v24 = vmul.f32 %v10555_v39, %v13654_v55  ;;  %v4211_v47 = vpop.xlane.xlu1 %4210  ;;  %5264 = vmatprep.mubr.bf16.mxu1 %v13884_v44  ;;  %v4330_v21 = vmul.f32 %v13818_v14, %v4287_v41  ;;  %v4447_v2 = vld [vmem:[%s11732_s3 + $0x118] sm:$0xff] }
 0xac5   : > { %5565 = vmatprep.subr.bf16.mxu0 %v9138_v31  ;;  %5377 = vmatprep.mubr.bf16.mxu0 %v13884_v44  ;;  %v4254_v31 = vadd.f32 1e-05, %v4238_v33  ;;  %v4239_v0 = vmul.f32 0.00390625, %v4211_v47  ;;  %v9143_v28 = vcombine.low %v13872_v13, %v4442_v38  ;;  %v4329_v55 = vmul.f32 %v13810_v45, %v4286_v40  ;;  %v13908_v13 = vld [vmem:[%s11732_s3 + $0x150] sm:$0xff]  ;;  %v4455_v43 = vld [vmem:[%s11732_s3 + $0x158] sm:$0xff] }
 0xac6   : > { %5265 = vmatmul.mubr.bf16.gmra.mrb[36].mxu1 %v13886_v16  ;;  %5378 = vmatmul.mubr.bf16.gmra.mrb[132].mxu0 %v13886_v16  ;;  %v4332_v17 = vmul.f32 %v13818_v14, %v4289_v24  ;;  %v4331_v63 = vmul.f32 %v13810_v45, %v4288_v15  ;;  %v9152_v41 = vcombine.high %v13890_v19, %v4450_v10  ;;  %v4459_v40 = vld [vmem:[%s11732_s3 + $0x178] sm:$0xff] }
 0xac7   : > { %5453 = vmatpush1.bf16.msra.mxu1 %v9135_v49  ;;  %10560 = vrsqrt.f32 %v4254_v31  ;;  %v4255_v25 = vadd.f32 1e-05, %v4239_v0  ;;  %v9154_v29 = vcombine.high %v4447_v2, %v4451_v4  ;;  %v4373_v38 = vadd.f32 %v13826_v8, %v4330_v21 }
 0xac8   : > { %5566 = vmatpush1.bf16.msra.mxu0 %v9137_v27  ;;  %5454 = vmatprep.subr.bf16.mxu1 %v9144_v9  ;;  %v4375_v49 = vadd.f32 %v13826_v8, %v4332_v17  ;;  %v4374_v27 = vadd.f32 %v13823_v61, %v4331_v63  ;;  %v4372_v33 = vadd.f32 %v13823_v61, %v4329_v55  ;;  %v4466_v55 = vld [vmem:[%s11732_s3 + $0x1b0] sm:$0xff]  ;;  %v4467_v63 = vld [vmem:[%s11732_s3 + $0x1b8] sm:$0xff] }
 0xac9   : > { %5567 = vmatprep.subr.bf16.mxu0 %v9146_v11  ;;  %v10557_v39 = vpop.eup %10556  ;;  %10562 = vrsqrt.f32 %v4255_v25  ;;  %v9151_v9 = vcombine.low %v13890_v19, %v4450_v10  ;;  %v9153_v11 = vcombine.low %v4447_v2, %v4451_v4  ;;  %v9160_v19 = vcombine.high %v13908_v13, %v4458_v48 }
 0xaca   : > { %v4290_v15 = vmul.f32 %v10557_v39, %v13661_v23  ;;  %v4291_v24 = vmul.f32 %v10557_v39, %v13664_v51  ;;  %v4214_v47 = vpop.xlane.xlu0 %4213  ;;  %v13920_v21 = vpack.c.bf16 %v4375_v49, %v4373_v38  ;;  %v13922_v17 = vpack.c.bf16 %v4374_v27, %v4372_v33  ;;  %v13926_v23 = vld [vmem:[%s11732_s3 + $0x190] sm:$0xff] }
 0xacb   : > { %5455 = vmatpush1.bf16.msra.mxu1 %v9143_v28  ;;  %v10559_v31 = vpop.eup %10558  ;;  %v4240_v0 = vmul.f32 0.00390625, %v4214_v47  ;;  %v9162_v10 = vcombine.high %v4455_v43, %v4459_v40  ;;  %v9168_v39 = vcombine.high %v13926_v23, %v4466_v55 }
 0xacc   : > { %5568 = vmatpush1.bf16.msra.mxu0 %v9145_v58  ;;  %5456 = vmatprep.subr.bf16.mxu1 %v9152_v41  ;;  %v4292_v51 = vmul.f32 %v10559_v31, %v13671_v30  ;;  %v4293_v2 = vmul.f32 %v10559_v31, %v13674_v26  ;;  %v4217_v4 = vpop.xlane.xlu1 %4216  ;;  %v4334_v28 = vmul.f32 %v13818_v14, %v4291_v24  ;;  %v4463_v58 = vld [vmem:[%s11732_s3 + $0x198] sm:$0xff] }
 0xacd   : > { %5569 = vmatprep.subr.bf16.mxu0 %v9154_v29  ;;  %5274 = vmatprep.mubr.bf16.mxu1 %v13920_v21  ;;  %v4256_v25 = vadd.f32 1e-05, %v4240_v0  ;;  %v4241_v41 = vmul.f32 0.00390625, %v4217_v4  ;;  %v9159_v30 = vcombine.low %v13908_v13, %v4458_v48  ;;  %v4333_v26 = vmul.f32 %v13810_v45, %v4290_v15  ;;  %v13944_v13 = vld [vmem:[%s11732_s3 + $0x1d0] sm:$0xff]  ;;  %v4475_v15 = vld [vmem:[%s11732_s3 + $0x1f8] sm:$0xff] }
 0xace   : > { %5387 = vmatprep.mubr.bf16.mxu0 %v13920_v21  ;;  %5275 = vmatmul.mubr.bf16.gmra.mrb[40].mxu1 %v13922_v17  ;;  %v9161_v29 = vcombine.low %v4455_v43, %v4459_v40  ;;  %v4336_v38 = vmul.f32 %v13818_v14, %v4293_v2  ;;  %v4335_v49 = vmul.f32 %v13810_v45, %v4292_v51  ;;  %v4474_v43 = vld [vmem:[%s11732_s3 + $0x1f0] sm:$0xff]  ;;  %v4471_v40 = vld [vmem:[%s11732_s3 + $0x1d8] sm:$0xff] }
 0xacf   : > { %5388 = vmatmul.mubr.bf16.gmra.mrb[136].mxu0 %v13922_v17  ;;  %5457 = vmatpush1.bf16.msra.mxu1 %v9151_v9  ;;  %10564 = vrsqrt.f32 %v4256_v25  ;;  %v4257_v27 = vadd.f32 1e-05, %v4241_v41  ;;  %v9170_v33 = vcombine.high %v4463_v58, %v4467_v63  ;;  %v4377_v48 = vadd.f32 %v13826_v8, %v4334_v28 }
 0xad0   : > { %5570 = vmatpush1.bf16.msra.mxu0 %v9153_v11  ;;  %5458 = vmatprep.subr.bf16.mxu1 %v9160_v19  ;;  %v4379_v9 = vadd.f32 %v13826_v8, %v4336_v38  ;;  %v4378_v11 = vadd.f32 %v13823_v61, %v4335_v49  ;;  %v4376_v47 = vadd.f32 %v13823_v61, %v4333_v26  ;;  %v4479_v26 = vld [vmem:[%s11732_s3 + $0x218] sm:$0xff] }
 0xad1   : > { %5571 = vmatprep.subr.bf16.mxu0 %v9162_v10  ;;  %v10561_v24 = vpop.eup %10560  ;;  %10566 = vrsqrt.f32 %v4257_v27  ;;  %v9167_v31 = vcombine.low %v13926_v23, %v4466_v55  ;;  %v9169_v0 = vcombine.low %v4463_v58, %v4467_v63  ;;  %v9176_v23 = vcombine.high %v13944_v13, %v4474_v43 }
 0xad2   : > { %v4294_v19 = vmul.f32 %v10561_v24, %v13689_v3  ;;  %v4295_v10 = vmul.f32 %v10561_v24, %v13692_v1  ;;  %v4220_v51 = vpop.xlane.xlu0 %4219  ;;  %v13956_v2 = vpack.c.bf16 %v4379_v9, %v4377_v48  ;;  %v13958_v25 = vpack.c.bf16 %v4378_v11, %v4376_v47  ;;  %v13962_v3 = vld [vmem:[%s11732_s3 + $0x210] sm:$0xff] }
 0xad3   : > { %5459 = vmatpush1.bf16.msra.mxu1 %v9159_v30  ;;  %v10563_v4 = vpop.eup %10562  ;;  %v4242_v28 = vmul.f32 0.00390625, %v4220_v51  ;;  %v9178_v55 = vcombine.high %v4471_v40, %v4475_v15  ;;  %v4482_v30 = vld [vmem:[%s11732_s3 + $0x230] sm:$0xff]  ;;  %v9177_v27 = vcombine.low %v4471_v40, %v4475_v15  ;;  %v4487_v15 = vld [vmem:[%s11732_s3 + $0x258] sm:$0xff] }
 0xad4   : > { %5572 = vmatpush1.bf16.msra.mxu0 %v9161_v29  ;;  %5460 = vmatprep.subr.bf16.mxu1 %v9168_v39  ;;  %v4296_v1 = vmul.f32 %v10563_v4, %v13699_v46  ;;  %v4297_v58 = vmul.f32 %v10563_v4, %v13702_v56  ;;  %v4223_v63 = vpop.xlane.xlu1 %4222  ;;  %v4338_v41 = vmul.f32 %v13818_v14, %v4295_v10  ;;  %v4483_v29 = vld [vmem:[%s11732_s3 + $0x238] sm:$0xff]  ;;  %v4490_v40 = vld [vmem:[%s11732_s3 + $0x270] sm:$0xff] }
 0xad5   : > { %5573 = vmatprep.subr.bf16.mxu0 %v9170_v33  ;;  %5284 = vmatprep.mubr.bf16.mxu1 %v13956_v2  ;;  %v4258_v38 = vadd.f32 1e-05, %v4242_v28  ;;  %v4243_v49 = vmul.f32 0.00390625, %v4223_v63  ;;  %v9175_v46 = vcombine.low %v13944_v13, %v4474_v43  ;;  %v4337_v56 = vmul.f32 %v13810_v45, %v4294_v19  ;;  %v13980_v13 = vld [vmem:[%s11732_s3 + $0x250] sm:$0xff] }
 0xad6   : > { %5397 = vmatprep.mubr.bf16.mxu0 %v13956_v2  ;;  %5285 = vmatmul.mubr.bf16.gmra.mrb[44].mxu1 %v13958_v25  ;;  %v4340_v39 = vmul.f32 %v13818_v14, %v4297_v58  ;;  %v4339_v33 = vmul.f32 %v13810_v45, %v4296_v1  ;;  %v9184_v9 = vcombine.high %v13962_v3, %v4482_v30 }
 0xad7   : > { %5398 = vmatmul.mubr.bf16.gmra.mrb[140].mxu0 %v13958_v25  ;;  %5461 = vmatpush1.bf16.msra.mxu1 %v9167_v31  ;;  %10568 = vrsqrt.f32 %v4258_v38  ;;  %v4259_v48 = vadd.f32 1e-05, %v4243_v49  ;;  %v9186_v11 = vcombine.high %v4479_v26, %v4483_v29  ;;  %v4381_v43 = vadd.f32 %v13826_v8, %v4338_v41  ;;  %v4491_v31 = vld [vmem:[%s11732_s3 + $0x278] sm:$0xff]  ;;  %v4498_v38 = vld [vmem:[%s11732_s3 + $0x2b0] sm:$0xff] }
 0xad8   : > { %5574 = vmatpush1.bf16.msra.mxu0 %v9169_v0  ;;  %5462 = vmatprep.subr.bf16.mxu1 %v9176_v23  ;;  %v4383_v24 = vadd.f32 %v13826_v8, %v4340_v39  ;;  %v4382_v47 = vadd.f32 %v13823_v61, %v4339_v33  ;;  %v4380_v19 = vadd.f32 %v13823_v61, %v4337_v56  ;;  %v4495_v49 = vld [vmem:[%s11732_s3 + $0x298] sm:$0xff] }
 0xad9   : > { %5575 = vmatprep.subr.bf16.mxu0 %v9178_v55  ;;  %v10565_v0 = vpop.eup %10564  ;;  %10570 = vrsqrt.f32 %v4259_v48  ;;  %v9183_v10 = vcombine.low %v13962_v3, %v4482_v30  ;;  %v9185_v51 = vcombine.low %v4479_v26, %v4483_v29  ;;  %v9192_v3 = vcombine.high %v13980_v13, %v4490_v40 }
 0xada   : > { %v4298_v4 = vmul.f32 %v10565_v0, %v13717_v20  ;;  %v4299_v28 = vmul.f32 %v10565_v0, %v13720_v36  ;;  %v4226_v23 = vpop.xlane.xlu0 %4225  ;;  %v13992_v55 = vpack.c.bf16 %v4383_v24, %v4381_v43  ;;  %v13994_v63 = vpack.c.bf16 %v4382_v47, %v4380_v19  ;;  %v13998_v20 = vld [vmem:[%s11732_s3 + $0x290] sm:$0xff] }
 0xadb   : > { %5463 = vmatpush1.bf16.msra.mxu1 %v9175_v46  ;;  %v10567_v1 = vpop.eup %10566  ;;  %v4244_v58 = vmul.f32 0.00390625, %v4226_v23  ;;  %v9194_v41 = vcombine.high %v4487_v15, %v4491_v31  ;;  %v4499_v46 = vld [vmem:[%s11732_s3 + $0x2b8] sm:$0xff]  ;;  %v9193_v39 = vcombine.low %v4487_v15, %v4491_v31  ;;  %v4506_v0 = vld [vmem:[%s11732_s3 + $0x2f0] sm:$0xff] }
 0xadc   : > { %5576 = vmatpush1.bf16.msra.mxu0 %v9177_v27  ;;  %5464 = vmatprep.subr.bf16.mxu1 %v9184_v9  ;;  %v4300_v36 = vmul.f32 %v10567_v1, %v13727_v50  ;;  %v4301_v30 = vmul.f32 %v10567_v1, %v13730_v59  ;;  %v4229_v26 = vpop.xlane.xlu1 %4228  ;;  %v4342_v29 = vmul.f32 %v13818_v14, %v4299_v28  ;;  %v4503_v15 = vld [vmem:[%s11732_s3 + $0x2d8] sm:$0xff] }
 0xadd   : > { %5577 = vmatprep.subr.bf16.mxu0 %v9186_v11  ;;  %5294 = vmatprep.mubr.bf16.mxu1 %v13992_v55  ;;  %v4260_v56 = vadd.f32 1e-05, %v4244_v58  ;;  %v4245_v27 = vmul.f32 0.00390625, %v4229_v26  ;;  %v9191_v50 = vcombine.low %v13980_v13, %v4490_v40  ;;  %v4341_v59 = vmul.f32 %v13810_v45, %v4298_v4  ;;  %v4502_v13 = vld [vmem:[%s11732_s3 + $0x2d0] sm:$0xff]  ;;  %v4507_v31 = vld [vmem:[%s11732_s3 + $0x2f8] sm:$0xff] }
 0xade   : > { %5407 = vmatprep.mubr.bf16.mxu0 %v13992_v55  ;;  %5295 = vmatmul.mubr.bf16.gmra.mrb[48].mxu1 %v13994_v63  ;;  %v4344_v33 = vmul.f32 %v13818_v14, %v4301_v30  ;;  %v4343_v48 = vmul.f32 %v13810_v45, %v4300_v36  ;;  %v9200_v11 = vcombine.high %v13998_v20, %v4498_v38  ;;  %v4514_v26 = vld [vmem:[%s11732_s3 + $0x330] sm:$0xff] }
 0xadf   : > { %5408 = vmatmul.mubr.bf16.gmra.mrb[144].mxu0 %v13994_v63  ;;  %5465 = vmatpush1.bf16.msra.mxu1 %v9183_v10  ;;  %10572 = vrsqrt.f32 %v4260_v56  ;;  %v4261_v9 = vadd.f32 1e-05, %v4245_v27  ;;  %v9202_v43 = vcombine.high %v4495_v49, %v4499_v46  ;;  %v4385_v24 = vadd.f32 %v13826_v8, %v4342_v29  ;;  %v4511_v29 = vld [vmem:[%s11732_s3 + $0x318] sm:$0xff] }
 0xae0   : > { %5578 = vmatpush1.bf16.msra.mxu0 %v9185_v51  ;;  %5466 = vmatprep.subr.bf16.mxu1 %v9192_v3  ;;  %v4387_v47 = vadd.f32 %v13826_v8, %v4344_v33  ;;  %v4386_v40 = vadd.f32 %v13823_v61, %v4343_v48  ;;  %v4384_v10 = vadd.f32 %v13823_v61, %v4341_v59  ;;  %v4518_v59 = vld [vmem:[%s11732_s3 + $0x350] sm:$0xff] }
 0xae1   : > { %5579 = vmatprep.subr.bf16.mxu0 %v9194_v41  ;;  %v10569_v19 = vpop.eup %10568  ;;  %10574 = vrsqrt.f32 %v4261_v9  ;;  %v9199_v51 = vcombine.low %v13998_v20, %v4498_v38  ;;  %v9201_v4 = vcombine.low %v4495_v49, %v4499_v46  ;;  %v9208_v41 = vcombine.high %v4502_v13, %v4506_v0  ;;  %v4510_v20 = vld [vmem:[%s11732_s3 + $0x310] sm:$0xff]  ;;  %v4515_v38 = vld [vmem:[%s11732_s3 + $0x338] sm:$0xff] }
 0xae2   : > { %v4302_v28 = vmul.f32 %v10569_v19, %v13745_v22  ;;  %v4303_v23 = vmul.f32 %v10569_v19, %v13748_v53  ;;  %v14026_v1 = vpack.c.bf16 %v4387_v47, %v4385_v24  ;;  %v14028_v3 = vpack.c.bf16 %v4386_v40, %v4384_v10  ;;  %v4522_v9 = vld [vmem:[%s11732_s3 + $0x370] sm:$0xff] }
 0xae3   : > { %5467 = vmatpush1.bf16.msra.mxu1 %v9191_v50  ;;  %v10571_v58 = vpop.eup %10570  ;;  %v9210_v36 = vcombine.high %v4503_v15, %v4507_v31  ;;  %v9207_v49 = vcombine.low %v4502_v13, %v4506_v0  ;;  %v9216_v27 = vcombine.high %v4510_v20, %v4514_v26  ;;  %v9218_v50 = vcombine.high %v4511_v29, %v4515_v38 }
 0xae4   : > { %5580 = vmatpush1.bf16.msra.mxu0 %v9193_v39  ;;  %5468 = vmatprep.subr.bf16.mxu1 %v9200_v11  ;;  %v4304_v30 = vmul.f32 %v10571_v58, %v13755_v18  ;;  %v4305_v22 = vmul.f32 %v10571_v58, %v13758_v60  ;;  %v4346_v53 = vmul.f32 %v13818_v14, %v4303_v23  ;;  %v4519_v11 = vld [vmem:[%s11732_s3 + $0x358] sm:$0xff]  ;;  %v4530_v58 = vld [vmem:[%s11732_s3 + $0x3b0] sm:$0xff] }
 0xae5   : > { %5581 = vmatprep.subr.bf16.mxu0 %v9202_v43  ;;  %5304 = vmatprep.mubr.bf16.mxu1 %v14026_v1  ;;  %v4345_v18 = vmul.f32 %v13810_v45, %v4302_v28  ;;  %v9209_v60 = vcombine.low %v4503_v15, %v4507_v31  ;;  %v4523_v43 = vld [vmem:[%s11732_s3 + $0x378] sm:$0xff]  ;;  %v9215_v47 = vcombine.low %v4510_v20, %v4514_v26  ;;  %v4526_v28 = vld [vmem:[%s11732_s3 + $0x390] sm:$0xff] }
 0xae6   : > { %5417 = vmatprep.mubr.bf16.mxu0 %v14026_v1  ;;  %5305 = vmatmul.mubr.bf16.gmra.mrb[52].mxu1 %v14028_v3  ;;  %v4348_v46 = vmul.f32 %v13818_v14, %v4305_v22  ;;  %v4347_v56 = vmul.f32 %v13810_v45, %v4304_v30  ;;  %v4389_v39 = vadd.f32 %v13826_v8, %v4346_v53 }
 0xae7   : > { %5418 = vmatmul.mubr.bf16.gmra.mrb[148].mxu0 %v14028_v3  ;;  %5469 = vmatpush1.bf16.msra.mxu1 %v9199_v51  ;;  %v4388_v24 = vadd.f32 %v13823_v61, %v4345_v18  ;;  %v9217_v40 = vcombine.low %v4511_v29, %v4515_v38  ;;  %v9224_v51 = vcombine.high %v4518_v59, %v4522_v9 }
 0xae8   : > { %5582 = vmatpush1.bf16.msra.mxu0 %v9201_v4  ;;  %5470 = vmatprep.subr.bf16.mxu1 %v9208_v41  ;;  %v4391_v33 = vadd.f32 %v13826_v8, %v4348_v46  ;;  %v4390_v48 = vadd.f32 %v13823_v61, %v4347_v56  ;;  %v9226_v4 = vcombine.high %v4519_v11, %v4523_v43  ;;  %v4527_v41 = vld [vmem:[%s11732_s3 + $0x398] sm:$0xff]  ;;  %v4538_v46 = vld [vmem:[%s11732_s3 + $0x3f0] sm:$0xff] }
 0xae9   : > { %5583 = vmatprep.subr.bf16.mxu0 %v9210_v36  ;;  %v10573_v13 = vpop.eup %10572  ;;  %v4531_v36 = vld [vmem:[%s11732_s3 + $0x3b8] sm:$0xff]  ;;  %v9223_v20 = vcombine.low %v4518_v59, %v4522_v9  ;;  %v9232_v53 = vcombine.high %v4526_v28, %v4530_v58  ;;  %v10192_v9 = vld [vmem:[%s11734_s24] ss:$8 sps:$4 sm:$0xff]  }
 0xaea   : > { %v4306_v0 = vmul.f32 %v10573_v13, %v13785_v37  ;;  %v4307_v15 = vmul.f32 %v10573_v13, %v13788_v52  ;;  %v14054_v31 = vpack.c.bf16 %v4391_v33, %v4389_v39  ;;  %v14056_v10 = vpack.c.bf16 %v4390_v48, %v4388_v24  ;;  %v4535_v56 = vld [vmem:[%s11732_s3 + $0x3d8] sm:$0xff]  ;;  %v10194_v48 = vld [vmem:[%s11734_s24 + $0x4] ss:$8 sps:$4 sm:$0xff]   ;;  %v10198_v13 = vld [vmem:[%s11734_s24 + $0x20] ss:$8 sps:$4 sm:$0xff]  }
 0xaeb   : > { %5471 = vmatpush1.bf16.msra.mxu1 %v9207_v49  ;;  %v10575_v19 = vpop.eup %10574  ;;  %v9234_v26 = vcombine.high %v4527_v41, %v4531_v36  ;;  %v9233_v59 = vcombine.low %v4527_v41, %v4531_v36  ;;  %v10203_v24 = vld [vmem:[%s11734_s24 + $0x34] ss:$8 sps:$4 sm:$0xff]   ;;  %v10242_v41 = vld [vmem:[%s11734_s24 + $0x104] ss:$8 sps:$4 sm:$0xff]   ;;  %v10243_v36 = vld [vmem:[%s11734_s24 + $0x300] ss:$8 sps:$4 sm:$0xff]  }
 0xaec   : > { %5584 = vmatpush1.bf16.msra.mxu0 %v9209_v60  ;;  %5472 = vmatprep.subr.bf16.mxu1 %v9216_v27  ;;  %v4308_v23 = vmul.f32 %v10575_v19, %v13795_v32  ;;  %v4309_v37 = vmul.f32 %v10575_v19, %v13798_v42  ;;  %v4350_v52 = vmul.f32 %v13818_v14, %v4307_v15  ;;  %v4534_v60 = vld [vmem:[%s11732_s3 + $0x3d0] sm:$0xff]  ;;  %v4539_v27 = vld [vmem:[%s11732_s3 + $0x3f8] sm:$0xff]  ;;  %v10216_v19 = vld [vmem:[%s11734_s24 + $0x80] ss:$8 sps:$4 sm:$0xff]  }
 0xaed   : > { %5585 = vmatprep.subr.bf16.mxu0 %v9218_v50  ;;  %5314 = vmatprep.mubr.bf16.mxu1 %v14054_v31  ;;  %v4349_v32 = vmul.f32 %v13810_v45, %v4306_v0  ;;  %v9225_v42 = vcombine.low %v4519_v11, %v4523_v43  ;;  %v9231_v50 = vcombine.low %v4526_v28, %v4530_v58  ;;  %v10197_v11 = vld [vmem:[%s11734_s24 + $0x14] ss:$8 sps:$4 sm:$0xff]   ;;  %v10200_v43 = vld [vmem:[%s11734_s24 + $0x24] ss:$8 sps:$4 sm:$0xff]   ;;  %v10210_v0 = vld [vmem:[%s11734_s24 + $0x60] ss:$8 sps:$4 sm:$0xff]  }
 0xaee   : > { %5427 = vmatprep.mubr.bf16.mxu0 %v14054_v31  ;;  %5315 = vmatmul.mubr.bf16.gmra.mrb[56].mxu1 %v14056_v10  ;;  %v4352_v30 = vmul.f32 %v13818_v14, %v4309_v37  ;;  %v4351_v22 = vmul.f32 %v13810_v45, %v4308_v23  ;;  %v4393_v29 = vadd.f32 %v13826_v8, %v4350_v52  ;;  %v10215_v15 = vld [vmem:[%s11734_s24 + $0x74] ss:$8 sps:$4 sm:$0xff]   ;;  %v10228_v23 = vld [vmem:[%s11734_s24 + $0xc0] ss:$8 sps:$4 sm:$0xff]  }
 0xaef   : > { %5428 = vmatmul.mubr.bf16.gmra.mrb[152].mxu0 %v14056_v10  ;;  %5473 = vmatpush1.bf16.msra.mxu1 %v9215_v47  ;;  %v4392_v49 = vadd.f32 %v13823_v61, %v4349_v32  ;;  %v9239_v39 = vcombine.low %v4534_v60, %v4538_v46  ;;  %v9241_v33 = vcombine.low %v4535_v56, %v4539_v27  ;;  %v10204_v47 = vld [vmem:[%s11734_s24 + $0x40] ss:$8 sps:$4 sm:$0xff]   ;;  %v10227_v28 = vld [vmem:[%s11734_s24 + $0xb4] ss:$8 sps:$4 sm:$0xff]  }
 0xaf0   : > { %5586 = vmatpush1.bf16.msra.mxu0 %v9217_v40  ;;  %5474 = vmatprep.subr.bf16.mxu1 %v9224_v51  ;;  %v4395_v38 = vadd.f32 %v13826_v8, %v4352_v30  ;;  %v4394_v18 = vadd.f32 %v13823_v61, %v4351_v22  ;;  %v9240_v61 = vcombine.high %v4534_v60, %v4538_v46  ;;  %v10209_v40 = vld [vmem:[%s11734_s24 + $0x54] ss:$8 sps:$4 sm:$0xff]   ;;  %v10234_v52 = vld [vmem:[%s11734_s24 + $0xe0] ss:$8 sps:$4 sm:$0xff]   ;;  %v10257_v22 = vld [vmem:[%s11734_s24 + $0x324] ss:$8 sps:$4 sm:$0xff]  }
 0xaf1   : > { %5587 = vmatprep.subr.bf16.mxu0 %v9226_v4  ;;  %v9242_v8 = vcombine.high %v4535_v56, %v4539_v27  ;;  %v10221_v51 = vld [vmem:[%s11734_s24 + $0x94] ss:$8 sps:$4 sm:$0xff]   ;;  %v10222_v4 = vld [vmem:[%s11734_s24 + $0xa0] ss:$8 sps:$4 sm:$0xff]   ;;  %v10281_v46 = vld [vmem:[%s11734_s24 + $0x364] ss:$8 sps:$4 sm:$0xff]  }
 0xaf2   : > { %v14080_v14 = vpack.c.bf16 %v4395_v38, %v4393_v29  ;;  %v14082_v45 = vpack.c.bf16 %v4394_v18, %v4392_v49  ;;  %v10233_v37 = vld [vmem:[%s11734_s24 + $0xd4] ss:$8 sps:$4 sm:$0xff]   ;;  %v10255_v30 = vld [vmem:[%s11734_s24 + $0x320] ss:$8 sps:$4 sm:$0xff]   ;;  %v10269_v38 = vld [vmem:[%s11734_s24 + $0x344] ss:$8 sps:$4 sm:$0xff]  }
 0xaf3   : > { %5475 = vmatpush1.bf16.msra.mxu1 %v9223_v20  ;;  %v10239_v58 = vld [vmem:[%s11734_s24 + $0xf4] ss:$8 sps:$4 sm:$0xff]   ;;  %v10245_v20 = vld [vmem:[%s11734_s24 + $0x304] ss:$8 sps:$4 sm:$0xff]   ;;  %v10267_v29 = vld [vmem:[%s11734_s24 + $0x340] ss:$8 sps:$4 sm:$0xff]  }
 0xaf4   : > { %5588 = vmatpush1.bf16.msra.mxu0 %v9225_v42  ;;  %5476 = vmatprep.subr.bf16.mxu1 %v9232_v53  ;;  %v10251_v32 = vld [vmem:[%s11734_s24 + $0x314] ss:$8 sps:$4 sm:$0xff]   ;;  %v10249_v42 = vld [vmem:[%s11734_s24 + $0x310] ss:$8 sps:$4 sm:$0xff]   ;;  %v10279_v60 = vld [vmem:[%s11734_s24 + $0x360] ss:$8 sps:$4 sm:$0xff]  }
 0xaf5   : > { %5589 = vmatprep.subr.bf16.mxu0 %v9234_v26  ;;  %5324 = vmatprep.mubr.bf16.mxu1 %v14080_v14  ;;  %v10263_v53 = vld [vmem:[%s11734_s24 + $0x334] ss:$8 sps:$4 sm:$0xff]   ;;  %v10261_v26 = vld [vmem:[%s11734_s24 + $0x330] ss:$8 sps:$4 sm:$0xff]  }
 0xaf6   : > { %5437 = vmatprep.mubr.bf16.mxu0 %v14080_v14  ;;  %5325 = vmatmul.mubr.bf16.gmra.mrb[60].mxu1 %v14082_v45  ;;  %v10275_v49 = vld [vmem:[%s11734_s24 + $0x354] ss:$8 sps:$4 sm:$0xff]   ;;  %v10273_v18 = vld [vmem:[%s11734_s24 + $0x350] ss:$8 sps:$4 sm:$0xff]  }
 0xaf7   : > { %5438 = vmatmul.mubr.bf16.gmra.mrb[156].mxu0 %v14082_v45  ;;  %5477 = vmatpush1.bf16.msra.mxu1 %v9231_v50  ;;  %v10287_v56 = vld [vmem:[%s11734_s24 + $0x374] ss:$8 sps:$4 sm:$0xff]   ;;  %v10285_v27 = vld [vmem:[%s11734_s24 + $0x370] ss:$8 sps:$4 sm:$0xff]   ;;  %v17113_v50 = vsub.s32 2, %v12718_v57 }
 0xaf8   : > { %5480 = vmatprep.mubr.bf16.mxu1 %v13844_v62  ;;  %5590 = vmatpush1.bf16.msra.mxu0 %v9233_v59 }
 0xaf9   : > { %5593 = vmatprep.mubr.bf16.mxu0 %v13844_v62  ;;  %5478 = vmatprep.subr.bf16.mxu1 %v9240_v61  ;;  %v10195_v62 = vld [vmem:[%s11734_s24 + $0x10] ss:$8 sps:$4 sm:$0xff]   ;;  %v10291_v61 = vld [vmem:[%s11734_s24 + $0x380] ss:$8 sps:$4 sm:$0xff]  }
 0xafa   : > { %5591 = vmatprep.subr.bf16.mxu0 %v9242_v8 }
 0xafb   : > { %5479 = vmatpush1.bf16.msra.mxu1 %v9239_v39  ;;  %v10293_v39 = vld [vmem:[%s11734_s24 + $0x384] ss:$8 sps:$4 sm:$0xff]  }
 0xafc   : > { %5592 = vmatpush1.bf16.msra.mxu0 %v9241_v33  ;;  %7670 = vmatprep.subr.bf16.mxu1 %v10194_v48  ;;  %v10299_v33 = vld [vmem:[%s11734_s24 + $0x394] ss:$8 sps:$4 sm:$0xff]  }
 0xafd   : > { %8009 = vmatprep.subr.bf16.mxu0 %v10245_v20 }
 0xafe   : > { %5481 = vmatmul.mubr.bf16.vlgmr.msra.gmra.mrb[64].mxu1 %v13846_v35 }
 0xaff   : > { %5594 = vmatmul.mubr.bf16.vlgmr.msra.gmra.mrb[160].mxu0 %v13846_v35  ;;  %5490 = vmatprep.mubr.bf16.mxu1 %v13884_v44  ;;  %v10201_v35 = vld [vmem:[%s11734_s24 + $0x30] ss:$8 sps:$4 sm:$0xff]  }
 0xb00   : > { %5603 = vmatprep.mubr.bf16.mxu0 %v13884_v44  ;;  %7671 = vmatpush1.bf16.msra.mxu1 %v10192_v9  ;;  %v10206_v44 = vld [vmem:[%s11734_s24 + $0x44] ss:$8 sps:$4 sm:$0xff]  }
 0xb01   : > { %7672 = vmatprep.subr.bf16.mxu1 %v10197_v11  ;;  %8010 = vmatpush1.bf16.msra.mxu0 %v10243_v36  ;;  %v17114_v11 = vsub.s32 3, %v12718_v57 }
 0xb02   : > { %8011 = vmatprep.subr.bf16.mxu0 %v10251_v32 }
 0xb04   : > { %7673 = vmatpush1.bf16.msra.mxu1 %v10195_v62 }
 0xb05   : > { %7674 = vmatprep.subr.bf16.mxu1 %v10200_v43  ;;  %8012 = vmatpush1.bf16.msra.mxu0 %v10249_v42 }
 0xb06   : > { %5491 = vmatmul.mubr.bf16.gmra.mrb[68].mxu1 %v13886_v16  ;;  %8013 = vmatprep.subr.bf16.mxu0 %v10257_v22 }
 0xb07   : > { %5604 = vmatmul.mubr.bf16.gmra.mrb[164].mxu0 %v13886_v16  ;;  %5500 = vmatprep.mubr.bf16.mxu1 %v13920_v21  ;;  %v10207_v16 = vld [vmem:[%s11734_s24 + $0x50] ss:$8 sps:$4 sm:$0xff]  }
 0xb08   : > { %5613 = vmatprep.mubr.bf16.mxu0 %v13920_v21  ;;  %7675 = vmatpush1.bf16.msra.mxu1 %v10198_v13  ;;  %v10212_v21 = vld [vmem:[%s11734_s24 + $0x64] ss:$8 sps:$4 sm:$0xff]  }
 0xb09   : > { %7676 = vmatprep.subr.bf16.mxu1 %v10203_v24  ;;  %8014 = vmatpush1.bf16.msra.mxu0 %v10255_v30 }
 0xb0a   : > { %8015 = vmatprep.subr.bf16.mxu0 %v10263_v53 }
 0xb0c   : > { %7677 = vmatpush1.bf16.msra.mxu1 %v10201_v35 }
 0xb0d   : > { %7678 = vmatprep.subr.bf16.mxu1 %v10206_v44  ;;  %8016 = vmatpush1.bf16.msra.mxu0 %v10261_v26  ;;  %v10297_v44 = vld [vmem:[%s11734_s24 + $0x390] ss:$8 sps:$4 sm:$0xff]  }
 0xb0e   : > { %5501 = vmatmul.mubr.bf16.gmra.mrb[72].mxu1 %v13922_v17  ;;  %8017 = vmatprep.subr.bf16.mxu0 %v10269_v38 }
 0xb0f   : > { %5614 = vmatmul.mubr.bf16.gmra.mrb[168].mxu0 %v13922_v17  ;;  %5510 = vmatprep.mubr.bf16.mxu1 %v13956_v2  ;;  %v10213_v17 = vld [vmem:[%s11734_s24 + $0x70] ss:$8 sps:$4 sm:$0xff]  }
 0xb10   : > { %5623 = vmatprep.mubr.bf16.mxu0 %v13956_v2  ;;  %7679 = vmatpush1.bf16.msra.mxu1 %v10204_v47  ;;  %v10218_v2 = vld [vmem:[%s11734_s24 + $0x84] ss:$8 sps:$4 sm:$0xff]  }
 0xb11   : > { %7680 = vmatprep.subr.bf16.mxu1 %v10209_v40  ;;  %8018 = vmatpush1.bf16.msra.mxu0 %v10267_v29 }
 0xb12   : > { %8019 = vmatprep.subr.bf16.mxu0 %v10275_v49 }
 0xb14   : > { %7681 = vmatpush1.bf16.msra.mxu1 %v10207_v16 }
 0xb15   : > { %7682 = vmatprep.subr.bf16.mxu1 %v10212_v21  ;;  %8020 = vmatpush1.bf16.msra.mxu0 %v10273_v18  ;;  %v4560_v21 = vsub.s32 4, %v12718_v57 }
 0xb16   : > { %5511 = vmatmul.mubr.bf16.gmra.mrb[76].mxu1 %v13958_v25  ;;  %8021 = vmatprep.subr.bf16.mxu0 %v10281_v46 }
 0xb17   : > { %5624 = vmatmul.mubr.bf16.gmra.mrb[172].mxu0 %v13958_v25  ;;  %5520 = vmatprep.mubr.bf16.mxu1 %v13992_v55  ;;  %v10219_v25 = vld [vmem:[%s11734_s24 + $0x90] ss:$8 sps:$4 sm:$0xff]  }
 0xb18   : > { %5633 = vmatprep.mubr.bf16.mxu0 %v13992_v55  ;;  %7683 = vmatpush1.bf16.msra.mxu1 %v10210_v0  ;;  %v10224_v55 = vld [vmem:[%s11734_s24 + $0xa4] ss:$8 sps:$4 sm:$0xff]  }
 0xb19   : > { %7684 = vmatprep.subr.bf16.mxu1 %v10215_v15  ;;  %8022 = vmatpush1.bf16.msra.mxu0 %v10279_v60 }
 0xb1a   : > { %8023 = vmatprep.subr.bf16.mxu0 %v10287_v56 }
 0xb1c   : > { %7685 = vmatpush1.bf16.msra.mxu1 %v10213_v17  ;;  %v4568_v17 = vsub.s32 6, %v12718_v57 }
 0xb1d   : > { %7686 = vmatprep.subr.bf16.mxu1 %v10218_v2  ;;  %8024 = vmatpush1.bf16.msra.mxu0 %v10285_v27  ;;  %v4564_v2 = vsub.s32 5, %v12718_v57 }
 0xb1e   : > { %5521 = vmatmul.mubr.bf16.gmra.mrb[80].mxu1 %v13994_v63  ;;  %8025 = vmatprep.subr.bf16.mxu0 %v10293_v39 }
 0xb1f   : > { %5634 = vmatmul.mubr.bf16.gmra.mrb[176].mxu0 %v13994_v63  ;;  %5530 = vmatprep.mubr.bf16.mxu1 %v14026_v1  ;;  %v10225_v63 = vld [vmem:[%s11734_s24 + $0xb0] ss:$8 sps:$4 sm:$0xff]  }
 0xb20   : > { %5643 = vmatprep.mubr.bf16.mxu0 %v14026_v1  ;;  %7687 = vmatpush1.bf16.msra.mxu1 %v10216_v19  ;;  %v10230_v1 = vld [vmem:[%s11734_s24 + $0xc4] ss:$8 sps:$4 sm:$0xff]  }
 0xb21   : > { %7688 = vmatprep.subr.bf16.mxu1 %v10221_v51  ;;  %8026 = vmatpush1.bf16.msra.mxu0 %v10291_v61 }
 0xb22   : > { %8027 = vmatprep.subr.bf16.mxu0 %v10299_v33 }
 0xb24   : > { %7689 = vmatpush1.bf16.msra.mxu1 %v10219_v25 }
 0xb25   : > { %7690 = vmatprep.subr.bf16.mxu1 %v10224_v55  ;;  %8028 = vmatpush1.bf16.msra.mxu0 %v10297_v44 }
 0xb26   : > { %5531 = vmatmul.mubr.bf16.gmra.mrb[84].mxu1 %v14028_v3 }
 0xb27   : > { %5644 = vmatmul.mubr.bf16.gmra.mrb[180].mxu0 %v14028_v3  ;;  %5540 = vmatprep.mubr.bf16.mxu1 %v14054_v31  ;;  %v10231_v3 = vld [vmem:[%s11734_s24 + $0xd0] ss:$8 sps:$4 sm:$0xff]  }
 0xb28   : > { %5653 = vmatprep.mubr.bf16.mxu0 %v14054_v31  ;;  %7691 = vmatpush1.bf16.msra.mxu1 %v10222_v4  ;;  %v10236_v31 = vld [vmem:[%s11734_s24 + $0xe4] ss:$8 sps:$4 sm:$0xff]  }
 0xb29   : > { %7692 = vmatprep.subr.bf16.mxu1 %v10227_v28  ;;  %v4572_v28 = vsub.s32 7, %v12718_v57 }
 0xb2c   : > { %7693 = vmatpush1.bf16.msra.mxu1 %v10225_v63 }
 0xb2d   : > { %7694 = vmatprep.subr.bf16.mxu1 %v10230_v1 }
 0xb2e   : > { %5541 = vmatmul.mubr.bf16.gmra.mrb[88].mxu1 %v14056_v10 }
 0xb2f   : > { %5654 = vmatmul.mubr.bf16.gmra.mrb[184].mxu0 %v14056_v10  ;;  %5550 = vmatprep.mubr.bf16.mxu1 %v14080_v14  ;;  %v10237_v10 = vld [vmem:[%s11734_s24 + $0xf0] ss:$8 sps:$4 sm:$0xff]  }
 0xb30   : > { %5663 = vmatprep.mubr.bf16.mxu0 %v14080_v14  ;;  %7695 = vmatpush1.bf16.msra.mxu1 %v10228_v23  ;;  %v4540_v14 = vld [vmem:[%s11724_s15] sm:$0xff] }
 0xb31   : > { %7696 = vmatprep.subr.bf16.mxu1 %v10233_v37  ;;  %v14175_v59 = vrot.slane %v4540_v14, %v17113_v50  ;;  %v14179_v8 = vrot.slane %v4540_v14, %v12724_v34  ;;  %v14185_v62 = vrot.slane %v4540_v14, %v17114_v11  ;;  %v14214_v30 = vrot.slane %v4540_v14, %v4564_v2 }
 0xb32   : > { %v14218_v49 = vrot.slane %v4540_v14, %v4572_v28 }
 0xb33   : > { %17119 = vst [vmem:[#allocation59_spill] sm:$0xff] %v14214_v30 }
 0xb34   : > { %7697 = vmatpush1.bf16.msra.mxu1 %v10231_v3  ;;  %17120 = vst [vmem:[#allocation60_spill] sm:$0xff] %v14218_v49 }
 0xb35   : > { %7698 = vmatprep.subr.bf16.mxu1 %v10236_v31  ;;  %v14206_v31 = vrot.slane %v4540_v14, %v4560_v21 }
 0xb36   : > { %5551 = vmatmul.mubr.bf16.gmra.mrb[92].mxu1 %v14082_v45 }
 0xb37   : > { %5664 = vmatmul.mubr.bf16.gmra.mrb[188].mxu0 %v14082_v45  ;;  %v14171_v45 = vrot.slane %v4540_v14, %v12721_v5  ;;  %17116 = vst [vmem:[#allocation56_spill] sm:$0xff] %v14206_v31 }
 0xb38   : > { %7699 = vmatpush1.bf16.msra.mxu1 %v10234_v52 }
 0xb39   : > { %7700 = vmatprep.subr.bf16.mxu1 %v10239_v58 }
 0xb3c   : > { %7701 = vmatpush1.bf16.msra.mxu1 %v10237_v10 }
 0xb3d   : > { %7783 = vmatprep.subr.bf16.mxu1 %v10242_v41  ;;  %v14208_v41 = vrot.slane %v4540_v14, %v4568_v17 }
 0xb3f   : > { %17117 = vst [vmem:[#allocation57_spill] sm:$0xff] %v14208_v41 }
 0xb90   : > { %v5256_v48 = vpop.f32.mrb[32].mxu1  ;;  %v5369_v9 = vpop.f32.mrb[128].mxu0 }
 0xb91   : > { %v5257_v43 = vadd.f32 %v5256_v48, %v14171_v45  ;;  %v5370_v13 = vadd.f32 %v5369_v9, %v14175_v59  ;;  %v5258_v24 = vpop.f32.mrb[33].mxu1  ;;  %v5371_v35 = vpop.f32.mrb[129].mxu0 }
 0xb92   : > { %v14191_v47 = vadd.f32 %v5258_v24, %v14179_v8  ;;  %v5260_v40 = vpop.f32.mrb[34].mxu1  ;;  %v5373_v16 = vpop.f32.mrb[130].mxu0  ;;  %v14197_v19 = vadd.f32 %v5371_v35, %v14185_v62 }
 0xb93   : > { %v5802_v0 = vmul.f32 0.044715, %v5257_v43  ;;  %v5804_v15 = vmul.f32 0.044715, %v5370_v13  ;;  %v5261_v51 = vadd.f32 %v5260_v40, %v14171_v45  ;;  %v5374_v25 = vadd.f32 %v5373_v16, %v14175_v59  ;;  %v5262_v55 = vpop.f32.mrb[35].mxu1  ;;  %v5375_v4 = vpop.f32.mrb[131].mxu0 }
 0xb94   : > { %17115 = vst [vmem:[#allocation55_spill] sm:$0xff] %v14197_v19  ;;  %v5803_v23 = vmul.f32 0.044715, %v14191_v47  ;;  %v14204_v37 = vadd.f32 %v5262_v55, %v14179_v8  ;;  %v5805_v36 = vmul.f32 0.044715, %v14197_v19  ;;  %v14212_v57 = vadd.f32 %v5375_v4, %v14185_v62 }
 0xb95   : > { %v5930_v63 = vmul.f32 %v5802_v0, %v5257_v43  ;;  %v5932_v1 = vmul.f32 %v5804_v15, %v5370_v13  ;;  %v5810_v3 = vmul.f32 0.044715, %v5261_v51  ;;  %v5812_v10 = vmul.f32 0.044715, %v5374_v25 }
 0xb96   : > { %17118 = vst [vmem:[#allocation58_spill] sm:$0xff] %v14212_v57  ;;  %v5931_v22 = vmul.f32 %v5803_v23, %v14191_v47  ;;  %v5811_v26 = vmul.f32 0.044715, %v14204_v37  ;;  %v14226_v61 = vmul.f32 0.5, %v5257_v43  ;;  %v14228_v39 = vmul.f32 0.5, %v5370_v13 }
 0xb97   : > { %v6058_v52 = vmul.f32 %v5930_v63, %v5257_v43  ;;  %v6060_v58 = vmul.f32 %v5932_v1, %v5370_v13  ;;  %v5938_v20 = vmul.f32 %v5810_v3, %v5261_v51  ;;  %v5940_v53 = vmul.f32 %v5812_v10, %v5374_v25  ;;  %v10311_v10 = vld [vmem:[%s11734_s24 + $0x3b4] ss:$8 sps:$4 sm:$0xff]  }
 0xb98   : > { %17122 = vst [vmem:[#allocation62_spill] sm:$0xff] %v14228_v39  ;;  %v5933_v11 = vmul.f32 %v5805_v36, %v14197_v19  ;;  %v14231_v24 = vmul.f32 0.5, %v5261_v51  ;;  %v5813_v44 = vmul.f32 0.044715, %v14212_v57  ;;  %v5939_v40 = vmul.f32 %v5811_v26, %v14204_v37  ;;  %v10309_v26 = vld [vmem:[%s11734_s24 + $0x3b0] ss:$8 sps:$4 sm:$0xff]  }
 0xb99   : > { %v5266_v32 = vpop.f32.mrb[36].mxu1  ;;  %v5379_v42 = vpop.f32.mrb[132].mxu0  ;;  %v6186_v18 = vadd.f32 %v6058_v52, %v5257_v43  ;;  %v6066_v60 = vmul.f32 %v5938_v20, %v5261_v51  ;;  %v6188_v33 = vadd.f32 %v6060_v58, %v5370_v13  ;;  %v6068_v48 = vmul.f32 %v5940_v53, %v5374_v25  ;;  %v10303_v13 = vld [vmem:[%s11734_s24 + $0x3a0] ss:$8 sps:$4 sm:$0xff]  }
 0xb9a   : > { %v5268_v29 = vpop.f32.mrb[37].mxu1  ;;  %v5381_v38 = vpop.f32.mrb[133].mxu0  ;;  %v14221_v46 = vadd.f32 %v5266_v32, %v14171_v45  ;;  %v14224_v56 = vadd.f32 %v5379_v42, %v14175_v59  ;;  %v14242_v15 = vmul.f32 %v5931_v22, %v14191_v47  ;;  %v14244_v17 = vmul.f32 0.5, %v5374_v25 }
 0xb9b   : > { %v5270_v27 = vpop.f32.mrb[38].mxu1  ;;  %v5383_v50 = vpop.f32.mrb[134].mxu0  ;;  %v6194_v35 = vadd.f32 %v6066_v60, %v5261_v51  ;;  %v14238_v21 = vadd.f32 %v5268_v29, %v14179_v8  ;;  %v6314_v0 = vmul.f32 0.7978846, %v6186_v18  ;;  %v6196_v2 = vadd.f32 %v6068_v48, %v5374_v25  ;;  %v10305_v51 = vld [vmem:[%s11734_s24 + $0x3a4] ss:$8 sps:$4 sm:$0xff]  }
 0xb9c   : > { %17121 = vst [vmem:[#allocation61_spill] sm:$0xff] %v14224_v56  ;;  %v5272_v14 = vpop.f32.mrb[39].mxu1  ;;  %v5385_v9 = vpop.f32.mrb[135].mxu0  ;;  %v5818_v16 = vmul.f32 0.044715, %v14221_v46  ;;  %17123 = vst [vmem:[#allocation63_spill] sm:$0xff] %v14244_v17  ;;  %v14248_v28 = vadd.f32 %v5381_v38, %v14185_v62  ;;  %v14251_v63 = vadd.f32 %v5270_v27, %v14171_v45  ;;  %v14254_v1 = vmul.f32 %v5933_v11, %v14197_v19 }
 0xb9d   : > { %v5820_v43 = vmul.f32 0.044715, %v14224_v56  ;;  %v6316_v55 = vmul.f32 0.7978846, %v6188_v33  ;;  %v6322_v4 = vmul.f32 0.7978846, %v6194_v35  ;;  %v5941_v23 = vmul.f32 %v5813_v44, %v14212_v57  ;;  %8029 = vmatprep.subr.bf16.mxu0 %v10305_v51 }
 0xb9e   : > { %17124 = vst [vmem:[#allocation64_spill] sm:$0xff] %v14248_v28  ;;  %17125 = vst [vmem:[#allocation65_spill] sm:$0xff] %v14254_v1  ;;  %v5819_v3 = vmul.f32 0.044715, %v14238_v21  ;;  %v14259_v52 = vadd.f32 %v5383_v50, %v14175_v59  ;;  %v14263_v36 = vmul.f32 %v5939_v40, %v14204_v37  ;;  %v5946_v20 = vmul.f32 %v5818_v16, %v14221_v46 }
 0xb9f   : > { %v5948_v32 = vmul.f32 %v5820_v43, %v14224_v56  ;;  %v5821_v42 = vmul.f32 0.044715, %v14248_v28  ;;  %8030 = vmatpush1.bf16.msra.mxu0 %v10303_v13  ;;  %v6324_v29 = vmul.f32 0.7978846, %v6196_v2  ;;  %v14270_v38 = vadd.f32 %v5272_v14, %v14179_v8 }
 0xba0   : > { %17126 = vst [vmem:[#allocation66_spill] sm:$0xff] %v14259_v52  ;;  %v14273_v18 = vadd.f32 %v5385_v9, %v14185_v62  ;;  %8031 = vmatprep.subr.bf16.mxu0 %v10311_v10  ;;  %10576 = vtanh.f32 %v6314_v0  ;;  %v5826_v33 = vmul.f32 0.044715, %v14251_v63  ;;  %v5828_v48 = vmul.f32 0.044715, %v14259_v52 }
 0xba1   : > { %v5276_v25 = vpop.f32.mrb[40].mxu1  ;;  %10578 = vtanh.f32 %v6316_v55  ;;  %v14284_v9 = vmul.f32 %v5941_v23, %v14212_v57  ;;  %v5947_v44 = vmul.f32 %v5819_v3, %v14238_v21  ;;  %v5827_v40 = vmul.f32 0.044715, %v14270_v38 }
 0xba2   : > { %v5389_v58 = vpop.f32.mrb[136].mxu0  ;;  %v5278_v22 = vpop.f32.mrb[41].mxu1  ;;  %17127 = vst [vmem:[#allocation67_spill] sm:$0xff] %v14273_v18  ;;  %v14276_v60 = vadd.f32 %v5276_v25, %v14171_v45  ;;  %v5949_v16 = vmul.f32 %v5821_v42, %v14248_v28  ;;  %v5829_v43 = vmul.f32 0.044715, %v14273_v18  ;;  %10580 = vtanh.f32 %v6322_v4 }
 0xba3   : > { %v5391_v53 = vpop.f32.mrb[137].mxu0  ;;  %v5280_v27 = vpop.f32.mrb[42].mxu1  ;;  %v14281_v11 = vadd.f32 %v5389_v58, %v14175_v59  ;;  %17129 = vst [vmem:[#allocation69_spill] sm:$0xff] %v14284_v9  ;;  %v14292_v0 = vadd.f32 %v5278_v22, %v14179_v8  ;;  %8032 = vmatpush1.bf16.msra.mxu0 %v10309_v26  ;;  %v14295_v2 = vmul.f32 %v5946_v20, %v14221_v46  ;;  %10582 = vtanh.f32 %v6324_v29 }
 0xba4   : > { %v5393_v50 = vpop.f32.mrb[138].mxu0  ;;  %v5282_v35 = vpop.f32.mrb[43].mxu1  ;;  %v5834_v13 = vmul.f32 0.044715, %v14276_v60  ;;  %v14298_v51 = vmul.f32 %v5948_v32, %v14224_v56  ;;  %v5954_v23 = vmul.f32 %v5826_v33, %v14251_v63  ;;  %v5956_v3 = vmul.f32 %v5828_v48, %v14259_v52 }
 0xba5   : > { %17128 = vst [vmem:[#allocation68_spill] sm:$0xff] %v14281_v11  ;;  %v5395_v14 = vpop.f32.mrb[139].mxu0  ;;  %v5836_v55 = vmul.f32 0.044715, %v14281_v11  ;;  %v14304_v25 = vadd.f32 %v5391_v53, %v14185_v62  ;;  %v5955_v58 = vmul.f32 %v5827_v40, %v14270_v38  ;;  %v5835_v4 = vmul.f32 0.044715, %v14292_v0 }
 0xba6   : > { %17130 = vst [vmem:[#allocation70_spill] sm:$0xff] %v14298_v51  ;;  %v14309_v10 = vadd.f32 %v5280_v27, %v14171_v45  ;;  %v14312_v20 = vadd.f32 %v5393_v50, %v14175_v59  ;;  %v14315_v22 = vmul.f32 %v5947_v44, %v14238_v21  ;;  %v14318_v26 = vmul.f32 %v5949_v16, %v14248_v28  ;;  %v10317_v28 = vld [vmem:[%s11734_s24 + $0x3c4] ss:$8 sps:$4 sm:$0xff]  }
 0xba7   : > { %17131 = vst [vmem:[#allocation71_spill] sm:$0xff] %v14304_v25  ;;  %v5957_v53 = vmul.f32 %v5829_v43, %v14273_v18  ;;  %v5962_v29 = vmul.f32 %v5834_v13, %v14276_v60  ;;  %v5964_v27 = vmul.f32 %v5836_v55, %v14281_v11  ;;  %v14324_v40 = vadd.f32 %v5282_v35, %v14179_v8 }
 0xba8   : > { %17132 = vst [vmem:[#allocation72_spill] sm:$0xff] %v14312_v20  ;;  %17133 = vst [vmem:[#allocation73_spill] sm:$0xff] %v14318_v26  ;;  %v14327_v50 = vadd.f32 %v5395_v14, %v14185_v62  ;;  %v14333_v54 = vmul.f32 %v5954_v23, %v14251_v63  ;;  %v14336_v43 = vmul.f32 %v5956_v3, %v14259_v52  ;;  %v5837_v13 = vmul.f32 0.044715, %v14304_v25  ;;  %v10315_v26 = vld [vmem:[%s11734_s24 + $0x3c0] ss:$8 sps:$4 sm:$0xff]  }
 0xba9   : > { %v5286_v32 = vpop.f32.mrb[44].mxu1  ;;  %v5963_v12 = vmul.f32 %v5835_v4, %v14292_v0  ;;  %v5842_v23 = vmul.f32 0.044715, %v14309_v10  ;;  %v5844_v6 = vmul.f32 0.044715, %v14312_v20  ;;  %v14362_v4 = vmul.f32 %v5962_v29, %v14276_v60  ;;  %8033 = vmatprep.subr.bf16.mxu0 %v10317_v28 }
 0xbaa   : > { %v5399_v42 = vpop.f32.mrb[140].mxu0  ;;  %v5288_v33 = vpop.f32.mrb[45].mxu1  ;;  %17134 = vst [vmem:[#allocation74_spill] sm:$0xff] %v14327_v50  ;;  %v14330_v44 = vadd.f32 %v5286_v32, %v14171_v45  ;;  %17136 = vst [vmem:[#allocation76_spill] sm:$0xff] %v14336_v43  ;;  %v14343_v32 = vmul.f32 %v5955_v58, %v14270_v38  ;;  %v5843_v34 = vmul.f32 0.044715, %v14324_v40  ;;  %v14359_v58 = vmul.f32 %v5957_v53, %v14273_v18 }
 0xbab   : > { %v5401_v48 = vpop.f32.mrb[141].mxu0  ;;  %v5290_v7 = vpop.f32.mrb[46].mxu1  ;;  %v14340_v55 = vadd.f32 %v5399_v42, %v14175_v59  ;;  %v5845_v42 = vmul.f32 0.044715, %v14327_v50  ;;  %v14354_v43 = vadd.f32 %v5288_v33, %v14179_v8  ;;  %17140 = vst [vmem:[#allocation80_spill] sm:$0xff] %v14362_v4  ;;  %v14365_v51 = vmul.f32 %v5964_v27, %v14281_v11  ;;  %8034 = vmatpush1.bf16.msra.mxu0 %v10315_v26 }
 0xbac   : > { %17135 = vst [vmem:[#allocation75_spill] sm:$0xff] %v14330_v44  ;;  %v5403_v16 = vpop.f32.mrb[142].mxu0  ;;  %v5292_v35 = vpop.f32.mrb[47].mxu1  ;;  %v5850_v5 = vmul.f32 0.044715, %v14330_v44  ;;  %17139 = vst [vmem:[#allocation79_spill] sm:$0xff] %v14359_v58  ;;  %v5965_v33 = vmul.f32 %v5837_v13, %v14304_v25  ;;  %v14373_v39 = vadd.f32 %v5401_v48, %v14185_v62  ;;  %v14376_v53 = vadd.f32 %v5290_v7, %v14171_v45 }
 0xbad   : > { %17137 = vst [vmem:[#allocation77_spill] sm:$0xff] %v14340_v55  ;;  %v5405_v14 = vpop.f32.mrb[143].mxu0  ;;  %v14348_v3 = vpop.eup %10576  ;;  %17141 = vst [vmem:[#allocation81_spill] sm:$0xff] %v14365_v51  ;;  %v5852_v56 = vmul.f32 0.044715, %v14340_v55  ;;  %v14381_v27 = vmul.f32 %v5963_v12, %v14292_v0  ;;  %v5970_v51 = vmul.f32 %v5842_v23, %v14309_v10  ;;  %v5972_v11 = vmul.f32 %v5844_v6, %v14312_v20 }
 0xbae   : > { %v14356_v52 = vpop.eup %10578  ;;  %v5851_v17 = vmul.f32 0.044715, %v14354_v43  ;;  %17142 = vst [vmem:[#allocation82_spill] sm:$0xff] %v14373_v39  ;;  %17143 = vst [vmem:[#allocation83_spill] sm:$0xff] %v14376_v53  ;;  %v14386_v58 = vadd.f32 %v5403_v16, %v14175_v59  ;;  %v10321_v48 = vld [vmem:[%s11734_s24 + $0x3d0] ss:$8 sps:$4 sm:$0xff]   ;;  %v5971_v7 = vmul.f32 %v5843_v34, %v14324_v40  ;;  %v5973_v57 = vmul.f32 %v5845_v42, %v14327_v50 }
 0xbaf   : > { %17138 = vst [vmem:[#allocation78_spill] sm:$0xff] %v14356_v52  ;;  %v14378_v29 = vpop.eup %10580  ;;  %v10323_v52 = vld [vmem:[%s11734_s24 + $0x3d4] ss:$8 sps:$4 sm:$0xff]   ;;  %v5853_v12 = vmul.f32 0.044715, %v14373_v39  ;;  %v5978_v16 = vmul.f32 %v5850_v5, %v14330_v44  ;;  %v5980_v19 = vmul.f32 %v5852_v56, %v14340_v55  ;;  %v14400_v49 = vadd.f32 %v5292_v35, %v14179_v8 }
 0xbb0   : > { %17144 = vst [vmem:[#allocation84_spill] sm:$0xff] %v14386_v58  ;;  %v14390_v9 = vpop.eup %10582  ;;  %v5858_v23 = vmul.f32 0.044715, %v14376_v53  ;;  %v5860_v28 = vmul.f32 0.044715, %v14386_v58  ;;  %8035 = vmatprep.subr.bf16.mxu0 %v10323_v52  ;;  %v14403_v42 = vmul.f32 %v5965_v33, %v14304_v25  ;;  %v5979_v30 = vmul.f32 %v5851_v17, %v14354_v43 }
 0xbb1   : > { %v5296_v13 = vpop.f32.mrb[48].mxu1  ;;  %17145 = vst [vmem:[#allocation85_spill] sm:$0xff] %v14390_v9  ;;  %v14407_v41 = vadd.f32 %v5405_v14, %v14185_v62  ;;  %v5981_v31 = vmul.f32 %v5853_v12, %v14373_v39  ;;  %v14419_v33 = vmul.f32 %v5970_v51, %v14309_v10  ;;  %v14422_v17 = vmul.f32 %v5972_v11, %v14312_v20 }
 0xbb2   : > { %v5409_v18 = vpop.f32.mrb[144].mxu0  ;;  %v5298_v1 = vpop.f32.mrb[49].mxu1  ;;  %17146 = vst [vmem:[#allocation86_spill] sm:$0xff] %v14403_v42  ;;  %v14410_v5 = vadd.f32 %v5296_v13, %v14171_v45  ;;  %v5986_v35 = vmul.f32 %v5858_v23, %v14376_v53  ;;  %v5988_v4 = vmul.f32 %v5860_v28, %v14386_v58  ;;  %v5859_v14 = vmul.f32 0.044715, %v14400_v49  ;;  %8036 = vmatpush1.bf16.msra.mxu0 %v10321_v48 }
 0xbb3   : > { %v5411_v6 = vpop.f32.mrb[145].mxu0  ;;  %v5300_v9 = vpop.f32.mrb[50].mxu1  ;;  %17147 = vst [vmem:[#allocation87_spill] sm:$0xff] %v14407_v41  ;;  %v14416_v52 = vadd.f32 %v5409_v18, %v14175_v59  ;;  %17150 = vst [vmem:[#allocation90_spill] sm:$0xff] %v14422_v17  ;;  %v14426_v13 = vadd.f32 %v5298_v1, %v14179_v8  ;;  %v14429_v12 = vmul.f32 %v5971_v7, %v14324_v40  ;;  %v5861_v28 = vmul.f32 0.044715, %v14407_v41 }
 0xbb4   : > { %v5413_v34 = vpop.f32.mrb[146].mxu0  ;;  %17148 = vst [vmem:[#allocation88_spill] sm:$0xff] %v14410_v5  ;;  %v5302_v56 = vpop.f32.mrb[51].mxu1  ;;  %v14432_v23 = vmul.f32 %v5973_v57, %v14327_v50  ;;  %v14435_v18 = vmul.f32 %v5978_v16, %v14330_v44  ;;  %v14438_v51 = vmul.f32 %v5980_v19, %v14340_v55  ;;  %v14441_v11 = vmul.f32 %v5979_v30, %v14354_v43 }
 0xbb5   : > { %v5415_v26 = vpop.f32.mrb[147].mxu0  ;;  %17149 = vst [vmem:[#allocation89_spill] sm:$0xff] %v14416_v52  ;;  %17151 = vst [vmem:[#allocation91_spill] sm:$0xff] %v14426_v13  ;;  %v5866_v1 = vmul.f32 0.044715, %v14410_v5  ;;  %v14446_v48 = vadd.f32 %v5411_v6, %v14185_v62  ;;  %v14449_v7 = vmul.f32 %v5981_v31, %v14373_v39  ;;  %v14452_v57 = vmul.f32 %v5986_v35, %v14376_v53 }
 0xbb6   : > { %17152 = vst [vmem:[#allocation92_spill] sm:$0xff] %v14432_v23  ;;  %17153 = vst [vmem:[#allocation93_spill] sm:$0xff] %v14435_v18  ;;  %v14455_v16 = vmul.f32 %v5988_v4, %v14386_v58  ;;  %v5868_v19 = vmul.f32 0.044715, %v14416_v52  ;;  %v5987_v55 = vmul.f32 %v5859_v14, %v14400_v49  ;;  %v5867_v17 = vmul.f32 0.044715, %v14426_v13 }
 0xbb7   : > { %17154 = vst [vmem:[#allocation94_spill] sm:$0xff] %v14438_v51  ;;  %17155 = vst [vmem:[#allocation95_spill] sm:$0xff] %v14446_v48  ;;  %v5869_v6 = vmul.f32 0.044715, %v14446_v48  ;;  %v6187_v31 = vadd.f32 %v14242_v15, %v14191_v47  ;;  %v6195_v35 = vadd.f32 %v14263_v36, %v14204_v37  ;;  %v14466_v4 = vadd.f32 %v5300_v9, %v14171_v45  ;;  %v10329_v18 = vld [vmem:[%s11734_s24 + $0x3e4] ss:$8 sps:$4 sm:$0xff]  }
 0xbb8   : > { %17156 = vst [vmem:[#allocation96_spill] sm:$0xff] %v14449_v7  ;;  %17157 = vst [vmem:[#allocation97_spill] sm:$0xff] %v14452_v57  ;;  %v6570_v14 = vadd.f32 1.0, %v14348_v3  ;;  %v5989_v23 = vmul.f32 %v5861_v28, %v14407_v41  ;;  %v5994_v15 = vmul.f32 %v5866_v1, %v14410_v5  ;;  %v6578_v42 = vadd.f32 1.0, %v14378_v29  ;;  %8037 = vmatprep.subr.bf16.mxu0 %v10329_v18 }
 0xbb9   : > { %17158 = vst [vmem:[#allocation98_spill] sm:$0xff] %v14455_v16  ;;  %v5306_v30 = vpop.f32.mrb[52].mxu1  ;;  %17159 = vst [vmem:[#allocation99_spill] sm:$0xff] %v14466_v4  ;;  %v14469_v16 = vadd.f32 %v5413_v34, %v14175_v59  ;;  %v6315_v50 = vmul.f32 0.7978846, %v6187_v31  ;;  %v5996_v34 = vmul.f32 %v5868_v19, %v14416_v52  ;;  %v14491_v29 = vadd.f32 %v5302_v56, %v14179_v8 }
 0xbba   : > { %v5419_v51 = vpop.f32.mrb[148].mxu0  ;;  %v5308_v7 = vpop.f32.mrb[53].mxu1  ;;  %v6323_v25 = vmul.f32 0.7978846, %v6195_v35  ;;  %v5874_v3 = vmul.f32 0.044715, %v14466_v4  ;;  %v14485_v28 = vmul.f32 %v6570_v14, %v14226_v61  ;;  %v14488_v1 = vmul.f32 %v6578_v42, %v14231_v24 }
 0xbbb   : > { %v5421_v39 = vpop.f32.mrb[149].mxu0  ;;  %17160 = vst [vmem:[#allocation100_spill] sm:$0xff] %v14469_v16  ;;  %v5310_v58 = vpop.f32.mrb[54].mxu1  ;;  %v5876_v57 = vmul.f32 0.044715, %v14469_v16  ;;  %10584 = vtanh.f32 %v6315_v50  ;;  %17161 = vst [vmem:[#allocation101_spill] sm:$0xff] %v14491_v29  ;;  %v5995_v53 = vmul.f32 %v5867_v17, %v14426_v13  ;;  %v5997_v19 = vmul.f32 %v5869_v6, %v14446_v48 }
 0xbbc   : > { %v14472_v20 = vpop.f32.mrb[150].mxu0  ;;  %v14477_v36 = vpop.f32.mrb[55].mxu1  ;;  %v10327_v31 = vld [vmem:[%s11734_s24 + $0x3e0] ss:$8 sps:$4 sm:$0xff]   ;;  %10586 = vtanh.f32 %v6323_v25  ;;  %v14497_v35 = vadd.f32 %v5415_v26, %v14185_v62  ;;  %v5875_v50 = vmul.f32 0.044715, %v14491_v29  ;;  %v14504_v24 = vadd.f32 %v5306_v30, %v14171_v45 }
 0xbbd   : > { %v14479_v9 = vpop.f32.mrb[151].mxu0  ;;  %v14507_v42 = vadd.f32 %v5419_v51, %v14175_v59  ;;  %v14510_v56 = vmul.f32 %v5987_v55, %v14400_v49  ;;  %v14513_v25 = vmul.f32 0.5, %v14191_v47  ;;  %v6002_v26 = vmul.f32 %v5874_v3, %v14466_v4  ;;  %8038 = vmatpush1.bf16.msra.mxu0 %v10327_v31 }
 0xbbe   : > { %17162 = vst [vmem:[#allocation102_spill] sm:$0xff] %v14497_v35  ;;  %17163 = vst [vmem:[#allocation103_spill] sm:$0xff] %v14504_v24  ;;  %v6004_v17 = vmul.f32 %v5876_v57, %v14469_v16  ;;  %v14522_v30 = vmul.f32 %v5989_v23, %v14407_v41  ;;  %v14525_v51 = vmul.f32 %v5994_v15, %v14410_v5  ;;  %v5877_v55 = vmul.f32 0.044715, %v14497_v35 }
 0xbbf   : > { %17164 = vst [vmem:[#allocation104_spill] sm:$0xff] %v14507_v42  ;;  %v14529_v47 = vadd.f32 %v5308_v7, %v14179_v8  ;;  %v14536_v57 = vmul.f32 %v5996_v34, %v14416_v52  ;;  %v14539_v23 = vmul.f32 %v5995_v53, %v14426_v13  ;;  %v5683_v18 = vmul.f32 0.5, %v14204_v37 }
 0xbc0   : > { %17165 = vst [vmem:[#allocation105_spill] sm:$0xff] %v14522_v30  ;;  %17166 = vst [vmem:[#allocation106_spill] sm:$0xff] %v14525_v51  ;;  %v14543_v15 = vadd.f32 %v5421_v39, %v14185_v62  ;;  %v14550_v41 = vmul.f32 %v5997_v19, %v14446_v48  ;;  %v6003_v34 = vmul.f32 %v5875_v50, %v14491_v29  ;;  %v5882_v31 = vmul.f32 0.044715, %v14504_v24  ;;  %v10335_v48 = vld [vmem:[%s11734_s24 + $0x3f4] ss:$8 sps:$4 sm:$0xff]  }
 0xbc1   : > { %v14517_v6 = vpop.f32.mrb[56].mxu1  ;;  %17167 = vst [vmem:[#allocation107_spill] sm:$0xff] %v14529_v47  ;;  %17168 = vst [vmem:[#allocation108_spill] sm:$0xff] %v14536_v57  ;;  %v5884_v53 = vmul.f32 0.044715, %v14507_v42  ;;  %v14560_v37 = vmul.f32 %v6002_v26, %v14466_v4  ;;  %v14563_v39 = vmul.f32 %v6004_v17, %v14469_v16  ;;  %v6203_v19 = vadd.f32 %v14315_v22, %v14238_v21 }
 0xbc2   : > { %v14519_v14 = vpop.f32.mrb[152].mxu0  ;;  %v14531_v61 = vpop.f32.mrb[57].mxu1  ;;  %17169 = vst [vmem:[#allocation109_spill] sm:$0xff] %v14539_v23  ;;  %17170 = vst [vmem:[#allocation110_spill] sm:$0xff] %v14543_v15  ;;  %v6211_v50 = vadd.f32 %v14343_v32, %v14270_v38  ;;  %v6005_v51 = vmul.f32 %v5877_v55, %v14497_v35  ;;  %v5883_v5 = vmul.f32 0.044715, %v14529_v47  ;;  %v14577_v26 = vadd.f32 %v5310_v58, %v14171_v45 }
 0xbc3   : > { %v14533_v3 = vpop.f32.mrb[153].mxu0  ;;  %v14545_v7 = vpop.f32.mrb[58].mxu1  ;;  %17171 = vst [vmem:[#allocation111_spill] sm:$0xff] %v14550_v41  ;;  %17172 = vst [vmem:[#allocation112_spill] sm:$0xff] %v14560_v37  ;;  %v10333_v41 = vld [vmem:[%s11734_s24 + $0x3f0] ss:$8 sps:$4 sm:$0xff]   ;;  %v14582_v22 = vadd.f32 %v14472_v20, %v14175_v59  ;;  %8039 = vmatprep.subr.bf16.mxu0 %v10335_v48  ;;  %v14585_v55 = vmul.f32 %v6003_v34, %v14491_v29  ;;  %v6010_v37 = vmul.f32 %v5882_v31, %v14504_v24 }
 0xbc4   : > { %v14547_v30 = vpop.f32.mrb[154].mxu0  ;;  %v14555_v57 = vpop.f32.mrb[59].mxu1  ;;  %17173 = vst [vmem:[#allocation113_spill] sm:$0xff] %v14563_v39  ;;  %v14574_v23 = vmul.f32 0.5, %v14238_v21  ;;  %17174 = vst [vmem:[#allocation114_spill] sm:$0xff] %v14577_v26  ;;  %v6012_v21 = vmul.f32 %v5884_v53, %v14507_v42  ;;  %v14590_v58 = vmul.f32 0.5, %v14270_v38  ;;  %8040 = vmatpush1.bf16.msra.mxu0 %v10333_v41  ;;  %v6202_v20 = vadd.f32 %v14295_v2, %v14221_v46 }
 0xbc5   : > { %v14557_v52 = vpop.f32.mrb[155].mxu0  ;;  %v5885_v17 = vmul.f32 0.044715, %v14543_v15  ;;  %v6331_v39 = vmul.f32 0.7978846, %v6203_v19  ;;  %17175 = vst [vmem:[#allocation115_spill] sm:$0xff] %v14582_v22  ;;  %v10585_v32 = vpop.eup %10584  ;;  %v6011_v31 = vmul.f32 %v5883_v5, %v14529_v47  ;;  %v6210_v38 = vadd.f32 %v14333_v54, %v14251_v63 }
 0xbc6   : > { %v6339_v16 = vmul.f32 0.7978846, %v6211_v50  ;;  %17176 = vst [vmem:[#allocation116_spill] sm:$0xff] %v14585_v55  ;;  %v10587_v4 = vpop.eup %10586  ;;  %v6571_v19 = vadd.f32 1.0, %v10585_v32  ;;  %v5890_v50 = vmul.f32 0.044715, %v14577_v26  ;;  %v14610_v29 = vadd.f32 %v14477_v36, %v14179_v8 }
 0xbc7   : > { %10588 = vtanh.f32 %v6331_v39  ;;  %v6579_v55 = vadd.f32 1.0, %v10587_v4  ;;  %v6013_v39 = vmul.f32 %v5885_v17, %v14543_v15  ;;  %v5892_v32 = vmul.f32 0.044715, %v14582_v22 }
 0xbc8   : > { %10590 = vtanh.f32 %v6339_v16  ;;  %v6330_v2 = vmul.f32 0.7978846, %v6202_v20  ;;  %17177 = vst [vmem:[#allocation117_spill] sm:$0xff] %v14610_v29  ;;  %v6699_v54 = vmul.f32 %v6571_v19, %v14513_v25  ;;  %v6338_v13 = vmul.f32 0.7978846, %v6210_v38 }
 0xbc9   : > { %v14595_v48 = vpop.f32.mrb[60].mxu1  ;;  %v6707_v16 = vmul.f32 %v6579_v55, %v5683_v18  ;;  %v14619_v17 = vadd.f32 %v14479_v9, %v14185_v62  ;;  %v6018_v36 = vmul.f32 %v5890_v50, %v14577_v26  ;;  %v10240_v18 = vld [vmem:[%s11734_s24 + $0x100] ss:$8 sps:$4 sm:$0xff]   ;;  %v14633_v55 = vmul.f32 %v6005_v51, %v14497_v35  ;;  %v10248_v19 = vld [vmem:[%s11734_s24 + $0x114] ss:$8 sps:$4 sm:$0xff]  }
 0xbca   : > { %v14597_v34 = vpop.f32.mrb[156].mxu0  ;;  %v14602_v41 = vpop.f32.mrb[61].mxu1  ;;  %10592 = vtanh.f32 %v6330_v2  ;;  %v14637_v9 = vadd.f32 %v14519_v14, %v14175_v59  ;;  %v14641_v50 = vmul.f32 %v6010_v37, %v14504_v24  ;;  %v14644_v38 = vmul.f32 %v6012_v21, %v14507_v42 }
 0xbcb   : > { %v14604_v53 = vpop.f32.mrb[157].mxu0  ;;  %v14612_v4 = vpop.f32.mrb[62].mxu1  ;;  %17180 = vst [vmem:[#allocation120_spill] sm:$0xff] %v14619_v17  ;;  %v6827_v25 = vpack.c.bf16 %v6707_v16, %v6699_v54  ;;  %17182 = vst [vmem:[#allocation122_spill] sm:$0xff] %v14633_v55  ;;  %10594 = vtanh.f32 %v6338_v13  ;;  %v14649_v2 = vadd.f32 %v14531_v61, %v14179_v8  ;;  %v14652_v13 = vmul.f32 %v6011_v31, %v14529_v47 }
 0xbcc   : > { %17178 = vst [vmem:[#allocation118_spill] sm:$0xff] %v14612_v4  ;;  %v14614_v5 = vpop.f32.mrb[158].mxu0  ;;  %v14621_v44 = vpop.f32.mrb[63].mxu1  ;;  %v5891_v4 = vmul.f32 0.044715, %v14610_v29  ;;  %17183 = vst [vmem:[#allocation123_spill] sm:$0xff] %v14637_v9  ;;  %v14655_v14 = vmul.f32 %v6013_v39, %v14543_v15  ;;  %v17188_v21 = vpack.c.bf16 %v14488_v1, %v14485_v28  ;;  %v14666_v61 = vmul.f32 %v6018_v36, %v14577_v26 }
 0xbcd   : > { %17179 = vst [vmem:[#allocation119_spill] sm:$0xff] %v14614_v5  ;;  %v14623_v20 = vpop.f32.mrb[159].mxu0  ;;  %v14629_v5 = vadd.f32 %v14517_v6, %v14171_v45  ;;  %17184 = vst [vmem:[#allocation124_spill] sm:$0xff] %v14641_v50  ;;  %v6020_v6 = vmul.f32 %v5892_v32, %v14582_v22  ;;  %7702 = vmatprep.mubr.bf16.mxu1 %v6827_v25  ;;  %v14658_v51 = vmul.f32 0.5, %v14221_v46  ;;  %v5893_v37 = vmul.f32 0.044715, %v14619_v17 }
 0xbce   : > { %17185 = vst [vmem:[#allocation125_spill] sm:$0xff] %v14644_v38  ;;  %17186 = vst [vmem:[#allocation126_spill] sm:$0xff] %v14652_v13  ;;  %7703 = vmatmul.mubr.bf16.vlgmr.msra.gmra.mrb[96].mxu1 %v17188_v21  ;;  %v10246_v32 = vld [vmem:[%s11734_s24 + $0x110] ss:$8 sps:$4 sm:$0xff]   ;;  %v14669_v54 = vmul.f32 0.5, %v14251_v63  ;;  %v6019_v31 = vmul.f32 %v5891_v4, %v14610_v29  ;;  %v14679_v28 = vadd.f32 %v14533_v3, %v14185_v62  ;;  %v14694_v3 = vmul.f32 0.5, %v14292_v0 }
 0xbcf   : > { %17181 = vst [vmem:[#allocation121_spill] sm:$0xff] %v14629_v5  ;;  %17187 = vst [vmem:[#allocation127_spill] sm:$0xff] %v14655_v14  ;;  %v5898_v39 = vmul.f32 0.044715, %v14629_v5  ;;  %7784 = vmatpush1.bf16.msra.mxu1 %v10240_v18  ;;  %v10254_v46 = vld [vmem:[%s11734_s24 + $0x124] ss:$8 sps:$4 sm:$0xff]   ;;  %v6219_v1 = vadd.f32 %v14381_v27, %v14292_v0  ;;  %v6227_v63 = vadd.f32 %v14429_v12, %v14324_v40 }
 0xbd0   : > { %17189 = vst [vmem:[#allocation128_spill] sm:$0xff] %v14666_v61  ;;  %v5900_v25 = vmul.f32 0.044715, %v14637_v9  ;;  %17190 = vst [vmem:[#allocation129_spill] sm:$0xff] %v14679_v28  ;;  %7785 = vmatprep.subr.bf16.mxu1 %v10248_v19  ;;  %v14690_v18 = vmul.f32 %v6020_v6, %v14582_v22  ;;  %v5899_v38 = vmul.f32 0.044715, %v14649_v2  ;;  %v14698_v27 = vadd.f32 %v14545_v7, %v14171_v45 }
 0xbd1   : > { %v14673_v16 = vpop.f32.mrb[64].mxu1  ;;  %v10589_v21 = vpop.eup %10588  ;;  %v6021_v19 = vmul.f32 %v5893_v37, %v14619_v17  ;;  %v6347_v6 = vmul.f32 0.7978846, %v6219_v1  ;;  %v14708_v0 = vmul.f32 %v6019_v31, %v14610_v29  ;;  %v6026_v7 = vmul.f32 %v5898_v39, %v14629_v5  ;;  %v10252_v37 = vld [vmem:[%s11734_s24 + $0x120] ss:$8 sps:$4 sm:$0xff]  }
 0xbd2   : > { %v14685_v36 = vpop.f32.mrb[160].mxu0  ;;  %v14687_v4 = vpop.f32.mrb[65].mxu1  ;;  %17191 = vst [vmem:[#allocation130_spill] sm:$0xff] %v14690_v18  ;;  %17192 = vst [vmem:[#allocation131_spill] sm:$0xff] %v14698_v27  ;;  %v6587_v15 = vadd.f32 1.0, %v10589_v21  ;;  %v14712_v35 = vmul.f32 0.5, %v14324_v40  ;;  %v14723_v31 = vadd.f32 %v14547_v30, %v14175_v59  ;;  %v6226_v30 = vadd.f32 %v14419_v33, %v14309_v10 }
 0xbd3   : > { %v14700_v12 = vpop.f32.mrb[161].mxu0  ;;  %v14702_v42 = vpop.f32.mrb[66].mxu1  ;;  %v6355_v18 = vmul.f32 0.7978846, %v6227_v63  ;;  %17193 = vst [vmem:[#allocation132_spill] sm:$0xff] %v14708_v0  ;;  %7786 = vmatpush1.bf16.msra.mxu1 %v10246_v32  ;;  %10596 = vtanh.f32 %v6347_v6  ;;  %v6028_v32 = vmul.f32 %v5900_v25, %v14637_v9  ;;  %v6027_v6 = vmul.f32 %v5899_v38, %v14649_v2  ;;  %v17195_v0 = vld [vmem:[#allocation80_spill] sm:$0xff] }
 0xbd4   : > { %v10591_v14 = vpop.eup %10590  ;;  %v14705_v22 = vpop.f32.mrb[162].mxu0  ;;  %v5901_v1 = vmul.f32 0.044715, %v14679_v28  ;;  %17194 = vst [vmem:[#allocation133_spill] sm:$0xff] %v14723_v31  ;;  %v6715_v40 = vmul.f32 %v6587_v15, %v14574_v23  ;;  %7787 = vmatprep.subr.bf16.mxu1 %v10254_v46  ;;  %v10260_v21 = vld [vmem:[%s11734_s24 + $0x134] ss:$8 sps:$4 sm:$0xff]   ;;  %v6218_v29 = vadd.f32 %v17195_v0, %v14276_v60 }
 0xbd5   : > { %v6595_v55 = vadd.f32 1.0, %v10591_v14  ;;  %v14714_v61 = vpop.f32.mrb[67].mxu1  ;;  %v14716_v26 = vpop.f32.mrb[163].mxu0  ;;  %v5906_v14 = vmul.f32 0.044715, %v14698_v27  ;;  %10598 = vtanh.f32 %v6355_v18 }
 0xbd6   : > { %v10593_v39 = vpop.eup %10592  ;;  %v10258_v23 = vld [vmem:[%s11734_s24 + $0x130] ss:$8 sps:$4 sm:$0xff]   ;;  %v5908_v15 = vmul.f32 0.044715, %v14723_v31  ;;  %v6029_v38 = vmul.f32 %v5901_v1, %v14679_v28  ;;  %v6346_v25 = vmul.f32 0.7978846, %v6218_v29 }
 0xbd7   : > { %v6723_v63 = vmul.f32 %v6595_v55, %v14590_v58  ;;  %v10595_v50 = vpop.eup %10594  ;;  %v6586_v24 = vadd.f32 1.0, %v10593_v39  ;;  %v14738_v58 = vadd.f32 %v14555_v57, %v14179_v8  ;;  %7788 = vmatpush1.bf16.msra.mxu1 %v10252_v37  ;;  %v6034_v46 = vmul.f32 %v5906_v14, %v14698_v27  ;;  %v10266_v57 = vld [vmem:[%s11734_s24 + $0x144] ss:$8 sps:$4 sm:$0xff]  }
 0xbd8   : > { %v6594_v47 = vadd.f32 1.0, %v10595_v50  ;;  %v6354_v18 = vmul.f32 0.7978846, %v6226_v30  ;;  %7789 = vmatprep.subr.bf16.mxu1 %v10260_v21  ;;  %v14754_v37 = vadd.f32 %v14557_v52, %v14185_v62  ;;  %10600 = vtanh.f32 %v6346_v25  ;;  %v10264_v30 = vld [vmem:[%s11734_s24 + $0x140] ss:$8 sps:$4 sm:$0xff]  }
 0xbd9   : > { %v6835_v13 = vpack.c.bf16 %v6723_v63, %v6715_v40  ;;  %v14740_v55 = vpop.f32.mrb[68].mxu1  ;;  %v6714_v0 = vmul.f32 %v6586_v24, %v14658_v51  ;;  %v5907_v40 = vmul.f32 0.044715, %v14738_v58  ;;  %v14766_v24 = vadd.f32 %v14597_v34, %v14175_v59 }
 0xbda   : > { %v14744_v33 = vpop.f32.mrb[164].mxu0  ;;  %v14746_v50 = vpop.f32.mrb[69].mxu1  ;;  %v6722_v39 = vmul.f32 %v6594_v47, %v14669_v54  ;;  %17196 = vst [vmem:[#allocation80_spill] sm:$0xff] %v14754_v37  ;;  %v14770_v47 = vadd.f32 %v14602_v41, %v14179_v8  ;;  %v14777_v14 = vmul.f32 %v6021_v19, %v14619_v17  ;;  %10602 = vtanh.f32 %v6354_v18 }
 0xbdb   : > { %7712 = vmatprep.mubr.bf16.mxu1 %v6835_v13  ;;  %v14756_v1 = vpop.f32.mrb[165].mxu0  ;;  %v14758_v29 = vpop.f32.mrb[70].mxu1  ;;  %v14762_v13 = vadd.f32 %v14595_v48, %v14171_v45  ;;  %17198 = vst [vmem:[#allocation135_spill] sm:$0xff] %v14766_v24  ;;  %v14780_v48 = vmul.f32 %v6026_v7, %v14629_v5  ;;  %7790 = vmatpush1.bf16.msra.mxu1 %v10258_v23  ;;  %v14796_v7 = vmul.f32 0.5, %v14276_v60  ;;  %v14799_v25 = vmul.f32 0.5, %v14309_v10  ;;  %v17216_v5 = vld [vmem:[#allocation83_spill] sm:$0xff] }
 0xbdc   : > { %v14772_v52 = vpop.f32.mrb[166].mxu0  ;;  %v14774_v51 = vpop.f32.mrb[71].mxu1  ;;  %v6834_v54 = vpack.c.bf16 %v6722_v39, %v6714_v0  ;;  %17199 = vst [vmem:[#allocation136_spill] sm:$0xff] %v14777_v14  ;;  %v14785_v34 = vmul.f32 %v6028_v32, %v14637_v9  ;;  %v14788_v41 = vmul.f32 %v6027_v6, %v14649_v2  ;;  %v14791_v21 = vmul.f32 %v6029_v38, %v14679_v28  ;;  %v10272_v23 = vld [vmem:[%s11734_s24 + $0x154] ss:$8 sps:$4 sm:$0xff]  }
 0xbdd   : > { %17197 = vst [vmem:[#allocation134_spill] sm:$0xff] %v14762_v13  ;;  %17200 = vst [vmem:[#allocation137_spill] sm:$0xff] %v14780_v48  ;;  %v14782_v63 = vpop.f32.mrb[167].mxu0  ;;  %v6036_v19 = vmul.f32 %v5908_v15, %v14723_v31  ;;  %7791 = vmatprep.subr.bf16.mxu1 %v10266_v57  ;;  %v6035_v32 = vmul.f32 %v5907_v40, %v14738_v58  ;;  %v5909_v6 = vmul.f32 0.044715, %v14754_v37  ;;  %v10597_v38 = vpop.eup %10596 }
 0xbde   : > { %17201 = vst [vmem:[#allocation138_spill] sm:$0xff] %v14785_v34  ;;  %17202 = vst [vmem:[#allocation139_spill] sm:$0xff] %v14791_v21  ;;  %7713 = vmatmul.mubr.bf16.gmra.mrb[100].mxu1 %v6834_v54  ;;  %v14805_v18 = vmul.f32 %v6034_v46, %v14698_v27  ;;  %v5914_v15 = vmul.f32 0.044715, %v14762_v13  ;;  %v5916_v0 = vmul.f32 0.044715, %v14766_v24  ;;  %v14813_v57 = vadd.f32 %v14604_v53, %v14185_v62 }
 0xbdf   : > { %v5915_v60 = vmul.f32 0.044715, %v14770_v47  ;;  %v10599_v39 = vpop.eup %10598  ;;  %v6603_v10 = vadd.f32 1.0, %v10597_v38  ;;  %v10270_v54 = vld [vmem:[%s11734_s24 + $0x150] ss:$8 sps:$4 sm:$0xff]   ;;  %v6235_v40 = vadd.f32 %v14441_v11, %v14354_v43  ;;  %v6243_v46 = vadd.f32 %v14510_v56, %v14400_v49  ;;  %7792 = vmatpush1.bf16.msra.mxu1 %v10264_v30 }
 0xbe0   : > { %17203 = vst [vmem:[#allocation140_spill] sm:$0xff] %v14805_v18  ;;  %17204 = vst [vmem:[#allocation141_spill] sm:$0xff] %v14813_v57  ;;  %v10278_v34 = vld [vmem:[%s11734_s24 + $0x164] ss:$8 sps:$4 sm:$0xff]   ;;  %v6611_v21 = vadd.f32 1.0, %v10599_v39  ;;  %v14823_v28 = vmul.f32 %v6036_v19, %v14723_v31  ;;  %v14826_v38 = vmul.f32 0.5, %v14354_v43  ;;  %v14836_v56 = vmul.f32 %v6035_v32, %v14738_v58  ;;  %7793 = vmatprep.subr.bf16.mxu1 %v10272_v23 }
 0xbe1   : > { %v14820_v9 = vpop.f32.mrb[72].mxu1  ;;  %v14829_v53 = vmul.f32 0.5, %v14400_v49  ;;  %v6037_v17 = vmul.f32 %v5909_v6, %v14754_v37  ;;  %v6363_v39 = vmul.f32 0.7978846, %v6235_v40  ;;  %v6371_v19 = vmul.f32 0.7978846, %v6243_v46 }
 0xbe2   : > { %17205 = vst [vmem:[#allocation142_spill] sm:$0xff] %v14823_v28  ;;  %v14831_v14 = vpop.f32.mrb[168].mxu0  ;;  %v14833_v11 = vpop.f32.mrb[73].mxu1  ;;  %v6731_v43 = vmul.f32 %v6603_v10, %v14694_v3  ;;  %v6739_v49 = vmul.f32 %v6611_v21, %v14712_v35  ;;  %v17207_v31 = vld [vmem:[#allocation118_spill] sm:$0xff]  ;;  %v17209_v32 = vld [vmem:[#allocation119_spill] sm:$0xff]  ;;  %v6042_v40 = vmul.f32 %v5914_v15, %v14762_v13  ;;  %v17214_v35 = vld [vmem:[#allocation93_spill] sm:$0xff] }
 0xbe3   : > { %v14839_v28 = vpop.f32.mrb[169].mxu0  ;;  %v14841_v30 = vpop.f32.mrb[74].mxu1  ;;  %v14847_v18 = vadd.f32 %v17207_v31, %v14171_v45  ;;  %v14851_v27 = vadd.f32 %v17209_v32, %v14175_v59  ;;  %v5917_v46 = vmul.f32 0.044715, %v14813_v57  ;;  %10604 = vtanh.f32 %v6363_v39  ;;  %v17213_v3 = vld [vmem:[#allocation75_spill] sm:$0xff]  ;;  %7794 = vmatpush1.bf16.msra.mxu1 %v10270_v54 }
 0xbe4   : > { %17206 = vst [vmem:[#allocation143_spill] sm:$0xff] %v14841_v30  ;;  %v14853_v6 = vpop.f32.mrb[170].mxu0  ;;  %v14855_v23 = vpop.f32.mrb[75].mxu1  ;;  %v6234_v21 = vadd.f32 %v17214_v35, %v17213_v3  ;;  %v6843_v31 = vpack.c.bf16 %v6739_v49, %v6731_v43  ;;  %v6044_v59 = vmul.f32 %v5916_v0, %v14766_v24  ;;  %10606 = vtanh.f32 %v6371_v19  ;;  %7795 = vmatprep.subr.bf16.mxu1 %v10278_v34 }
 0xbe5   : > { %17208 = vst [vmem:[#allocation118_spill] sm:$0xff] %v14847_v18  ;;  %17210 = vst [vmem:[#allocation119_spill] sm:$0xff] %v14851_v27  ;;  %v14861_v10 = vpop.f32.mrb[171].mxu0  ;;  %v10601_v45 = vpop.eup %10600  ;;  %v5922_v32 = vmul.f32 0.044715, %v14847_v18  ;;  %v14870_v35 = vadd.f32 %v14621_v44, %v14179_v8  ;;  %v6043_v0 = vmul.f32 %v5915_v60, %v14770_v47  ;;  %v14877_v43 = vadd.f32 %v14623_v20, %v14185_v62 }
 0xbe6   : > { %17211 = vst [vmem:[#allocation144_spill] sm:$0xff] %v14853_v6  ;;  %17212 = vst [vmem:[#allocation145_spill] sm:$0xff] %v14855_v23  ;;  %v10276_v23 = vld [vmem:[%s11734_s24 + $0x160] ss:$8 sps:$4 sm:$0xff]   ;;  %v10603_v48 = vpop.eup %10602  ;;  %v6602_v15 = vadd.f32 1.0, %v10601_v45  ;;  %7722 = vmatprep.mubr.bf16.mxu1 %v6843_v31  ;;  %v14880_v49 = vmul.f32 %v6037_v17, %v14754_v37  ;;  %v6045_v34 = vmul.f32 %v5917_v46, %v14813_v57  ;;  %v17221_v46 = vld [vmem:[#allocation56_spill] sm:$0xff] }
 0xbe7   : > { %17215 = vst [vmem:[#allocation75_spill] sm:$0xff] %v14861_v10  ;;  %v17217_v6 = vld [vmem:[#allocation97_spill] sm:$0xff]  ;;  %v6362_v30 = vmul.f32 0.7978846, %v6234_v21  ;;  %v10284_v10 = vld [vmem:[%s11734_s24 + $0x174] ss:$8 sps:$4 sm:$0xff]   ;;  %v14888_v60 = vmul.f32 %v6042_v40, %v14762_v13  ;;  %7796 = vmatpush1.bf16.msra.mxu1 %v10276_v23  ;;  %v6050_v20 = vmul.f32 %v5922_v32, %v14847_v18 }
 0xbe8   : > { %v6242_v39 = vadd.f32 %v17217_v6, %v17216_v5  ;;  %v6610_v54 = vadd.f32 1.0, %v10603_v48  ;;  %v5924_v19 = vmul.f32 0.044715, %v14851_v27  ;;  %17218 = vst [vmem:[#allocation93_spill] sm:$0xff] %v14877_v43  ;;  %17219 = vst [vmem:[#allocation83_spill] sm:$0xff] %v14880_v49  ;;  %v6730_v44 = vmul.f32 %v6602_v15, %v14796_v7  ;;  %7797 = vmatprep.subr.bf16.mxu1 %v10284_v10  ;;  %v17231_v49 = vld [vmem:[#allocation60_spill] sm:$0xff] }
 0xbe9   : > { %10608 = vtanh.f32 %v6362_v30  ;;  %v14883_v8 = vpop.f32.mrb[76].mxu1  ;;  %17220 = vst [vmem:[#allocation97_spill] sm:$0xff] %v14888_v60  ;;  %v5923_v21 = vmul.f32 0.044715, %v14870_v35  ;;  %v10282_v30 = vld [vmem:[%s11734_s24 + $0x170] ss:$8 sps:$4 sm:$0xff]   ;;  %v14899_v7 = vadd.f32 %v14673_v16, %v17221_v46  ;;  %v14910_v15 = vmul.f32 %v6044_v59, %v14766_v24 }
 0xbea   : > { %v6370_v6 = vmul.f32 0.7978846, %v6242_v39  ;;  %v6738_v48 = vmul.f32 %v6610_v54, %v14799_v25  ;;  %v14891_v62 = vpop.f32.mrb[172].mxu0  ;;  %v14893_v17 = vpop.f32.mrb[77].mxu1  ;;  %v17222_v25 = vld [vmem:[#allocation57_spill] sm:$0xff]  ;;  %v6052_v32 = vmul.f32 %v5924_v19, %v14851_v27  ;;  %v17229_v24 = vld [vmem:[#allocation59_spill] sm:$0xff] }
 0xbeb   : > { %v14903_v40 = vadd.f32 %v14685_v36, %v17222_v25  ;;  %v14905_v45 = vpop.f32.mrb[173].mxu0  ;;  %v14907_v23 = vpop.f32.mrb[78].mxu1  ;;  %17224 = vst [vmem:[#allocation57_spill] sm:$0xff] %v14910_v15  ;;  %v5925_v10 = vmul.f32 0.044715, %v14877_v43  ;;  %v14920_v36 = vmul.f32 %v6043_v0, %v14770_v47  ;;  %v14935_v0 = vadd.f32 %v14687_v4, %v17229_v24  ;;  %7798 = vmatpush1.bf16.msra.mxu1 %v10282_v30  ;;  %v17234_v37 = vld [vmem:[#allocation109_spill] sm:$0xff] }
 0xbec   : > { %10610 = vtanh.f32 %v6370_v6  ;;  %17223 = vst [vmem:[#allocation56_spill] sm:$0xff] %v14907_v23  ;;  %v6842_v31 = vpack.c.bf16 %v6738_v48, %v6730_v44  ;;  %v10290_v39 = vld [vmem:[%s11734_s24 + $0x184] ss:$8 sps:$4 sm:$0xff]   ;;  %v14915_v54 = vpop.f32.mrb[174].mxu0  ;;  %v14917_v16 = vpop.f32.mrb[79].mxu1  ;;  %v14923_v6 = vmul.f32 %v6045_v34, %v14813_v57  ;;  %v14926_v44 = vmul.f32 0.5, %v17213_v3 }
 0xbed   : > { %17225 = vst [vmem:[#allocation146_spill] sm:$0xff] %v14915_v54  ;;  %17226 = vst [vmem:[#allocation147_spill] sm:$0xff] %v14917_v16  ;;  %v5806_v59 = vmul.f32 0.044715, %v14899_v7  ;;  %v14929_v19 = vpop.f32.mrb[175].mxu0  ;;  %v6051_v48 = vmul.f32 %v5923_v21, %v14870_v35  ;;  %v14939_v34 = vadd.f32 %v14700_v12, %v17231_v49  ;;  %v10605_v3 = vpop.eup %10604  ;;  %v5730_v57 = vmul.f32 0.5, %v17216_v5  ;;  %7799 = vmatprep.subr.bf16.mxu1 %v10290_v39 }
 0xbee   : > { %17227 = vst [vmem:[#allocation148_spill] sm:$0xff] %v14923_v6  ;;  %17228 = vst [vmem:[#allocation149_spill] sm:$0xff] %v14929_v19  ;;  %7723 = vmatmul.mubr.bf16.gmra.mrb[104].mxu1 %v6842_v31  ;;  %v5808_v15 = vmul.f32 0.044715, %v14903_v40  ;;  %v14942_v6 = vmul.f32 %v6050_v20, %v14847_v18  ;;  %v17233_v31 = vld [vmem:[#allocation91_spill] sm:$0xff]  ;;  %v10607_v60 = vpop.eup %10606  ;;  %v6619_v4 = vadd.f32 1.0, %v10605_v3  ;;  %v14950_v13 = vmul.f32 %v6052_v32, %v14851_v27 }
 0xbef   : > { %17230 = vst [vmem:[#allocation59_spill] sm:$0xff] %v14935_v0  ;;  %v5934_v21 = vmul.f32 %v5806_v59, %v14899_v7  ;;  %v6251_v19 = vadd.f32 %v17234_v37, %v17233_v31  ;;  %v10288_v16 = vld [vmem:[%s11734_s24 + $0x180] ss:$8 sps:$4 sm:$0xff]   ;;  %v14953_v12 = vmul.f32 %v5925_v10, %v14877_v43  ;;  %v6627_v5 = vadd.f32 1.0, %v10607_v60  ;;  %v17237_v18 = vld [vmem:[#allocation116_spill] sm:$0xff] }
 0xbf0   : > { %17232 = vst [vmem:[#allocation60_spill] sm:$0xff] %v14942_v6  ;;  %17235 = vst [vmem:[#allocation91_spill] sm:$0xff] %v14950_v13  ;;  %v5936_v20 = vmul.f32 %v5808_v15, %v14903_v40  ;;  %v10296_v6 = vld [vmem:[%s11734_s24 + $0x194] ss:$8 sps:$4 sm:$0xff]   ;;  %v17236_v59 = vld [vmem:[#allocation101_spill] sm:$0xff]  ;;  %v6747_v32 = vmul.f32 %v6619_v4, %v14826_v38  ;;  %v14964_v3 = vmul.f32 %v6051_v48, %v14870_v35  ;;  %7800 = vmatpush1.bf16.msra.mxu1 %v10288_v16 }
 0xbf1   : > { %v6062_v30 = vmul.f32 %v5934_v21, %v14899_v7  ;;  %v6259_v37 = vadd.f32 %v17237_v18, %v17236_v59  ;;  %v6379_v54 = vmul.f32 0.7978846, %v6251_v19  ;;  %v14960_v23 = vpop.f32.mrb[80].mxu1  ;;  %v5807_v10 = vmul.f32 0.044715, %v14935_v0  ;;  %7801 = vmatprep.subr.bf16.mxu1 %v10296_v6 }
 0xbf2   : > { %17238 = vst [vmem:[#allocation109_spill] sm:$0xff] %v14960_v23  ;;  %v5809_v15 = vmul.f32 0.044715, %v14939_v34  ;;  %v14968_v39 = vpop.f32.mrb[176].mxu0  ;;  %v14970_v60 = vpop.f32.mrb[81].mxu1  ;;  %v6755_v18 = vmul.f32 %v6627_v5, %v14829_v53  ;;  %v6064_v19 = vmul.f32 %v5936_v20, %v14903_v40  ;;  %v14986_v53 = vadd.f32 %v14705_v22, %v17222_v25 }
 0xbf3   : > { %17239 = vst [vmem:[#allocation101_spill] sm:$0xff] %v14968_v39  ;;  %v10609_v21 = vpop.eup %10608  ;;  %v6387_v13 = vmul.f32 0.7978846, %v6259_v37  ;;  %10612 = vtanh.f32 %v6379_v54  ;;  %v10294_v38 = vld [vmem:[%s11734_s24 + $0x190] ss:$8 sps:$4 sm:$0xff]   ;;  %v14975_v48 = vpop.f32.mrb[177].mxu0  ;;  %v6190_v23 = vadd.f32 %v6062_v30, %v14899_v7  ;;  %v14982_v39 = vadd.f32 %v14702_v42, %v17221_v46 }
 0xbf4   : > { %17240 = vst [vmem:[#allocation116_spill] sm:$0xff] %v14975_v48  ;;  %v14977_v4 = vpop.f32.mrb[82].mxu1  ;;  %v6618_v27 = vadd.f32 1.0, %v10609_v21  ;;  %v10302_v20 = vld [vmem:[%s11734_s24 + $0x1a4] ss:$8 sps:$4 sm:$0xff]   ;;  %v14989_v54 = vpop.f32.mrb[178].mxu0  ;;  %v6851_v37 = vpack.c.bf16 %v6755_v18, %v6747_v32  ;;  %v5935_v6 = vmul.f32 %v5807_v10, %v14935_v0  ;;  %v5937_v32 = vmul.f32 %v5809_v15, %v14939_v34  ;;  %7802 = vmatpush1.bf16.msra.mxu1 %v10294_v38 }
 0xbf5   : > { %17241 = vst [vmem:[#allocation150_spill] sm:$0xff] %v14977_v4  ;;  %17242 = vst [vmem:[#allocation151_spill] sm:$0xff] %v14989_v54  ;;  %v14991_v16 = vpop.f32.mrb[83].mxu1  ;;  %v14994_v21 = vmul.f32 0.5, %v14899_v7  ;;  %v14997_v30 = vmul.f32 0.5, %v14903_v40  ;;  %10614 = vtanh.f32 %v6387_v13  ;;  %v14999_v42 = vpop.f32.mrb[179].mxu0  ;;  %v6192_v7 = vadd.f32 %v6064_v19, %v14903_v40  ;;  %7803 = vmatprep.subr.bf16.mxu1 %v10302_v20 }
 0xbf6   : > { %17243 = vst [vmem:[#allocation152_spill] sm:$0xff] %v14991_v16  ;;  %v10611_v5 = vpop.eup %10610  ;;  %17246 = vst [vmem:[#allocation155_spill] sm:$0xff] %v14999_v42  ;;  %v15003_v54 = vmul.f32 0.5, %v17233_v31  ;;  %v15006_v16 = vmul.f32 0.5, %v17236_v59  ;;  %7732 = vmatprep.mubr.bf16.mxu1 %v6851_v37  ;;  %v5814_v13 = vmul.f32 0.044715, %v14982_v39  ;;  %v6746_v10 = vmul.f32 %v6618_v27, %v14926_v44 }
 0xbf7   : > { %17244 = vst [vmem:[#allocation153_spill] sm:$0xff] %v14994_v21  ;;  %17245 = vst [vmem:[#allocation154_spill] sm:$0xff] %v14997_v30  ;;  %v6626_v22 = vadd.f32 1.0, %v10611_v5  ;;  %v5816_v18 = vmul.f32 0.044715, %v14986_v53  ;;  %v17247_v42 = vld [vmem:[#allocation88_spill] sm:$0xff]  ;;  %v15023_v38 = vadd.f32 %v14714_v61, %v17229_v24  ;;  %v15030_v20 = vadd.f32 %v14716_v26, %v17231_v49 }
 0xbf8   : > { %v10300_v5 = vld [vmem:[%s11734_s24 + $0x1a0] ss:$8 sps:$4 sm:$0xff]   ;;  %v6318_v21 = vmul.f32 0.7978846, %v6190_v23  ;;  %v10308_v37 = vld [vmem:[%s11734_s24 + $0x1b4] ss:$8 sps:$4 sm:$0xff]   ;;  %v5942_v40 = vmul.f32 %v5814_v13, %v14982_v39 }
 0xbf9   : > { %v6754_v31 = vmul.f32 %v6626_v22, %v5730_v57  ;;  %v17248_v59 = vld [vmem:[#allocation106_spill] sm:$0xff]  ;;  %v5944_v15 = vmul.f32 %v5816_v18, %v14986_v53  ;;  %v17249_v19 = vld [vmem:[#allocation99_spill] sm:$0xff]  ;;  %v17250_v4 = vld [vmem:[#allocation112_spill] sm:$0xff]  ;;  %17251 = vst [vmem:[#allocation88_spill] sm:$0xff] %v15023_v38  ;;  %v15026_v44 = vpop.f32.mrb[84].mxu1  ;;  %v15034_v22 = vadd.f32 %v14740_v55, %v17221_v46  ;;  %7804 = vmatpush1.bf16.msra.mxu1 %v10300_v5 }
 0xbfa   : > { %v6250_v30 = vadd.f32 %v17248_v59, %v17247_v42  ;;  %v6258_v48 = vadd.f32 %v17250_v4, %v17249_v19  ;;  %v10306_v27 = vld [vmem:[%s11734_s24 + $0x1b0] ss:$8 sps:$4 sm:$0xff]   ;;  %17252 = vst [vmem:[#allocation106_spill] sm:$0xff] %v15026_v44  ;;  %v10314_v13 = vld [vmem:[%s11734_s24 + $0x1c4] ss:$8 sps:$4 sm:$0xff]   ;;  %v15037_v18 = vpop.f32.mrb[180].mxu0  ;;  %v6070_v61 = vmul.f32 %v5942_v40, %v14982_v39  ;;  %v15050_v55 = vmul.f32 %v14953_v12, %v14877_v43 }
 0xbfb   : > { %v6850_v57 = vpack.c.bf16 %v6754_v31, %v6746_v10  ;;  %17253 = vst [vmem:[#allocation99_spill] sm:$0xff] %v15034_v22  ;;  %v15039_v4 = vpop.f32.mrb[85].mxu1  ;;  %v6072_v59 = vmul.f32 %v5944_v15, %v14986_v53  ;;  %v15044_v10 = vpop.f32.mrb[181].mxu0  ;;  %v6320_v31 = vmul.f32 0.7978846, %v6192_v7  ;;  %7805 = vmatprep.subr.bf16.mxu1 %v10308_v37  ;;  %v15058_v5 = vmul.f32 %v5935_v6, %v14935_v0  ;;  %v17269_v0 = vld [vmem:[#allocation117_spill] sm:$0xff] }
 0xbfc   : > { %v6378_v23 = vmul.f32 0.7978846, %v6250_v30  ;;  %17254 = vst [vmem:[#allocation112_spill] sm:$0xff] %v15039_v4  ;;  %v6386_v44 = vmul.f32 0.7978846, %v6258_v48  ;;  %v15046_v26 = vpop.f32.mrb[86].mxu1  ;;  %v15065_v7 = vmul.f32 %v5937_v32, %v14939_v34 }
 0xbfd   : > { %v5815_v30 = vmul.f32 0.044715, %v15023_v38  ;;  %7733 = vmatmul.mubr.bf16.gmra.mrb[108].mxu1 %v6850_v57  ;;  %17255 = vst [vmem:[#allocation156_spill] sm:$0xff] %v15050_v55  ;;  %v5817_v4 = vmul.f32 0.044715, %v15030_v20  ;;  %v15053_v40 = vpop.f32.mrb[182].mxu0  ;;  %v10613_v15 = vpop.eup %10612  ;;  %v6198_v57 = vadd.f32 %v6070_v61, %v14982_v39  ;;  %v15075_v61 = vadd.f32 %v14744_v33, %v17222_v25 }
 0xbfe   : > { %10616 = vtanh.f32 %v6378_v23  ;;  %v15055_v48 = vpop.f32.mrb[87].mxu1  ;;  %17257 = vst [vmem:[#allocation158_spill] sm:$0xff] %v15058_v5  ;;  %v5822_v12 = vmul.f32 0.044715, %v15034_v22  ;;  %v15062_v55 = vpop.f32.mrb[183].mxu0  ;;  %v6635_v37 = vadd.f32 1.0, %v10613_v15  ;;  %v6200_v23 = vadd.f32 %v6072_v59, %v14986_v53  ;;  %7806 = vmatpush1.bf16.msra.mxu1 %v10306_v27 }
 0xbff   : > { %17256 = vst [vmem:[#allocation157_spill] sm:$0xff] %v15055_v48  ;;  %10618 = vtanh.f32 %v6386_v44  ;;  %17258 = vst [vmem:[#allocation159_spill] sm:$0xff] %v15062_v55  ;;  %v15069_v43 = vmul.f32 0.5, %v17247_v42  ;;  %v10615_v48 = vpop.eup %10614  ;;  %v5943_v6 = vmul.f32 %v5815_v30, %v15023_v38  ;;  %v5945_v44 = vmul.f32 %v5817_v4, %v15030_v20  ;;  %v10312_v32 = vld [vmem:[%s11734_s24 + $0x1c0] ss:$8 sps:$4 sm:$0xff]   ;;  %7807 = vmatprep.subr.bf16.mxu1 %v10314_v13 }
 0xc00   : > { %10620 = vtanh.f32 %v6318_v21  ;;  %v6643_v5 = vadd.f32 1.0, %v10615_v48  ;;  %v15079_v15 = vmul.f32 0.5, %v14982_v39  ;;  %v15082_v42 = vmul.f32 0.5, %v14986_v53  ;;  %v10320_v21 = vld [vmem:[%s11734_s24 + $0x1d4] ss:$8 sps:$4 sm:$0xff]  }
 0xc01   : > { %10622 = vtanh.f32 %v6320_v31  ;;  %v6326_v59 = vmul.f32 0.7978846, %v6198_v57  ;;  %v5746_v4 = vmul.f32 0.5, %v17249_v19  ;;  %v5950_v30 = vmul.f32 %v5822_v12, %v15034_v22  ;;  %v15091_v27 = vpop.f32.mrb[88].mxu1  ;;  %v17265_v12 = vld [vmem:[#allocation107_spill] sm:$0xff] }
 0xc02   : > { %17259 = vst [vmem:[#allocation160_spill] sm:$0xff] %v15079_v15  ;;  %v15089_v33 = vadd.f32 %v14746_v50, %v17229_v24  ;;  %17261 = vst [vmem:[#allocation162_spill] sm:$0xff] %v15091_v27  ;;  %v6763_v39 = vmul.f32 %v6635_v37, %v15003_v54  ;;  %v6771_v31 = vmul.f32 %v6643_v5, %v15006_v16  ;;  %v6328_v53 = vmul.f32 0.7978846, %v6200_v23  ;;  %v15099_v48 = vpop.f32.mrb[184].mxu0  ;;  %v15101_v19 = vpop.f32.mrb[89].mxu1 }
 0xc03   : > { %v15097_v13 = vadd.f32 %v14756_v1, %v17231_v49  ;;  %17262 = vst [vmem:[#allocation163_spill] sm:$0xff] %v15099_v48  ;;  %17263 = vst [vmem:[#allocation164_spill] sm:$0xff] %v15101_v19  ;;  %v15104_v57 = vmul.f32 %v5943_v6, %v15023_v38  ;;  %v15107_v50 = vmul.f32 %v5945_v44, %v15030_v20  ;;  %v5824_v54 = vmul.f32 0.044715, %v15075_v61  ;;  %v17266_v16 = vld [vmem:[#allocation126_spill] sm:$0xff]  ;;  %v15113_v1 = vpop.f32.mrb[185].mxu0 }
 0xc04   : > { %17260 = vst [vmem:[#allocation161_spill] sm:$0xff] %v15089_v33  ;;  %v6267_v5 = vadd.f32 %v17266_v16, %v17265_v12  ;;  %7808 = vmatpush1.bf16.msra.mxu1 %v10312_v32  ;;  %v10318_v37 = vld [vmem:[%s11734_s24 + $0x1d0] ss:$8 sps:$4 sm:$0xff]   ;;  %17267 = vst [vmem:[#allocation107_spill] sm:$0xff] %v15113_v1  ;;  %v15115_v23 = vpop.f32.mrb[90].mxu1  ;;  %v6859_v15 = vpack.c.bf16 %v6771_v31, %v6763_v39  ;;  %v15121_v6 = vadd.f32 %v14758_v29, %v17221_v46  ;;  %v15128_v32 = vpop.f32.mrb[186].mxu0 }
 0xc05   : > { %17264 = vst [vmem:[#allocation165_spill] sm:$0xff] %v15104_v57  ;;  %17268 = vst [vmem:[#allocation126_spill] sm:$0xff] %v15115_v23  ;;  %v17270_v19 = vld [vmem:[#allocation132_spill] sm:$0xff]  ;;  %v15125_v44 = vadd.f32 %v14772_v52, %v17222_v25  ;;  %7809 = vmatprep.subr.bf16.mxu1 %v10320_v21  ;;  %v10326_v16 = vld [vmem:[%s11734_s24 + $0x1e4] ss:$8 sps:$4 sm:$0xff]   ;;  %v15130_v57 = vpop.f32.mrb[91].mxu1  ;;  %10624 = vtanh.f32 %v6326_v59  ;;  %v15133_v39 = vmul.f32 %v5950_v30, %v15034_v22 }
 0xc06   : > { %v6275_v48 = vadd.f32 %v17270_v19, %v17269_v0  ;;  %17271 = vst [vmem:[#allocation117_spill] sm:$0xff] %v15121_v6  ;;  %17273 = vst [vmem:[#allocation166_spill] sm:$0xff] %v15128_v32  ;;  %v5823_v31 = vmul.f32 0.044715, %v15089_v33  ;;  %v6395_v29 = vmul.f32 0.7978846, %v6267_v5  ;;  %7742 = vmatprep.mubr.bf16.mxu1 %v6859_v15  ;;  %10626 = vtanh.f32 %v6328_v53 }
 0xc07   : > { %17272 = vst [vmem:[#allocation132_spill] sm:$0xff] %v15125_v44  ;;  %17274 = vst [vmem:[#allocation167_spill] sm:$0xff] %v15130_v57  ;;  %v15136_v19 = vpop.f32.mrb[187].mxu0  ;;  %v5825_v52 = vmul.f32 0.044715, %v15097_v13  ;;  %v17277_v32 = vld [vmem:[#allocation103_spill] sm:$0xff]  ;;  %v5952_v30 = vmul.f32 %v5824_v54, %v15075_v61 }
 0xc08   : > { %17275 = vst [vmem:[#allocation168_spill] sm:$0xff] %v15133_v39  ;;  %17276 = vst [vmem:[#allocation169_spill] sm:$0xff] %v15136_v19  ;;  %v10617_v38 = vpop.eup %10616  ;;  %v6403_v21 = vmul.f32 0.7978846, %v6275_v48  ;;  %v17278_v23 = vld [vmem:[#allocation124_spill] sm:$0xff]  ;;  %v15143_v39 = vmul.f32 0.5, %v17265_v12  ;;  %10628 = vtanh.f32 %v6395_v29  ;;  %7810 = vmatpush1.bf16.msra.mxu1 %v10318_v37  ;;  %v15156_v37 = vadd.f32 %v14774_v51, %v17229_v24 }
 0xc09   : > { %v6266_v57 = vadd.f32 %v17278_v23, %v17277_v32  ;;  %v10619_v59 = vpop.eup %10618  ;;  %v6634_v1 = vadd.f32 1.0, %v10617_v38  ;;  %v10324_v5 = vld [vmem:[%s11734_s24 + $0x1e0] ss:$8 sps:$4 sm:$0xff]   ;;  %v10332_v22 = vld [vmem:[%s11734_s24 + $0x1f4] ss:$8 sps:$4 sm:$0xff]   ;;  %7811 = vmatprep.subr.bf16.mxu1 %v10326_v16  ;;  %v5951_v38 = vmul.f32 %v5823_v31, %v15089_v33  ;;  %v15158_v29 = vpop.f32.mrb[92].mxu1  ;;  %v5953_v16 = vmul.f32 %v5825_v52, %v15097_v13 }
 0xc0a   : > { %v6642_v19 = vadd.f32 1.0, %v10619_v59  ;;  %10630 = vtanh.f32 %v6403_v21  ;;  %v5830_v15 = vmul.f32 0.044715, %v15121_v6  ;;  %v5832_v53 = vmul.f32 0.044715, %v15125_v44  ;;  %v15149_v48 = vpop.eup %10620  ;;  %v17280_v54 = vld [vmem:[#allocation114_spill] sm:$0xff] }
 0xc0b   : > { %17279 = vst [vmem:[#allocation103_spill] sm:$0xff] %v15149_v48  ;;  %v17281_v23 = vld [vmem:[#allocation128_spill] sm:$0xff]  ;;  %v6394_v27 = vmul.f32 0.7978846, %v6266_v57  ;;  %17282 = vst [vmem:[#allocation124_spill] sm:$0xff] %v15156_v37  ;;  %v15160_v21 = vpop.eup %10622  ;;  %v6762_v59 = vmul.f32 %v6634_v1, %v15069_v43  ;;  %v15166_v31 = vadd.f32 %v14782_v63, %v17231_v49  ;;  %v15169_v57 = vpop.f32.mrb[188].mxu0  ;;  %v15176_v43 = vadd.f32 %v14820_v9, %v17221_v46 }
 0xc0c   : > { %v6274_v12 = vadd.f32 %v17281_v23, %v17280_v54  ;;  %17283 = vst [vmem:[#allocation114_spill] sm:$0xff] %v15158_v29  ;;  %v6770_v55 = vmul.f32 %v6642_v19, %v5746_v4  ;;  %v10330_v23 = vld [vmem:[%s11734_s24 + $0x1f0] ss:$8 sps:$4 sm:$0xff]   ;;  %17284 = vst [vmem:[#allocation128_spill] sm:$0xff] %v15169_v57  ;;  %v15171_v48 = vpop.f32.mrb[93].mxu1  ;;  %7812 = vmatpush1.bf16.msra.mxu1 %v10324_v5  ;;  %v15178_v4 = vpop.f32.mrb[189].mxu0  ;;  %v5958_v19 = vmul.f32 %v5830_v15, %v15121_v6 }
 0xc0d   : > { %17285 = vst [vmem:[#allocation170_spill] sm:$0xff] %v15171_v48  ;;  %10632 = vtanh.f32 %v6394_v27  ;;  %v5831_v29 = vmul.f32 0.044715, %v15156_v37  ;;  %17286 = vst [vmem:[#allocation171_spill] sm:$0xff] %v15178_v4  ;;  %v15180_v1 = vpop.f32.mrb[94].mxu1  ;;  %v5960_v52 = vmul.f32 %v5832_v53, %v15125_v44  ;;  %7813 = vmatprep.subr.bf16.mxu1 %v10332_v22  ;;  %v15187_v48 = vpop.f32.mrb[190].mxu0  ;;  %v15192_v9 = vmul.f32 %v5952_v30, %v15075_v61 }
 0xc0e   : > { %v6402_v51 = vmul.f32 0.7978846, %v6274_v12  ;;  %17287 = vst [vmem:[#allocation172_spill] sm:$0xff] %v15180_v1  ;;  %v6858_v63 = vpack.c.bf16 %v6770_v55, %v6762_v59  ;;  %v5616_v12 = vadd.f32 %v14831_v14, %v17222_v25  ;;  %v10338_v27 = vld [vmem:[%s11734_s24 + $0x204] ss:$8 sps:$4 sm:$0xff]   ;;  %17288 = vst [vmem:[#allocation173_spill] sm:$0xff] %v15187_v48  ;;  %v15201_v22 = vadd.f32 %v14833_v11, %v17229_v24 }
 0xc0f   : > { %v15189_v57 = vpop.f32.mrb[95].mxu1  ;;  %17290 = vst [vmem:[#allocation175_spill] sm:$0xff] %v15192_v9  ;;  %v5763_v5 = vmul.f32 0.5, %v17269_v0  ;;  %v5833_v55 = vmul.f32 0.044715, %v15166_v31  ;;  %v15196_v15 = vpop.f32.mrb[191].mxu0  ;;  %v5959_v53 = vmul.f32 %v5831_v29, %v15156_v37  ;;  %v15205_v59 = vadd.f32 %v14839_v28, %v17231_v49 }
 0xc10   : > { %17289 = vst [vmem:[#allocation174_spill] sm:$0xff] %v15189_v57  ;;  %10634 = vtanh.f32 %v6402_v51  ;;  %17291 = vst [vmem:[#allocation176_spill] sm:$0xff] %v15196_v15  ;;  %7743 = vmatmul.mubr.bf16.gmra.mrb[112].mxu1 %v6858_v63  ;;  %v5840_v14 = vmul.f32 0.044715, %v5616_v12  ;;  %v15207_v30 = vpop.eup %10624  ;;  %v15210_v0 = vmul.f32 %v5951_v38, %v15089_v33  ;;  %v15213_v51 = vmul.f32 %v5953_v16, %v15097_v13 }
 0xc11   : > { %17292 = vst [vmem:[#allocation177_spill] sm:$0xff] %v15205_v59  ;;  %17293 = vst [vmem:[#allocation178_spill] sm:$0xff] %v15207_v30  ;;  %v5754_v63 = vmul.f32 0.5, %v17277_v32  ;;  %v5838_v29 = vmul.f32 0.044715, %v15176_v43  ;;  %7814 = vmatpush1.bf16.msra.mxu1 %v10330_v23  ;;  %v15217_v15 = vpop.eup %10626  ;;  %v15220_v11 = vmul.f32 %v5958_v19, %v15121_v6  ;;  %v15223_v28 = vmul.f32 %v5960_v52, %v15125_v44 }
 0xc12   : > { %17294 = vst [vmem:[#allocation179_spill] sm:$0xff] %v15210_v0  ;;  %v5762_v30 = vmul.f32 0.5, %v17280_v54  ;;  %v5968_v38 = vmul.f32 %v5840_v14, %v5616_v12  ;;  %7896 = vmatprep.subr.bf16.mxu1 %v10338_v27  ;;  %v10629_v0 = vpop.eup %10628  ;;  %v5961_v16 = vmul.f32 %v5833_v55, %v15166_v31  ;;  %v15227_v33 = vmul.f32 0.5, %v5616_v12 }
 0xc13   : > { %17295 = vst [vmem:[#allocation180_spill] sm:$0xff] %v15220_v11  ;;  %17296 = vst [vmem:[#allocation181_spill] sm:$0xff] %v15223_v28  ;;  %v6283_v32 = vadd.f32 %v14788_v41, %v14649_v2  ;;  %v6291_v23 = vadd.f32 %v14836_v56, %v14738_v58  ;;  %v6651_v11 = vadd.f32 1.0, %v10629_v0  ;;  %v15234_v52 = vmul.f32 %v5959_v53, %v15156_v37  ;;  %v17299_v56 = vld [vmem:[#allocation143_spill] sm:$0xff]  ;;  %v17300_v53 = vld [vmem:[#allocation144_spill] sm:$0xff] }
 0xc14   : > { %17297 = vst [vmem:[#allocation182_spill] sm:$0xff] %v15227_v33  ;;  %v10631_v19 = vpop.eup %10630  ;;  %v5839_v54 = vmul.f32 0.044715, %v15201_v22  ;;  %v5841_v27 = vmul.f32 0.044715, %v15205_v59  ;;  %v5966_v55 = vmul.f32 %v5838_v29, %v15176_v43  ;;  %v6096_v57 = vmul.f32 %v5968_v38, %v5616_v12  ;;  %v17302_v28 = vld [vmem:[#allocation137_spill] sm:$0xff] }
 0xc15   : > { %17298 = vst [vmem:[#allocation183_spill] sm:$0xff] %v15234_v52  ;;  %v6659_v14 = vadd.f32 1.0, %v10631_v19  ;;  %v6411_v6 = vmul.f32 0.7978846, %v6283_v32  ;;  %v6419_v33 = vmul.f32 0.7978846, %v6291_v23  ;;  %v15244_v48 = vadd.f32 %v17299_v56, %v17221_v46 }
 0xc16   : > { %v15240_v41 = vmul.f32 0.5, %v14649_v2  ;;  %v5620_v0 = vadd.f32 %v17300_v53, %v17222_v25  ;;  %v6779_v37 = vmul.f32 %v6651_v11, %v15143_v39  ;;  %v15250_v19 = vmul.f32 %v5961_v16, %v15166_v31  ;;  %v17301_v53 = vld [vmem:[#allocation121_spill] sm:$0xff] }
 0xc17   : > { %v10633_v52 = vpop.eup %10632  ;;  %v6787_v1 = vmul.f32 %v6659_v14, %v5763_v5  ;;  %10636 = vtanh.f32 %v6411_v6  ;;  %v5967_v38 = vmul.f32 %v5839_v54, %v15201_v22  ;;  %v5779_v2 = vmul.f32 0.5, %v14738_v58  ;;  %v17304_v54 = vld [vmem:[#allocation140_spill] sm:$0xff] }
 0xc18   : > { %v6650_v29 = vadd.f32 1.0, %v10633_v52  ;;  %10638 = vtanh.f32 %v6419_v33  ;;  %v5969_v56 = vmul.f32 %v5841_v27, %v15205_v59  ;;  %v5848_v4 = vmul.f32 0.044715, %v5620_v0  ;;  %v17303_v52 = vld [vmem:[#allocation131_spill] sm:$0xff]  ;;  %v17305_v33 = vld [vmem:[#allocation145_spill] sm:$0xff] }
 0xc19   : > { %v6867_v23 = vpack.c.bf16 %v6787_v1, %v6779_v37  ;;  %v6282_v44 = vadd.f32 %v17302_v28, %v17301_v53  ;;  %v6224_v11 = vadd.f32 %v6096_v57, %v5616_v12  ;;  %v5846_v16 = vmul.f32 0.044715, %v15244_v48  ;;  %v17306_v27 = vld [vmem:[#allocation75_spill] sm:$0xff] }
 0xc1a   : > { %v10635_v32 = vpop.eup %10634  ;;  %v6778_v5 = vmul.f32 %v6650_v29, %v5754_v63  ;;  %v5976_v6 = vmul.f32 %v5848_v4, %v5620_v0  ;;  %v6290_v14 = vadd.f32 %v17304_v54, %v17303_v52  ;;  %v15262_v37 = vadd.f32 %v17305_v33, %v17229_v24 }
 0xc1b   : > { %v6658_v39 = vadd.f32 1.0, %v10635_v32  ;;  %7752 = vmatprep.mubr.bf16.mxu1 %v6867_v23  ;;  %v6410_v58 = vmul.f32 0.7978846, %v6282_v44  ;;  %v15266_v9 = vadd.f32 %v17306_v27, %v17231_v49  ;;  %v15270_v57 = vadd.f32 %v14883_v8, %v17221_v46 }
 0xc1c   : > { %v15274_v4 = vadd.f32 %v14891_v62, %v17222_v25  ;;  %v6104_v12 = vmul.f32 %v5976_v6, %v5620_v0  ;;  %v6418_v63 = vmul.f32 0.7978846, %v6290_v14  ;;  %v5847_v44 = vmul.f32 0.044715, %v15262_v37 }
 0xc1d   : > { %v6786_v1 = vmul.f32 %v6658_v39, %v5762_v30  ;;  %17307 = vst [vmem:[#allocation143_spill] sm:$0xff] %v15266_v9  ;;  %17308 = vst [vmem:[#allocation144_spill] sm:$0xff] %v15270_v57  ;;  %10640 = vtanh.f32 %v6410_v58  ;;  %v6352_v29 = vmul.f32 0.7978846, %v6224_v11  ;;  %v5974_v30 = vmul.f32 %v5846_v16, %v15244_v48 }
 0xc1e   : > { %17309 = vst [vmem:[#allocation121_spill] sm:$0xff] %v15274_v4  ;;  %v5849_v32 = vmul.f32 0.044715, %v15266_v9  ;;  %v15280_v23 = vmul.f32 %v5966_v55, %v15176_v43  ;;  %10642 = vtanh.f32 %v6418_v63  ;;  %v5854_v8 = vmul.f32 0.044715, %v15270_v57 }
 0xc1f   : > { %v6866_v28 = vpack.c.bf16 %v6786_v1, %v6778_v5  ;;  %v5856_v62 = vmul.f32 0.044715, %v15274_v4  ;;  %v15285_v39 = vmul.f32 %v5967_v38, %v15201_v22  ;;  %v15288_v6 = vmul.f32 %v5969_v56, %v15205_v59 }
 0xc20   : > { %v6232_v5 = vadd.f32 %v6104_v12, %v5620_v0  ;;  %v5975_v11 = vmul.f32 %v5847_v44, %v15262_v37  ;;  %v15291_v54 = vmul.f32 0.5, %v5620_v0  ;;  %v5770_v55 = vmul.f32 0.5, %v17301_v53 }
 0xc21   : > { %7753 = vmatmul.mubr.bf16.gmra.mrb[116].mxu1 %v6866_v28  ;;  %17310 = vst [vmem:[#allocation137_spill] sm:$0xff] %v15288_v6  ;;  %v10637_v16 = vpop.eup %10636  ;;  %v5778_v14 = vmul.f32 0.5, %v17303_v52  ;;  %v15297_v58 = vadd.f32 %v14893_v17, %v17229_v24  ;;  %10644 = vtanh.f32 %v6352_v29  ;;  %v15300_v56 = vmul.f32 %v5974_v30, %v15244_v48 }
 0xc22   : > { %17311 = vst [vmem:[#allocation131_spill] sm:$0xff] %v15291_v54  ;;  %v10639_v33 = vpop.eup %10638  ;;  %v6667_v38 = vadd.f32 1.0, %v10637_v16  ;;  %v5977_v1 = vmul.f32 %v5849_v32, %v15266_v9  ;;  %v5982_v0 = vmul.f32 %v5854_v8, %v15270_v57  ;;  %v5984_v12 = vmul.f32 %v5856_v62, %v15274_v4  ;;  %v17313_v32 = vld [vmem:[#allocation56_spill] sm:$0xff] }
 0xc23   : > { %v6675_v27 = vadd.f32 1.0, %v10639_v33  ;;  %v15307_v53 = vadd.f32 %v14905_v45, %v17231_v49  ;;  %v6360_v52 = vmul.f32 0.7978846, %v6232_v5  ;;  %v15310_v17 = vmul.f32 %v5975_v11, %v15262_v37  ;;  %v17314_v11 = vld [vmem:[#allocation146_spill] sm:$0xff] }
 0xc24   : > { %v6299_v63 = vadd.f32 %v14920_v36, %v14770_v47  ;;  %v6307_v44 = vadd.f32 %v14964_v3, %v14870_v35  ;;  %v6795_v28 = vmul.f32 %v6667_v38, %v15240_v41  ;;  %v5855_v30 = vmul.f32 0.044715, %v15297_v58 }
 0xc25   : > { %17312 = vst [vmem:[#allocation140_spill] sm:$0xff] %v15307_v53  ;;  %v6803_v29 = vmul.f32 %v6675_v27, %v5779_v2  ;;  %v15320_v8 = vadd.f32 %v17313_v32, %v17221_v46  ;;  %v15323_v45 = vmul.f32 0.5, %v14770_v47  ;;  %v15327_v36 = vadd.f32 %v17314_v11, %v17222_v25  ;;  %v17318_v27 = vld [vmem:[#allocation134_spill] sm:$0xff] }
 0xc26   : > { %v6427_v62 = vmul.f32 0.7978846, %v6299_v63  ;;  %v6435_v5 = vmul.f32 0.7978846, %v6307_v44  ;;  %v15330_v41 = vmul.f32 %v5977_v1, %v15266_v9  ;;  %v15333_v2 = vmul.f32 %v5982_v0, %v15270_v57  ;;  %v17319_v63 = vld [vmem:[#allocation97_spill] sm:$0xff]  ;;  %v17321_v1 = vld [vmem:[#allocation60_spill] sm:$0xff] }
 0xc27   : > { %17315 = vst [vmem:[#allocation145_spill] sm:$0xff] %v15327_v36  ;;  %v10641_v16 = vpop.eup %10640  ;;  %v6875_v3 = vpack.c.bf16 %v6803_v29, %v6795_v28  ;;  %v5857_v33 = vmul.f32 0.044715, %v15307_v53  ;;  %v5862_v47 = vmul.f32 0.044715, %v15320_v8  ;;  %v6298_v44 = vadd.f32 %v17319_v63, %v17318_v27  ;;  %v17320_v29 = vld [vmem:[#allocation118_spill] sm:$0xff] }
 0xc28   : > { %17316 = vst [vmem:[#allocation75_spill] sm:$0xff] %v15330_v41  ;;  %17317 = vst [vmem:[#allocation56_spill] sm:$0xff] %v15333_v2  ;;  %v6666_v38 = vadd.f32 1.0, %v10641_v16  ;;  %10646 = vtanh.f32 %v6427_v62  ;;  %v10643_v32 = vpop.eup %10642  ;;  %v5864_v28 = vmul.f32 0.044715, %v15327_v36  ;;  %v6306_v11 = vadd.f32 %v17321_v1, %v17320_v29  ;;  %v17322_v0 = vld [vmem:[#allocation147_spill] sm:$0xff] }
 0xc29   : > { %7762 = vmatprep.mubr.bf16.mxu1 %v6875_v3  ;;  %10648 = vtanh.f32 %v6435_v5  ;;  %v15344_v54 = vadd.f32 %v17322_v0, %v17229_v24  ;;  %v6674_v16 = vadd.f32 1.0, %v10643_v32  ;;  %v15347_v62 = vmul.f32 %v5984_v12, %v15274_v4  ;;  %v17324_v3 = vld [vmem:[#allocation149_spill] sm:$0xff] }
 0xc2a   : > { %10650 = vtanh.f32 %v6360_v52  ;;  %v6426_v41 = vmul.f32 0.7978846, %v6298_v44  ;;  %v5983_v63 = vmul.f32 %v5855_v30, %v15297_v58  ;;  %v6434_v9 = vmul.f32 0.7978846, %v6306_v11  ;;  %v17327_v11 = vld [vmem:[#allocation55_spill] sm:$0xff]  ;;  %v17330_v2 = vld [vmem:[#allocation69_spill] sm:$0xff] }
 0xc2b   : > { %17323 = vst [vmem:[#allocation146_spill] sm:$0xff] %v15347_v62  ;;  %v5863_v5 = vmul.f32 0.044715, %v15344_v54  ;;  %v15353_v6 = vadd.f32 %v17324_v3, %v17231_v49  ;;  %v15355_v1 = vpop.eup %10644  ;;  %v6794_v59 = vmul.f32 %v6666_v38, %v5770_v55  ;;  %v6802_v0 = vmul.f32 %v6674_v16, %v5778_v14  ;;  %v17328_v62 = vld [vmem:[#allocation65_spill] sm:$0xff]  ;;  %v17329_v3 = vld [vmem:[#allocation58_spill] sm:$0xff] }
 0xc2c   : > { %17326 = vst [vmem:[#allocation97_spill] sm:$0xff] %v15355_v1  ;;  %v5985_v52 = vmul.f32 %v5857_v33, %v15307_v53  ;;  %10652 = vtanh.f32 %v6426_v41  ;;  %v5990_v12 = vmul.f32 %v5862_v47, %v15320_v8  ;;  %v5992_v44 = vmul.f32 %v5864_v28, %v15327_v36  ;;  %v17331_v55 = vld [vmem:[#allocation109_spill] sm:$0xff] }
 0xc2d   : > { %17325 = vst [vmem:[#allocation134_spill] sm:$0xff] %v15353_v6  ;;  %10654 = vtanh.f32 %v6434_v9  ;;  %v5865_v30 = vmul.f32 0.044715, %v15353_v6  ;;  %v6874_v32 = vpack.c.bf16 %v6802_v0, %v6794_v59  ;;  %v6189_v4 = vadd.f32 %v17328_v62, %v17327_v11 }
 0xc2e   : > { %v6197_v57 = vadd.f32 %v17330_v2, %v17329_v3  ;;  %v15367_v14 = vadd.f32 %v17331_v55, %v17221_v46  ;;  %v15370_v41 = vmul.f32 %v5983_v63, %v15297_v58  ;;  %v5795_v33 = vmul.f32 0.5, %v14870_v35  ;;  %v17333_v63 = vld [vmem:[#allocation101_spill] sm:$0xff] }
 0xc2f   : > { %v5786_v9 = vmul.f32 0.5, %v17318_v27  ;;  %v5991_v38 = vmul.f32 %v5863_v5, %v15344_v54  ;;  %7763 = vmatmul.mubr.bf16.gmra.mrb[120].mxu1 %v6874_v32  ;;  %v15376_v59 = vmul.f32 %v5985_v52, %v15307_v53  ;;  %v5993_v47 = vmul.f32 %v5865_v30, %v15353_v6  ;;  %v17341_v53 = vld [vmem:[#allocation78_spill] sm:$0xff] }
 0xc30   : > { %v6317_v2 = vmul.f32 0.7978846, %v6189_v4  ;;  %v6325_v28 = vmul.f32 0.7978846, %v6197_v57  ;;  %v15380_v16 = vmul.f32 %v5990_v12, %v15320_v8  ;;  %v5794_v62 = vmul.f32 0.5, %v17320_v29 }
 0xc31   : > { %17332 = vst [vmem:[#allocation118_spill] sm:$0xff] %v15376_v59  ;;  %v15385_v35 = vadd.f32 %v17333_v63, %v17222_v25  ;;  %v15389_v27 = vadd.f32 %v14970_v60, %v17229_v24  ;;  %v15392_v0 = vmul.f32 %v5992_v44, %v15327_v36  ;;  %v15395_v4 = vmul.f32 0.5, %v17327_v11  ;;  %v17338_v11 = vld [vmem:[#allocation116_spill] sm:$0xff] }
 0xc32   : > { %v10647_v5 = vpop.eup %10646  ;;  %10656 = vtanh.f32 %v6317_v2  ;;  %v5870_v57 = vmul.f32 0.044715, %v15367_v14  ;;  %v15399_v12 = vmul.f32 %v5991_v38, %v15344_v54  ;;  %v5685_v30 = vmul.f32 0.5, %v17329_v3 }
 0xc33   : > { %17334 = vst [vmem:[#allocation60_spill] sm:$0xff] %v15385_v35  ;;  %17335 = vst [vmem:[#allocation147_spill] sm:$0xff] %v15392_v0  ;;  %v10649_v52 = vpop.eup %10648  ;;  %v6683_v29 = vadd.f32 1.0, %v10647_v5  ;;  %10658 = vtanh.f32 %v6325_v28  ;;  %v15405_v44 = vmul.f32 %v5993_v47, %v15353_v6  ;;  %v15409_v55 = vadd.f32 %v17338_v11, %v17231_v49  ;;  %v17340_v6 = vld [vmem:[#allocation150_spill] sm:$0xff] }
 0xc34   : > { %v15402_v60 = vpop.eup %10650  ;;  %v6691_v32 = vadd.f32 1.0, %v10649_v52  ;;  %v6193_v2 = vadd.f32 %v15065_v7, %v14939_v34  ;;  %v5872_v63 = vmul.f32 0.044715, %v15385_v35  ;;  %v5871_v38 = vmul.f32 0.044715, %v15389_v27 }
 0xc35   : > { %17336 = vst [vmem:[#allocation149_spill] sm:$0xff] %v15402_v60  ;;  %17337 = vst [vmem:[#allocation55_spill] sm:$0xff] %v15405_v44  ;;  %v15416_v3 = vmul.f32 0.5, %v14939_v34  ;;  %v6201_v28 = vadd.f32 %v15107_v50, %v15030_v20  ;;  %v6811_v47 = vmul.f32 %v6683_v29, %v15323_v45  ;;  %v5998_v11 = vmul.f32 %v5870_v57, %v15367_v14  ;;  %v17342_v57 = vld [vmem:[#allocation85_spill] sm:$0xff] }
 0xc36   : > { %17339 = vst [vmem:[#allocation65_spill] sm:$0xff] %v15409_v55  ;;  %v10653_v5 = vpop.eup %10652  ;;  %v6819_v52 = vmul.f32 %v6691_v32, %v5795_v33  ;;  %v6321_v0 = vmul.f32 0.7978846, %v6193_v2  ;;  %v15424_v59 = vadd.f32 %v17340_v6, %v17221_v46  ;;  %v6572_v34 = vadd.f32 1.0, %v17341_v53  ;;  %v17343_v6 = vld [vmem:[#allocation151_spill] sm:$0xff] }
 0xc37   : > { %v10655_v36 = vpop.eup %10654  ;;  %v6682_v44 = vadd.f32 1.0, %v10653_v5  ;;  %v6329_v7 = vmul.f32 0.7978846, %v6201_v28  ;;  %v5873_v50 = vmul.f32 0.044715, %v15409_v55  ;;  %v6000_v45 = vmul.f32 %v5872_v63, %v15385_v35  ;;  %v17345_v5 = vld [vmem:[#allocation62_spill] sm:$0xff] }
 0xc38   : > { %v6883_v60 = vpack.c.bf16 %v6819_v52, %v6811_v47  ;;  %v6690_v1 = vadd.f32 1.0, %v10655_v36  ;;  %10660 = vtanh.f32 %v6321_v0  ;;  %v5689_v33 = vmul.f32 0.5, %v15030_v20  ;;  %v17346_v47 = vld [vmem:[#allocation63_spill] sm:$0xff] }
 0xc39   : > { %10662 = vtanh.f32 %v6329_v7  ;;  %v6580_v29 = vadd.f32 1.0, %v17342_v57  ;;  %v6810_v32 = vmul.f32 %v6682_v44, %v5786_v9  ;;  %v15433_v28 = vadd.f32 %v17343_v6, %v17222_v25  ;;  %v17347_v9 = vld [vmem:[#allocation154_spill] sm:$0xff] }
 0xc3a   : > { %7772 = vmatprep.mubr.bf16.mxu1 %v6883_v60  ;;  %v6818_v2 = vmul.f32 %v6690_v1, %v5794_v62  ;;  %v6576_v53 = vadd.f32 1.0, %v15160_v21  ;;  %v5878_v36 = vmul.f32 0.044715, %v15424_v59  ;;  %v6700_v0 = vmul.f32 %v6572_v34, %v17345_v5  ;;  %v17348_v62 = vld [vmem:[#allocation152_spill] sm:$0xff] }
 0xc3b   : > { %17344 = vst [vmem:[#allocation58_spill] sm:$0xff] %v15433_v28  ;;  %v6708_v63 = vmul.f32 %v6580_v29, %v17346_v47  ;;  %v6584_v20 = vadd.f32 1.0, %v15217_v15  ;;  %v5999_v60 = vmul.f32 %v5871_v38, %v15389_v27  ;;  %v15446_v44 = vadd.f32 %v17348_v62, %v17229_v24  ;;  %v17349_v29 = vld [vmem:[#allocation155_spill] sm:$0xff]  ;;  %v17352_v47 = vld [vmem:[#allocation64_spill] sm:$0xff] }
 0xc3c   : > { %v10657_v52 = vpop.eup %10656  ;;  %v6882_v7 = vpack.c.bf16 %v6818_v2, %v6810_v32  ;;  %v15442_v1 = vmul.f32 %v6576_v53, %v17347_v9  ;;  %v15453_v15 = vadd.f32 %v17349_v29, %v17231_v49  ;;  %v15456_v38 = vmul.f32 %v5998_v11, %v15367_v14  ;;  %v17355_v9 = vld [vmem:[#allocation79_spill] sm:$0xff]  ;;  %v17356_v29 = vld [vmem:[#allocation106_spill] sm:$0xff] }
 0xc3d   : > { %v10659_v21 = vpop.eup %10658  ;;  %v6573_v57 = vadd.f32 1.0, %v10657_v52  ;;  %v6828_v6 = vpack.c.bf16 %v6708_v63, %v6700_v0  ;;  %v15449_v34 = vmul.f32 %v6584_v20, %v15082_v42  ;;  %v6001_v2 = vmul.f32 %v5873_v50, %v15409_v55  ;;  %v17353_v63 = vld [vmem:[#allocation73_spill] sm:$0xff]  ;;  %v17354_v50 = vld [vmem:[#allocation67_spill] sm:$0xff] }
 0xc3e   : > { %17350 = vst [vmem:[#allocation69_spill] sm:$0xff] %v15453_v15  ;;  %7773 = vmatmul.mubr.bf16.gmra.mrb[124].mxu1 %v6882_v7  ;;  %v6581_v32 = vadd.f32 1.0, %v10659_v21  ;;  %v5880_v53 = vmul.f32 0.044715, %v15433_v28  ;;  %v15461_v5 = vmul.f32 %v6000_v45, %v15385_v35  ;;  %v6006_v42 = vmul.f32 %v5878_v36, %v15424_v59 }
 0xc3f   : > { %v6832_v0 = vpack.c.bf16 %v15449_v34, %v15442_v1  ;;  %v6205_v20 = vadd.f32 %v17353_v63, %v17352_v47  ;;  %v6701_v52 = vmul.f32 %v6573_v57, %v15395_v4  ;;  %v5879_v7 = vmul.f32 0.044715, %v15446_v44  ;;  %v10336_v57 = vld [vmem:[%s11734_s24 + $0x200] ss:$8 sps:$4 sm:$0xff]   ;;  %v17359_v63 = vld [vmem:[#allocation112_spill] sm:$0xff] }
 0xc40   : > { %17351 = vst [vmem:[#allocation109_spill] sm:$0xff] %v15461_v5  ;;  %v6709_v11 = vmul.f32 %v6581_v32, %v5685_v30  ;;  %v6213_v62 = vadd.f32 %v17355_v9, %v17354_v50  ;;  %v5881_v21 = vmul.f32 0.044715, %v15453_v15  ;;  %v15475_v36 = vadd.f32 %v17356_v29, %v17221_v46 }
 0xc41   : > { %v6333_v45 = vmul.f32 0.7978846, %v6205_v20  ;;  %v15479_v1 = vadd.f32 %v15037_v18, %v17222_v25  ;;  %v6008_v30 = vmul.f32 %v5880_v53, %v15433_v28  ;;  %v15485_v9 = vadd.f32 %v17359_v63, %v17229_v24 }
 0xc42   : > { %17357 = vst [vmem:[#allocation101_spill] sm:$0xff] %v15475_v36  ;;  %v10661_v34 = vpop.eup %10660  ;;  %v6829_v4 = vpack.c.bf16 %v6709_v11, %v6701_v52  ;;  %v6341_v32 = vmul.f32 0.7978846, %v6213_v62  ;;  %v5886_v29 = vmul.f32 0.044715, %v15475_v36  ;;  %v15490_v18 = vmul.f32 %v5999_v60, %v15389_v27 }
 0xc43   : > { %17358 = vst [vmem:[#allocation116_spill] sm:$0xff] %v15479_v1  ;;  %v10663_v20 = vpop.eup %10662  ;;  %v6577_v5 = vadd.f32 1.0, %v10661_v34  ;;  %10664 = vtanh.f32 %v6333_v45  ;;  %v5888_v35 = vmul.f32 0.044715, %v15479_v1  ;;  %v6007_v53 = vmul.f32 %v5879_v7, %v15446_v44  ;;  %v10341_v11 = vld [vmem:[%s11734_s24 + $0x214] ss:$8 sps:$4 sm:$0xff]  }
 0xc44   : > { %7815 = vmatprep.mubr.bf16.mxu1 %v6829_v4  ;;  %v6585_v52 = vadd.f32 1.0, %v10663_v20  ;;  %10666 = vtanh.f32 %v6341_v32  ;;  %v15495_v62 = vmul.f32 %v6001_v2, %v15409_v55  ;;  %v15498_v34 = vmul.f32 %v6006_v42, %v15424_v59  ;;  %v10339_v32 = vld [vmem:[%s11734_s24 + $0x210] ss:$8 sps:$4 sm:$0xff]   ;;  %v17382_v55 = vld [vmem:[#allocation74_spill] sm:$0xff] }
 0xc45   : > { %v6009_v45 = vmul.f32 %v5881_v21, %v15453_v15  ;;  %v15503_v4 = vadd.f32 %v15044_v10, %v17231_v49  ;;  %v6705_v60 = vmul.f32 %v6577_v5, %v15416_v3  ;;  %v15507_v7 = vmul.f32 %v6008_v30, %v15433_v28 }
 0xc46   : > { %17360 = vst [vmem:[#allocation150_spill] sm:$0xff] %v15495_v62  ;;  %v6713_v63 = vmul.f32 %v6585_v52, %v5689_v33  ;;  %7816 = vmatmul.mubr.bf16.vlgmr.msra.gmra.mrb[96].mxu1 %v6828_v6  ;;  %v5887_v2 = vmul.f32 0.044715, %v15485_v9  ;;  %v6014_v42 = vmul.f32 %v5886_v29, %v15475_v36  ;;  %v6016_v21 = vmul.f32 %v5888_v35, %v15479_v1 }
 0xc47   : > { %17361 = vst [vmem:[#allocation78_spill] sm:$0xff] %v15503_v4  ;;  %17362 = vst [vmem:[#allocation85_spill] sm:$0xff] %v15507_v7  ;;  %7897 = vmatpush1.bf16.msra.mxu1 %v10336_v57  ;;  %v6209_v10 = vadd.f32 %v15213_v51, %v15097_v13  ;;  %v6217_v3 = vadd.f32 %v15250_v19, %v15166_v31  ;;  %v15518_v33 = vmul.f32 %v6007_v53, %v15446_v44  ;;  %v10344_v57 = vld [vmem:[%s11734_s24 + $0x224] ss:$8 sps:$4 sm:$0xff]  }
 0xc48   : > { %v6833_v5 = vpack.c.bf16 %v6713_v63, %v6705_v60  ;;  %v5693_v6 = vmul.f32 0.5, %v17352_v47  ;;  %v5701_v30 = vmul.f32 0.5, %v17354_v50  ;;  %7898 = vmatprep.subr.bf16.mxu1 %v10341_v11  ;;  %v15524_v20 = vmul.f32 %v6009_v45, %v15453_v15  ;;  %v17364_v50 = vld [vmem:[#allocation61_spill] sm:$0xff]  ;;  %v17365_v53 = vld [vmem:[#allocation70_spill] sm:$0xff] }
 0xc49   : > { %v5889_v35 = vmul.f32 0.044715, %v15503_v4  ;;  %v6337_v51 = vmul.f32 0.7978846, %v6209_v10  ;;  %v6345_v29 = vmul.f32 0.7978846, %v6217_v3  ;;  %v6015_v19 = vmul.f32 %v5887_v2, %v15485_v9 }
 0xc4a   : > { %17363 = vst [vmem:[#allocation151_spill] sm:$0xff] %v15524_v20  ;;  %8041 = vmatprep.mubr.bf16.mxu0 %v6833_v5  ;;  %v15529_v52 = vmul.f32 0.5, %v15097_v13  ;;  %v15532_v47 = vmul.f32 0.5, %v15166_v31  ;;  %v6204_v11 = vadd.f32 %v17365_v53, %v17364_v50  ;;  %v15537_v45 = vmul.f32 %v6014_v42, %v15475_v36  ;;  %v17368_v63 = vld [vmem:[#allocation66_spill] sm:$0xff]  ;;  %v17369_v2 = vld [vmem:[#allocation76_spill] sm:$0xff] }
 0xc4b   : > { %8042 = vmatmul.mubr.bf16.vlgmr.msra.gmra.mrb[192].mxu0 %v6832_v0  ;;  %7899 = vmatpush1.bf16.msra.mxu1 %v10339_v32  ;;  %v15540_v60 = vmul.f32 %v6016_v21, %v15479_v1  ;;  %10668 = vtanh.f32 %v6337_v51  ;;  %v6212_v10 = vadd.f32 %v17369_v2, %v17368_v63  ;;  %v10342_v13 = vld [vmem:[%s11734_s24 + $0x220] ss:$8 sps:$4 sm:$0xff]   ;;  %v15547_v31 = vadd.f32 %v15046_v26, %v17221_v46  ;;  %v10347_v42 = vld [vmem:[%s11734_s24 + $0x234] ss:$8 sps:$4 sm:$0xff]  }
 0xc4c   : > { %17366 = vst [vmem:[#allocation62_spill] sm:$0xff] %v15537_v45  ;;  %10670 = vtanh.f32 %v6345_v29  ;;  %v15551_v0 = vadd.f32 %v15053_v40, %v17222_v25  ;;  %v6332_v32 = vmul.f32 0.7978846, %v6204_v11  ;;  %7900 = vmatprep.subr.bf16.mxu1 %v10344_v57  ;;  %v6017_v3 = vmul.f32 %v5889_v35, %v15503_v4  ;;  %v17372_v51 = vld [vmem:[#allocation175_spill] sm:$0xff]  ;;  %v17373_v53 = vld [vmem:[#allocation132_spill] sm:$0xff]  ;;  %v17374_v2 = vld [vmem:[#allocation181_spill] sm:$0xff] }
 0xc4d   : > { %17367 = vst [vmem:[#allocation63_spill] sm:$0xff] %v15540_v60  ;;  %17370 = vst [vmem:[#allocation154_spill] sm:$0xff] %v15547_v31  ;;  %v10665_v21 = vpop.eup %10664  ;;  %v6340_v5 = vmul.f32 0.7978846, %v6212_v10  ;;  %v6208_v29 = vadd.f32 %v17372_v51, %v15075_v61  ;;  %v6216_v60 = vadd.f32 %v17374_v2, %v17373_v53  ;;  %v15560_v7 = vmul.f32 %v6015_v19, %v15485_v9  ;;  %v17376_v40 = vld [vmem:[#allocation157_spill] sm:$0xff] }
 0xc4e   : > { %17371 = vst [vmem:[#allocation152_spill] sm:$0xff] %v15551_v0  ;;  %v10667_v26 = vpop.eup %10666  ;;  %v6589_v1 = vadd.f32 1.0, %v10665_v21  ;;  %10672 = vtanh.f32 %v6332_v32  ;;  %v15564_v57 = vadd.f32 %v17376_v40, %v17229_v24  ;;  %v10345_v11 = vld [vmem:[%s11734_s24 + $0x230] ss:$8 sps:$4 sm:$0xff]   ;;  %v15568_v35 = vmul.f32 0.5, %v17364_v50 }
 0xc4f   : > { %17375 = vst [vmem:[#allocation155_spill] sm:$0xff] %v15560_v7  ;;  %v6597_v28 = vadd.f32 1.0, %v10667_v26  ;;  %10674 = vtanh.f32 %v6340_v5  ;;  %v6336_v10 = vmul.f32 0.7978846, %v6208_v29  ;;  %7901 = vmatpush1.bf16.msra.mxu1 %v10342_v13  ;;  %v10350_v51 = vld [vmem:[%s11734_s24 + $0x244] ss:$8 sps:$4 sm:$0xff]   ;;  %v15578_v50 = vmul.f32 %v6017_v3, %v15503_v4 }
 0xc50   : > { %v5894_v2 = vmul.f32 0.044715, %v15547_v31  ;;  %v5896_v21 = vmul.f32 0.044715, %v15551_v0  ;;  %v6344_v19 = vmul.f32 0.7978846, %v6216_v60  ;;  %7902 = vmatprep.subr.bf16.mxu1 %v10347_v42  ;;  %v6717_v40 = vmul.f32 %v6589_v1, %v5693_v6 }
 0xc51   : > { %v17377_v32 = vld [vmem:[#allocation159_spill] sm:$0xff]  ;;  %v6725_v26 = vmul.f32 %v6597_v28, %v5701_v30  ;;  %17379 = vst [vmem:[#allocation73_spill] sm:$0xff] %v15578_v50  ;;  %10676 = vtanh.f32 %v6336_v10  ;;  %v5895_v13 = vmul.f32 0.044715, %v15564_v57  ;;  %v17381_v60 = vld [vmem:[#allocation86_spill] sm:$0xff] }
 0xc52   : > { %v15575_v20 = vadd.f32 %v17377_v32, %v17231_v49  ;;  %10678 = vtanh.f32 %v6344_v19  ;;  %v17380_v29 = vld [vmem:[#allocation71_spill] sm:$0xff]  ;;  %v17383_v32 = vld [vmem:[#allocation92_spill] sm:$0xff]  ;;  %v17384_v28 = vld [vmem:[#allocation162_spill] sm:$0xff]  ;;  %v6022_v3 = vmul.f32 %v5894_v2, %v15547_v31  ;;  %v6024_v10 = vmul.f32 %v5896_v21, %v15551_v0 }
 0xc53   : > { %v6221_v15 = vadd.f32 %v17381_v60, %v17380_v29  ;;  %v6837_v62 = vpack.c.bf16 %v6725_v26, %v6717_v40  ;;  %v6229_v45 = vadd.f32 %v17383_v32, %v17382_v55  ;;  %7903 = vmatpush1.bf16.msra.mxu1 %v10345_v11  ;;  %v15588_v1 = vadd.f32 %v17384_v28, %v17221_v46  ;;  %v17386_v6 = vld [vmem:[#allocation163_spill] sm:$0xff]  ;;  %v10348_v42 = vld [vmem:[%s11734_s24 + $0x240] ss:$8 sps:$4 sm:$0xff]   ;;  %v17388_v40 = vld [vmem:[#allocation164_spill] sm:$0xff] }
 0xc54   : > { %17378 = vst [vmem:[#allocation64_spill] sm:$0xff] %v15575_v20  ;;  %v5897_v5 = vmul.f32 0.044715, %v15575_v20  ;;  %v15592_v30 = vadd.f32 %v17386_v6, %v17222_v25  ;;  %v15599_v26 = vadd.f32 %v17388_v40, %v17229_v24  ;;  %7904 = vmatprep.subr.bf16.mxu1 %v10350_v51  ;;  %v10353_v11 = vld [vmem:[%s11734_s24 + $0x254] ss:$8 sps:$4 sm:$0xff]   ;;  %v5700_v32 = vmul.f32 0.5, %v17368_v63 }
 0xc55   : > { %17385 = vst [vmem:[#allocation67_spill] sm:$0xff] %v15588_v1  ;;  %v6349_v19 = vmul.f32 0.7978846, %v6221_v15  ;;  %v10669_v60 = vpop.eup %10668  ;;  %7825 = vmatprep.mubr.bf16.mxu1 %v6837_v62  ;;  %v5696_v28 = vmul.f32 0.5, %v15075_v61  ;;  %v6357_v6 = vmul.f32 0.7978846, %v6229_v45  ;;  %v6023_v15 = vmul.f32 %v5895_v13, %v15564_v57 }
 0xc56   : > { %17387 = vst [vmem:[#allocation79_spill] sm:$0xff] %v15592_v30  ;;  %17389 = vst [vmem:[#allocation106_spill] sm:$0xff] %v15599_v26  ;;  %v5902_v50 = vmul.f32 0.044715, %v15588_v1  ;;  %v10671_v2 = vpop.eup %10670  ;;  %v6593_v4 = vadd.f32 1.0, %v10669_v60  ;;  %v6025_v40 = vmul.f32 %v5897_v5, %v15575_v20  ;;  %v15611_v45 = vmul.f32 %v6022_v3, %v15547_v31 }
 0xc57   : > { %10680 = vtanh.f32 %v6349_v19  ;;  %v5904_v21 = vmul.f32 0.044715, %v15592_v30  ;;  %v6601_v51 = vadd.f32 1.0, %v10671_v2  ;;  %v5903_v62 = vmul.f32 0.044715, %v15599_v26  ;;  %7905 = vmatpush1.bf16.msra.mxu1 %v10348_v42  ;;  %v17392_v19 = vld [vmem:[#allocation107_spill] sm:$0xff] }
 0xc58   : > { %10682 = vtanh.f32 %v6357_v6  ;;  %v10351_v63 = vld [vmem:[%s11734_s24 + $0x250] ss:$8 sps:$4 sm:$0xff]   ;;  %v10673_v61 = vpop.eup %10672  ;;  %17390 = vst [vmem:[#allocation112_spill] sm:$0xff] %v15611_v45  ;;  %v15614_v60 = vmul.f32 %v6024_v10, %v15551_v0  ;;  %v5704_v13 = vmul.f32 0.5, %v17373_v53  ;;  %v15619_v36 = vadd.f32 %v17392_v19, %v17231_v49  ;;  %7906 = vmatprep.subr.bf16.mxu1 %v10353_v11  ;;  %v10356_v5 = vld [vmem:[%s11734_s24 + $0x264] ss:$8 sps:$4 sm:$0xff]  }
 0xc59   : > { %v10675_v6 = vpop.eup %10674  ;;  %v6721_v42 = vmul.f32 %v6593_v4, %v15529_v52  ;;  %v6729_v2 = vmul.f32 %v6601_v51, %v15532_v47  ;;  %v6588_v7 = vadd.f32 1.0, %v10673_v61  ;;  %v6030_v3 = vmul.f32 %v5902_v50, %v15588_v1  ;;  %v10354_v47 = vld [vmem:[%s11734_s24 + $0x260] ss:$8 sps:$4 sm:$0xff]  }
 0xc5a   : > { %17391 = vst [vmem:[#allocation61_spill] sm:$0xff] %v15614_v60  ;;  %17393 = vst [vmem:[#allocation70_spill] sm:$0xff] %v15619_v36  ;;  %v6596_v45 = vadd.f32 1.0, %v10675_v6  ;;  %v5709_v10 = vmul.f32 0.5, %v17380_v29  ;;  %v5717_v53 = vmul.f32 0.5, %v17382_v55  ;;  %v6032_v19 = vmul.f32 %v5904_v21, %v15592_v30 }
 0xc5b   : > { %v10677_v60 = vpop.eup %10676  ;;  %v6841_v11 = vpack.c.bf16 %v6729_v2, %v6721_v42  ;;  %v15629_v0 = vmul.f32 %v6023_v15, %v15564_v57  ;;  %v15632_v4 = vmul.f32 %v6025_v40, %v15575_v20  ;;  %v6031_v52 = vmul.f32 %v5903_v62, %v15599_v26  ;;  %7907 = vmatpush1.bf16.msra.mxu1 %v10351_v63  ;;  %v10359_v21 = vld [vmem:[%s11734_s24 + $0x274] ss:$8 sps:$4 sm:$0xff]   ;;  %v17397_v40 = vld [vmem:[#allocation126_spill] sm:$0xff]  ;;  %v17400_v63 = vld [vmem:[#allocation81_spill] sm:$0xff] }
 0xc5c   : > { %v10679_v50 = vpop.eup %10678  ;;  %v6716_v29 = vmul.f32 %v6588_v7, %v15568_v35  ;;  %v6724_v51 = vmul.f32 %v6596_v45, %v5700_v32  ;;  %v6592_v61 = vadd.f32 1.0, %v10677_v60  ;;  %v5905_v55 = vmul.f32 0.044715, %v15619_v36  ;;  %7908 = vmatprep.subr.bf16.mxu1 %v10356_v5  ;;  %v17399_v62 = vld [vmem:[#allocation68_spill] sm:$0xff]  ;;  %v17402_v32 = vld [vmem:[#allocation166_spill] sm:$0xff] }
 0xc5d   : > { %17394 = vst [vmem:[#allocation66_spill] sm:$0xff] %v15629_v0  ;;  %17395 = vst [vmem:[#allocation76_spill] sm:$0xff] %v15632_v4  ;;  %8051 = vmatprep.mubr.bf16.mxu0 %v6841_v11  ;;  %v6600_v6 = vadd.f32 1.0, %v10679_v50  ;;  %v15640_v15 = vmul.f32 %v6030_v3, %v15588_v1  ;;  %v15644_v42 = vadd.f32 %v17397_v40, %v17221_v46  ;;  %v17404_v60 = vld [vmem:[#allocation72_spill] sm:$0xff]  ;;  %v17405_v5 = vld [vmem:[#allocation90_spill] sm:$0xff] }
 0xc5e   : > { %v6220_v2 = vadd.f32 %v17400_v63, %v17399_v62  ;;  %v6836_v7 = vpack.c.bf16 %v6724_v51, %v6716_v29  ;;  %v15649_v35 = vmul.f32 %v6032_v19, %v15592_v30  ;;  %v15653_v45 = vadd.f32 %v17402_v32, %v17222_v25  ;;  %v17406_v40 = vld [vmem:[#allocation167_spill] sm:$0xff]  ;;  %v17409_v32 = vld [vmem:[#allocation169_spill] sm:$0xff] }
 0xc5f   : > { %17396 = vst [vmem:[#allocation175_spill] sm:$0xff] %v15640_v15  ;;  %17398 = vst [vmem:[#allocation132_spill] sm:$0xff] %v15644_v42  ;;  %v6228_v3 = vadd.f32 %v17405_v5, %v17404_v60  ;;  %v6720_v11 = vmul.f32 %v6592_v61, %v5696_v28  ;;  %v6728_v50 = vmul.f32 %v6600_v6, %v5704_v13  ;;  %7909 = vmatpush1.bf16.msra.mxu1 %v10354_v47  ;;  %v10357_v28 = vld [vmem:[%s11734_s24 + $0x270] ss:$8 sps:$4 sm:$0xff]   ;;  %v10362_v47 = vld [vmem:[%s11734_s24 + $0x284] ss:$8 sps:$4 sm:$0xff]  }
 0xc60   : > { %17401 = vst [vmem:[#allocation181_spill] sm:$0xff] %v15649_v35  ;;  %17403 = vst [vmem:[#allocation157_spill] sm:$0xff] %v15653_v45  ;;  %v6348_v4 = vmul.f32 0.7978846, %v6220_v2  ;;  %v15659_v20 = vadd.f32 %v17406_v40, %v17229_v24  ;;  %7826 = vmatmul.mubr.bf16.gmra.mrb[100].mxu1 %v6836_v7  ;;  %v15662_v19 = vmul.f32 %v6031_v52, %v15599_v26  ;;  %7910 = vmatprep.subr.bf16.mxu1 %v10359_v21  ;;  %v17411_v40 = vld [vmem:[#allocation82_spill] sm:$0xff]  ;;  %v17412_v21 = vld [vmem:[#allocation96_spill] sm:$0xff] }
 0xc61   : > { %v10681_v29 = vpop.eup %10680  ;;  %v6033_v51 = vmul.f32 %v5905_v55, %v15619_v36  ;;  %v6356_v63 = vmul.f32 0.7978846, %v6228_v3  ;;  %v15667_v5 = vadd.f32 %v17409_v32, %v17231_v49  ;;  %v6840_v61 = vpack.c.bf16 %v6728_v50, %v6720_v11  ;;  %v17413_v11 = vld [vmem:[#allocation87_spill] sm:$0xff]  ;;  %v17414_v50 = vld [vmem:[#allocation105_spill] sm:$0xff]  ;;  %v17417_v15 = vld [vmem:[#allocation128_spill] sm:$0xff] }
 0xc62   : > { %17407 = vst [vmem:[#allocation159_spill] sm:$0xff] %v15659_v20  ;;  %17408 = vst [vmem:[#allocation71_spill] sm:$0xff] %v15662_v19  ;;  %v10683_v13 = vpop.eup %10682  ;;  %v6605_v6 = vadd.f32 1.0, %v10681_v29  ;;  %v5910_v2 = vmul.f32 0.044715, %v15644_v42  ;;  %10684 = vtanh.f32 %v6348_v4  ;;  %v6237_v32 = vadd.f32 %v17412_v21, %v17411_v40  ;;  %v17415_v4 = vld [vmem:[#allocation114_spill] sm:$0xff] }
 0xc63   : > { %17410 = vst [vmem:[#allocation86_spill] sm:$0xff] %v15667_v5  ;;  %v6613_v7 = vadd.f32 1.0, %v10683_v13  ;;  %v5912_v52 = vmul.f32 0.044715, %v15653_v45  ;;  %10686 = vtanh.f32 %v6356_v63  ;;  %v5911_v55 = vmul.f32 0.044715, %v15659_v20  ;;  %8052 = vmatmul.mubr.bf16.gmra.mrb[196].mxu0 %v6840_v61  ;;  %7911 = vmatpush1.bf16.msra.mxu1 %v10357_v28 }
 0xc64   : > { %v5913_v3 = vmul.f32 0.044715, %v15667_v5  ;;  %v6245_v29 = vadd.f32 %v17414_v50, %v17413_v11  ;;  %v15681_v35 = vadd.f32 %v17415_v4, %v17221_v46  ;;  %v6733_v13 = vmul.f32 %v6605_v6, %v5709_v10  ;;  %v10360_v1 = vld [vmem:[%s11734_s24 + $0x280] ss:$8 sps:$4 sm:$0xff]   ;;  %7912 = vmatprep.subr.bf16.mxu1 %v10362_v47  ;;  %v10365_v10 = vld [vmem:[%s11734_s24 + $0x294] ss:$8 sps:$4 sm:$0xff]  }
 0xc65   : > { %v6741_v30 = vmul.f32 %v6613_v7, %v5717_v53  ;;  %v5708_v63 = vmul.f32 0.5, %v17399_v62  ;;  %v15686_v61 = vadd.f32 %v17417_v15, %v17222_v25  ;;  %v6038_v19 = vmul.f32 %v5910_v2, %v15644_v42  ;;  %v17419_v50 = vld [vmem:[#allocation170_spill] sm:$0xff]  ;;  %v17422_v7 = vld [vmem:[#allocation171_spill] sm:$0xff] }
 0xc66   : > { %17416 = vst [vmem:[#allocation74_spill] sm:$0xff] %v15681_v35  ;;  %v6365_v21 = vmul.f32 0.7978846, %v6237_v32  ;;  %v6373_v26 = vmul.f32 0.7978846, %v6245_v29  ;;  %v15692_v31 = vadd.f32 %v17419_v50, %v17229_v24  ;;  %v15696_v62 = vmul.f32 %v6033_v51, %v15619_v36  ;;  %v17424_v51 = vld [vmem:[#allocation172_spill] sm:$0xff] }
 0xc67   : > { %17418 = vst [vmem:[#allocation92_spill] sm:$0xff] %v15686_v61  ;;  %v6845_v53 = vpack.c.bf16 %v6741_v30, %v6733_v13  ;;  %v6040_v15 = vmul.f32 %v5912_v52, %v15653_v45  ;;  %v5918_v28 = vmul.f32 0.044715, %v15681_v35  ;;  %v6039_v6 = vmul.f32 %v5911_v55, %v15659_v20  ;;  %v17426_v52 = vld [vmem:[#allocation173_spill] sm:$0xff]  ;;  %7913 = vmatpush1.bf16.msra.mxu1 %v10360_v1  ;;  %v10363_v55 = vld [vmem:[%s11734_s24 + $0x290] ss:$8 sps:$4 sm:$0xff]  }
 0xc68   : > { %17420 = vst [vmem:[#allocation162_spill] sm:$0xff] %v15692_v31  ;;  %17421 = vst [vmem:[#allocation163_spill] sm:$0xff] %v15696_v62  ;;  %v6041_v2 = vmul.f32 %v5913_v3, %v15667_v5  ;;  %10688 = vtanh.f32 %v6365_v21  ;;  %v15704_v32 = vadd.f32 %v17422_v7, %v17231_v49  ;;  %v5920_v30 = vmul.f32 0.044715, %v15686_v61  ;;  %7914 = vmatprep.subr.bf16.mxu1 %v10365_v10  ;;  %v17432_v7 = vld [vmem:[#allocation94_spill] sm:$0xff] }
 0xc69   : > { %7835 = vmatprep.mubr.bf16.mxu1 %v6845_v53  ;;  %10690 = vtanh.f32 %v6373_v26  ;;  %v15709_v47 = vadd.f32 %v17424_v51, %v17221_v46  ;;  %v15713_v29 = vadd.f32 %v17426_v52, %v17222_v25  ;;  %v15717_v3 = vmul.f32 %v6038_v19, %v15644_v42  ;;  %v10368_v46 = vld [vmem:[%s11734_s24 + $0x2a4] ss:$8 sps:$4 sm:$0xff]   ;;  %v17433_v51 = vld [vmem:[#allocation84_spill] sm:$0xff]  ;;  %v10366_v62 = vld [vmem:[%s11734_s24 + $0x2a0] ss:$8 sps:$4 sm:$0xff]  }
 0xc6a   : > { %17423 = vst [vmem:[#allocation164_spill] sm:$0xff] %v15704_v32  ;;  %v5716_v4 = vmul.f32 0.5, %v17404_v60  ;;  %v15721_v26 = vmul.f32 0.5, %v17411_v40  ;;  %v5919_v13 = vmul.f32 0.044715, %v15692_v31  ;;  %v5733_v21 = vmul.f32 0.5, %v17413_v11 }
 0xc6b   : > { %17425 = vst [vmem:[#allocation107_spill] sm:$0xff] %v15709_v47  ;;  %17427 = vst [vmem:[#allocation126_spill] sm:$0xff] %v15713_v29  ;;  %v6046_v25 = vmul.f32 %v5918_v28, %v15681_v35  ;;  %v5921_v1 = vmul.f32 0.044715, %v15704_v32  ;;  %v5926_v50 = vmul.f32 0.044715, %v15709_v47  ;;  %v15730_v53 = vmul.f32 %v6040_v15, %v15653_v45  ;;  %7915 = vmatpush1.bf16.msra.mxu1 %v10363_v55 }
 0xc6c   : > { %17428 = vst [vmem:[#allocation68_spill] sm:$0xff] %v15717_v3  ;;  %v10685_v19 = vpop.eup %10684  ;;  %v15733_v60 = vmul.f32 %v6039_v6, %v15659_v20  ;;  %v17431_v40 = vld [vmem:[#allocation77_spill] sm:$0xff]  ;;  %v17434_v52 = vld [vmem:[#allocation98_spill] sm:$0xff]  ;;  %v15741_v3 = vmul.f32 %v6041_v2, %v15667_v5  ;;  %v6048_v42 = vmul.f32 %v5920_v30, %v15686_v61  ;;  %v5928_v15 = vmul.f32 0.044715, %v15713_v29  ;;  %7916 = vmatprep.subr.bf16.mxu1 %v10368_v46  ;;  %v17473_v20 = vld [vmem:[#allocation156_spill] sm:$0xff] }
 0xc6d   : > { %17429 = vst [vmem:[#allocation81_spill] sm:$0xff] %v15730_v53  ;;  %v6236_v10 = vadd.f32 %v17432_v7, %v17431_v40  ;;  %v6244_v11 = vadd.f32 %v17434_v52, %v17433_v51  ;;  %v10687_v36 = vpop.eup %10686  ;;  %v6604_v28 = vadd.f32 1.0, %v10685_v19  ;;  %v10371_v53 = vld [vmem:[%s11734_s24 + $0x2b4] ss:$8 sps:$4 sm:$0xff]   ;;  %v6047_v45 = vmul.f32 %v5919_v13, %v15692_v31 }
 0xc6e   : > { %17430 = vst [vmem:[#allocation166_spill] sm:$0xff] %v15733_v60  ;;  %17435 = vst [vmem:[#allocation72_spill] sm:$0xff] %v15741_v3  ;;  %v6612_v6 = vadd.f32 1.0, %v10687_v36  ;;  %v15748_v52 = vmul.f32 %v6046_v25, %v15681_v35  ;;  %v6049_v19 = vmul.f32 %v5921_v1, %v15704_v32  ;;  %v6054_v2 = vmul.f32 %v5926_v50, %v15709_v47  ;;  %v17437_v36 = vld [vmem:[#allocation174_spill] sm:$0xff]  ;;  %v17439_v1 = vld [vmem:[#allocation95_spill] sm:$0xff] }
 0xc6f   : > { %v6364_v60 = vmul.f32 0.7978846, %v6236_v10  ;;  %v6372_v7 = vmul.f32 0.7978846, %v6244_v11  ;;  %v15753_v30 = vmul.f32 0.5, %v17431_v40  ;;  %v6732_v3 = vmul.f32 %v6604_v28, %v5708_v63  ;;  %v17440_v10 = vld [vmem:[#allocation111_spill] sm:$0xff]  ;;  %7917 = vmatpush1.bf16.msra.mxu1 %v10366_v62 }
 0xc70   : > { %17436 = vst [vmem:[#allocation90_spill] sm:$0xff] %v15748_v52  ;;  %v6740_v55 = vmul.f32 %v6612_v6, %v5716_v4  ;;  %v15757_v13 = vadd.f32 %v17437_v36, %v17229_v24  ;;  %v15760_v46 = vmul.f32 %v6048_v42, %v15686_v61  ;;  %v6056_v25 = vmul.f32 %v5928_v15, %v15713_v29  ;;  %v10369_v40 = vld [vmem:[%s11734_s24 + $0x2b0] ss:$8 sps:$4 sm:$0xff]   ;;  %v17442_v24 = vld [vmem:[#allocation102_spill] sm:$0xff]  ;;  %v17452_v61 = vld [vmem:[#allocation113_spill] sm:$0xff] }
 0xc71   : > { %10692 = vtanh.f32 %v6364_v60  ;;  %v6253_v50 = vadd.f32 %v17440_v10, %v17439_v1  ;;  %v15767_v4 = vmul.f32 %v6047_v45, %v15692_v31  ;;  %v15770_v60 = vmul.f32 0.5, %v17433_v51  ;;  %v17443_v28 = vld [vmem:[#allocation122_spill] sm:$0xff]  ;;  %7918 = vmatprep.subr.bf16.mxu1 %v10371_v53  ;;  %v17446_v10 = vld [vmem:[#allocation89_spill] sm:$0xff] }
 0xc72   : > { %17438 = vst [vmem:[#allocation167_spill] sm:$0xff] %v15760_v46  ;;  %10694 = vtanh.f32 %v6372_v7  ;;  %v10689_v11 = vpop.eup %10688  ;;  %v6844_v63 = vpack.c.bf16 %v6740_v55, %v6732_v3  ;;  %v6261_v42 = vadd.f32 %v17443_v28, %v17442_v24  ;;  %v10374_v6 = vld [vmem:[%s11734_s24 + $0x2c4] ss:$8 sps:$4 sm:$0xff]   ;;  %v15776_v36 = vmul.f32 %v6049_v19, %v15704_v32  ;;  %v17447_v28 = vld [vmem:[#allocation108_spill] sm:$0xff] }
 0xc73   : > { %17441 = vst [vmem:[#allocation169_spill] sm:$0xff] %v15767_v4  ;;  %v10691_v15 = vpop.eup %10690  ;;  %v6621_v7 = vadd.f32 1.0, %v10689_v11  ;;  %v15779_v62 = vmul.f32 %v6054_v2, %v15709_v47  ;;  %v6381_v3 = vmul.f32 0.7978846, %v6253_v50  ;;  %v5927_v51 = vmul.f32 0.044715, %v15757_v13  ;;  %7919 = vmatpush1.bf16.msra.mxu1 %v10369_v40 }
 0xc74   : > { %17444 = vst [vmem:[#allocation82_spill] sm:$0xff] %v15776_v36  ;;  %7836 = vmatmul.mubr.bf16.gmra.mrb[104].mxu1 %v6844_v63  ;;  %v6629_v45 = vadd.f32 1.0, %v10691_v15  ;;  %v6389_v55 = vmul.f32 0.7978846, %v6261_v42  ;;  %v6252_v53 = vadd.f32 %v17447_v28, %v17446_v10  ;;  %v15785_v46 = vmul.f32 %v6056_v25, %v15713_v29  ;;  %v17449_v11 = vld [vmem:[#allocation176_spill] sm:$0xff]  ;;  %7920 = vmatprep.subr.bf16.mxu1 %v10374_v6  ;;  %v17453_v29 = vld [vmem:[#allocation110_spill] sm:$0xff] }
 0xc75   : > { %17445 = vst [vmem:[#allocation96_spill] sm:$0xff] %v15779_v62  ;;  %v15789_v19 = vadd.f32 %v17449_v11, %v17231_v49  ;;  %10696 = vtanh.f32 %v6381_v3  ;;  %v17451_v2 = vld [vmem:[#allocation100_spill] sm:$0xff]  ;;  %v10372_v63 = vld [vmem:[%s11734_s24 + $0x2c0] ss:$8 sps:$4 sm:$0xff]   ;;  %v6749_v15 = vmul.f32 %v6621_v7, %v15721_v26  ;;  %v5741_v25 = vmul.f32 0.5, %v17439_v1  ;;  %v17454_v49 = vld [vmem:[#allocation127_spill] sm:$0xff] }
 0xc76   : > { %17448 = vst [vmem:[#allocation87_spill] sm:$0xff] %v15785_v46  ;;  %v6260_v50 = vadd.f32 %v17452_v61, %v17451_v2  ;;  %v6757_v36 = vmul.f32 %v6629_v45, %v5733_v21  ;;  %10698 = vtanh.f32 %v6389_v55  ;;  %v6380_v42 = vmul.f32 0.7978846, %v6252_v53  ;;  %v10377_v28 = vld [vmem:[%s11734_s24 + $0x2d4] ss:$8 sps:$4 sm:$0xff]   ;;  %v17458_v1 = vld [vmem:[#allocation125_spill] sm:$0xff] }
 0xc77   : > { %17450 = vst [vmem:[#allocation105_spill] sm:$0xff] %v15789_v19  ;;  %v6269_v11 = vadd.f32 %v17454_v49, %v17453_v29  ;;  %v17455_v3 = vld [vmem:[#allocation120_spill] sm:$0xff]  ;;  %v15802_v40 = vmul.f32 %v5927_v51, %v15757_v13  ;;  %v5749_v26 = vmul.f32 0.5, %v17442_v24  ;;  %7921 = vmatpush1.bf16.msra.mxu1 %v10372_v63  ;;  %v17460_v51 = vld [vmem:[#allocation115_spill] sm:$0xff]  ;;  %v17462_v24 = vld [vmem:[#allocation129_spill] sm:$0xff]  ;;  %v15821_v35 = vmul.f32 0.5, %v17453_v29 }
 0xc78   : > { %v6388_v46 = vmul.f32 0.7978846, %v6260_v50  ;;  %v17456_v32 = vld [vmem:[#allocation136_spill] sm:$0xff]  ;;  %v6853_v61 = vpack.c.bf16 %v6757_v36, %v6749_v15  ;;  %10700 = vtanh.f32 %v6380_v42  ;;  %v5740_v36 = vmul.f32 0.5, %v17446_v10  ;;  %v17461_v50 = vld [vmem:[#allocation130_spill] sm:$0xff]  ;;  %v17463_v42 = vld [vmem:[#allocation139_spill] sm:$0xff]  ;;  %7922 = vmatprep.subr.bf16.mxu1 %v10377_v28 }
 0xc79   : > { %v6277_v5 = vadd.f32 %v17456_v32, %v17455_v3  ;;  %v6397_v21 = vmul.f32 0.7978846, %v6269_v11  ;;  %v17457_v7 = vld [vmem:[#allocation104_spill] sm:$0xff]  ;;  %v15809_v32 = vmul.f32 0.044715, %v15789_v19  ;;  %v6276_v15 = vadd.f32 %v17461_v50, %v17460_v51  ;;  %v17472_v31 = vld [vmem:[#allocation93_spill] sm:$0xff] }
 0xc7a   : > { %10702 = vtanh.f32 %v6388_v46  ;;  %v6268_v45 = vadd.f32 %v17458_v1, %v17457_v7  ;;  %v10375_v55 = vld [vmem:[%s11734_s24 + $0x2d0] ss:$8 sps:$4 sm:$0xff]   ;;  %7845 = vmatprep.mubr.bf16.mxu1 %v6853_v61  ;;  %v6285_v46 = vadd.f32 %v17463_v42, %v17462_v24  ;;  %v5748_v50 = vmul.f32 0.5, %v17451_v2  ;;  %v10378_v42 = vld [vmem:[%s11734_s24 + $0x2e0] ss:$8 sps:$4 sm:$0xff]  }
 0xc7b   : > { %v6405_v6 = vmul.f32 0.7978846, %v6277_v5  ;;  %v10693_v53 = vpop.eup %10692  ;;  %17459 = vst [vmem:[#allocation114_spill] sm:$0xff] %v15809_v32  ;;  %v10380_v5 = vld [vmem:[%s11734_s24 + $0x2e4] ss:$8 sps:$4 sm:$0xff]   ;;  %10704 = vtanh.f32 %v6397_v21  ;;  %v17464_v1 = vld [vmem:[#allocation80_spill] sm:$0xff]  ;;  %7923 = vmatpush1.bf16.msra.mxu1 %v10375_v55  ;;  %v6309_v32 = vadd.f32 %v17473_v20, %v17472_v31 }
 0xc7c   : > { %v10695_v49 = vpop.eup %10694  ;;  %v6620_v11 = vadd.f32 1.0, %v10693_v53  ;;  %v6396_v63 = vmul.f32 0.7978846, %v6268_v45  ;;  %v17465_v61 = vld [vmem:[#allocation83_spill] sm:$0xff]  ;;  %v6404_v10 = vmul.f32 0.7978846, %v6276_v15  ;;  %7924 = vmatprep.subr.bf16.mxu1 %v10380_v5 }
 0xc7d   : > { %v6293_v62 = vadd.f32 %v17465_v61, %v17464_v1  ;;  %v6628_v47 = vadd.f32 1.0, %v10695_v49  ;;  %10706 = vtanh.f32 %v6405_v6  ;;  %v6413_v52 = vmul.f32 0.7978846, %v6285_v46  ;;  %v17466_v53 = vld [vmem:[#allocation123_spill] sm:$0xff]  ;;  %v17467_v61 = vld [vmem:[#allocation138_spill] sm:$0xff]  ;;  %v17471_v5 = vld [vmem:[#allocation148_spill] sm:$0xff] }
 0xc7e   : > { %10708 = vtanh.f32 %v6396_v63  ;;  %v6748_v21 = vmul.f32 %v6620_v11, %v15753_v30  ;;  %v6284_v49 = vadd.f32 %v17467_v61, %v17466_v53  ;;  %v10383_v6 = vld [vmem:[%s11734_s24 + $0x2f4] ss:$8 sps:$4 sm:$0xff]   ;;  %v5765_v2 = vmul.f32 0.5, %v17455_v3  ;;  %v17469_v55 = vld [vmem:[#allocation142_spill] sm:$0xff]  ;;  %v17470_v61 = vld [vmem:[#allocation141_spill] sm:$0xff] }
 0xc7f   : > { %v6421_v28 = vmul.f32 0.7978846, %v6293_v62  ;;  %v6756_v45 = vmul.f32 %v6628_v47, %v15770_v60  ;;  %10710 = vtanh.f32 %v6404_v10  ;;  %v10697_v15 = vpop.eup %10696  ;;  %v5756_v29 = vmul.f32 0.5, %v17457_v7  ;;  %v17468_v62 = vld [vmem:[#allocation133_spill] sm:$0xff]  ;;  %7925 = vmatpush1.bf16.msra.mxu1 %v10378_v42  ;;  %v10381_v3 = vld [vmem:[%s11734_s24 + $0x2f0] ss:$8 sps:$4 sm:$0xff]  }
 0xc80   : > { %10712 = vtanh.f32 %v6413_v52  ;;  %v6292_v46 = vadd.f32 %v17469_v55, %v17468_v62  ;;  %v10699_v63 = vpop.eup %10698  ;;  %v6637_v11 = vadd.f32 1.0, %v10697_v15  ;;  %v6412_v47 = vmul.f32 0.7978846, %v6284_v49  ;;  %7926 = vmatprep.subr.bf16.mxu1 %v10383_v6  ;;  %v17474_v20 = vld [vmem:[#allocation135_spill] sm:$0xff]  ;;  %v17475_v42 = vld [vmem:[#allocation57_spill] sm:$0xff] }
 0xc81   : > { %v6852_v30 = vpack.c.bf16 %v6756_v45, %v6748_v21  ;;  %10714 = vtanh.f32 %v6421_v28  ;;  %v6645_v60 = vadd.f32 1.0, %v10699_v63  ;;  %v6301_v4 = vadd.f32 %v17471_v5, %v17470_v61  ;;  %v17476_v19 = vld [vmem:[#allocation119_spill] sm:$0xff] }
 0xc82   : > { %v6420_v10 = vmul.f32 0.7978846, %v6292_v46  ;;  %v10701_v7 = vpop.eup %10700  ;;  %v6765_v52 = vmul.f32 %v6637_v11, %v5741_v25  ;;  %v5764_v55 = vmul.f32 0.5, %v17460_v51  ;;  %v5773_v21 = vmul.f32 0.5, %v17462_v24 }
 0xc83   : > { %7846 = vmatmul.mubr.bf16.gmra.mrb[108].mxu1 %v6852_v30  ;;  %10716 = vtanh.f32 %v6412_v47  ;;  %v6773_v45 = vmul.f32 %v6645_v60, %v5749_v26  ;;  %v6636_v49 = vadd.f32 1.0, %v10701_v7  ;;  %v6429_v15 = vmul.f32 0.7978846, %v6301_v4  ;;  %v17477_v30 = vld [vmem:[#allocation91_spill] sm:$0xff]  ;;  %v10864_v60 = vld [vmem:[%s11734_s24 + $0x304] ss:$8 sps:$4 sm:$0xff]  }
 0xc84   : > { %v10703_v28 = vpop.eup %10702  ;;  %10718 = vtanh.f32 %v6420_v10  ;;  %v6437_v63 = vmul.f32 0.7978846, %v6309_v32  ;;  %v6300_v5 = vadd.f32 %v17475_v42, %v17474_v20  ;;  %v6308_v25 = vadd.f32 %v17477_v30, %v17476_v19  ;;  %7927 = vmatpush1.bf16.msra.mxu1 %v10381_v3  ;;  %v17478_v42 = vld [vmem:[#allocation59_spill] sm:$0xff] }
 0xc85   : > { %v6644_v46 = vadd.f32 1.0, %v10703_v28  ;;  %v10705_v11 = vpop.eup %10704  ;;  %v6861_v51 = vpack.c.bf16 %v6773_v45, %v6765_v52  ;;  %v6764_v0 = vmul.f32 %v6636_v49, %v5740_v36  ;;  %v5781_v24 = vmul.f32 0.5, %v17464_v1  ;;  %9783 = vmatprep.subr.bf16.mxu1 %v10864_v60  ;;  %v17479_v52 = vld [vmem:[#allocation158_spill] sm:$0xff] }
 0xc86   : > { %10720 = vtanh.f32 %v6429_v15  ;;  %v6653_v47 = vadd.f32 1.0, %v10705_v11  ;;  %v6428_v4 = vmul.f32 0.7978846, %v6300_v5  ;;  %v5772_v7 = vmul.f32 0.5, %v17466_v53  ;;  %v17481_v5 = vld [vmem:[#allocation165_spill] sm:$0xff] }
 0xc87   : > { %v10707_v26 = vpop.eup %10706  ;;  %v6772_v6 = vmul.f32 %v6644_v46, %v5748_v50  ;;  %10722 = vtanh.f32 %v6437_v63  ;;  %7855 = vmatprep.mubr.bf16.mxu1 %v6861_v51  ;;  %v6436_v28 = vmul.f32 0.7978846, %v6308_v25  ;;  %v6191_v36 = vadd.f32 %v17479_v52, %v17478_v42  ;;  %v17480_v63 = vld [vmem:[#allocation88_spill] sm:$0xff] }
 0xc88   : > { %v10709_v32 = vpop.eup %10708  ;;  %v6661_v10 = vadd.f32 1.0, %v10707_v26  ;;  %v6781_v3 = vmul.f32 %v6653_v47, %v15821_v35  ;;  %10724 = vtanh.f32 %v6428_v4  ;;  %v6199_v30 = vadd.f32 %v17481_v5, %v17480_v63  ;;  %v17482_v26 = vld [vmem:[#allocation103_spill] sm:$0xff]  ;;  %v17486_v5 = vld [vmem:[#allocation161_spill] sm:$0xff] }
 0xc89   : > { %v10711_v45 = vpop.eup %10710  ;;  %v6860_v1 = vpack.c.bf16 %v6772_v6, %v6764_v0  ;;  %v6652_v49 = vadd.f32 1.0, %v10709_v32  ;;  %10726 = vtanh.f32 %v6436_v28  ;;  %v6319_v51 = vmul.f32 0.7978846, %v6191_v36  ;;  %v17483_v32 = vld [vmem:[#allocation178_spill] sm:$0xff] }
 0xc8a   : > { %v10713_v50 = vpop.eup %10712  ;;  %v6789_v15 = vmul.f32 %v6661_v10, %v5765_v2  ;;  %v6660_v46 = vadd.f32 1.0, %v10711_v45  ;;  %v6574_v60 = vadd.f32 1.0, %v17482_v26  ;;  %v6327_v35 = vmul.f32 0.7978846, %v6199_v30  ;;  %v17487_v30 = vld [vmem:[#allocation179_spill] sm:$0xff] }
 0xc8b   : > { %v10715_v11 = vpop.eup %10714  ;;  %7856 = vmatmul.mubr.bf16.gmra.mrb[112].mxu1 %v6860_v1  ;;  %v6780_v53 = vmul.f32 %v6652_v49, %v5756_v29  ;;  %v6669_v25 = vadd.f32 1.0, %v10713_v50  ;;  %v5780_v2 = vmul.f32 0.5, %v17468_v62  ;;  %10728 = vtanh.f32 %v6319_v51  ;;  %v17485_v50 = vld [vmem:[#allocation160_spill] sm:$0xff] }
 0xc8c   : > { %v6869_v52 = vpack.c.bf16 %v6789_v15, %v6781_v3  ;;  %v6788_v0 = vmul.f32 %v6660_v46, %v5764_v55  ;;  %v6677_v6 = vadd.f32 1.0, %v10715_v11  ;;  %v6582_v10 = vadd.f32 1.0, %v17483_v32  ;;  %v17484_v3 = vld [vmem:[#allocation153_spill] sm:$0xff] }
 0xc8d   : > { %v10717_v47 = vpop.eup %10716  ;;  %v6797_v4 = vmul.f32 %v6669_v25, %v5773_v21  ;;  %10730 = vtanh.f32 %v6327_v35  ;;  %v5789_v49 = vmul.f32 0.5, %v17470_v61  ;;  %v15857_v55 = vmul.f32 %v6574_v60, %v17484_v3  ;;  %v17492_v3 = vld [vmem:[#allocation117_spill] sm:$0xff] }
 0xc8e   : > { %v10719_v28 = vpop.eup %10718  ;;  %7865 = vmatprep.mubr.bf16.mxu1 %v6869_v52  ;;  %v6868_v45 = vpack.c.bf16 %v6788_v0, %v6780_v53  ;;  %v6805_v1 = vmul.f32 %v6677_v6, %v5781_v24  ;;  %v6668_v29 = vadd.f32 1.0, %v10717_v47  ;;  %v15860_v15 = vmul.f32 %v6582_v10, %v17485_v50  ;;  %v17488_v53 = vld [vmem:[#allocation124_spill] sm:$0xff]  ;;  %v17489_v24 = vld [vmem:[#allocation183_spill] sm:$0xff] }
 0xc8f   : > { %v6676_v36 = vadd.f32 1.0, %v10719_v28  ;;  %v5797_v46 = vmul.f32 0.5, %v17472_v31  ;;  %v6207_v11 = vadd.f32 %v17487_v30, %v17486_v5  ;;  %v6215_v25 = vadd.f32 %v17489_v24, %v17488_v53  ;;  %v17490_v10 = vld [vmem:[#allocation99_spill] sm:$0xff]  ;;  %v17491_v28 = vld [vmem:[#allocation168_spill] sm:$0xff] }
 0xc90   : > { %v10721_v21 = vpop.eup %10720  ;;  %v6877_v62 = vpack.c.bf16 %v6805_v1, %v6797_v4  ;;  %v6796_v26 = vmul.f32 %v6668_v29, %v5772_v7  ;;  %v6830_v60 = vpack.c.bf16 %v15860_v15, %v15857_v55  ;;  %v5788_v6 = vmul.f32 0.5, %v17474_v20  ;;  %v17493_v7 = vld [vmem:[#allocation180_spill] sm:$0xff] }
 0xc91   : > { %v10723_v51 = vpop.eup %10722  ;;  %v6804_v52 = vmul.f32 %v6676_v36, %v5780_v2  ;;  %v6685_v61 = vadd.f32 1.0, %v10721_v21  ;;  %v6335_v35 = vmul.f32 0.7978846, %v6207_v11  ;;  %v6343_v47 = vmul.f32 0.7978846, %v6215_v25 }
 0xc92   : > { %v6693_v0 = vadd.f32 1.0, %v10723_v51  ;;  %v10725_v4 = vpop.eup %10724  ;;  %v5796_v32 = vmul.f32 0.5, %v17476_v19  ;;  %v6206_v1 = vadd.f32 %v17491_v28, %v17490_v10  ;;  %v6214_v2 = vadd.f32 %v17493_v7, %v17492_v3  ;;  %v10866_v15 = vld [vmem:[%s11734_s24 + $0x314] ss:$8 sps:$4 sm:$0xff]  }
 0xc93   : > { %7866 = vmatmul.mubr.bf16.gmra.mrb[116].mxu1 %v6868_v45  ;;  %v6876_v31 = vpack.c.bf16 %v6804_v52, %v6796_v26  ;;  %v10727_v29 = vpop.eup %10726  ;;  %v6813_v36 = vmul.f32 %v6685_v61, %v5789_v49  ;;  %v6684_v21 = vadd.f32 1.0, %v10725_v4  ;;  %10732 = vtanh.f32 %v6335_v35 }
 0xc94   : > { %7875 = vmatprep.mubr.bf16.mxu1 %v6877_v62  ;;  %v6821_v50 = vmul.f32 %v6693_v0, %v5797_v46  ;;  %v6692_v20 = vadd.f32 1.0, %v10727_v29  ;;  %10734 = vtanh.f32 %v6343_v47  ;;  %v6334_v30 = vmul.f32 0.7978846, %v6206_v1 }
 0xc95   : > { %v6342_v11 = vmul.f32 0.7978846, %v6214_v2  ;;  %v15877_v45 = vmul.f32 %v15802_v40, %v15757_v13  ;;  %v5679_v24 = vmul.f32 0.5, %v17478_v42  ;;  %v6223_v25 = vadd.f32 %v15285_v39, %v15201_v22  ;;  %v10729_v51 = vpop.eup %10728 }
 0xc96   : > { %v6885_v19 = vpack.c.bf16 %v6821_v50, %v6813_v36  ;;  %v6812_v62 = vmul.f32 %v6684_v21, %v5788_v6  ;;  %v6820_v49 = vmul.f32 %v6692_v20, %v5796_v32  ;;  %10736 = vtanh.f32 %v6334_v30 }
 0xc97   : > { %v6231_v46 = vadd.f32 %v15310_v17, %v15262_v37  ;;  %v10731_v26 = vpop.eup %10730  ;;  %v5687_v52 = vmul.f32 0.5, %v17480_v63  ;;  %v6575_v61 = vadd.f32 1.0, %v10729_v51  ;;  %10738 = vtanh.f32 %v6342_v11 }
 0xc98   : > { %v6351_v40 = vmul.f32 0.7978846, %v6223_v25  ;;  %v6884_v0 = vpack.c.bf16 %v6820_v49, %v6812_v62  ;;  %v6583_v35 = vadd.f32 1.0, %v10731_v26  ;;  %v6222_v42 = vadd.f32 %v15280_v23, %v15176_v43 }
 0xc99   : > { %v6359_v47 = vmul.f32 0.7978846, %v6231_v46  ;;  %v5695_v39 = vmul.f32 0.5, %v17486_v5  ;;  %v5703_v6 = vmul.f32 0.5, %v17488_v53  ;;  %v6230_v17 = vadd.f32 %v15300_v56, %v15244_v48  ;;  %v17494_v56 = vld [vmem:[#allocation144_spill] sm:$0xff] }
 0xc9a   : > { %10740 = vtanh.f32 %v6351_v40  ;;  %v6703_v4 = vmul.f32 %v6575_v61, %v5679_v24  ;;  %v6711_v63 = vmul.f32 %v6583_v35, %v5687_v52  ;;  %v6350_v32 = vmul.f32 0.7978846, %v6222_v42 }
 0xc9b   : > { %7876 = vmatmul.mubr.bf16.gmra.mrb[120].mxu1 %v6876_v31  ;;  %10742 = vtanh.f32 %v6359_v47  ;;  %v5694_v28 = vmul.f32 0.5, %v17490_v10  ;;  %v6358_v1 = vmul.f32 0.7978846, %v6230_v17  ;;  %v6239_v23 = vadd.f32 %v15370_v41, %v15297_v58  ;;  %v17495_v31 = vld [vmem:[#allocation56_spill] sm:$0xff] }
 0xc9c   : > { %7885 = vmatprep.mubr.bf16.mxu1 %v6885_v19  ;;  %v6247_v5 = vadd.f32 %v15399_v12, %v15344_v54  ;;  %v6831_v53 = vpack.c.bf16 %v6711_v63, %v6703_v4  ;;  %v5702_v7 = vmul.f32 0.5, %v17492_v3  ;;  %10744 = vtanh.f32 %v6350_v32  ;;  %v17496_v32 = vld [vmem:[#allocation155_spill] sm:$0xff] }
 0xc9d   : > { %v6238_v2 = vadd.f32 %v17495_v31, %v17494_v56  ;;  %v10733_v29 = vpop.eup %10732  ;;  %10746 = vtanh.f32 %v6358_v1  ;;  %v6367_v36 = vmul.f32 0.7978846, %v6239_v23  ;;  %v6246_v10 = vadd.f32 %v15380_v16, %v15320_v8 }
 0xc9e   : > { %v6375_v50 = vmul.f32 0.7978846, %v6247_v5  ;;  %v10735_v21 = vpop.eup %10734  ;;  %v6591_v20 = vadd.f32 1.0, %v10733_v29  ;;  %v5711_v41 = vmul.f32 0.5, %v15201_v22  ;;  %v5719_v12 = vmul.f32 0.5, %v15262_v37 }
 0xc9f   : > { %v6366_v30 = vmul.f32 0.7978846, %v6238_v2  ;;  %v6599_v11 = vadd.f32 1.0, %v10735_v21  ;;  %10748 = vtanh.f32 %v6367_v36  ;;  %v6374_v3 = vmul.f32 0.7978846, %v6246_v10 }
 0xca0   : > { %v6255_v19 = vadd.f32 %v15490_v18, %v15389_v27  ;;  %v10737_v24 = vpop.eup %10736  ;;  %v6719_v25 = vmul.f32 %v6591_v20, %v5695_v39  ;;  %v5710_v51 = vmul.f32 0.5, %v15176_v43  ;;  %10750 = vtanh.f32 %v6375_v50  ;;  %v17498_v20 = vld [vmem:[#allocation101_spill] sm:$0xff] }
 0xca1   : > { %v6263_v16 = vadd.f32 %v15518_v33, %v15446_v44  ;;  %v10739_v62 = vpop.eup %10738  ;;  %v6727_v49 = vmul.f32 %v6599_v11, %v5703_v6  ;;  %v6590_v22 = vadd.f32 1.0, %v10737_v24  ;;  %10752 = vtanh.f32 %v6366_v30  ;;  %v10865_v11 = vld [vmem:[%s11734_s24 + $0x300] ss:$8 sps:$4 sm:$0xff]   ;;  %v17501_v24 = vld [vmem:[#allocation112_spill] sm:$0xff] }
 0xca2   : > { %v6383_v37 = vmul.f32 0.7978846, %v6255_v19  ;;  %v6598_v46 = vadd.f32 1.0, %v10739_v62  ;;  %v5718_v26 = vmul.f32 0.5, %v15244_v48  ;;  %10754 = vtanh.f32 %v6374_v3  ;;  %v17500_v19 = vld [vmem:[#allocation154_spill] sm:$0xff] }
 0xca3   : > { %7886 = vmatmul.mubr.bf16.gmra.mrb[124].mxu1 %v6884_v0  ;;  %v6391_v52 = vmul.f32 0.7978846, %v6263_v16  ;;  %v6839_v61 = vpack.c.bf16 %v6727_v49, %v6719_v25  ;;  %v15909_v40 = vmul.f32 %v6590_v22, %v5694_v28  ;;  %v6254_v43 = vadd.f32 %v15456_v38, %v15367_v14 }
 0xca4   : > { %v10741_v18 = vpop.eup %10740  ;;  %7928 = vmatprep.mubr.bf16.mxu1 %v6831_v53  ;;  %10756 = vtanh.f32 %v6383_v37  ;;  %v15913_v35 = vmul.f32 %v6598_v46, %v5702_v7  ;;  %v6262_v0 = vadd.f32 %v15498_v34, %v15424_v59  ;;  %v5727_v42 = vmul.f32 0.5, %v15297_v58  ;;  %v17497_v58 = vld [vmem:[#allocation66_spill] sm:$0xff] }
 0xca5   : > { %v10743_v33 = vpop.eup %10742  ;;  %v6607_v47 = vadd.f32 1.0, %v10741_v18  ;;  %10758 = vtanh.f32 %v6391_v52  ;;  %v5735_v39 = vmul.f32 0.5, %v15344_v54  ;;  %v6382_v6 = vmul.f32 0.7978846, %v6254_v43  ;;  %v17503_v43 = vld [vmem:[#allocation71_spill] sm:$0xff] }
 0xca6   : > { %v6615_v48 = vadd.f32 1.0, %v10743_v33  ;;  %v10745_v17 = vpop.eup %10744  ;;  %v6838_v4 = vpack.c.bf16 %v15913_v35, %v15909_v40  ;;  %v6390_v38 = vmul.f32 0.7978846, %v6262_v0  ;;  %v6271_v28 = vadd.f32 %v17496_v32, %v15485_v9  ;;  %v17507_v32 = vld [vmem:[#allocation166_spill] sm:$0xff]  ;;  %v10870_v40 = vld [vmem:[%s11734_s24 + $0x334] ss:$8 sps:$4 sm:$0xff]  }
 0xca7   : > { %v15921_v63 = vmul.f32 %v6607_v47, %v5711_v41  ;;  %v10747_v1 = vpop.eup %10746  ;;  %v6606_v34 = vadd.f32 1.0, %v10745_v17  ;;  %10760 = vtanh.f32 %v6382_v6  ;;  %v6279_v5 = vadd.f32 %v17497_v58, %v15564_v57  ;;  %v17499_v41 = vld [vmem:[#allocation62_spill] sm:$0xff]  ;;  %v10867_v47 = vld [vmem:[%s11734_s24 + $0x310] ss:$8 sps:$4 sm:$0xff]  }
 0xca8   : > { %v15925_v23 = vmul.f32 %v6615_v48, %v5719_v12  ;;  %v6614_v54 = vadd.f32 1.0, %v10747_v1  ;;  %v5726_v53 = vmul.f32 0.5, %v17494_v56  ;;  %10762 = vtanh.f32 %v6390_v38  ;;  %v10868_v17 = vld [vmem:[%s11734_s24 + $0x324] ss:$8 sps:$4 sm:$0xff]   ;;  %v17506_v38 = vld [vmem:[#allocation159_spill] sm:$0xff] }
 0xca9   : > { %v6399_v7 = vmul.f32 0.7978846, %v6271_v28  ;;  %v10749_v31 = vpop.eup %10748  ;;  %v15932_v29 = vmul.f32 %v6606_v34, %v5710_v51  ;;  %v5734_v36 = vmul.f32 0.5, %v15320_v8  ;;  %v6407_v50 = vmul.f32 0.7978846, %v6279_v5 }
 0xcaa   : > { %v6847_v2 = vpack.c.bf16 %v15925_v23, %v15921_v63  ;;  %v10751_v10 = vpop.eup %10750  ;;  %v15938_v21 = vmul.f32 %v6614_v54, %v5718_v26  ;;  %v6623_v56 = vadd.f32 1.0, %v10749_v31  ;;  %v6270_v12 = vadd.f32 %v17499_v41, %v17498_v20  ;;  %v17508_v54 = vld [vmem:[#allocation67_spill] sm:$0xff]  ;;  %v10869_v41 = vld [vmem:[%s11734_s24 + $0x320] ss:$8 sps:$4 sm:$0xff]  }
 0xcab   : > { %7929 = vmatmul.mubr.bf16.vlgmr.msra.gmra.mrb[96].mxu1 %v6830_v60  ;;  %10764 = vtanh.f32 %v6399_v7  ;;  %v10753_v30 = vpop.eup %10752  ;;  %v6631_v3 = vadd.f32 1.0, %v10751_v10  ;;  %v5743_v8 = vmul.f32 0.5, %v15389_v27  ;;  %v6278_v25 = vadd.f32 %v17501_v24, %v17500_v19  ;;  %v17511_v10 = vld [vmem:[#allocation68_spill] sm:$0xff] }
 0xcac   : > { %7938 = vmatprep.mubr.bf16.mxu1 %v6839_v61  ;;  %9799 = vmatpush1.bf16.msra.mxu1 %v10865_v11  ;;  %10766 = vtanh.f32 %v6407_v50  ;;  %v10755_v55 = vpop.eup %10754  ;;  %v6846_v60 = vpack.c.bf16 %v15938_v21, %v15932_v29  ;;  %v6622_v51 = vadd.f32 1.0, %v10753_v30  ;;  %v5751_v16 = vmul.f32 0.5, %v15446_v44  ;;  %v17502_v61 = vld [vmem:[#allocation106_spill] sm:$0xff]  ;;  %v17510_v50 = vld [vmem:[#allocation132_spill] sm:$0xff]  ;;  %v17520_v29 = vld [vmem:[#allocation143_spill] sm:$0xff] }
 0xcad   : > { %9784 = vmatprep.subr.bf16.mxu1 %v10866_v15  ;;  %v6398_v62 = vmul.f32 0.7978846, %v6270_v12  ;;  %v15950_v22 = vmul.f32 %v6623_v56, %v5727_v42  ;;  %v15952_v27 = vmul.f32 %v6631_v3, %v5735_v39  ;;  %v6630_v37 = vadd.f32 1.0, %v10755_v55  ;;  %v17504_v42 = vld [vmem:[#allocation105_spill] sm:$0xff]  ;;  %v17505_v39 = vld [vmem:[#allocation114_spill] sm:$0xff]  ;;  %v17521_v21 = vld [vmem:[#allocation75_spill] sm:$0xff] }
 0xcae   : > { %v10757_v49 = vpop.eup %10756  ;;  %v6406_v46 = vmul.f32 0.7978846, %v6278_v25  ;;  %v15954_v52 = vmul.f32 %v6622_v51, %v5726_v53  ;;  %v6287_v33 = vadd.f32 %v17503_v43, %v17502_v61  ;;  %v15965_v6 = vmul.f32 %v17505_v39, %v17504_v42  ;;  %v17509_v53 = vld [vmem:[#allocation175_spill] sm:$0xff]  ;;  %v17512_v15 = vld [vmem:[#allocation162_spill] sm:$0xff] }
 0xcaf   : > { %v10759_v26 = vpop.eup %10758  ;;  %v6639_v18 = vadd.f32 1.0, %v10757_v49  ;;  %10768 = vtanh.f32 %v6398_v62  ;;  %v6855_v44 = vpack.c.bf16 %v15952_v27, %v15950_v22  ;;  %v15961_v0 = vmul.f32 %v6630_v37, %v5734_v36  ;;  %v10871_v37 = vld [vmem:[%s11734_s24 + $0x330] ss:$8 sps:$4 sm:$0xff]   ;;  %v17515_v39 = vld [vmem:[#allocation90_spill] sm:$0xff]  ;;  %v17522_v22 = vld [vmem:[#allocation97_spill] sm:$0xff] }
 0xcb0   : > { %9800 = vmatpush1.bf16.msra.mxu1 %v10867_v47  ;;  %v6647_v48 = vadd.f32 1.0, %v10759_v26  ;;  %10770 = vtanh.f32 %v6406_v46  ;;  %v5742_v63 = vmul.f32 0.5, %v15367_v14  ;;  %v6295_v28 = vadd.f32 %v17507_v32, %v17506_v38 }
 0xcb1   : > { %9785 = vmatprep.subr.bf16.mxu1 %v10868_v17  ;;  %v6415_v1 = vmul.f32 0.7978846, %v6287_v33  ;;  %v10761_v23 = vpop.eup %10760  ;;  %v6854_v34 = vpack.c.bf16 %v15961_v0, %v15954_v52  ;;  %v15973_v58 = vmul.f32 %v6639_v18, %v5743_v8  ;;  %v6286_v7 = vadd.f32 %v17509_v53, %v17508_v54  ;;  %v10872_v33 = vld [vmem:[%s11734_s24 + $0x344] ss:$8 sps:$4 sm:$0xff]   ;;  %v17516_v17 = vld [vmem:[#allocation107_spill] sm:$0xff] }
 0xcb2   : > { %v15975_v5 = vmul.f32 %v6647_v48, %v5751_v16  ;;  %v10763_v31 = vpop.eup %10762  ;;  %v6638_v14 = vadd.f32 1.0, %v10761_v23  ;;  %v6423_v36 = vmul.f32 0.7978846, %v6295_v28  ;;  %v6294_v56 = vadd.f32 %v17511_v10, %v17510_v50  ;;  %v17514_v48 = vld [vmem:[#allocation74_spill] sm:$0xff]  ;;  %v17519_v10 = vld [vmem:[#allocation137_spill] sm:$0xff] }
 0xcb3   : > { %7939 = vmatmul.mubr.bf16.gmra.mrb[100].mxu1 %v6838_v4  ;;  %10772 = vtanh.f32 %v6415_v1  ;;  %v5750_v30 = vmul.f32 0.5, %v15424_v59  ;;  %v6646_v11 = vadd.f32 1.0, %v10763_v31  ;;  %v6414_v3 = vmul.f32 0.7978846, %v6286_v7  ;;  %v17513_v59 = vld [vmem:[#allocation169_spill] sm:$0xff] }
 0xcb4   : > { %7948 = vmatprep.mubr.bf16.mxu1 %v6847_v2  ;;  %9801 = vmatpush1.bf16.msra.mxu1 %v10869_v41  ;;  %v6863_v12 = vpack.c.bf16 %v15975_v5, %v15973_v58  ;;  %v15989_v35 = vmul.f32 %v6638_v14, %v5742_v63  ;;  %v5759_v4 = vmul.f32 0.5, %v15485_v9  ;;  %10774 = vtanh.f32 %v6423_v36  ;;  %v17517_v63 = vld [vmem:[#allocation96_spill] sm:$0xff]  ;;  %v17518_v36 = vld [vmem:[#allocation177_spill] sm:$0xff] }
 0xcb5   : > { %v10765_v8 = vpop.eup %10764  ;;  %9786 = vmatprep.subr.bf16.mxu1 %v10870_v40  ;;  %v6422_v24 = vmul.f32 0.7978846, %v6294_v56  ;;  %v15992_v25 = vmul.f32 %v6646_v11, %v5750_v30  ;;  %10776 = vtanh.f32 %v6414_v3  ;;  %v6303_v51 = vadd.f32 %v17513_v59, %v17512_v15  ;;  %v10874_v30 = vld [vmem:[%s11734_s24 + $0x354] ss:$8 sps:$4 sm:$0xff]   ;;  %v17524_v59 = vld [vmem:[#allocation182_spill] sm:$0xff] }
 0xcb6   : > { %v10767_v2 = vpop.eup %10766  ;;  %v6655_v55 = vadd.f32 1.0, %v10765_v8  ;;  %v5767_v16 = vmul.f32 0.5, %v15564_v57  ;;  %v6311_v49 = vadd.f32 %v15877_v45, %v15757_v13  ;;  %v5758_v26 = vmul.f32 0.5, %v17498_v20 }
 0xcb7   : > { %v6663_v62 = vadd.f32 1.0, %v10767_v2  ;;  %10778 = vtanh.f32 %v6422_v24  ;;  %v6862_v9 = vpack.c.bf16 %v15992_v25, %v15989_v35  ;;  %v6431_v18 = vmul.f32 0.7978846, %v6303_v51  ;;  %v10882_v25 = vld [vmem:[%s11734_s24 + $0x394] ss:$8 sps:$4 sm:$0xff]  }
 0xcb8   : > { %9802 = vmatpush1.bf16.msra.mxu1 %v10871_v37  ;;  %v16002_v46 = vmul.f32 %v6655_v55, %v5759_v4  ;;  %v6439_v47 = vmul.f32 0.7978846, %v6311_v49  ;;  %v6302_v45 = vadd.f32 %v17515_v39, %v17514_v48  ;;  %v6310_v32 = vadd.f32 %v17517_v63, %v17516_v17  ;;  %v10875_v37 = vld [vmem:[%s11734_s24 + $0x350] ss:$8 sps:$4 sm:$0xff]   ;;  %v17527_v63 = vld [vmem:[#allocation118_spill] sm:$0xff] }
 0xcb9   : > { %v10769_v43 = vpop.eup %10768  ;;  %9787 = vmatprep.subr.bf16.mxu1 %v10872_v33  ;;  %v16006_v57 = vmul.f32 %v6663_v62, %v5767_v16  ;;  %v5766_v1 = vmul.f32 0.5, %v17500_v19  ;;  %v5775_v20 = vmul.f32 0.5, %v17502_v61  ;;  %10780 = vtanh.f32 %v6431_v18  ;;  %v10873_v19 = vld [vmem:[%s11734_s24 + $0x340] ss:$8 sps:$4 sm:$0xff]   ;;  %v17525_v16 = vld [vmem:[#allocation131_spill] sm:$0xff] }
 0xcba   : > { %v10771_v28 = vpop.eup %10770  ;;  %v6654_v23 = vadd.f32 1.0, %v10769_v43  ;;  %10782 = vtanh.f32 %v6439_v47  ;;  %v6430_v31 = vmul.f32 0.7978846, %v6302_v45  ;;  %v6438_v61 = vmul.f32 0.7978846, %v6310_v32  ;;  %v17526_v45 = vld [vmem:[#allocation140_spill] sm:$0xff] }
 0xcbb   : > { %7949 = vmatmul.mubr.bf16.gmra.mrb[104].mxu1 %v6846_v60  ;;  %v6871_v53 = vpack.c.bf16 %v16006_v57, %v16002_v46  ;;  %v6662_v7 = vadd.f32 1.0, %v10771_v28  ;;  %v6225_v56 = vadd.f32 %v17519_v10, %v17518_v36  ;;  %v6233_v60 = vadd.f32 %v17521_v21, %v17520_v29  ;;  %v10876_v47 = vld [vmem:[%s11734_s24 + $0x364] ss:$8 sps:$4 sm:$0xff]  }
 0xcbc   : > { %7958 = vmatprep.mubr.bf16.mxu1 %v6855_v44  ;;  %9803 = vmatpush1.bf16.msra.mxu1 %v10873_v19  ;;  %v16023_v14 = vmul.f32 %v6654_v23, %v5758_v26  ;;  %10784 = vtanh.f32 %v6430_v31  ;;  %v6608_v27 = vadd.f32 1.0, %v17522_v22  ;;  %v17523_v44 = vld [vmem:[#allocation149_spill] sm:$0xff]  ;;  %v5783_v55 = vmul.f32 0.5, %v17506_v38  ;;  %v17528_v23 = vld [vmem:[#allocation134_spill] sm:$0xff] }
 0xcbd   : > { %v10773_v41 = vpop.eup %10772  ;;  %9788 = vmatprep.subr.bf16.mxu1 %v10874_v30  ;;  %v16030_v11 = vmul.f32 %v6662_v7, %v5766_v1  ;;  %v6616_v3 = vadd.f32 1.0, %v17523_v44  ;;  %10786 = vtanh.f32 %v6438_v61  ;;  %v6353_v40 = vmul.f32 0.7978846, %v6225_v56  ;;  %v17530_v10 = vld [vmem:[#allocation121_spill] sm:$0xff]  ;;  %v17531_v56 = vld [vmem:[#allocation146_spill] sm:$0xff]  ;;  %v17533_v30 = vld [vmem:[#allocation147_spill] sm:$0xff] }
 0xcbe   : > { %v6671_v8 = vadd.f32 1.0, %v10773_v41  ;;  %v6361_v4 = vmul.f32 0.7978846, %v6233_v60  ;;  %v10775_v24 = vpop.eup %10774  ;;  %v16038_v51 = vmul.f32 %v6608_v27, %v17524_v59  ;;  %v5774_v18 = vmul.f32 0.5, %v17508_v54  ;;  %v10877_v60 = vld [vmem:[%s11734_s24 + $0x360] ss:$8 sps:$4 sm:$0xff]  }
 0xcbf   : > { %v6870_v2 = vpack.c.bf16 %v16030_v11, %v16023_v14  ;;  %v16041_v62 = vmul.f32 %v6616_v3, %v17525_v16  ;;  %v10777_v49 = vpop.eup %10776  ;;  %v6679_v26 = vadd.f32 1.0, %v10775_v24  ;;  %v5782_v43 = vmul.f32 0.5, %v17510_v50  ;;  %v17529_v50 = vld [vmem:[#allocation55_spill] sm:$0xff]  ;;  %v17535_v59 = vld [vmem:[#allocation150_spill] sm:$0xff]  ;;  %v17553_v14 = vld [vmem:[#allocation72_spill] sm:$0xff] }
 0xcc0   : > { %9804 = vmatpush1.bf16.msra.mxu1 %v10875_v37  ;;  %10788 = vtanh.f32 %v6353_v40  ;;  %v6670_v38 = vadd.f32 1.0, %v10777_v49  ;;  %v6241_v32 = vadd.f32 %v17527_v63, %v17526_v45  ;;  %v16051_v28 = vmul.f32 %v6671_v8, %v5775_v20  ;;  %v10878_v27 = vld [vmem:[%s11734_s24 + $0x374] ss:$8 sps:$4 sm:$0xff]   ;;  %v10879_v49 = vld [vmem:[%s11734_s24 + $0x370] ss:$8 sps:$4 sm:$0xff]  }
 0xcc1   : > { %v10779_v33 = vpop.eup %10778  ;;  %9789 = vmatprep.subr.bf16.mxu1 %v10876_v47  ;;  %10790 = vtanh.f32 %v6361_v4  ;;  %v6848_v39 = vpack.c.bf16 %v16041_v62, %v16038_v51  ;;  %v16053_v1 = vmul.f32 %v6679_v26, %v5783_v55  ;;  %v6249_v7 = vadd.f32 %v17529_v50, %v17528_v23  ;;  %v17534_v55 = vld [vmem:[#allocation65_spill] sm:$0xff] }
 0xcc2   : > { %v6678_v54 = vadd.f32 1.0, %v10779_v33  ;;  %v16060_v31 = vmul.f32 %v6670_v38, %v5774_v18  ;;  %v5791_v19 = vmul.f32 0.5, %v17512_v15  ;;  %v6369_v61 = vmul.f32 0.7978846, %v6241_v32  ;;  %v17536_v18 = vld [vmem:[#allocation69_spill] sm:$0xff] }
 0xcc3   : > { %7959 = vmatmul.mubr.bf16.gmra.mrb[108].mxu1 %v6854_v34  ;;  %v6240_v20 = vadd.f32 %v17531_v56, %v17530_v10  ;;  %v10781_v21 = vpop.eup %10780  ;;  %v6879_v41 = vpack.c.bf16 %v16053_v1, %v16051_v28  ;;  %v6377_v0 = vmul.f32 0.7978846, %v6249_v7  ;;  %v17532_v34 = vld [vmem:[#allocation145_spill] sm:$0xff]  ;;  %v5799_v44 = vmul.f32 0.5, %v15757_v13 }
 0xcc4   : > { %7968 = vmatprep.mubr.bf16.mxu1 %v6863_v12  ;;  %9805 = vmatpush1.bf16.msra.mxu1 %v10877_v60  ;;  %v16071_v52 = vmul.f32 %v6678_v54, %v5782_v43  ;;  %v6248_v15 = vadd.f32 %v17533_v30, %v17532_v34  ;;  %v10783_v22 = vpop.eup %10782  ;;  %v6687_v3 = vadd.f32 1.0, %v10781_v21  ;;  %10792 = vtanh.f32 %v6369_v61  ;;  %v17537_v43 = vld [vmem:[#allocation151_spill] sm:$0xff]  ;;  %v10880_v47 = vld [vmem:[%s11734_s24 + $0x384] ss:$8 sps:$4 sm:$0xff]   ;;  %v17538_v61 = vld [vmem:[#allocation60_spill] sm:$0xff] }
 0xcc5   : > { %9790 = vmatprep.subr.bf16.mxu1 %v10878_v27  ;;  %v6368_v58 = vmul.f32 0.7978846, %v6240_v20  ;;  %v6695_v12 = vadd.f32 1.0, %v10783_v22  ;;  %10794 = vtanh.f32 %v6377_v0  ;;  %v5790_v24 = vmul.f32 0.5, %v17514_v48  ;;  %v17539_v56 = vld [vmem:[#allocation109_spill] sm:$0xff]  ;;  %v17540_v60 = vld [vmem:[#allocation58_spill] sm:$0xff] }
 0xcc6   : > { %v6878_v5 = vpack.c.bf16 %v16071_v52, %v16060_v31  ;;  %v6376_v8 = vmul.f32 0.7978846, %v6248_v15  ;;  %v10785_v40 = vpop.eup %10784  ;;  %v16079_v4 = vmul.f32 %v6687_v3, %v5791_v19  ;;  %v6257_v16 = vadd.f32 %v17535_v59, %v17534_v55  ;;  %v17541_v0 = vld [vmem:[#allocation85_spill] sm:$0xff] }
 0xcc7   : > { %10796 = vtanh.f32 %v6368_v58  ;;  %v10787_v13 = vpop.eup %10786  ;;  %v16085_v37 = vmul.f32 %v6695_v12, %v5799_v44  ;;  %v6686_v26 = vadd.f32 1.0, %v10785_v40  ;;  %v6265_v33 = vadd.f32 %v17537_v43, %v17536_v18  ;;  %v10881_v15 = vld [vmem:[%s11734_s24 + $0x380] ss:$8 sps:$4 sm:$0xff]   ;;  %v17544_v12 = vld [vmem:[#allocation64_spill] sm:$0xff] }
 0xcc8   : > { %9806 = vmatpush1.bf16.msra.mxu1 %v10879_v49  ;;  %10798 = vtanh.f32 %v6376_v8  ;;  %v5798_v38 = vmul.f32 0.5, %v17516_v17  ;;  %v6694_v48 = vadd.f32 1.0, %v10787_v13  ;;  %v5713_v63 = vmul.f32 0.5, %v17518_v36  ;;  %v17545_v8 = vld [vmem:[#allocation76_spill] sm:$0xff]  ;;  %v17547_v13 = vld [vmem:[#allocation63_spill] sm:$0xff] }
 0xcc9   : > { %9791 = vmatprep.subr.bf16.mxu1 %v10880_v47  ;;  %v6385_v32 = vmul.f32 0.7978846, %v6257_v16  ;;  %v6887_v50 = vpack.c.bf16 %v16085_v37, %v16079_v4  ;;  %v16094_v7 = vmul.f32 %v6686_v26, %v5790_v24  ;;  %v6393_v19 = vmul.f32 0.7978846, %v6265_v33  ;;  %v17546_v16 = vld [vmem:[#allocation116_spill] sm:$0xff]  ;;  %v17563_v4 = vld [vmem:[#allocation87_spill] sm:$0xff] }
 0xcca   : > { %v10789_v54 = vpop.eup %10788  ;;  %v6256_v20 = vadd.f32 %v17539_v56, %v17538_v61  ;;  %v16101_v17 = vmul.f32 %v6694_v48, %v5798_v38  ;;  %v6264_v30 = vadd.f32 %v17541_v0, %v17540_v60  ;;  %v5721_v22 = vmul.f32 0.5, %v17520_v29  ;;  %v17543_v29 = vld [vmem:[#allocation73_spill] sm:$0xff]  ;;  %v10883_v43 = vld [vmem:[%s11734_s24 + $0x390] ss:$8 sps:$4 sm:$0xff]  }
 0xccb   : > { %v10791_v21 = vpop.eup %10790  ;;  %7969 = vmatmul.mubr.bf16.gmra.mrb[112].mxu1 %v6862_v9  ;;  %v6609_v36 = vadd.f32 1.0, %v10789_v54  ;;  %10800 = vtanh.f32 %v6385_v32  ;;  %v16112_v35 = vmul.f32 %v15965_v6, %v17504_v42  ;;  %v6281_v6 = vadd.f32 %v17545_v8, %v17544_v12  ;;  %v10884_v32 = vld [vmem:[%s11734_s24 + $0x3a4] ss:$8 sps:$4 sm:$0xff]   ;;  %v17548_v54 = vld [vmem:[#allocation152_spill] sm:$0xff] }
 0xccc   : > { %7978 = vmatprep.mubr.bf16.mxu1 %v6871_v53  ;;  %9807 = vmatpush1.bf16.msra.mxu1 %v10881_v15  ;;  %v6617_v27 = vadd.f32 1.0, %v10791_v21  ;;  %10802 = vtanh.f32 %v6393_v19  ;;  %v6384_v44 = vmul.f32 0.7978846, %v6256_v20  ;;  %v6886_v9 = vpack.c.bf16 %v16101_v17, %v16094_v7  ;;  %v17542_v53 = vld [vmem:[#allocation78_spill] sm:$0xff]  ;;  %v17549_v19 = vld [vmem:[#allocation61_spill] sm:$0xff] }
 0xccd   : > { %9792 = vmatprep.subr.bf16.mxu1 %v10882_v25  ;;  %v16117_v3 = vmul.f32 %v6609_v36, %v5713_v63  ;;  %v6392_v46 = vmul.f32 0.7978846, %v6264_v30  ;;  %v6273_v58 = vadd.f32 %v17543_v29, %v17542_v53  ;;  %v5729_v24 = vmul.f32 0.5, %v17526_v45  ;;  %v17551_v25 = vld [vmem:[#allocation163_spill] sm:$0xff]  ;;  %v17552_v29 = vld [vmem:[#allocation86_spill] sm:$0xff] }
 0xcce   : > { %v16119_v57 = vmul.f32 %v6617_v27, %v5721_v22  ;;  %10804 = vtanh.f32 %v6384_v44  ;;  %v10793_v40 = vpop.eup %10792  ;;  %v5737_v59 = vmul.f32 0.5, %v17528_v23  ;;  %v6272_v49 = vadd.f32 %v17547_v13, %v17546_v16  ;;  %v10885_v27 = vld [vmem:[%s11734_s24 + $0x3a0] ss:$8 sps:$4 sm:$0xff]  }
 0xccf   : > { %10806 = vtanh.f32 %v6392_v46  ;;  %v10795_v26 = vpop.eup %10794  ;;  %v6625_v47 = vadd.f32 1.0, %v10793_v40  ;;  %v6401_v38 = vmul.f32 0.7978846, %v6273_v58  ;;  %v6409_v48 = vmul.f32 0.7978846, %v6281_v6  ;;  %v17550_v44 = vld [vmem:[#allocation70_spill] sm:$0xff] }
 0xcd0   : > { %9808 = vmatpush1.bf16.msra.mxu1 %v10883_v43  ;;  %v6849_v33 = vpack.c.bf16 %v16119_v57, %v16117_v3  ;;  %v6633_v45 = vadd.f32 1.0, %v10795_v26  ;;  %v5728_v23 = vmul.f32 0.5, %v17530_v10  ;;  %v6280_v56 = vadd.f32 %v17549_v19, %v17548_v54  ;;  %v10886_v58 = vld [vmem:[%s11734_s24 + $0x3b4] ss:$8 sps:$4 sm:$0xff]   ;;  %v17555_v26 = vld [vmem:[#allocation181_spill] sm:$0xff] }
 0xcd1   : > { %v10797_v63 = vpop.eup %10796  ;;  %9793 = vmatprep.subr.bf16.mxu1 %v10884_v32  ;;  %v6400_v20 = vmul.f32 0.7978846, %v6272_v49  ;;  %v16136_v36 = vmul.f32 %v6625_v47, %v5729_v24  ;;  %v5736_v0 = vmul.f32 0.5, %v17532_v34  ;;  %10808 = vtanh.f32 %v6401_v38  ;;  %v17554_v49 = vld [vmem:[#allocation79_spill] sm:$0xff]  ;;  %v17556_v47 = vld [vmem:[#allocation157_spill] sm:$0xff] }
 0xcd2   : > { %v10799_v21 = vpop.eup %10798  ;;  %v6624_v30 = vadd.f32 1.0, %v10797_v63  ;;  %v16142_v15 = vmul.f32 %v6633_v45, %v5737_v59  ;;  %10810 = vtanh.f32 %v6409_v48  ;;  %v6408_v10 = vmul.f32 0.7978846, %v6280_v56  ;;  %v17557_v38 = vld [vmem:[#allocation81_spill] sm:$0xff]  ;;  %v10887_v32 = vld [vmem:[%s11734_s24 + $0x3b0] ss:$8 sps:$4 sm:$0xff]  }
 0xcd3   : > { %7979 = vmatmul.mubr.bf16.gmra.mrb[116].mxu1 %v6870_v2  ;;  %v6632_v22 = vadd.f32 1.0, %v10799_v21  ;;  %v5745_v34 = vmul.f32 0.5, %v17534_v55  ;;  %10812 = vtanh.f32 %v6400_v20  ;;  %v6289_v46 = vadd.f32 %v17551_v25, %v17550_v44  ;;  %v10888_v56 = vld [vmem:[%s11734_s24 + $0x3c4] ss:$8 sps:$4 sm:$0xff]  }
 0xcd4   : > { %7988 = vmatprep.mubr.bf16.mxu1 %v6879_v41  ;;  %9809 = vmatpush1.bf16.msra.mxu1 %v10885_v27  ;;  %v6297_v11 = vadd.f32 %v17553_v14, %v17552_v29  ;;  %v6857_v8 = vpack.c.bf16 %v16142_v15, %v16136_v36  ;;  %v16156_v28 = vmul.f32 %v6624_v30, %v5728_v23  ;;  %10814 = vtanh.f32 %v6408_v10  ;;  %v17558_v10 = vld [vmem:[#allocation164_spill] sm:$0xff]  ;;  %v17559_v27 = vld [vmem:[#allocation82_spill] sm:$0xff] }
 0xcd5   : > { %v10801_v2 = vpop.eup %10800  ;;  %9794 = vmatprep.subr.bf16.mxu1 %v10886_v58  ;;  %v16158_v1 = vmul.f32 %v6632_v22, %v5736_v0  ;;  %v5753_v55 = vmul.f32 0.5, %v17536_v18  ;;  %v6417_v40 = vmul.f32 0.7978846, %v6289_v46  ;;  %v6288_v43 = vadd.f32 %v17555_v26, %v17554_v49 }
 0xcd6   : > { %v10803_v41 = vpop.eup %10802  ;;  %v6641_v6 = vadd.f32 1.0, %v10801_v2  ;;  %v6425_v24 = vmul.f32 0.7978846, %v6297_v11  ;;  %v6296_v48 = vadd.f32 %v17557_v38, %v17556_v47  ;;  %v5744_v18 = vmul.f32 0.5, %v17538_v61  ;;  %v10889_v11 = vld [vmem:[%s11734_s24 + $0x3c0] ss:$8 sps:$4 sm:$0xff]  }
 0xcd7   : > { %v6856_v59 = vpack.c.bf16 %v16158_v1, %v16156_v28  ;;  %v6649_v13 = vadd.f32 1.0, %v10803_v41  ;;  %v5752_v23 = vmul.f32 0.5, %v17540_v60  ;;  %10816 = vtanh.f32 %v6417_v40  ;;  %v10890_v2 = vld [vmem:[%s11734_s24 + $0x3d4] ss:$8 sps:$4 sm:$0xff]   ;;  %v17562_v40 = vld [vmem:[#allocation126_spill] sm:$0xff] }
 0xcd8   : > { %v10805_v63 = vpop.eup %10804  ;;  %9810 = vmatpush1.bf16.msra.mxu1 %v10887_v32  ;;  %v16168_v45 = vmul.f32 %v6641_v6, %v5745_v34  ;;  %10818 = vtanh.f32 %v6425_v24  ;;  %v6416_v0 = vmul.f32 0.7978846, %v6288_v43  ;;  %v6424_v22 = vmul.f32 0.7978846, %v6296_v48  ;;  %v17560_v41 = vld [vmem:[#allocation92_spill] sm:$0xff] }
 0xcd9   : > { %v10807_v19 = vpop.eup %10806  ;;  %9795 = vmatprep.subr.bf16.mxu1 %v10888_v56  ;;  %v16173_v20 = vmul.f32 %v6649_v13, %v5753_v55  ;;  %v6640_v21 = vadd.f32 1.0, %v10805_v63  ;;  %v6305_v34 = vadd.f32 %v17559_v27, %v17558_v10  ;;  %v6313_v61 = vadd.f32 %v16112_v35, %v17504_v42  ;;  %v17561_v55 = vld [vmem:[#allocation167_spill] sm:$0xff]  ;;  %v10892_v56 = vld [vmem:[%s11734_s24 + $0x3e4] ss:$8 sps:$4 sm:$0xff]   ;;  %v10893_v27 = vld [vmem:[%s11734_s24 + $0x3e0] ss:$8 sps:$4 sm:$0xff]  }
 0xcda   : > { %v6648_v30 = vadd.f32 1.0, %v10807_v19  ;;  %v5761_v46 = vmul.f32 0.5, %v17542_v53  ;;  %10820 = vtanh.f32 %v6416_v0  ;;  %v5769_v58 = vmul.f32 0.5, %v17544_v12  ;;  %v10891_v63 = vld [vmem:[%s11734_s24 + $0x3d0] ss:$8 sps:$4 sm:$0xff]  }
 0xcdb   : > { %7989 = vmatmul.mubr.bf16.gmra.mrb[120].mxu1 %v6878_v5  ;;  %v6865_v60 = vpack.c.bf16 %v16173_v20, %v16168_v45  ;;  %v16184_v25 = vmul.f32 %v6640_v21, %v5744_v18  ;;  %v10809_v14 = vpop.eup %10808  ;;  %10822 = vtanh.f32 %v6424_v22  ;;  %v6433_v31 = vmul.f32 0.7978846, %v6305_v34  ;;  %v17565_v45 = vld [vmem:[#allocation21_spill] sm:$0xff] }
 0xcdc   : > { %7998 = vmatprep.mubr.bf16.mxu1 %v6887_v50  ;;  %9811 = vmatpush1.bf16.msra.mxu1 %v10889_v11  ;;  %v16191_v35 = vmul.f32 %v6648_v30, %v5752_v23  ;;  %v6441_v52 = vmul.f32 0.7978846, %v6313_v61  ;;  %v10811_v5 = vpop.eup %10810  ;;  %v6657_v53 = vadd.f32 1.0, %v10809_v14  ;;  %v6304_v6 = vadd.f32 %v17561_v55, %v17560_v41 }
 0xcdd   : > { %9796 = vmatprep.subr.bf16.mxu1 %v10890_v2  ;;  %v6312_v37 = vadd.f32 %v17563_v4, %v17562_v40  ;;  %v10813_v50 = vpop.eup %10812  ;;  %v6665_v13 = vadd.f32 1.0, %v10811_v5  ;;  %v5760_v26 = vmul.f32 0.5, %v17546_v16  ;;  %10824 = vtanh.f32 %v6433_v31  ;;  %v10894_v31 = vld [vmem:[%s11734_s24 + $0x3f4] ss:$8 sps:$4 sm:$0xff]  }
 0xcde   : > { %v6864_v24 = vpack.c.bf16 %v16191_v35, %v16184_v25  ;;  %v10815_v43 = vpop.eup %10814  ;;  %v5768_v38 = vmul.f32 0.5, %v17548_v54  ;;  %v6656_v12 = vadd.f32 1.0, %v10813_v50  ;;  %10826 = vtanh.f32 %v6441_v52 }
 0xcdf   : > { %v6432_v48 = vmul.f32 0.7978846, %v6304_v6  ;;  %v6785_v32 = vmul.f32 %v6657_v53, %v5761_v46  ;;  %v6793_v18 = vmul.f32 %v6665_v13, %v5769_v58  ;;  %v6664_v23 = vadd.f32 1.0, %v10815_v43 }
 0xce0   : > { %9812 = vmatpush1.bf16.msra.mxu1 %v10891_v63  ;;  %v6440_v19 = vmul.f32 0.7978846, %v6312_v37  ;;  %v6784_v0 = vmul.f32 %v6656_v12, %v5760_v26  ;;  %v5777_v61 = vmul.f32 0.5, %v17550_v44  ;;  %v5785_v46 = vmul.f32 0.5, %v17552_v29 }
 0xce1   : > { %9797 = vmatprep.subr.bf16.mxu1 %v10892_v56  ;;  %10828 = vtanh.f32 %v6432_v48  ;;  %v10817_v21 = vpop.eup %10816  ;;  %v6873_v16 = vpack.c.bf16 %v6793_v18, %v6785_v32  ;;  %v6792_v30 = vmul.f32 %v6664_v23, %v5768_v38  ;;  %v5776_v5 = vmul.f32 0.5, %v17554_v49 }
 0xce2   : > { %10830 = vtanh.f32 %v6440_v19  ;;  %v10819_v54 = vpop.eup %10818  ;;  %v6673_v22 = vadd.f32 1.0, %v10817_v21  ;;  %v5784_v2 = vmul.f32 0.5, %v17556_v47  ;;  %v5793_v6 = vmul.f32 0.5, %v17558_v10 }
 0xce3   : > { %7999 = vmatmul.mubr.bf16.gmra.mrb[124].mxu1 %v6886_v9  ;;  %v6872_v34 = vpack.c.bf16 %v6792_v30, %v6784_v0  ;;  %v6681_v14 = vadd.f32 1.0, %v10819_v54  ;;  %v5801_v4 = vmul.f32 0.5, %v17504_v42  ;;  %v5792_v38 = vmul.f32 0.5, %v17560_v41  ;;  %v17567_v0 = vld [vmem:[#allocation23_spill] sm:$0xff] }
 0xce4   : > { %9813 = vmatpush1.bf16.msra.mxu1 %v10893_v27  ;;  %8061 = vmatprep.mubr.bf16.mxu1 %v6849_v33  ;;  %v10821_v11 = vpop.eup %10820  ;;  %v6801_v7 = vmul.f32 %v6673_v22, %v5777_v61  ;;  %v10895_v33 = vld [vmem:[%s11734_s24 + $0x3f0] ss:$8 sps:$4 sm:$0xff]   ;;  %v5800_v10 = vmul.f32 0.5, %v17562_v40  ;;  %v17569_v61 = vld [vmem:[#allocation25_spill] sm:$0xff] }
 0xce5   : > { %9798 = vmatprep.subr.bf16.mxu1 %v10894_v31  ;;  %v10823_v52 = vpop.eup %10822  ;;  %v6809_v17 = vmul.f32 %v6681_v14, %v5785_v46  ;;  %v6672_v9 = vadd.f32 1.0, %v10821_v11  ;;  %v17568_v22 = vld [vmem:[#allocation24_spill] sm:$0xff]  ;;  %v17570_v14 = vld [vmem:[#allocation26_spill] sm:$0xff] }
 0xce6   : > { %v6680_v3 = vadd.f32 1.0, %v10823_v52 }
 0xce7   : > { %v10825_v57 = vpop.eup %10824  ;;  %v6881_v58 = vpack.c.bf16 %v6809_v17, %v6801_v7  ;;  %v6800_v53 = vmul.f32 %v6672_v9, %v5776_v5 }
 0xce8   : > { %9814 = vmatpush1.bf16.msra.mxu1 %v10895_v33  ;;  %v10827_v44 = vpop.eup %10826  ;;  %v6808_v29 = vmul.f32 %v6680_v3, %v5784_v2  ;;  %v6689_v55 = vadd.f32 1.0, %v10825_v57 }
 0xce9   : > { %v6697_v37 = vadd.f32 1.0, %v10827_v44 }
 0xcea   : > { %v6880_v49 = vpack.c.bf16 %v6808_v29, %v6800_v53  ;;  %v6817_v13 = vmul.f32 %v6689_v55, %v5793_v6  ;;  %v17572_v29 = vld [vmem:[#allocation28_spill] sm:$0xff] }
 0xceb   : > { %v10829_v50 = vpop.eup %10828  ;;  %8062 = vmatmul.mubr.bf16.vlgmr.msra.gmra.mrb[104].mxu1 %v6848_v39  ;;  %v6825_v26 = vmul.f32 %v6697_v37, %v5801_v4  ;;  %v17573_v4 = vld [vmem:[#allocation29_spill] sm:$0xff] }
 0xcec   : > { %v10831_v47 = vpop.eup %10830  ;;  %8071 = vmatprep.mubr.bf16.mxu1 %v6857_v8  ;;  %v6688_v43 = vadd.f32 1.0, %v10829_v50  ;;  %v17574_v50 = vld [vmem:[#allocation30_spill] sm:$0xff] }
 0xced   : > { %v6696_v42 = vadd.f32 1.0, %v10831_v47  ;;  %v6889_v12 = vpack.c.bf16 %v6825_v26, %v6817_v13 }
 0xcee   : > { %v6816_v48 = vmul.f32 %v6688_v43, %v5792_v38 }
 0xcef   : > { %v6824_v63 = vmul.f32 %v6696_v42, %v5800_v10  ;;  %v17575_v10 = vld [vmem:[#allocation31_spill] sm:$0xff] }
 0xcf1   : > { %v6888_v32 = vpack.c.bf16 %v6824_v63, %v6816_v48  ;;  %v17576_v63 = vld [vmem:[#allocation32_spill] sm:$0xff] }
 0xcf3   : > { %8072 = vmatmul.mubr.bf16.gmra.mrb[108].mxu1 %v6856_v59  ;;  %v7018_v59 = vld [vmem:[%s918_s7] sm:$0x3] }
 0xcf4   : > { %8081 = vmatprep.mubr.bf16.mxu1 %v6865_v60  ;;  %v16243_v20 = vrot.slane %v7018_v59, %v17565_v45  ;;  %v17566_v60 = vld [vmem:[#allocation22_spill] sm:$0xff] }
 0xcf5   : > { %v16246_v25 = vrot.slane %v7018_v59, %v17566_v60  ;;  %v17579_v60 = vld [vmem:[#allocation35_spill] sm:$0xff] }
 0xcfb   : > { %8082 = vmatmul.mubr.bf16.gmra.mrb[112].mxu1 %v6864_v24 }
 0xcfc   : > { %8091 = vmatprep.mubr.bf16.mxu1 %v6873_v16 }
 0xd03   : > { %8092 = vmatmul.mubr.bf16.gmra.mrb[116].mxu1 %v6872_v34 }
 0xd04   : > { %8101 = vmatprep.mubr.bf16.mxu1 %v6881_v58  ;;  %v17571_v58 = vld [vmem:[#allocation27_spill] sm:$0xff] }
 0xd0b   : > { %8102 = vmatmul.mubr.bf16.gmra.mrb[120].mxu1 %v6880_v49 }
 0xd0c   : > { %8111 = vmatprep.mubr.bf16.mxu1 %v6889_v12 }
 0xd13   : > { %8112 = vmatmul.mubr.bf16.gmra.mrb[124].mxu1 %v6888_v32 }
 0xd1e   : > { %v8043_v51 = vpop.f32.mrb[192].mxu0 }
 0xd1f   : > { %v8045_v62 = vpop.f32.mrb[193].mxu0 }
 0xd20   : > { %v8047_v39 = vpop.f32.mrb[194].mxu0 }
 0xd21   : > { %v8049_v36 = vpop.f32.mrb[195].mxu0 }
 0xd36   : > { %v8053_v15 = vpop.f32.mrb[196].mxu0 }
 0xd37   : > { %v8055_v8 = vpop.f32.mrb[197].mxu0 }
 0xd38   : > { %v8057_v28 = vpop.f32.mrb[198].mxu0 }
 0xd39   : > { %v8059_v1 = vpop.f32.mrb[199].mxu0 }
 0xd7e   : > { %v7930_v35 = vpop.f32.mrb[96].mxu1 }
 0xd7f   : > { %v9815_v41 = vadd.f32 %v7930_v35, %v16243_v20  ;;  %v7932_v40 = vpop.f32.mrb[97].mxu1 }
 0xd80   : > { %v9817_v24 = vadd.f32 %v7932_v40, %v16246_v25  ;;  %v7934_v18 = vpop.f32.mrb[98].mxu1 }
 0xd81   : > { %v9816_v23 = vadd.f32 %v9815_v41, %v8043_v51  ;;  %v9819_v19 = vadd.f32 %v7934_v18, %v16243_v20  ;;  %v7936_v56 = vpop.f32.mrb[99].mxu1 }
 0xd82   : > { %v9818_v21 = vadd.f32 %v9817_v24, %v8045_v62  ;;  %v9821_v16 = vadd.f32 %v7936_v56, %v16246_v25  ;;  %v17577_v62 = vld [vmem:[#allocation33_spill] sm:$0xff]  ;;  %v17580_v24 = vld [vmem:[#allocation36_spill] sm:$0xff] }
 0xd83   : > { %v16253_v30 = vadd.f32 %v9816_v23, %v17567_v0  ;;  %v9820_v54 = vadd.f32 %v9819_v19, %v8047_v39  ;;  %v17581_v19 = vld [vmem:[#allocation37_spill] sm:$0xff] }
 0xd84   : > { %v16256_v27 = vadd.f32 %v9818_v21, %v17568_v22  ;;  %v9822_v34 = vadd.f32 %v9821_v16, %v8049_v36  ;;  %v17578_v36 = vld [vmem:[#allocation34_spill] sm:$0xff] }
 0xd85   : > { %v16259_v46 = vadd.f32 %v9820_v54, %v17569_v61  ;;  %v17582_v21 = vld [vmem:[#allocation38_spill] sm:$0xff]  ;;  %8158 = vst [vmem:[#allocation13] sm:$0xff] (!%p9371_p11), %v16253_v30 }
 0xd86   : > { %v16262_v11 = vadd.f32 %v9822_v34, %v17570_v14  ;;  %v7940_v31 = vpop.f32.mrb[100].mxu1  ;;  %v17583_v14 = vld [vmem:[#allocation39_spill] sm:$0xff]  ;;  %8159 = vst [vmem:[#allocation13 + $0x8] sm:$0xff] (!%p9371_p11), %v16256_v27 }
 0xd87   : > { %v9823_v52 = vadd.f32 %v7940_v31, %v16243_v20  ;;  %v7942_v7 = vpop.f32.mrb[101].mxu1  ;;  %8160 = vst [vmem:[#allocation13 + $0x10] sm:$0xff] (!%p9371_p11), %v16259_v46 }
 0xd88   : > { %v9825_v17 = vadd.f32 %v7942_v7, %v16246_v25  ;;  %v7944_v9 = vpop.f32.mrb[102].mxu1  ;;  %8161 = vst [vmem:[#allocation13 + $0x18] sm:$0xff] (!%p9371_p11), %v16262_v11 }
 0xd89   : > { %v9824_v5 = vadd.f32 %v9823_v52, %v8053_v15  ;;  %v9827_v2 = vadd.f32 %v7944_v9, %v16243_v20  ;;  %v7946_v3 = vpop.f32.mrb[103].mxu1 }
 0xd8a   : > { %v9826_v57 = vadd.f32 %v9825_v17, %v8055_v8  ;;  %v9829_v33 = vadd.f32 %v7946_v3, %v16246_v25  ;;  %v17584_v17 = vld [vmem:[#allocation40_spill] sm:$0xff] }
 0xd8b   : > { %v16269_v44 = vadd.f32 %v9824_v5, %v17571_v58  ;;  %v9828_v53 = vadd.f32 %v9827_v2, %v8057_v28  ;;  %v17585_v2 = vld [vmem:[#allocation41_spill] sm:$0xff] }
 0xd8c   : > { %v16272_v55 = vadd.f32 %v9826_v57, %v17572_v29  ;;  %v9830_v6 = vadd.f32 %v9829_v33, %v8059_v1  ;;  %v17586_v57 = vld [vmem:[#allocation42_spill] sm:$0xff] }
 0xd8d   : > { %v16275_v37 = vadd.f32 %v9828_v53, %v17573_v4  ;;  %8162 = vst [vmem:[#allocation13 + $0x20] sm:$0xff] (!%p9371_p11), %v16269_v44 }
 0xd8e   : > { %v16278_v49 = vadd.f32 %v9830_v6, %v17574_v50  ;;  %v17587_v50 = vld [vmem:[#allocation43_spill] sm:$0xff]  ;;  %8163 = vst [vmem:[#allocation13 + $0x28] sm:$0xff] (!%p9371_p11), %v16272_v55 }
 0xd8f   : > { %8164 = vst [vmem:[#allocation13 + $0x30] sm:$0xff] (!%p9371_p11), %v16275_v37 }
 0xd90   : > { %8165 = vst [vmem:[#allocation13 + $0x38] sm:$0xff] (!%p9371_p11), %v16278_v49 }
 0xdbe   : > { %v8063_v47 = vpop.f32.mrb[104].mxu1 }
 0xdbf   : > { %v9831_v13 = vadd.f32 %v8063_v47, %v16243_v20  ;;  %v8065_v26 = vpop.f32.mrb[105].mxu1 }
 0xdc0   : > { %v9832_v43 = vadd.f32 %v8065_v26, %v16246_v25  ;;  %v8067_v38 = vpop.f32.mrb[106].mxu1 }
 0xdc1   : > { %v16283_v42 = vadd.f32 %v9831_v13, %v17575_v10  ;;  %v9833_v12 = vadd.f32 %v8067_v38, %v16243_v20  ;;  %v8069_v48 = vpop.f32.mrb[107].mxu1 }
 0xdc2   : > { %v16287_v32 = vadd.f32 %v9832_v43, %v17576_v63  ;;  %v9834_v51 = vadd.f32 %v8069_v48, %v16246_v25  ;;  %v17588_v43 = vld [vmem:[#allocation44_spill] sm:$0xff]  ;;  %v17590_v63 = vld [vmem:[#allocation46_spill] sm:$0xff] }
 0xdc3   : > { %v16291_v39 = vadd.f32 %v9833_v12, %v17577_v62  ;;  %v17589_v12 = vld [vmem:[#allocation45_spill] sm:$0xff]  ;;  %8166 = vst [vmem:[#allocation13 + $0x40] sm:$0xff] (!%p9371_p11), %v16283_v42 }
 0xdc4   : > { %v16294_v15 = vadd.f32 %v9834_v51, %v17578_v36  ;;  %8167 = vst [vmem:[#allocation13 + $0x48] sm:$0xff] (!%p9371_p11), %v16287_v32 }
 0xdc5   : > { %8168 = vst [vmem:[#allocation13 + $0x50] sm:$0xff] (!%p9371_p11), %v16291_v39 }
 0xdc6   : > { %v8073_v8 = vpop.f32.mrb[108].mxu1  ;;  %8169 = vst [vmem:[#allocation13 + $0x58] sm:$0xff] (!%p9371_p11), %v16294_v15 }
 0xdc7   : > { %v9835_v28 = vadd.f32 %v8073_v8, %v16243_v20  ;;  %v8075_v1 = vpop.f32.mrb[109].mxu1 }
 0xdc8   : > { %v9836_v59 = vadd.f32 %v8075_v1, %v16246_v25  ;;  %v8077_v45 = vpop.f32.mrb[110].mxu1 }
 0xdc9   : > { %v16299_v35 = vadd.f32 %v9835_v28, %v17579_v60  ;;  %v9837_v41 = vadd.f32 %v8077_v45, %v16243_v20  ;;  %v8079_v40 = vpop.f32.mrb[111].mxu1 }
 0xdca   : > { %v16303_v18 = vadd.f32 %v9836_v59, %v17580_v24  ;;  %v9838_v23 = vadd.f32 %v8079_v40, %v16246_v25  ;;  %v17591_v59 = vld [vmem:[#allocation47_spill] sm:$0xff]  ;;  %v17592_v40 = vld [vmem:[#allocation48_spill] sm:$0xff] }
 0xdcb   : > { %v16307_v56 = vadd.f32 %v9837_v41, %v17581_v19  ;;  %v17593_v19 = vld [vmem:[#allocation49_spill] sm:$0xff]  ;;  %8170 = vst [vmem:[#allocation13 + $0x60] sm:$0xff] (!%p9371_p11), %v16299_v35 }
 0xdcc   : > { %v16310_v16 = vadd.f32 %v9838_v23, %v17582_v21  ;;  %8171 = vst [vmem:[#allocation13 + $0x68] sm:$0xff] (!%p9371_p11), %v16303_v18 }
 0xdcd   : > { %8172 = vst [vmem:[#allocation13 + $0x70] sm:$0xff] (!%p9371_p11), %v16307_v56 }
 0xdce   : > { %v8083_v0 = vpop.f32.mrb[112].mxu1  ;;  %8173 = vst [vmem:[#allocation13 + $0x78] sm:$0xff] (!%p9371_p11), %v16310_v16 }
 0xdcf   : > { %v9839_v54 = vadd.f32 %v8083_v0, %v16243_v20  ;;  %v8085_v22 = vpop.f32.mrb[113].mxu1  ;;  %v17594_v0 = vld [vmem:[#allocation50_spill] sm:$0xff] }
 0xdd0   : > { %v9840_v34 = vadd.f32 %v8085_v22, %v16246_v25  ;;  %v8087_v61 = vpop.f32.mrb[114].mxu1 }
 0xdd1   : > { %v16315_v31 = vadd.f32 %v9839_v54, %v17583_v14  ;;  %v9841_v52 = vadd.f32 %v8087_v61, %v16243_v20  ;;  %v8089_v7 = vpop.f32.mrb[115].mxu1 }
 0xdd2   : > { %v16319_v9 = vadd.f32 %v9840_v34, %v17584_v17  ;;  %v9842_v5 = vadd.f32 %v8089_v7, %v16246_v25  ;;  %v17595_v7 = vld [vmem:[#allocation51_spill] sm:$0xff] }
 0xdd3   : > { %v16323_v3 = vadd.f32 %v9841_v52, %v17585_v2  ;;  %8174 = vst [vmem:[#allocation13 + $0x80] sm:$0xff] (!%p9371_p11), %v16315_v31 }
 0xdd4   : > { %v16326_v33 = vadd.f32 %v9842_v5, %v17586_v57  ;;  %v17596_v57 = vld [vmem:[#allocation52_spill] sm:$0xff]  ;;  %8175 = vst [vmem:[#allocation13 + $0x88] sm:$0xff] (!%p9371_p11), %v16319_v9 }
 0xdd5   : > { %8176 = vst [vmem:[#allocation13 + $0x90] sm:$0xff] (!%p9371_p11), %v16323_v3 }
 0xdd6   : > { %v8093_v58 = vpop.f32.mrb[116].mxu1  ;;  %8177 = vst [vmem:[#allocation13 + $0x98] sm:$0xff] (!%p9371_p11), %v16326_v33 }
 0xdd7   : > { %v9843_v53 = vadd.f32 %v8093_v58, %v16243_v20  ;;  %v8095_v29 = vpop.f32.mrb[117].mxu1 }
 0xdd8   : > { %v9844_v6 = vadd.f32 %v8095_v29, %v16246_v25  ;;  %v8097_v4 = vpop.f32.mrb[118].mxu1  ;;  %v17597_v29 = vld [vmem:[#allocation53_spill] sm:$0xff] }
 0xdd9   : > { %v16331_v47 = vadd.f32 %v9843_v53, %v17587_v50  ;;  %v9845_v13 = vadd.f32 %v8097_v4, %v16243_v20  ;;  %v8099_v26 = vpop.f32.mrb[119].mxu1  ;;  %v17598_v4 = vld [vmem:[#allocation54_spill] sm:$0xff] }
 0xdda   : > { %v16335_v38 = vadd.f32 %v9844_v6, %v17588_v43  ;;  %v9846_v10 = vadd.f32 %v8099_v26, %v16246_v25 }
 0xddb   : > { %v16339_v48 = vadd.f32 %v9845_v13, %v17589_v12  ;;  %8178 = vst [vmem:[#allocation13 + $0xa0] sm:$0xff] (!%p9371_p11), %v16331_v47 }
 0xddc   : > { %v16342_v51 = vadd.f32 %v9846_v10, %v17590_v63  ;;  %8179 = vst [vmem:[#allocation13 + $0xa8] sm:$0xff] (!%p9371_p11), %v16335_v38 }
 0xddd   : > { %8180 = vst [vmem:[#allocation13 + $0xb0] sm:$0xff] (!%p9371_p11), %v16339_v48 }
 0xdde   : > { %v8103_v62 = vpop.f32.mrb[120].mxu1  ;;  %8181 = vst [vmem:[#allocation13 + $0xb8] sm:$0xff] (!%p9371_p11), %v16342_v51 }
 0xddf   : > { %v9847_v36 = vadd.f32 %v8103_v62, %v16243_v20  ;;  %v8105_v8 = vpop.f32.mrb[121].mxu1 }
 0xde0   : > { %v9848_v28 = vadd.f32 %v8105_v8, %v16246_v25  ;;  %v8107_v1 = vpop.f32.mrb[122].mxu1 }
 0xde1   : > { %v16347_v45 = vadd.f32 %v9847_v36, %v17591_v59  ;;  %v9849_v60 = vadd.f32 %v8107_v1, %v16243_v20  ;;  %v8109_v41 = vpop.f32.mrb[123].mxu1 }
 0xde2   : > { %v16351_v24 = vadd.f32 %v9848_v28, %v17592_v40  ;;  %v9850_v23 = vadd.f32 %v8109_v41, %v16246_v25 }
 0xde3   : > { %v16355_v21 = vadd.f32 %v9849_v60, %v17593_v19  ;;  %8182 = vst [vmem:[#allocation13 + $0xc0] sm:$0xff] (!%p9371_p11), %v16347_v45 }
 0xde4   : > { %v16358_v54 = vadd.f32 %v9850_v23, %v17594_v0  ;;  %8183 = vst [vmem:[#allocation13 + $0xc8] sm:$0xff] (!%p9371_p11), %v16351_v24 }
 0xde5   : > { %8184 = vst [vmem:[#allocation13 + $0xd0] sm:$0xff] (!%p9371_p11), %v16355_v21 }
 0xde6   : > { %v8113_v22 = vpop.f32.mrb[124].mxu1  ;;  %8157 = sbr.rel (%p9371_p11) target bundleno = 3567 (0xdef), region = 136  ;;  %8185 = vst [vmem:[#allocation13 + $0xd8] sm:$0xff] (!%p9371_p11), %v16358_v54 }
 0xde7   : > { %v9851_v34 = vadd.f32 %v8113_v22, %v16243_v20  ;;  %v8115_v61 = vpop.f32.mrb[125].mxu1 }
 0xde8   : > { %v9852_v14 = vadd.f32 %v8115_v61, %v16246_v25  ;;  %v8117_v52 = vpop.f32.mrb[126].mxu1 }
 0xde9   : > { %v16363_v17 = vadd.f32 %v9851_v34, %v17595_v7  ;;  %v9853_v5 = vadd.f32 %v8117_v52, %v16243_v20  ;;  %v8119_v2 = vpop.f32.mrb[127].mxu1 }
 0xdea   : > { %v16367_v58 = vadd.f32 %v9852_v14, %v17596_v57  ;;  %v9854_v53 = vadd.f32 %v8119_v2, %v16246_v25 }
 0xdeb   : > { %v16371_v6 = vadd.f32 %v9853_v5, %v17597_v29  ;;  %8186 = vst [vmem:[#allocation13 + $0xe0] sm:$0xff] (!%p9371_p11), %v16363_v17 }
 0xdec   : > { %v16374_v50 = vadd.f32 %v9854_v53, %v17598_v4  ;;  %8187 = vst [vmem:[#allocation13 + $0xe8] sm:$0xff] (!%p9371_p11), %v16367_v58 }
 0xded   : > { %8188 = vst [vmem:[#allocation13 + $0xf0] sm:$0xff] %v16371_v6 }
 0xdee   : > { %8189 = vst [vmem:[#allocation13 + $0xf8] sm:$0xff] %v16374_v50 }
 0xdef PF: > { %p9372_p6 = scmp.ne.s32.totalorder %s11377_s1, 1 }
 0xdf0   : > { %v8196_v20 = vadd.f32 (!%p9372_p6), %v16256_v27, %v16253_v30  ;;  %v8202_v25 = vadd.f32 (!%p9372_p6), %v16272_v55, %v16269_v44  ;;  %v8199_v13 = vadd.f32 (!%p9372_p6), %v16262_v11, %v16259_v46  ;;  %v8205_v26 = vadd.f32 (!%p9372_p6), %v16278_v49, %v16275_v37  ;;  %s17599_s3 = sld [smem:[#allocation201_spill]] (!%p9372_p6)  ;;  %s17600_s21 = sld [smem:[#allocation202_spill]] (!%p9372_p6) }
 0xdf1   : > { %8193 = sbr.rel (%p9372_p6) target bundleno = 3922 (0xf52), region = 140  ;;  %v8208_v43 = vadd.f32 (!%p9372_p6), %v16287_v32, %v16283_v42  ;;  %v8211_v10 = vadd.f32 (!%p9372_p6), %v16294_v15, %v16291_v39  ;;  %v8214_v12 = vadd.f32 (!%p9372_p6), %v16303_v18, %v16299_v35  ;;  %v8217_v63 = vadd.f32 (!%p9372_p6), %v16310_v16, %v16307_v56 }
 0xdf2   : > { %8197 = vadd.xlane.f32.xlu0 (!%p9372_p6), %v8196_v20  ;;  %8203 = vadd.xlane.f32.xlu1 (!%p9372_p6), %v8202_v25  ;;  %v8220_v62 = vadd.f32 (!%p9372_p6), %v16319_v9, %v16315_v31  ;;  %v8223_v36 = vadd.f32 (!%p9372_p6), %v16326_v33, %v16323_v3  ;;  %v8226_v8 = vadd.f32 (!%p9372_p6), %v16335_v38, %v16331_v47 }
 0xdf3   : > { %v8229_v28 = vadd.f32 (!%p9372_p6), %v16342_v51, %v16339_v48  ;;  %v8232_v1 = vadd.f32 (!%p9372_p6), %v16351_v24, %v16347_v45  ;;  %v8235_v59 = vadd.f32 (!%p9372_p6), %v16358_v54, %v16355_v21  ;;  %v8238_v60 = vadd.f32 (!%p9372_p6), %v16367_v58, %v16363_v17 }
 0xdf4   : > { %v8241_v41 = vadd.f32 (!%p9372_p6), %v16374_v50, %v16371_v6 }
 0xdf6   : > { %8200 = vadd.xlane.f32.xlu0 (!%p9372_p6), %v8199_v13  ;;  %8206 = vadd.xlane.f32.xlu1 (!%p9372_p6), %v8205_v26 }
 0xdfa   : > { %8209 = vadd.xlane.f32.xlu0 %v8208_v43  ;;  %8212 = vadd.xlane.f32.xlu1 %v8211_v10 }
 0xdfe   : > { %8215 = vadd.xlane.f32.xlu0 %v8214_v12  ;;  %8218 = vadd.xlane.f32.xlu1 %v8217_v63 }
 0xe02   : > { %8221 = vadd.xlane.f32.xlu0 %v8220_v62  ;;  %8224 = vadd.xlane.f32.xlu1 %v8223_v36 }
 0xe06   : > { %8227 = vadd.xlane.f32.xlu0 %v8226_v8  ;;  %8230 = vadd.xlane.f32.xlu1 %v8229_v28 }
 0xe0a   : > { %8233 = vadd.xlane.f32.xlu0 %v8232_v1  ;;  %8236 = vadd.xlane.f32.xlu1 %v8235_v59 }
 0xe0e   : > { %8239 = vadd.xlane.f32.xlu0 %v8238_v60  ;;  %8242 = vadd.xlane.f32.xlu1 %v8241_v41 }
 0xe7f   : > { %v8198_v40 = vpop.xlane.xlu0 %8197  ;;  %v8204_v23 = vpop.xlane.xlu1 %8203 }
 0xe80   : > { %v8244_v19 = vmul.f32 0.00390625, %v8198_v40  ;;  %v8246_v0 = vmul.f32 0.00390625, %v8204_v23 }
 0xe82   : > { %v16445_v22 = vsub.f32 %v16253_v30, %v8244_v19  ;;  %v16448_v34 = vsub.f32 %v16256_v27, %v8244_v19  ;;  %v16451_v61 = vsub.f32 %v16269_v44, %v8246_v0  ;;  %v16454_v14 = vsub.f32 %v16272_v55, %v8246_v0 }
 0xe83   : > { %v8201_v52 = vpop.xlane.xlu0 %8200  ;;  %v8207_v7 = vpop.xlane.xlu1 %8206 }
 0xe84   : > { %v8245_v5 = vmul.f32 0.00390625, %v8201_v52  ;;  %v8247_v2 = vmul.f32 0.00390625, %v8207_v7  ;;  %v8292_v57 = vmul.f32 %v16445_v22, %v16445_v22  ;;  %v8293_v30 = vmul.f32 %v16448_v34, %v16448_v34 }
 0xe85   : > { %v8296_v27 = vmul.f32 %v16451_v61, %v16451_v61  ;;  %v8297_v44 = vmul.f32 %v16454_v14, %v16454_v14 }
 0xe86   : > { %v16465_v53 = vsub.f32 %v16259_v46, %v8245_v5  ;;  %v16468_v55 = vsub.f32 %v16262_v11, %v8245_v5  ;;  %v16471_v29 = vsub.f32 %v16275_v37, %v8247_v2  ;;  %v16474_v4 = vsub.f32 %v16278_v49, %v8247_v2 }
 0xe87   : > { %v8210_v20 = vpop.xlane.xlu0 %8209  ;;  %v8324_v25 = vadd.f32 %v8293_v30, %v8292_v57  ;;  %v8213_v13 = vpop.xlane.xlu1 %8212  ;;  %v8330_v11 = vadd.f32 %v8297_v44, %v8296_v27 }
 0xe88   : > { %v8248_v26 = vmul.f32 0.00390625, %v8210_v20  ;;  %v8249_v43 = vmul.f32 0.00390625, %v8213_v13  ;;  %v8294_v10 = vmul.f32 %v16465_v53, %v16465_v53  ;;  %v8295_v46 = vmul.f32 %v16468_v55, %v16468_v55 }
 0xe89   : > { %8325 = vadd.xlane.f32.xlu0 %v8324_v25  ;;  %v8298_v37 = vmul.f32 %v16471_v29, %v16471_v29  ;;  %v8299_v49 = vmul.f32 %v16474_v4, %v16474_v4 }
 0xe8a   : > { %v16485_v12 = vsub.f32 %v16283_v42, %v8248_v26  ;;  %v16488_v63 = vsub.f32 %v16287_v32, %v8248_v26  ;;  %v16491_v62 = vsub.f32 %v16291_v39, %v8249_v43  ;;  %v16494_v36 = vsub.f32 %v16294_v15, %v8249_v43 }
 0xe8b   : > { %v8216_v8 = vpop.xlane.xlu0 %8215  ;;  %v8327_v28 = vadd.f32 %v8295_v46, %v8294_v10  ;;  %v8219_v1 = vpop.xlane.xlu1 %8218  ;;  %v8333_v32 = vadd.f32 %v8299_v49, %v8298_v37 }
 0xe8c   : > { %v8250_v59 = vmul.f32 0.00390625, %v8216_v8  ;;  %v8251_v60 = vmul.f32 0.00390625, %v8219_v1  ;;  %v8300_v41 = vmul.f32 %v16485_v12, %v16485_v12  ;;  %v8301_v42 = vmul.f32 %v16488_v63, %v16488_v63 }
 0xe8d   : > { %8331 = vadd.xlane.f32.xlu0 %v8330_v11  ;;  %8328 = vadd.xlane.f32.xlu1 %v8327_v28  ;;  %v8302_v39 = vmul.f32 %v16491_v62, %v16491_v62  ;;  %v8303_v15 = vmul.f32 %v16494_v36, %v16494_v36 }
 0xe8e   : > { %v16505_v40 = vsub.f32 %v16299_v35, %v8250_v59  ;;  %v16508_v23 = vsub.f32 %v16303_v18, %v8250_v59  ;;  %v16511_v19 = vsub.f32 %v16307_v56, %v8251_v60  ;;  %v16514_v0 = vsub.f32 %v16310_v16, %v8251_v60 }
 0xe8f   : > { %v8222_v52 = vpop.xlane.xlu0 %8221  ;;  %v8336_v7 = vadd.f32 %v8301_v42, %v8300_v41  ;;  %v8225_v5 = vpop.xlane.xlu1 %8224  ;;  %v8339_v18 = vadd.f32 %v8303_v15, %v8302_v39 }
 0xe90   : > { %v8252_v2 = vmul.f32 0.00390625, %v8222_v52  ;;  %v8253_v57 = vmul.f32 0.00390625, %v8225_v5  ;;  %v8304_v30 = vmul.f32 %v16505_v40, %v16505_v40  ;;  %v8305_v35 = vmul.f32 %v16508_v23, %v16508_v23 }
 0xe91   : > { %8334 = vadd.xlane.f32.xlu1 %v8333_v32  ;;  %8337 = vadd.xlane.f32.xlu0 %v8336_v7  ;;  %v8306_v56 = vmul.f32 %v16511_v19, %v16511_v19  ;;  %v8307_v16 = vmul.f32 %v16514_v0, %v16514_v0 }
 0xe92   : > { %v16525_v27 = vsub.f32 %v16315_v31, %v8252_v2  ;;  %v16528_v44 = vsub.f32 %v16319_v9, %v8252_v2  ;;  %v16531_v20 = vsub.f32 %v16323_v3, %v8253_v57  ;;  %v16534_v25 = vsub.f32 %v16326_v33, %v8253_v57 }
 0xe93   : > { %v8228_v13 = vpop.xlane.xlu0 %8227  ;;  %v8342_v26 = vadd.f32 %v8305_v35, %v8304_v30  ;;  %v8231_v43 = vpop.xlane.xlu1 %8230  ;;  %v8345_v9 = vadd.f32 %v8307_v16, %v8306_v56 }
 0xe94   : > { %v8254_v10 = vmul.f32 0.00390625, %v8228_v13  ;;  %v8255_v46 = vmul.f32 0.00390625, %v8231_v43  ;;  %v8308_v11 = vmul.f32 %v16525_v27, %v16525_v27  ;;  %v8309_v31 = vmul.f32 %v16528_v44, %v16528_v44 }
 0xe95   : > { %8340 = vadd.xlane.f32.xlu1 %v8339_v18  ;;  %8343 = vadd.xlane.f32.xlu0 %v8342_v26  ;;  %v8310_v3 = vmul.f32 %v16531_v20, %v16531_v20  ;;  %v8311_v33 = vmul.f32 %v16534_v25, %v16534_v25 }
 0xe96   : > { %v16545_v37 = vsub.f32 %v16331_v47, %v8254_v10  ;;  %v16548_v49 = vsub.f32 %v16335_v38, %v8254_v10  ;;  %v16551_v8 = vsub.f32 %v16339_v48, %v8255_v46  ;;  %v16554_v28 = vsub.f32 %v16342_v51, %v8255_v46 }
 0xe97   : > { %v8234_v1 = vpop.xlane.xlu0 %8233  ;;  %v8348_v59 = vadd.f32 %v8309_v31, %v8308_v11  ;;  %v8237_v60 = vpop.xlane.xlu1 %8236  ;;  %v8351_v38 = vadd.f32 %v8311_v33, %v8310_v3 }
 0xe98   : > { %v8256_v41 = vmul.f32 0.00390625, %v8234_v1  ;;  %v8257_v42 = vmul.f32 0.00390625, %v8237_v60  ;;  %v8312_v32 = vmul.f32 %v16545_v37, %v16545_v37  ;;  %v8313_v47 = vmul.f32 %v16548_v49, %v16548_v49 }
 0xe99   : > { %8346 = vadd.xlane.f32.xlu1 %v8345_v9  ;;  %8349 = vadd.xlane.f32.xlu0 %v8348_v59  ;;  %v8314_v48 = vmul.f32 %v16551_v8, %v16551_v8  ;;  %v8315_v51 = vmul.f32 %v16554_v28, %v16554_v28 }
 0xe9a   : > { %v16565_v39 = vsub.f32 %v16347_v45, %v8256_v41  ;;  %v16568_v15 = vsub.f32 %v16351_v24, %v8256_v41  ;;  %v16571_v52 = vsub.f32 %v16355_v21, %v8257_v42  ;;  %v16574_v7 = vsub.f32 %v16358_v54, %v8257_v42 }
 0xe9b   : > { %v8240_v5 = vpop.xlane.xlu0 %8239  ;;  %v8354_v2 = vadd.f32 %v8313_v47, %v8312_v32  ;;  %v8243_v57 = vpop.xlane.xlu1 %8242  ;;  %v8357_v24 = vadd.f32 %v8315_v51, %v8314_v48  ;;  %v8194_v51 = vld [vmem:[%s17599_s3] sm:$0x3] }
 0xe9c   : > { %v8258_v30 = vmul.f32 0.00390625, %v8240_v5  ;;  %v8259_v35 = vmul.f32 0.00390625, %v8243_v57  ;;  %v8316_v18 = vmul.f32 %v16565_v39, %v16565_v39  ;;  %v8317_v45 = vmul.f32 %v16568_v15, %v16568_v15 }
 0xe9d   : > { %8352 = vadd.xlane.f32.xlu1 %v8351_v38  ;;  %8355 = vadd.xlane.f32.xlu0 %v8354_v2  ;;  %v8318_v21 = vmul.f32 %v16571_v52, %v16571_v52  ;;  %v8319_v54 = vmul.f32 %v16574_v7, %v16574_v7 }
 0xe9e   : > { %v16585_v56 = vsub.f32 %v16363_v17, %v8258_v30  ;;  %v16588_v16 = vsub.f32 %v16367_v58, %v8258_v30  ;;  %v16591_v13 = vsub.f32 %v16371_v6, %v8259_v35  ;;  %v16594_v26 = vsub.f32 %v16374_v50, %v8259_v35  ;;  %v8195_v35 = vld [vmem:[%s17600_s21] sm:$0x3] }
 0xe9f   : > { %v8360_v43 = vadd.f32 %v8317_v45, %v8316_v18  ;;  %v8363_v17 = vadd.f32 %v8319_v54, %v8318_v21  ;;  %v17602_v54 = vld [vmem:[#allocation22_spill] sm:$0xff] }
 0xea0   : > { %v8320_v10 = vmul.f32 %v16585_v56, %v16585_v56  ;;  %v8321_v46 = vmul.f32 %v16588_v16, %v16588_v16  ;;  %v8322_v58 = vmul.f32 %v16591_v13, %v16591_v13  ;;  %v8323_v6 = vmul.f32 %v16594_v26, %v16594_v26 }
 0xea1   : > { %8358 = vadd.xlane.f32.xlu1 %v8357_v24  ;;  %8361 = vadd.xlane.f32.xlu0 %v8360_v43  ;;  %v17601_v24 = vld [vmem:[#allocation21_spill] sm:$0xff]  ;;  %v16614_v43 = vrot.slane %v8194_v51, %v17602_v54 }
 0xea2   : > { %v8366_v11 = vadd.f32 %v8321_v46, %v8320_v10  ;;  %v8369_v50 = vadd.f32 %v8323_v6, %v8322_v58  ;;  %v16611_v21 = vrot.slane %v8194_v51, %v17601_v24 }
 0xea5   : > { %8364 = vadd.xlane.f32.xlu1 %v8363_v17  ;;  %8367 = vadd.xlane.f32.xlu0 %v8366_v11  ;;  %v16619_v11 = vrot.slane %v8195_v35, %v17601_v24 }
 0xea9   : > { %8370 = vadd.xlane.f32.xlu1 %v8369_v50  ;;  %v16622_v50 = vrot.slane %v8195_v35, %v17602_v54 }
 0xf16   : > { %v8326_v31 = vpop.xlane.xlu0 %8325 }
 0xf17   : > { %v8372_v9 = vmul.f32 0.00390625, %v8326_v31 }
 0xf19   : > { %v8388_v3 = vadd.f32 1e-05, %v8372_v9 }
 0xf1a   : > { %v8329_v33 = vpop.xlane.xlu1 %8328  ;;  %v8332_v1 = vpop.xlane.xlu0 %8331 }
 0xf1b   : > { %10896 = vrsqrt.f32 %v8388_v3  ;;  %v8373_v59 = vmul.f32 0.00390625, %v8329_v33  ;;  %v8374_v60 = vmul.f32 0.00390625, %v8332_v1 }
 0xf1d   : > { %v8389_v41 = vadd.f32 1e-05, %v8373_v59  ;;  %v8390_v42 = vadd.f32 1e-05, %v8374_v60 }
 0xf1e   : > { %v8335_v32 = vpop.xlane.xlu1 %8334  ;;  %v8338_v47 = vpop.xlane.xlu0 %8337 }
 0xf1f   : > { %10898 = vrsqrt.f32 %v8389_v41  ;;  %v8375_v38 = vmul.f32 0.00390625, %v8335_v32  ;;  %v8376_v48 = vmul.f32 0.00390625, %v8338_v47 }
 0xf20   : > { %10900 = vrsqrt.f32 %v8390_v42 }
 0xf21   : > { %v8391_v5 = vadd.f32 1e-05, %v8375_v38  ;;  %v8392_v2 = vadd.f32 1e-05, %v8376_v48 }
 0xf22   : > { %v8341_v57 = vpop.xlane.xlu1 %8340  ;;  %v8344_v30 = vpop.xlane.xlu0 %8343 }
 0xf23   : > { %10902 = vrsqrt.f32 %v8391_v5  ;;  %v8377_v18 = vmul.f32 0.00390625, %v8341_v57  ;;  %v8378_v45 = vmul.f32 0.00390625, %v8344_v30 }
 0xf24   : > { %10904 = vrsqrt.f32 %v8392_v2 }
 0xf25   : > { %v10897_v10 = vpop.eup %10896  ;;  %v8393_v46 = vadd.f32 1e-05, %v8377_v18  ;;  %v8394_v17 = vadd.f32 1e-05, %v8378_v45 }
 0xf26   : > { %v8420_v58 = vmul.f32 %v10897_v10, %v16445_v22  ;;  %v8421_v6 = vmul.f32 %v10897_v10, %v16448_v34  ;;  %v8347_v31 = vpop.xlane.xlu1 %8346  ;;  %v8350_v9 = vpop.xlane.xlu0 %8349 }
 0xf27   : > { %10906 = vrsqrt.f32 %v8393_v46  ;;  %v8379_v3 = vmul.f32 0.00390625, %v8347_v31  ;;  %v8380_v33 = vmul.f32 0.00390625, %v8350_v9 }
 0xf28   : > { %v8463_v1 = vmul.f32 %v16611_v21, %v8420_v58  ;;  %v8464_v59 = vmul.f32 %v16614_v43, %v8421_v6  ;;  %10908 = vrsqrt.f32 %v8394_v17 }
 0xf29   : > { %v10899_v60 = vpop.eup %10898  ;;  %v8395_v22 = vadd.f32 1e-05, %v8379_v3  ;;  %v8396_v41 = vadd.f32 1e-05, %v8380_v33 }
 0xf2a   : > { %v10901_v34 = vpop.eup %10900  ;;  %v8506_v42 = vadd.f32 %v16619_v11, %v8463_v1  ;;  %v8507_v32 = vadd.f32 %v16622_v50, %v8464_v59  ;;  %v8422_v47 = vmul.f32 %v10899_v60, %v16465_v53  ;;  %v8423_v38 = vmul.f32 %v10899_v60, %v16468_v55  ;;  %v8353_v48 = vpop.xlane.xlu1 %8352 }
 0xf2b   : > { %v8356_v51 = vpop.xlane.xlu0 %8355  ;;  %v8424_v5 = vmul.f32 %v10901_v34, %v16451_v61  ;;  %v8425_v2 = vmul.f32 %v10901_v34, %v16454_v14  ;;  %10910 = vrsqrt.f32 %v8395_v22  ;;  %v8381_v57 = vmul.f32 0.00390625, %v8353_v48 }
 0xf2c   : > { %8538 = vst [vmem:[#allocation13] sm:$0xff] %v8506_v42  ;;  %8539 = vst [vmem:[#allocation13 + $0x8] sm:$0xff] %v8507_v32  ;;  %v8465_v30 = vmul.f32 %v16611_v21, %v8422_v47  ;;  %v8466_v35 = vmul.f32 %v16614_v43, %v8423_v38  ;;  %10912 = vrsqrt.f32 %v8396_v41  ;;  %v8382_v18 = vmul.f32 0.00390625, %v8356_v51 }
 0xf2d   : > { %v10903_v45 = vpop.eup %10902  ;;  %v8467_v53 = vmul.f32 %v16611_v21, %v8424_v5  ;;  %v8468_v55 = vmul.f32 %v16614_v43, %v8425_v2  ;;  %v8397_v24 = vadd.f32 1e-05, %v8381_v57 }
 0xf2e   : > { %v10905_v54 = vpop.eup %10904  ;;  %v8508_v61 = vadd.f32 %v16619_v11, %v8465_v30  ;;  %v8509_v14 = vadd.f32 %v16622_v50, %v8466_v35  ;;  %v8426_v10 = vmul.f32 %v10903_v45, %v16471_v29  ;;  %v8427_v46 = vmul.f32 %v10903_v45, %v16474_v4  ;;  %v8359_v17 = vpop.xlane.xlu1 %8358 }
 0xf2f   : > { %v8362_v58 = vpop.xlane.xlu0 %8361  ;;  %v8510_v6 = vadd.f32 %v16619_v11, %v8467_v53  ;;  %v8511_v31 = vadd.f32 %v16622_v50, %v8468_v55  ;;  %v8428_v9 = vmul.f32 %v10905_v54, %v16485_v12  ;;  %v8429_v3 = vmul.f32 %v10905_v54, %v16488_v63 }
 0xf30   : > { %8540 = vst [vmem:[#allocation13 + $0x10] sm:$0xff] %v8508_v61  ;;  %8541 = vst [vmem:[#allocation13 + $0x18] sm:$0xff] %v8509_v14  ;;  %v8469_v33 = vmul.f32 %v16611_v21, %v8426_v10  ;;  %v8470_v1 = vmul.f32 %v16614_v43, %v8427_v46  ;;  %10914 = vrsqrt.f32 %v8397_v24  ;;  %v8398_v29 = vadd.f32 1e-05, %v8382_v18 }
 0xf31   : > { %v10907_v59 = vpop.eup %10906  ;;  %8542 = vst [vmem:[#allocation13 + $0x20] sm:$0xff] %v8510_v6  ;;  %8543 = vst [vmem:[#allocation13 + $0x28] sm:$0xff] %v8511_v31  ;;  %v8471_v4 = vmul.f32 %v16611_v21, %v8428_v9  ;;  %v8472_v60 = vmul.f32 %v16614_v43, %v8429_v3  ;;  %v8383_v22 = vmul.f32 0.00390625, %v8359_v17  ;;  %v8384_v41 = vmul.f32 0.00390625, %v8362_v58 }
 0xf32   : > { %v10909_v12 = vpop.eup %10908  ;;  %v8512_v63 = vadd.f32 %v16619_v11, %v8469_v33  ;;  %v8513_v34 = vadd.f32 %v16622_v50, %v8470_v1  ;;  %v8430_v42 = vmul.f32 %v10907_v59, %v16491_v62  ;;  %v8431_v32 = vmul.f32 %v10907_v59, %v16494_v36  ;;  %v8365_v47 = vpop.xlane.xlu1 %8364 }
 0xf33   : > { %v8514_v38 = vadd.f32 %v16619_v11, %v8471_v4  ;;  %v8515_v48 = vadd.f32 %v16622_v50, %v8472_v60  ;;  %v8432_v51 = vmul.f32 %v10909_v12, %v16505_v40  ;;  %v8433_v5 = vmul.f32 %v10909_v12, %v16508_v23  ;;  %v8368_v54 = vpop.xlane.xlu0 %8367 }
 0xf34   : > { %8544 = vst [vmem:[#allocation13 + $0x30] sm:$0xff] %v8512_v63  ;;  %8545 = vst [vmem:[#allocation13 + $0x38] sm:$0xff] %v8513_v34  ;;  %v8473_v2 = vmul.f32 %v16611_v21, %v8430_v42  ;;  %v8474_v57 = vmul.f32 %v16614_v43, %v8431_v32  ;;  %10916 = vrsqrt.f32 %v8398_v29  ;;  %v8399_v30 = vadd.f32 1e-05, %v8383_v22 }
 0xf35   : > { %v10911_v62 = vpop.eup %10910  ;;  %8546 = vst [vmem:[#allocation13 + $0x40] sm:$0xff] %v8514_v38  ;;  %8547 = vst [vmem:[#allocation13 + $0x48] sm:$0xff] %v8515_v48  ;;  %v8475_v36 = vmul.f32 %v16611_v21, %v8432_v51  ;;  %v8476_v35 = vmul.f32 %v16614_v43, %v8433_v5  ;;  %v8400_v18 = vadd.f32 1e-05, %v8384_v41  ;;  %v8385_v45 = vmul.f32 0.00390625, %v8365_v47 }
 0xf36   : > { %v10913_v40 = vpop.eup %10912  ;;  %v8516_v23 = vadd.f32 %v16619_v11, %v8473_v2  ;;  %v8517_v53 = vadd.f32 %v16622_v50, %v8474_v57  ;;  %v8434_v55 = vmul.f32 %v10911_v62, %v16511_v19  ;;  %v8435_v24 = vmul.f32 %v10911_v62, %v16514_v0  ;;  %v8371_v17 = vpop.xlane.xlu1 %8370 }
 0xf37   : > { %v8518_v61 = vadd.f32 %v16619_v11, %v8475_v36  ;;  %v8519_v14 = vadd.f32 %v16622_v50, %v8476_v35  ;;  %v8436_v10 = vmul.f32 %v10913_v40, %v16525_v27  ;;  %v8437_v46 = vmul.f32 %v10913_v40, %v16528_v44 }
 0xf38   : > { %8548 = vst [vmem:[#allocation13 + $0x50] sm:$0xff] %v8516_v23  ;;  %8549 = vst [vmem:[#allocation13 + $0x58] sm:$0xff] %v8517_v53  ;;  %v8477_v58 = vmul.f32 %v16611_v21, %v8434_v55  ;;  %v8478_v6 = vmul.f32 %v16614_v43, %v8435_v24  ;;  %10918 = vrsqrt.f32 %v8399_v30  ;;  %v8401_v19 = vadd.f32 1e-05, %v8385_v45 }
 0xf39   : > { %8550 = vst [vmem:[#allocation13 + $0x60] sm:$0xff] %v8518_v61  ;;  %8551 = vst [vmem:[#allocation13 + $0x68] sm:$0xff] %v8519_v14  ;;  %v8479_v0 = vmul.f32 %v16611_v21, %v8436_v10  ;;  %v8480_v31 = vmul.f32 %v16614_v43, %v8437_v46  ;;  %10920 = vrsqrt.f32 %v8400_v18  ;;  %v8386_v9 = vmul.f32 0.00390625, %v8368_v54 }
 0xf3a   : > { %v10915_v27 = vpop.eup %10914  ;;  %v8520_v44 = vadd.f32 %v16619_v11, %v8477_v58  ;;  %v8521_v3 = vadd.f32 %v16622_v50, %v8478_v6  ;;  %10922 = vrsqrt.f32 %v8401_v19  ;;  %v8387_v33 = vmul.f32 0.00390625, %v8371_v17 }
 0xf3b   : > { %v8522_v1 = vadd.f32 %v16619_v11, %v8479_v0  ;;  %v8523_v29 = vadd.f32 %v16622_v50, %v8480_v31  ;;  %v8438_v59 = vmul.f32 %v10915_v27, %v16531_v20  ;;  %v8439_v4 = vmul.f32 %v10915_v27, %v16534_v25 }
 0xf3c   : > { %8552 = vst [vmem:[#allocation13 + $0x70] sm:$0xff] %v8520_v44  ;;  %8553 = vst [vmem:[#allocation13 + $0x78] sm:$0xff] %v8521_v3  ;;  %v8402_v60 = vadd.f32 1e-05, %v8386_v9  ;;  %v8403_v22 = vadd.f32 1e-05, %v8387_v33 }
 0xf3d   : > { %8554 = vst [vmem:[#allocation13 + $0x80] sm:$0xff] %v8522_v1  ;;  %8555 = vst [vmem:[#allocation13 + $0x88] sm:$0xff] %v8523_v29  ;;  %v8481_v41 = vmul.f32 %v16611_v21, %v8438_v59  ;;  %v8482_v12 = vmul.f32 %v16614_v43, %v8439_v4 }
 0xf3e   : > { %v10917_v63 = vpop.eup %10916  ;;  %10924 = vrsqrt.f32 %v8402_v60 }
 0xf3f   : > { %v8524_v34 = vadd.f32 %v16619_v11, %v8481_v41  ;;  %v8525_v42 = vadd.f32 %v16622_v50, %v8482_v12  ;;  %v8440_v20 = vmul.f32 %v10917_v63, %v16545_v37  ;;  %v8441_v25 = vmul.f32 %v10917_v63, %v16548_v49 }
 0xf40   : > { %10926 = vrsqrt.f32 %v8403_v22 }
 0xf41   : > { %8556 = vst [vmem:[#allocation13 + $0x90] sm:$0xff] %v8524_v34  ;;  %8557 = vst [vmem:[#allocation13 + $0x98] sm:$0xff] %v8525_v42  ;;  %v8483_v32 = vmul.f32 %v16611_v21, %v8440_v20  ;;  %v8484_v47 = vmul.f32 %v16614_v43, %v8441_v25 }
 0xf42   : > { %v10919_v38 = vpop.eup %10918 }
 0xf43   : > { %v10921_v48 = vpop.eup %10920  ;;  %v8526_v51 = vadd.f32 %v16619_v11, %v8483_v32  ;;  %v8527_v5 = vadd.f32 %v16622_v50, %v8484_v47  ;;  %v8442_v2 = vmul.f32 %v10919_v38, %v16551_v8  ;;  %v8443_v57 = vmul.f32 %v10919_v38, %v16554_v28 }
 0xf44   : > { %v10923_v37 = vpop.eup %10922  ;;  %v8444_v49 = vmul.f32 %v10921_v48, %v16565_v39  ;;  %v8445_v30 = vmul.f32 %v10921_v48, %v16568_v15 }
 0xf45   : > { %8558 = vst [vmem:[#allocation13 + $0xa0] sm:$0xff] %v8526_v51  ;;  %8559 = vst [vmem:[#allocation13 + $0xa8] sm:$0xff] %v8527_v5  ;;  %v8485_v62 = vmul.f32 %v16611_v21, %v8442_v2  ;;  %v8486_v36 = vmul.f32 %v16614_v43, %v8443_v57  ;;  %v8446_v35 = vmul.f32 %v10923_v37, %v16571_v52 }
 0xf46   : > { %v8447_v18 = vmul.f32 %v10923_v37, %v16574_v7  ;;  %v8487_v45 = vmul.f32 %v16611_v21, %v8444_v49  ;;  %v8488_v8 = vmul.f32 %v16614_v43, %v8445_v30 }
 0xf47   : > { %v8528_v28 = vadd.f32 %v16619_v11, %v8485_v62  ;;  %v8529_v39 = vadd.f32 %v16622_v50, %v8486_v36  ;;  %v8489_v15 = vmul.f32 %v16611_v21, %v8446_v35 }
 0xf48   : > { %v8490_v40 = vmul.f32 %v16614_v43, %v8447_v18  ;;  %v10925_v23 = vpop.eup %10924  ;;  %v8530_v53 = vadd.f32 %v16619_v11, %v8487_v45  ;;  %v8531_v55 = vadd.f32 %v16622_v50, %v8488_v8 }
 0xf49   : > { %8560 = vst [vmem:[#allocation13 + $0xb0] sm:$0xff] %v8528_v28  ;;  %8561 = vst [vmem:[#allocation13 + $0xb8] sm:$0xff] %v8529_v39  ;;  %v8532_v52 = vadd.f32 %v16619_v11, %v8489_v15  ;;  %v8448_v24 = vmul.f32 %v10925_v23, %v16585_v56  ;;  %v8449_v54 = vmul.f32 %v10925_v23, %v16588_v16 }
 0xf4a   : > { %v8533_v7 = vadd.f32 %v16622_v50, %v8490_v40  ;;  %v10927_v61 = vpop.eup %10926  ;;  %8562 = vst [vmem:[#allocation13 + $0xc0] sm:$0xff] %v8530_v53  ;;  %8563 = vst [vmem:[#allocation13 + $0xc8] sm:$0xff] %v8531_v55 }
 0xf4b   : > { %8564 = vst [vmem:[#allocation13 + $0xd0] sm:$0xff] %v8532_v52  ;;  %v8491_v14 = vmul.f32 %v16611_v21, %v8448_v24  ;;  %v8492_v10 = vmul.f32 %v16614_v43, %v8449_v54  ;;  %v8450_v46 = vmul.f32 %v10927_v61, %v16591_v13  ;;  %v8451_v17 = vmul.f32 %v10927_v61, %v16594_v26 }
 0xf4c   : > { %8565 = vst [vmem:[#allocation13 + $0xd8] sm:$0xff] %v8533_v7 }
 0xf4d   : > { %v8534_v58 = vadd.f32 %v16619_v11, %v8491_v14  ;;  %v8535_v6 = vadd.f32 %v16622_v50, %v8492_v10  ;;  %v8493_v56 = vmul.f32 %v16611_v21, %v8450_v46  ;;  %v8494_v16 = vmul.f32 %v16614_v43, %v8451_v17 }
 0xf4f   : > { %8566 = vst [vmem:[#allocation13 + $0xe0] sm:$0xff] %v8534_v58  ;;  %8567 = vst [vmem:[#allocation13 + $0xe8] sm:$0xff] %v8535_v6  ;;  %v8536_v19 = vadd.f32 %v16619_v11, %v8493_v56  ;;  %v8537_v0 = vadd.f32 %v16622_v50, %v8494_v16 }
 0xf51   : > { %8568 = vst [vmem:[#allocation13 + $0xf0] sm:$0xff] %v8536_v19  ;;  %8569 = vst [vmem:[#allocation13 + $0xf8] sm:$0xff] %v8537_v0 }
 0xf52 PF: > { %s11255_s23 = smov [#allocation13]  }
 0xf53   : > { %s8576_s4 = sshll.u32 %s11255_s23, 4  ;;  %s8577_s4 = int_to_ptr.vmem [resolvable:$true] %s8576_s4 }
 0xf54   : > { %s11164_s8 = scalar_lea.vmem %s8577_s4, 4096  ;;  %p11171_p9 = scmp.lt.s32.totalorder %s8577_s4, %s8577_s4 }
 0xf55   : > { %p11165_p4 = scmp.ne.s32.totalorder %s8577_s4, %s11164_s8  ;;  %p11172_p13 = scmp.lt.s32.totalorder %s11164_s8, %s11164_s8 }
 0xf57   : > { %p11166_p10 = pnand %p11165_p4, %p9371_p11  ;;  %p11173_p12 = por %p11172_p13, %p11171_p9 }
 0xf59   : > { %p11167_p5 = pneg %p11166_p10 }
 0xf5b   : > { %p11174_p3 = pnand %p11173_p12, %p11167_p5 }
 0xf5d   : > { %11177 = shalt.err (!%p11174_p3)
}
 0xf5e   : > { %s17603_s0 = sld [smem:[#allocation203_spill]] }
 0xf64   : > { %s17604_s18 = smov %s17603_s0  ;;  %s11178_s14 = scalar_lea.hbm %s17603_s0, 4096 }
 0xf65   : > { %p11179_p7 = scmp.ne.s32.totalorder %s17604_s18, %s11178_s14  ;;  %p11184_p8 = scmp.lt.u32.totalorder %s11178_s14, %s17604_s18 }
 0xf67   : > { %p11180_p0 = pnand %p11179_p7, %p9371_p11 }
 0xf69   : > { %p11181_p2 = pneg %p11180_p0 }
 0xf6b   : > { %p11186_p1 = pnand %p11184_p8, %p11181_p2 }
 0xf6d   : > { %11189 = shalt.err (!%p11186_p1)
}
 0xf6e   : > { %s11256_s13 = smov 256   ;;  %s11257_s20 = smov 16  }
 0xf6f   : > { %9964 = dma.vmem_to_hbm [thread:$0]  (%p9371_p11), %s8577_s4, 4096, %s17604_s18, [#allocation4], %s11256_s13, %s11256_s13, %s11257_s20  }
 0xf70   : > { %11219 = dma.done.wait (%p9371_p11), [#allocation4], 4096  }
 0xf71   : > { %11221 = vsyncadd (%p9371_p11), [#allocation4], 4294963200 }
 0xf72 PF: > { %s17605_s21 = sld [smem:[#allocation19_spill]]  ;;  %s17606_s6 = sld [smem:[#allocation18_spill]] }
 0xf73   : > { %s17607_s20 = sld [smem:[#allocation20_spill]]  ;;  %s17608_s0 = smov %s11228_s30 }
 0xf78   : > { %p29_p6 = scmp.ge.s32.totalorder %s17605_s21, 4   ;;  %s17609_s30 = smov %s17606_s6 }
 0xf7a   :  { %31 = sbr.rel (!%p29_p6) target bundleno = 25 (0x19), region = 225 }
 0xf81   :  { %8592 = vsyncpa [#allocation3], 1 }
 0xf82   :  { %8594 = vsyncpa [#allocation3 + $0x1], 1 }
 0xf83   :  { %8595 = vsyncpa [#allocation6], 1 }
 0xf84   :  { %8596 = vsyncpa [#allocation4], 1 }
 0xf85   :  { %8598 = vsyncpa [#allocation4 + $0x1], 1 }

</bundles_post_ra>
